<compile_context>
chip_gen: v7x
topology: tpu7x:2x2x1
jax: 0.10.0
libtpu: 0.0.40
codegen_flags: <defaults>
</compile_context>

<pallas_src>
import numpy as np

import jax
import jax.numpy as jnp
from jax.experimental import pallas as pl
from jax.experimental.pallas import tpu as pltpu

CPAD = 128  # all channel dims are zero-padded to 128 lanes inside the kernel


# ---------------------------------------------------------------------------
# quaternion weight assembly (Hamilton product), exactly as in quaternion_conv()
# ---------------------------------------------------------------------------
def _quaternion_full_weight(r, i, j, k):
    """Components (Cout//4, Cin//4, 3, 3) -> full conv weight (Cout, Cin, 3, 3)."""
    row_r = jnp.concatenate([r, -i, -j, -k], axis=1)
    row_i = jnp.concatenate([i,  r, -k,  j], axis=1)
    row_j = jnp.concatenate([j,  k,  r, -i], axis=1)
    row_k = jnp.concatenate([k, -j,  i,  r], axis=1)
    return jnp.concatenate([row_r, row_i, row_j, row_k], axis=0)


# ---------------------------------------------------------------------------
# shape-only constants per layer (numpy, computed once at trace time)
# ---------------------------------------------------------------------------
def _dst_layout(B, H2, W2, last):
    """Row layout of the pooled output (next layer's padded+guarded act, or final)."""
    if last:
        def dst(b, h2, w2):
            return b * H2 * W2 + h2 * W2 + w2
        return B * H2 * W2, dst
    Hpn, Wpn = H2 + 2, W2 + 2
    Gn = Wpn + 1

    def dst(b, h2, w2):
        return Gn + b * Hpn * Wpn + (h2 + 1) * Wpn + (w2 + 1)
    return B * Hpn * Wpn + 2 * Gn, dst


def _msel(Cout, inv_nq):
    """mu_per_channel = colsum(masked_conv) @ msel  (per-component mean selector)."""
    Q = Cout // 4
    S = np.zeros((CPAD, 4), np.float32)
    for c in range(Cout):
        S[c, c // Q] = 1.0
    return (S @ S.T * inv_nq).astype(np.float32)


def _layer1_static(B, H, W, Cout):
    """Layer 1: conv rows are the valid pixels only (im2col built in the wrapper)."""
    H2, W2 = H // 2, W // 2
    Np = B * H * W
    inv_nq = 1.0 / float(Np * (Cout // 4))
    n_dst, dst = _dst_layout(B, H2, W2, last=False)
    pool = np.zeros((n_dst, Np), np.float32)
    for b in range(B):
        for h2 in range(H2):
            for w2 in range(W2):
                d = dst(b, h2, w2)
                for dh in range(2):
                    for dw in range(2):
                        pool[d, b * H * W + (2 * h2 + dh) * W + (2 * w2 + dw)] = 0.25
    return dict(Np=Np, inv_nq=inv_nq, msel=_msel(Cout, inv_nq), pool=pool, n_dst=n_dst)


def _layerN_static(B, H, W, Cout, last):
    """Layers 2/3: conv rows live on the zero-padded, guard-extended flat domain."""
    Hp, Wp = H + 2, W + 2
    Np = B * Hp * Wp
    G = Wp + 1
    H2, W2 = H // 2, W // 2
    inv_nq = 1.0 / float(B * H * W * (Cout // 4))

    mask = np.zeros((Np, 1), np.float32)       # 1.0 on real (non-border) pixels
    for b in range(B):
        for ii in range(1, Hp - 1):
            for jj in range(1, Wp - 1):
                mask[b * Hp * Wp + ii * Wp + jj, 0] = 1.0

    n_dst, dst = _dst_layout(B, H2, W2, last)
    pool = np.zeros((n_dst, Np), np.float32)
    for b in range(B):
        for h2 in range(H2):
            for w2 in range(W2):
                d = dst(b, h2, w2)
                for dh in range(2):
                    for dw in range(2):
                        src = b * Hp * Wp + (2 * h2 + 1 + dh) * Wp + (2 * w2 + 1 + dw)
                        pool[d, src] = 0.25
    return dict(Wp=Wp, Np=Np, G=G, inv_nq=inv_nq, mask=mask,
                msel=_msel(Cout, inv_nq), pool=pool, n_dst=n_dst)


# ---------------------------------------------------------------------------
# parameter-derived kernel inputs
# ---------------------------------------------------------------------------
def _bgb(p):
    """bias / gamma / beta merged into one (8, 128) constant (rows 0,1,2 used)."""
    cout = p['beta'].shape[0]
    b = jnp.zeros((8, CPAD), jnp.float32)
    b = b.at[0, :cout].set(p['bias'].astype(jnp.float32))
    b = b.at[1, :cout].set(jnp.tile(p['gamma'], 4).astype(jnp.float32))
    b = b.at[2, :cout].set(p['beta'].astype(jnp.float32))
    return b


def _layer1_params(p):
    """Tap-packed weight: all 9 taps stacked along K (9*Cin <= 128 lanes)."""
    cin = p['r'].shape[1] * 4
    cout = p['beta'].shape[0]
    w_full = _quaternion_full_weight(p['r'], p['i'], p['j'], p['k'])   # (Cout,Cin,3,3)
    wpack = jnp.transpose(w_full, (2, 3, 1, 0)).reshape(9 * cin, cout)  # (9*Cin, Cout)
    wpack = jnp.pad(wpack, ((0, CPAD - 9 * cin), (0, CPAD - cout))).astype(jnp.bfloat16)
    return wpack, _bgb(p)


def _layerN_params(p):
    """Per-tap weights for the 9 shifted-slice matmuls."""
    cin = p['r'].shape[1] * 4
    cout = p['beta'].shape[0]
    w_full = _quaternion_full_weight(p['r'], p['i'], p['j'], p['k'])
    wt = jnp.transpose(w_full, (2, 3, 1, 0)).reshape(9, cin, cout)      # (tap, Cin, Cout)
    wt = jnp.pad(wt, ((0, 0), (0, CPAD - cin), (0, CPAD - cout))).astype(jnp.bfloat16)
    return wt, _bgb(p)


# ---------------------------------------------------------------------------
# the fused kernel (all three layers back-to-back in VMEM)
# ---------------------------------------------------------------------------
def _build_kernel(st1, st2, st3):

    def bn_relu(conv, gamma, beta, msel, inv_nq, mask):
        # reordered mean: row-reduce first, then tiny selector matmul
        masked = conv if mask is None else conv * mask
        colsum = jnp.sum(masked, axis=0, keepdims=True)                  # (1, CPAD)
        mu = jnp.dot(colsum, msel, preferred_element_type=jnp.float32)   # (1, CPAD)
        delta = conv - mu
        d2 = delta * delta
        if mask is not None:
            d2 = d2 * mask
        qvar = jnp.sum(d2) * inv_nq
        inv_d = jax.lax.rsqrt(qvar + jnp.float32(1e-5))
        return jnp.maximum(gamma * (delta * inv_d) + beta, 0.0)

    def tap_conv(act_ref, w_ref, bias, Wp, Np, G):
        # 9 accumulating tap matmuls on statically shifted bf16 row slices
        acc = jnp.zeros((Np, CPAD), jnp.float32)
        t = 0
        for dh in (-1, 0, 1):
            for dw in (-1, 0, 1):
                a = act_ref[pl.ds(G + dh * Wp + dw, Np), :]      # already bf16
                acc = acc + jnp.dot(a, w_ref[t], preferred_element_type=jnp.float32)
                t += 1
        return acc + bias

    def kernel(act1_ref, w1_ref, bgb1_ref, msel1_ref, pool1_ref,
               w2_ref, bgb2_ref, msel2_ref, mask2_ref, pool2_ref,
               w3_ref, bgb3_ref, msel3_ref, mask3_ref, pool3_ref,
               out_ref, act2_ref, act3_ref):
        # ---- layer 1: tap-packed conv (single K=128 matmul), BN, ReLU, pool ----
        conv1 = jnp.dot(act1_ref[...], w1_ref[...], preferred_element_type=jnp.float32)
        conv1 = conv1 + bgb1_ref[0:1, :]
        y1 = bn_relu(conv1, bgb1_ref[1:2, :], bgb1_ref[2:3, :], msel1_ref[...],
                     st1['inv_nq'], None)
        act2_ref[...] = jnp.dot(pool1_ref[...], y1.astype(jnp.bfloat16),
                                preferred_element_type=jnp.float32).astype(jnp.bfloat16)

        # ---- layer 2: 9 shifted-slice taps, BN (masked stats), ReLU, pool ----
        conv2 = tap_conv(act2_ref, w2_ref, bgb2_ref[0:1, :],
                         st2['Wp'], st2['Np'], st2['G'])
        y2 = bn_relu(conv2, bgb2_ref[1:2, :], bgb2_ref[2:3, :], msel2_ref[...],
                     st2['inv_nq'], mask2_ref[...])
        act3_ref[...] = jnp.dot(pool2_ref[...], y2.astype(jnp.bfloat16),
                                preferred_element_type=jnp.float32).astype(jnp.bfloat16)

        # ---- layer 3 ----
        conv3 = tap_conv(act3_ref, w3_ref, bgb3_ref[0:1, :],
                         st3['Wp'], st3['Np'], st3['G'])
        y3 = bn_relu(conv3, bgb3_ref[1:2, :], bgb3_ref[2:3, :], msel3_ref[...],
                     st3['inv_nq'], mask3_ref[...])
        out_ref[...] = jnp.dot(pool3_ref[...], y3.astype(jnp.bfloat16),
                               preferred_element_type=jnp.float32)

    return kernel


# ---------------------------------------------------------------------------
# wrapper: PyTorch-facing NCHW in, flattened features out (like the torch module)
# ---------------------------------------------------------------------------
@jax.jit
def qconv_etal_forward(x_nchw, params):
    B, Cin, H, W = x_nchw.shape
    p1, p2, p3 = params
    c1, c2, c3 = p1['beta'].shape[0], p2['beta'].shape[0], p3['beta'].shape[0]

    st1 = _layer1_static(B, H, W, c1)
    st2 = _layerN_static(B, H // 2, W // 2, c2, last=False)
    st3 = _layerN_static(B, H // 4, W // 4, c3, last=True)

    # layer-1 input: im2col with all 9 taps stacked along lanes (tap-major, then channel),
    # zero lane-padded to 128, stored bf16.
    xh = jnp.transpose(x_nchw, (0, 2, 3, 1))                       # NHWC
    xp = jnp.pad(xh, ((0, 0), (1, 1), (1, 1), (0, 0)))
    patches = [xp[:, dh:dh + H, dw:dw + W, :] for dh in range(3) for dw in range(3)]
    act1 = jnp.concatenate(patches, axis=-1).reshape(B * H * W, 9 * Cin)
    act1 = jnp.pad(act1, ((0, 0), (0, CPAD - 9 * Cin))).astype(jnp.bfloat16)

    w1, bgb1 = _layer1_params(p1)
    w2, bgb2 = _layerN_params(p2)
    w3, bgb3 = _layerN_params(p3)

    inputs = [
        act1,
        w1, bgb1, jnp.asarray(st1['msel']), jnp.asarray(st1['pool'], jnp.bfloat16),
        w2, bgb2, jnp.asarray(st2['msel']), jnp.asarray(st2['mask']),
        jnp.asarray(st2['pool'], jnp.bfloat16),
        w3, bgb3, jnp.asarray(st3['msel']), jnp.asarray(st3['mask']),
        jnp.asarray(st3['pool'], jnp.bfloat16),
    ]

    # honest cost estimate for the packed / bf16 shapes
    flops = (2 * st1['Np'] * CPAD * CPAD                         # layer-1 packed conv
             + 2 * st1['n_dst'] * st1['Np'] * CPAD               # pool1
             + 9 * 2 * st2['Np'] * CPAD * CPAD                   # layer-2 taps
             + 2 * st2['n_dst'] * st2['Np'] * CPAD               # pool2
             + 9 * 2 * st3['Np'] * CPAD * CPAD                   # layer-3 taps
             + 2 * st3['n_dst'] * st3['Np'] * CPAD               # pool3
             + 3 * 2 * CPAD * CPAD)                              # BN mean selectors
    bytes_accessed = sum(int(np.prod(a.shape)) * a.dtype.itemsize for a in inputs)
    bytes_accessed += st3['n_dst'] * CPAD * 4

    pooled = pl.pallas_call(
        _build_kernel(st1, st2, st3),
        out_shape=jax.ShapeDtypeStruct((st3['n_dst'], CPAD), jnp.float32),
        in_specs=[pl.BlockSpec(memory_space=pltpu.MemorySpace.VMEM)] * len(inputs),
        out_specs=pl.BlockSpec(memory_space=pltpu.MemorySpace.VMEM),
        scratch_shapes=[pltpu.VMEM((st1['n_dst'], CPAD), jnp.bfloat16),   # layer-2 act
                        pltpu.VMEM((st2['n_dst'], CPAD), jnp.bfloat16)],  # layer-3 act
        cost_estimate=pl.CostEstimate(flops=int(flops), transcendentals=3,
                                      bytes_accessed=int(bytes_accessed)),
    )(*inputs)

    h_out, w_out = H // 8, W // 8
    out = pooled[:, :c3].reshape(B, h_out, w_out, c3)    # (b,h,w) rows -> NHWC
    out = jnp.transpose(out, (0, 3, 1, 2))               # NCHW
    return out.reshape(B, -1)                            # nn.Flatten()


# ---------------------------------------------------------------------------
# plain-XLA reference (mirrors the torch module, f32) for a self-check
# ---------------------------------------------------------------------------
def _reference_forward(x, params):
    hh = x
    for p in params:
        w_full = _quaternion_full_weight(p['r'], p['i'], p['j'], p['k'])
        hh = jax.lax.conv_general_dilated(
            hh, w_full, window_strides=(1, 1), padding=((1, 1), (1, 1)),
            dimension_numbers=('NCHW', 'OIHW', 'NCHW'),
            precision=jax.lax.Precision.HIGHEST)
        hh = hh + p['bias'].reshape(1, -1, 1, 1)
        C = hh.shape[1]
        Q = C // 4
        comps = [hh[:, q * Q:(q + 1) * Q] for q in range(4)]
        deltas = [c - jnp.mean(c) for c in comps]
        qvar = jnp.mean(sum(d * d for d in deltas))
        denom = jnp.sqrt(qvar + 1e-5)
        gamma = p['gamma'].reshape(1, -1, 1, 1)
        out_c = [gamma * (deltas[q] / denom)
                 + p['beta'][q * Q:(q + 1) * Q].reshape(1, -1, 1, 1) for q in range(4)]
        hh = jnp.maximum(jnp.concatenate(out_c, axis=1), 0.0)
        B, C, Hh, Ww = hh.shape
        hh = hh.reshape(B, C, Hh // 2, 2, Ww // 2, 2).mean(axis=(3, 5))
    return hh.reshape(hh.shape[0], -1)


def init_params(key):
    """Deterministic synthetic parameters (shapes dictated by the module __init__)."""
    cfgs = [(4, 16), (16, 64), (64, 128)]  # layer1..layer3 (layer4 unused in forward)
    params = []
    for cin, cout in cfgs:
        kr, ki, kj, kk, kb, key = jax.random.split(key, 6)
        shape = (cout // 4, cin // 4, 3, 3)
        scale = (2.0 / (9 * cout)) ** 0.5
        params.append(dict(
            r=jax.random.normal(kr, shape, jnp.float32) * scale,
            i=jax.random.normal(ki, shape, jnp.float32) * scale,
            j=jax.random.normal(kj, shape, jnp.float32) * scale,
            k=jax.random.normal(kk, shape, jnp.float32) * scale,
            bias=jax.random.normal(kb, (cout,), jnp.float32) * 0.01,
            gamma=jnp.full((cout // 4,), 1.0, jnp.float32),   # gamma_init=1.0
            beta=jnp.zeros((cout,), jnp.float32),
        ))
    return params


if __name__ == "__main__":
    key = jax.random.PRNGKey(0)
    kx, kp = jax.random.split(key)
    x = jax.random.normal(kx, (2, 4, 16, 16), jnp.float32)   # NCHW, Cin=4
    params = init_params(kp)

    out = qconv_etal_forward(x, params)
    jax.block_until_ready(out)

    # (2,4,16,16) -> L1 (2,16,8,8) -> L2 (2,64,4,4) -> L3 (2,128,2,2) -> flatten (2,512)
    assert out.shape == (2, 128 * 2 * 2), out.shape
    assert bool(jnp.all(jnp.isfinite(out)))

    # self-check vs plain-XLA f32 reference (kernel uses bf16 MXU operands / activations)
    ref = _reference_forward(x, params)
    err = float(jnp.max(jnp.abs(out - ref)))
    scale = float(jnp.max(jnp.abs(ref)))
    assert err < 0.25, f"abs err {err}"
    assert err < 0.1 * scale + 1e-3, f"rel err {err} vs scale {scale}"

    print("KERNEL_OK")
</pallas_src>

<mosaic_0001>
module attributes {stable_mosaic.version = 11 : i64} {
  func.func @kernel(%arg0: memref<512x128xbf16, #tpu.memory_space<vmem>>, %arg1: memref<128x128xbf16, #tpu.memory_space<vmem>>, %arg2: memref<8x128xf32, #tpu.memory_space<vmem>>, %arg3: memref<128x128xf32, #tpu.memory_space<vmem>>, %arg4: memref<222x512xbf16, #tpu.memory_space<vmem>>, %arg5: memref<9x128x128xbf16, #tpu.memory_space<vmem>>, %arg6: memref<8x128xf32, #tpu.memory_space<vmem>>, %arg7: memref<128x128xf32, #tpu.memory_space<vmem>>, %arg8: memref<200x1xf32, #tpu.memory_space<vmem>>, %arg9: memref<86x200xbf16, #tpu.memory_space<vmem>>, %arg10: memref<9x128x128xbf16, #tpu.memory_space<vmem>>, %arg11: memref<8x128xf32, #tpu.memory_space<vmem>>, %arg12: memref<128x128xf32, #tpu.memory_space<vmem>>, %arg13: memref<72x1xf32, #tpu.memory_space<vmem>>, %arg14: memref<8x72xbf16, #tpu.memory_space<vmem>>, %arg15: memref<8x128xf32, #tpu.memory_space<vmem>>, %arg16: memref<222x128xbf16, #tpu.memory_space<vmem>>, %arg17: memref<86x128xbf16, #tpu.memory_space<vmem>>) attributes {dimension_semantics = [], scalar_prefetch = 0 : i64, scratch_operands = 2 : i64, tpu.core_type = #tpu.core_type<tc>} {
    %c0 = arith.constant 0 : index
    %c0_0 = arith.constant 0 : index
    %0 = vector.load %arg0[%c0, %c0_0] : memref<512x128xbf16, #tpu.memory_space<vmem>>, vector<512x128xbf16>
    %c0_1 = arith.constant 0 : index
    %c0_2 = arith.constant 0 : index
    %1 = vector.load %arg1[%c0_1, %c0_2] : memref<128x128xbf16, #tpu.memory_space<vmem>>, vector<128x128xbf16>
    %cst = arith.constant dense<0.000000e+00> : vector<512x128xf32>
    %2 = tpu.matmul %0, %1, %cst {dimension_numbers = #tpu.dot_dimension_numbers<[1], [0], [0], [1], [0, 0, 1, 1], [], []>} : vector<512x128xbf16>, vector<128x128xbf16>, vector<512x128xf32> -> vector<512x128xf32>
    %c0_3 = arith.constant 0 : index
    %c0_4 = arith.constant 0 : index
    %3 = vector.load %arg2[%c0_3, %c0_4] : memref<8x128xf32, #tpu.memory_space<vmem>>, vector<1x128xf32>
    %4 = vector.broadcast %3 : vector<1x128xf32> to vector<512x128xf32>
    %5 = arith.addf %2, %4 : vector<512x128xf32>
    %c1 = arith.constant 1 : index
    %c0_5 = arith.constant 0 : index
    %6 = vector.load %arg2[%c1, %c0_5] : memref<8x128xf32, #tpu.memory_space<vmem>>, vector<1x128xf32>
    %c2 = arith.constant 2 : index
    %c0_6 = arith.constant 0 : index
    %7 = vector.load %arg2[%c2, %c0_6] : memref<8x128xf32, #tpu.memory_space<vmem>>, vector<1x128xf32>
    %c0_7 = arith.constant 0 : index
    %c0_8 = arith.constant 0 : index
    %8 = vector.load %arg3[%c0_7, %c0_8] : memref<128x128xf32, #tpu.memory_space<vmem>>, vector<128x128xf32>
    %cst_9 = arith.constant dense<0.000000e+00> : vector<128xf32>
    %9 = vector.multi_reduction <add>, %5, %cst_9 [0] : vector<512x128xf32> to vector<128xf32>
    %10 = vector.shape_cast %9 : vector<128xf32> to vector<1x128xf32>
    %cst_10 = arith.constant dense<0.000000e+00> : vector<1x128xf32>
    %11 = tpu.matmul %10, %8, %cst_10 {dimension_numbers = #tpu.dot_dimension_numbers<[1], [0], [0], [1], [0, 0, 1, 1], [], []>} : vector<1x128xf32>, vector<128x128xf32>, vector<1x128xf32> -> vector<1x128xf32>
    %12 = vector.broadcast %11 : vector<1x128xf32> to vector<512x128xf32>
    %13 = arith.subf %5, %12 : vector<512x128xf32>
    %14 = arith.mulf %13, %13 : vector<512x128xf32>
    %15 = vector.shape_cast %14 : vector<512x128xf32> to vector<1x512x128xf32>
    %cst_11 = arith.constant dense<0.000000e+00> : vector<1xf32>
    %16 = vector.multi_reduction <add>, %15, %cst_11 [1, 2] : vector<1x512x128xf32> to vector<1xf32>
    %17 = vector.shape_cast %16 : vector<1xf32> to vector<1x1x1xf32>
    %18 = vector.extract %17[0, 0, 0] : f32 from vector<1x1x1xf32>
    %cst_12 = arith.constant 4.8828125E-4 : f32
    %19 = arith.mulf %18, %cst_12 : f32
    %cst_13 = arith.constant 9.99999974E-6 : f32
    %20 = arith.addf %19, %cst_13 : f32
    %21 = math.rsqrt %20 : f32
    %22 = vector.broadcast %21 : f32 to vector<512x128xf32>
    %23 = arith.mulf %13, %22 : vector<512x128xf32>
    %24 = vector.broadcast %6 : vector<1x128xf32> to vector<512x128xf32>
    %25 = arith.mulf %24, %23 : vector<512x128xf32>
    %26 = vector.broadcast %7 : vector<1x128xf32> to vector<512x128xf32>
    %27 = arith.addf %25, %26 : vector<512x128xf32>
    %cst_14 = arith.constant 0.000000e+00 : f32
    %28 = vector.broadcast %cst_14 : f32 to vector<512x128xf32>
    %29 = arith.maximumf %27, %28 : vector<512x128xf32>
    %c0_15 = arith.constant 0 : index
    %c0_16 = arith.constant 0 : index
    %30 = vector.load %arg4[%c0_15, %c0_16] : memref<222x512xbf16, #tpu.memory_space<vmem>>, vector<222x512xbf16>
    %31 = arith.truncf %29 : vector<512x128xf32> to vector<512x128xbf16>
    %cst_17 = arith.constant dense<0.000000e+00> : vector<222x128xf32>
    %32 = tpu.matmul %30, %31, %cst_17 {dimension_numbers = #tpu.dot_dimension_numbers<[1], [0], [0], [1], [0, 0, 1, 1], [], []>} : vector<222x512xbf16>, vector<512x128xbf16>, vector<222x128xf32> -> vector<222x128xf32>
    %33 = arith.truncf %32 : vector<222x128xf32> to vector<222x128xbf16>
    %c0_18 = arith.constant 0 : index
    %c0_19 = arith.constant 0 : index
    %34 = vector.load %arg16[%c0_18, %c0_19] : memref<222x128xbf16, #tpu.memory_space<vmem>>, vector<222x128xbf16>
    tpu.vector_store %arg16[%c0_18, %c0_19], %33 {strides = array<i32>} : memref<222x128xbf16, #tpu.memory_space<vmem>>, vector<222x128xbf16>,
    %c0_20 = arith.constant 0 : index
    %c0_21 = arith.constant 0 : index
    %35 = vector.load %arg6[%c0_20, %c0_21] : memref<8x128xf32, #tpu.memory_space<vmem>>, vector<1x128xf32>
    %cst_22 = arith.constant 0.000000e+00 : f32
    %36 = vector.broadcast %cst_22 : f32 to vector<200x128xf32>
    %c0_23 = arith.constant 0 : index
    %c0_24 = arith.constant 0 : index
    %37 = vector.load %arg16[%c0_23, %c0_24] : memref<222x128xbf16, #tpu.memory_space<vmem>>, vector<200x128xbf16>
    %c0_25 = arith.constant 0 : index
    %c0_26 = arith.constant 0 : index
    %c0_27 = arith.constant 0 : index
    %38 = vector.load %arg5[%c0_25, %c0_26, %c0_27] : memref<9x128x128xbf16, #tpu.memory_space<vmem>>, vector<1x128x128xbf16>
    %39 = vector.shape_cast %38 : vector<1x128x128xbf16> to vector<128x128xbf16>
    %cst_28 = arith.constant dense<0.000000e+00> : vector<200x128xf32>
    %40 = tpu.matmul %37, %39, %cst_28 {dimension_numbers = #tpu.dot_dimension_numbers<[1], [0], [0], [1], [0, 0, 1, 1], [], []>} : vector<200x128xbf16>, vector<128x128xbf16>, vector<200x128xf32> -> vector<200x128xf32>
    %41 = arith.addf %36, %40 : vector<200x128xf32>
    %c1_29 = arith.constant 1 : index
    %c0_30 = arith.constant 0 : index
    %42 = vector.load %arg16[%c1_29, %c0_30] : memref<222x128xbf16, #tpu.memory_space<vmem>>, vector<200x128xbf16>
    %c1_31 = arith.constant 1 : index
    %c0_32 = arith.constant 0 : index
    %c0_33 = arith.constant 0 : index
    %43 = vector.load %arg5[%c1_31, %c0_32, %c0_33] : memref<9x128x128xbf16, #tpu.memory_space<vmem>>, vector<1x128x128xbf16>
    %44 = vector.shape_cast %43 : vector<1x128x128xbf16> to vector<128x128xbf16>
    %cst_34 = arith.constant dense<0.000000e+00> : vector<200x128xf32>
    %45 = tpu.matmul %42, %44, %cst_34 {dimension_numbers = #tpu.dot_dimension_numbers<[1], [0], [0], [1], [0, 0, 1, 1], [], []>} : vector<200x128xbf16>, vector<128x128xbf16>, vector<200x128xf32> -> vector<200x128xf32>
    %46 = arith.addf %41, %45 : vector<200x128xf32>
    %c2_35 = arith.constant 2 : index
    %c0_36 = arith.constant 0 : index
    %47 = vector.load %arg16[%c2_35, %c0_36] : memref<222x128xbf16, #tpu.memory_space<vmem>>, vector<200x128xbf16>
    %c2_37 = arith.constant 2 : index
    %c0_38 = arith.constant 0 : index
    %c0_39 = arith.constant 0 : index
    %48 = vector.load %arg5[%c2_37, %c0_38, %c0_39] : memref<9x128x128xbf16, #tpu.memory_space<vmem>>, vector<1x128x128xbf16>
    %49 = vector.shape_cast %48 : vector<1x128x128xbf16> to vector<128x128xbf16>
    %cst_40 = arith.constant dense<0.000000e+00> : vector<200x128xf32>
    %50 = tpu.matmul %47, %49, %cst_40 {dimension_numbers = #tpu.dot_dimension_numbers<[1], [0], [0], [1], [0, 0, 1, 1], [], []>} : vector<200x128xbf16>, vector<128x128xbf16>, vector<200x128xf32> -> vector<200x128xf32>
    %51 = arith.addf %46, %50 : vector<200x128xf32>
    %c10 = arith.constant 10 : index
    %c0_41 = arith.constant 0 : index
    %52 = vector.load %arg16[%c10, %c0_41] : memref<222x128xbf16, #tpu.memory_space<vmem>>, vector<200x128xbf16>
    %c3 = arith.constant 3 : index
    %c0_42 = arith.constant 0 : index
    %c0_43 = arith.constant 0 : index
    %53 = vector.load %arg5[%c3, %c0_42, %c0_43] : memref<9x128x128xbf16, #tpu.memory_space<vmem>>, vector<1x128x128xbf16>
    %54 = vector.shape_cast %53 : vector<1x128x128xbf16> to vector<128x128xbf16>
    %cst_44 = arith.constant dense<0.000000e+00> : vector<200x128xf32>
    %55 = tpu.matmul %52, %54, %cst_44 {dimension_numbers = #tpu.dot_dimension_numbers<[1], [0], [0], [1], [0, 0, 1, 1], [], []>} : vector<200x128xbf16>, vector<128x128xbf16>, vector<200x128xf32> -> vector<200x128xf32>
    %56 = arith.addf %51, %55 : vector<200x128xf32>
    %c11 = arith.constant 11 : index
    %c0_45 = arith.constant 0 : index
    %57 = vector.load %arg16[%c11, %c0_45] : memref<222x128xbf16, #tpu.memory_space<vmem>>, vector<200x128xbf16>
    %c4 = arith.constant 4 : index
    %c0_46 = arith.constant 0 : index
    %c0_47 = arith.constant 0 : index
    %58 = vector.load %arg5[%c4, %c0_46, %c0_47] : memref<9x128x128xbf16, #tpu.memory_space<vmem>>, vector<1x128x128xbf16>
    %59 = vector.shape_cast %58 : vector<1x128x128xbf16> to vector<128x128xbf16>
    %cst_48 = arith.constant dense<0.000000e+00> : vector<200x128xf32>
    %60 = tpu.matmul %57, %59, %cst_48 {dimension_numbers = #tpu.dot_dimension_numbers<[1], [0], [0], [1], [0, 0, 1, 1], [], []>} : vector<200x128xbf16>, vector<128x128xbf16>, vector<200x128xf32> -> vector<200x128xf32>
    %61 = arith.addf %56, %60 : vector<200x128xf32>
    %c12 = arith.constant 12 : index
    %c0_49 = arith.constant 0 : index
    %62 = vector.load %arg16[%c12, %c0_49] : memref<222x128xbf16, #tpu.memory_space<vmem>>, vector<200x128xbf16>
    %c5 = arith.constant 5 : index
    %c0_50 = arith.constant 0 : index
    %c0_51 = arith.constant 0 : index
    %63 = vector.load %arg5[%c5, %c0_50, %c0_51] : memref<9x128x128xbf16, #tpu.memory_space<vmem>>, vector<1x128x128xbf16>
    %64 = vector.shape_cast %63 : vector<1x128x128xbf16> to vector<128x128xbf16>
    %cst_52 = arith.constant dense<0.000000e+00> : vector<200x128xf32>
    %65 = tpu.matmul %62, %64, %cst_52 {dimension_numbers = #tpu.dot_dimension_numbers<[1], [0], [0], [1], [0, 0, 1, 1], [], []>} : vector<200x128xbf16>, vector<128x128xbf16>, vector<200x128xf32> -> vector<200x128xf32>
    %66 = arith.addf %61, %65 : vector<200x128xf32>
    %c20 = arith.constant 20 : index
    %c0_53 = arith.constant 0 : index
    %67 = vector.load %arg16[%c20, %c0_53] : memref<222x128xbf16, #tpu.memory_space<vmem>>, vector<200x128xbf16>
    %c6 = arith.constant 6 : index
    %c0_54 = arith.constant 0 : index
    %c0_55 = arith.constant 0 : index
    %68 = vector.load %arg5[%c6, %c0_54, %c0_55] : memref<9x128x128xbf16, #tpu.memory_space<vmem>>, vector<1x128x128xbf16>
    %69 = vector.shape_cast %68 : vector<1x128x128xbf16> to vector<128x128xbf16>
    %cst_56 = arith.constant dense<0.000000e+00> : vector<200x128xf32>
    %70 = tpu.matmul %67, %69, %cst_56 {dimension_numbers = #tpu.dot_dimension_numbers<[1], [0], [0], [1], [0, 0, 1, 1], [], []>} : vector<200x128xbf16>, vector<128x128xbf16>, vector<200x128xf32> -> vector<200x128xf32>
    %71 = arith.addf %66, %70 : vector<200x128xf32>
    %c21 = arith.constant 21 : index
    %c0_57 = arith.constant 0 : index
    %72 = vector.load %arg16[%c21, %c0_57] : memref<222x128xbf16, #tpu.memory_space<vmem>>, vector<200x128xbf16>
    %c7 = arith.constant 7 : index
    %c0_58 = arith.constant 0 : index
    %c0_59 = arith.constant 0 : index
    %73 = vector.load %arg5[%c7, %c0_58, %c0_59] : memref<9x128x128xbf16, #tpu.memory_space<vmem>>, vector<1x128x128xbf16>
    %74 = vector.shape_cast %73 : vector<1x128x128xbf16> to vector<128x128xbf16>
    %cst_60 = arith.constant dense<0.000000e+00> : vector<200x128xf32>
    %75 = tpu.matmul %72, %74, %cst_60 {dimension_numbers = #tpu.dot_dimension_numbers<[1], [0], [0], [1], [0, 0, 1, 1], [], []>} : vector<200x128xbf16>, vector<128x128xbf16>, vector<200x128xf32> -> vector<200x128xf32>
    %76 = arith.addf %71, %75 : vector<200x128xf32>
    %c22 = arith.constant 22 : index
    %c0_61 = arith.constant 0 : index
    %77 = vector.load %arg16[%c22, %c0_61] : memref<222x128xbf16, #tpu.memory_space<vmem>>, vector<200x128xbf16>
    %c8 = arith.constant 8 : index
    %c0_62 = arith.constant 0 : index
    %c0_63 = arith.constant 0 : index
    %78 = vector.load %arg5[%c8, %c0_62, %c0_63] : memref<9x128x128xbf16, #tpu.memory_space<vmem>>, vector<1x128x128xbf16>
    %79 = vector.shape_cast %78 : vector<1x128x128xbf16> to vector<128x128xbf16>
    %cst_64 = arith.constant dense<0.000000e+00> : vector<200x128xf32>
    %80 = tpu.matmul %77, %79, %cst_64 {dimension_numbers = #tpu.dot_dimension_numbers<[1], [0], [0], [1], [0, 0, 1, 1], [], []>} : vector<200x128xbf16>, vector<128x128xbf16>, vector<200x128xf32> -> vector<200x128xf32>
    %81 = arith.addf %76, %80 : vector<200x128xf32>
    %82 = vector.broadcast %35 : vector<1x128xf32> to vector<200x128xf32>
    %83 = arith.addf %81, %82 : vector<200x128xf32>
    %c1_65 = arith.constant 1 : index
    %c0_66 = arith.constant 0 : index
    %84 = vector.load %arg6[%c1_65, %c0_66] : memref<8x128xf32, #tpu.memory_space<vmem>>, vector<1x128xf32>
    %c2_67 = arith.constant 2 : index
    %c0_68 = arith.constant 0 : index
    %85 = vector.load %arg6[%c2_67, %c0_68] : memref<8x128xf32, #tpu.memory_space<vmem>>, vector<1x128xf32>
    %c0_69 = arith.constant 0 : index
    %c0_70 = arith.constant 0 : index
    %86 = vector.load %arg7[%c0_69, %c0_70] : memref<128x128xf32, #tpu.memory_space<vmem>>, vector<128x128xf32>
    %c0_71 = arith.constant 0 : index
    %c0_72 = arith.constant 0 : index
    %87 = vector.load %arg8[%c0_71, %c0_72] : memref<200x1xf32, #tpu.memory_space<vmem>>, vector<200x1xf32>
    %88 = vector.broadcast %87 : vector<200x1xf32> to vector<200x128xf32>
    %89 = arith.mulf %83, %88 : vector<200x128xf32>
    %cst_73 = arith.constant dense<0.000000e+00> : vector<128xf32>
    %90 = vector.multi_reduction <add>, %89, %cst_73 [0] : vector<200x128xf32> to vector<128xf32>
    %91 = vector.shape_cast %90 : vector<128xf32> to vector<1x128xf32>
    %cst_74 = arith.constant dense<0.000000e+00> : vector<1x128xf32>
    %92 = tpu.matmul %91, %86, %cst_74 {dimension_numbers = #tpu.dot_dimension_numbers<[1], [0], [0], [1], [0, 0, 1, 1], [], []>} : vector<1x128xf32>, vector<128x128xf32>, vector<1x128xf32> -> vector<1x128xf32>
    %93 = vector.broadcast %92 : vector<1x128xf32> to vector<200x128xf32>
    %94 = arith.subf %83, %93 : vector<200x128xf32>
    %95 = arith.mulf %94, %94 : vector<200x128xf32>
    %96 = vector.broadcast %87 : vector<200x1xf32> to vector<200x128xf32>
    %97 = arith.mulf %95, %96 : vector<200x128xf32>
    %98 = vector.shape_cast %97 : vector<200x128xf32> to vector<1x200x128xf32>
    %cst_75 = arith.constant dense<0.000000e+00> : vector<1xf32>
    %99 = vector.multi_reduction <add>, %98, %cst_75 [1, 2] : vector<1x200x128xf32> to vector<1xf32>
    %100 = vector.shape_cast %99 : vector<1xf32> to vector<1x1x1xf32>
    %101 = vector.extract %100[0, 0, 0] : f32 from vector<1x1x1xf32>
    %cst_76 = arith.constant 4.8828125E-4 : f32
    %102 = arith.mulf %101, %cst_76 : f32
    %cst_77 = arith.constant 9.99999974E-6 : f32
    %103 = arith.addf %102, %cst_77 : f32
    %104 = math.rsqrt %103 : f32
    %105 = vector.broadcast %104 : f32 to vector<200x128xf32>
    %106 = arith.mulf %94, %105 : vector<200x128xf32>
    %107 = vector.broadcast %84 : vector<1x128xf32> to vector<200x128xf32>
    %108 = arith.mulf %107, %106 : vector<200x128xf32>
    %109 = vector.broadcast %85 : vector<1x128xf32> to vector<200x128xf32>
    %110 = arith.addf %108, %109 : vector<200x128xf32>
    %cst_78 = arith.constant 0.000000e+00 : f32
    %111 = vector.broadcast %cst_78 : f32 to vector<200x128xf32>
    %112 = arith.maximumf %110, %111 : vector<200x128xf32>
    %c0_79 = arith.constant 0 : index
    %c0_80 = arith.constant 0 : index
    %113 = vector.load %arg9[%c0_79, %c0_80] : memref<86x200xbf16, #tpu.memory_space<vmem>>, vector<86x200xbf16>
    %114 = arith.truncf %112 : vector<200x128xf32> to vector<200x128xbf16>
    %cst_81 = arith.constant dense<0.000000e+00> : vector<86x128xf32>
    %115 = tpu.matmul %113, %114, %cst_81 {dimension_numbers = #tpu.dot_dimension_numbers<[1], [0], [0], [1], [0, 0, 1, 1], [], []>} : vector<86x200xbf16>, vector<200x128xbf16>, vector<86x128xf32> -> vector<86x128xf32>
    %116 = arith.truncf %115 : vector<86x128xf32> to vector<86x128xbf16>
    %c0_82 = arith.constant 0 : index
    %c0_83 = arith.constant 0 : index
    %117 = vector.load %arg17[%c0_82, %c0_83] : memref<86x128xbf16, #tpu.memory_space<vmem>>, vector<86x128xbf16>
    tpu.vector_store %arg17[%c0_82, %c0_83], %116 {strides = array<i32>} : memref<86x128xbf16, #tpu.memory_space<vmem>>, vector<86x128xbf16>,
    %c0_84 = arith.constant 0 : index
    %c0_85 = arith.constant 0 : index
    %118 = vector.load %arg11[%c0_84, %c0_85] : memref<8x128xf32, #tpu.memory_space<vmem>>, vector<1x128xf32>
    %cst_86 = arith.constant 0.000000e+00 : f32
    %119 = vector.broadcast %cst_86 : f32 to vector<72x128xf32>
    %c0_87 = arith.constant 0 : index
    %c0_88 = arith.constant 0 : index
    %120 = vector.load %arg17[%c0_87, %c0_88] : memref<86x128xbf16, #tpu.memory_space<vmem>>, vector<72x128xbf16>
    %c0_89 = arith.constant 0 : index
    %c0_90 = arith.constant 0 : index
    %c0_91 = arith.constant 0 : index
    %121 = vector.load %arg10[%c0_89, %c0_90, %c0_91] : memref<9x128x128xbf16, #tpu.memory_space<vmem>>, vector<1x128x128xbf16>
    %122 = vector.shape_cast %121 : vector<1x128x128xbf16> to vector<128x128xbf16>
    %cst_92 = arith.constant dense<0.000000e+00> : vector<72x128xf32>
    %123 = tpu.matmul %120, %122, %cst_92 {dimension_numbers = #tpu.dot_dimension_numbers<[1], [0], [0], [1], [0, 0, 1, 1], [], []>} : vector<72x128xbf16>, vector<128x128xbf16>, vector<72x128xf32> -> vector<72x128xf32>
    %124 = arith.addf %119, %123 : vector<72x128xf32>
    %c1_93 = arith.constant 1 : index
    %c0_94 = arith.constant 0 : index
    %125 = vector.load %arg17[%c1_93, %c0_94] : memref<86x128xbf16, #tpu.memory_space<vmem>>, vector<72x128xbf16>
    %c1_95 = arith.constant 1 : index
    %c0_96 = arith.constant 0 : index
    %c0_97 = arith.constant 0 : index
    %126 = vector.load %arg10[%c1_95, %c0_96, %c0_97] : memref<9x128x128xbf16, #tpu.memory_space<vmem>>, vector<1x128x128xbf16>
    %127 = vector.shape_cast %126 : vector<1x128x128xbf16> to vector<128x128xbf16>
    %cst_98 = arith.constant dense<0.000000e+00> : vector<72x128xf32>
    %128 = tpu.matmul %125, %127, %cst_98 {dimension_numbers = #tpu.dot_dimension_numbers<[1], [0], [0], [1], [0, 0, 1, 1], [], []>} : vector<72x128xbf16>, vector<128x128xbf16>, vector<72x128xf32> -> vector<72x128xf32>
    %129 = arith.addf %124, %128 : vector<72x128xf32>
    %c2_99 = arith.constant 2 : index
    %c0_100 = arith.constant 0 : index
    %130 = vector.load %arg17[%c2_99, %c0_100] : memref<86x128xbf16, #tpu.memory_space<vmem>>, vector<72x128xbf16>
    %c2_101 = arith.constant 2 : index
    %c0_102 = arith.constant 0 : index
    %c0_103 = arith.constant 0 : index
    %131 = vector.load %arg10[%c2_101, %c0_102, %c0_103] : memref<9x128x128xbf16, #tpu.memory_space<vmem>>, vector<1x128x128xbf16>
    %132 = vector.shape_cast %131 : vector<1x128x128xbf16> to vector<128x128xbf16>
    %cst_104 = arith.constant dense<0.000000e+00> : vector<72x128xf32>
    %133 = tpu.matmul %130, %132, %cst_104 {dimension_numbers = #tpu.dot_dimension_numbers<[1], [0], [0], [1], [0, 0, 1, 1], [], []>} : vector<72x128xbf16>, vector<128x128xbf16>, vector<72x128xf32> -> vector<72x128xf32>
    %134 = arith.addf %129, %133 : vector<72x128xf32>
    %c6_105 = arith.constant 6 : index
    %c0_106 = arith.constant 0 : index
    %135 = vector.load %arg17[%c6_105, %c0_106] : memref<86x128xbf16, #tpu.memory_space<vmem>>, vector<72x128xbf16>
    %c3_107 = arith.constant 3 : index
    %c0_108 = arith.constant 0 : index
    %c0_109 = arith.constant 0 : index
    %136 = vector.load %arg10[%c3_107, %c0_108, %c0_109] : memref<9x128x128xbf16, #tpu.memory_space<vmem>>, vector<1x128x128xbf16>
    %137 = vector.shape_cast %136 : vector<1x128x128xbf16> to vector<128x128xbf16>
    %cst_110 = arith.constant dense<0.000000e+00> : vector<72x128xf32>
    %138 = tpu.matmul %135, %137, %cst_110 {dimension_numbers = #tpu.dot_dimension_numbers<[1], [0], [0], [1], [0, 0, 1, 1], [], []>} : vector<72x128xbf16>, vector<128x128xbf16>, vector<72x128xf32> -> vector<72x128xf32>
    %139 = arith.addf %134, %138 : vector<72x128xf32>
    %c7_111 = arith.constant 7 : index
    %c0_112 = arith.constant 0 : index
    %140 = vector.load %arg17[%c7_111, %c0_112] : memref<86x128xbf16, #tpu.memory_space<vmem>>, vector<72x128xbf16>
    %c4_113 = arith.constant 4 : index
    %c0_114 = arith.constant 0 : index
    %c0_115 = arith.constant 0 : index
    %141 = vector.load %arg10[%c4_113, %c0_114, %c0_115] : memref<9x128x128xbf16, #tpu.memory_space<vmem>>, vector<1x128x128xbf16>
    %142 = vector.shape_cast %141 : vector<1x128x128xbf16> to vector<128x128xbf16>
    %cst_116 = arith.constant dense<0.000000e+00> : vector<72x128xf32>
    %143 = tpu.matmul %140, %142, %cst_116 {dimension_numbers = #tpu.dot_dimension_numbers<[1], [0], [0], [1], [0, 0, 1, 1], [], []>} : vector<72x128xbf16>, vector<128x128xbf16>, vector<72x128xf32> -> vector<72x128xf32>
    %144 = arith.addf %139, %143 : vector<72x128xf32>
    %c8_117 = arith.constant 8 : index
    %c0_118 = arith.constant 0 : index
    %145 = vector.load %arg17[%c8_117, %c0_118] : memref<86x128xbf16, #tpu.memory_space<vmem>>, vector<72x128xbf16>
    %c5_119 = arith.constant 5 : index
    %c0_120 = arith.constant 0 : index
    %c0_121 = arith.constant 0 : index
    %146 = vector.load %arg10[%c5_119, %c0_120, %c0_121] : memref<9x128x128xbf16, #tpu.memory_space<vmem>>, vector<1x128x128xbf16>
    %147 = vector.shape_cast %146 : vector<1x128x128xbf16> to vector<128x128xbf16>
    %cst_122 = arith.constant dense<0.000000e+00> : vector<72x128xf32>
    %148 = tpu.matmul %145, %147, %cst_122 {dimension_numbers = #tpu.dot_dimension_numbers<[1], [0], [0], [1], [0, 0, 1, 1], [], []>} : vector<72x128xbf16>, vector<128x128xbf16>, vector<72x128xf32> -> vector<72x128xf32>
    %149 = arith.addf %144, %148 : vector<72x128xf32>
    %c12_123 = arith.constant 12 : index
    %c0_124 = arith.constant 0 : index
    %150 = vector.load %arg17[%c12_123, %c0_124] : memref<86x128xbf16, #tpu.memory_space<vmem>>, vector<72x128xbf16>
    %c6_125 = arith.constant 6 : index
    %c0_126 = arith.constant 0 : index
    %c0_127 = arith.constant 0 : index
    %151 = vector.load %arg10[%c6_125, %c0_126, %c0_127] : memref<9x128x128xbf16, #tpu.memory_space<vmem>>, vector<1x128x128xbf16>
    %152 = vector.shape_cast %151 : vector<1x128x128xbf16> to vector<128x128xbf16>
    %cst_128 = arith.constant dense<0.000000e+00> : vector<72x128xf32>
    %153 = tpu.matmul %150, %152, %cst_128 {dimension_numbers = #tpu.dot_dimension_numbers<[1], [0], [0], [1], [0, 0, 1, 1], [], []>} : vector<72x128xbf16>, vector<128x128xbf16>, vector<72x128xf32> -> vector<72x128xf32>
    %154 = arith.addf %149, %153 : vector<72x128xf32>
    %c13 = arith.constant 13 : index
    %c0_129 = arith.constant 0 : index
    %155 = vector.load %arg17[%c13, %c0_129] : memref<86x128xbf16, #tpu.memory_space<vmem>>, vector<72x128xbf16>
    %c7_130 = arith.constant 7 : index
    %c0_131 = arith.constant 0 : index
    %c0_132 = arith.constant 0 : index
    %156 = vector.load %arg10[%c7_130, %c0_131, %c0_132] : memref<9x128x128xbf16, #tpu.memory_space<vmem>>, vector<1x128x128xbf16>
    %157 = vector.shape_cast %156 : vector<1x128x128xbf16> to vector<128x128xbf16>
    %cst_133 = arith.constant dense<0.000000e+00> : vector<72x128xf32>
    %158 = tpu.matmul %155, %157, %cst_133 {dimension_numbers = #tpu.dot_dimension_numbers<[1], [0], [0], [1], [0, 0, 1, 1], [], []>} : vector<72x128xbf16>, vector<128x128xbf16>, vector<72x128xf32> -> vector<72x128xf32>
    %159 = arith.addf %154, %158 : vector<72x128xf32>
    %c14 = arith.constant 14 : index
    %c0_134 = arith.constant 0 : index
    %160 = vector.load %arg17[%c14, %c0_134] : memref<86x128xbf16, #tpu.memory_space<vmem>>, vector<72x128xbf16>
    %c8_135 = arith.constant 8 : index
    %c0_136 = arith.constant 0 : index
    %c0_137 = arith.constant 0 : index
    %161 = vector.load %arg10[%c8_135, %c0_136, %c0_137] : memref<9x128x128xbf16, #tpu.memory_space<vmem>>, vector<1x128x128xbf16>
    %162 = vector.shape_cast %161 : vector<1x128x128xbf16> to vector<128x128xbf16>
    %cst_138 = arith.constant dense<0.000000e+00> : vector<72x128xf32>
    %163 = tpu.matmul %160, %162, %cst_138 {dimension_numbers = #tpu.dot_dimension_numbers<[1], [0], [0], [1], [0, 0, 1, 1], [], []>} : vector<72x128xbf16>, vector<128x128xbf16>, vector<72x128xf32> -> vector<72x128xf32>
    %164 = arith.addf %159, %163 : vector<72x128xf32>
    %165 = vector.broadcast %118 : vector<1x128xf32> to vector<72x128xf32>
    %166 = arith.addf %164, %165 : vector<72x128xf32>
    %c1_139 = arith.constant 1 : index
    %c0_140 = arith.constant 0 : index
    %167 = vector.load %arg11[%c1_139, %c0_140] : memref<8x128xf32, #tpu.memory_space<vmem>>, vector<1x128xf32>
    %c2_141 = arith.constant 2 : index
    %c0_142 = arith.constant 0 : index
    %168 = vector.load %arg11[%c2_141, %c0_142] : memref<8x128xf32, #tpu.memory_space<vmem>>, vector<1x128xf32>
    %c0_143 = arith.constant 0 : index
    %c0_144 = arith.constant 0 : index
    %169 = vector.load %arg12[%c0_143, %c0_144] : memref<128x128xf32, #tpu.memory_space<vmem>>, vector<128x128xf32>
    %c0_145 = arith.constant 0 : index
    %c0_146 = arith.constant 0 : index
    %170 = vector.load %arg13[%c0_145, %c0_146] : memref<72x1xf32, #tpu.memory_space<vmem>>, vector<72x1xf32>
    %171 = vector.broadcast %170 : vector<72x1xf32> to vector<72x128xf32>
    %172 = arith.mulf %166, %171 : vector<72x128xf32>
    %cst_147 = arith.constant dense<0.000000e+00> : vector<128xf32>
    %173 = vector.multi_reduction <add>, %172, %cst_147 [0] : vector<72x128xf32> to vector<128xf32>
    %174 = vector.shape_cast %173 : vector<128xf32> to vector<1x128xf32>
    %cst_148 = arith.constant dense<0.000000e+00> : vector<1x128xf32>
    %175 = tpu.matmul %174, %169, %cst_148 {dimension_numbers = #tpu.dot_dimension_numbers<[1], [0], [0], [1], [0, 0, 1, 1], [], []>} : vector<1x128xf32>, vector<128x128xf32>, vector<1x128xf32> -> vector<1x128xf32>
    %176 = vector.broadcast %175 : vector<1x128xf32> to vector<72x128xf32>
    %177 = arith.subf %166, %176 : vector<72x128xf32>
    %178 = arith.mulf %177, %177 : vector<72x128xf32>
    %179 = vector.broadcast %170 : vector<72x1xf32> to vector<72x128xf32>
    %180 = arith.mulf %178, %179 : vector<72x128xf32>
    %181 = vector.shape_cast %180 : vector<72x128xf32> to vector<1x72x128xf32>
    %cst_149 = arith.constant dense<0.000000e+00> : vector<1xf32>
    %182 = vector.multi_reduction <add>, %181, %cst_149 [1, 2] : vector<1x72x128xf32> to vector<1xf32>
    %183 = vector.shape_cast %182 : vector<1xf32> to vector<1x1x1xf32>
    %184 = vector.extract %183[0, 0, 0] : f32 from vector<1x1x1xf32>
    %cst_150 = arith.constant 9.765625E-4 : f32
    %185 = arith.mulf %184, %cst_150 : f32
    %cst_151 = arith.constant 9.99999974E-6 : f32
    %186 = arith.addf %185, %cst_151 : f32
    %187 = math.rsqrt %186 : f32
    %188 = vector.broadcast %187 : f32 to vector<72x128xf32>
    %189 = arith.mulf %177, %188 : vector<72x128xf32>
    %190 = vector.broadcast %167 : vector<1x128xf32> to vector<72x128xf32>
    %191 = arith.mulf %190, %189 : vector<72x128xf32>
    %192 = vector.broadcast %168 : vector<1x128xf32> to vector<72x128xf32>
    %193 = arith.addf %191, %192 : vector<72x128xf32>
    %cst_152 = arith.constant 0.000000e+00 : f32
    %194 = vector.broadcast %cst_152 : f32 to vector<72x128xf32>
    %195 = arith.maximumf %193, %194 : vector<72x128xf32>
    %c0_153 = arith.constant 0 : index
    %c0_154 = arith.constant 0 : index
    %196 = vector.load %arg14[%c0_153, %c0_154] : memref<8x72xbf16, #tpu.memory_space<vmem>>, vector<8x72xbf16>
    %197 = arith.truncf %195 : vector<72x128xf32> to vector<72x128xbf16>
    %cst_155 = arith.constant dense<0.000000e+00> : vector<8x128xf32>
    %198 = tpu.matmul %196, %197, %cst_155 {dimension_numbers = #tpu.dot_dimension_numbers<[1], [0], [0], [1], [0, 0, 1, 1], [], []>} : vector<8x72xbf16>, vector<72x128xbf16>, vector<8x128xf32> -> vector<8x128xf32>
    %c0_156 = arith.constant 0 : index
    %c0_157 = arith.constant 0 : index
    %199 = vector.load %arg15[%c0_156, %c0_157] : memref<8x128xf32, #tpu.memory_space<vmem>>, vector<8x128xf32>
    tpu.vector_store %arg15[%c0_156, %c0_157], %198 {strides = array<i32>} : memref<8x128xf32, #tpu.memory_space<vmem>>, vector<8x128xf32>,
    return
  }
}

</mosaic_0001>

<bundles_post_ra>
// kernel: tile.18
= control target key start
LH: loop header
LB: loop body
LE: loop exit
PB: predicated region body
PF: predicated region fallthrough
CT: control target
= control target key end

     0   :  { %s22_s0 = inlined_call_operand.vmem [shape: f32[4], index: 0, kind: input, shape index: {}]   ;;  %s23_s1 = inlined_call_operand.vmem [shape: f32[4,4], index: 1, kind: output, shape index: {}]  }
   0x1   :  { %v4_v0 = vld [vmem:[%s22_s0] ss:$0 sm:$0xff] }
   0x2   :  { %5 = vst [vmem:[%s23_s1] sm:$0xf] %v4_v0 }

// kernel: tile.23
= control target key start
LH: loop header
LB: loop body
LE: loop exit
PB: predicated region body
PF: predicated region fallthrough
CT: control target
= control target key end

     0   :  { %s22_s0 = inlined_call_operand.vmem [shape: f32[16], index: 0, kind: input, shape index: {}]   ;;  %s23_s1 = inlined_call_operand.vmem [shape: f32[4,16], index: 1, kind: output, shape index: {}]  }
   0x1   :  { %v4_v0 = vld [vmem:[%s22_s0] ss:$0 sm:$0xff] }
   0x2   :  { %5 = vst [vmem:[%s23_s1] sm:$0xf] %v4_v0 }

// kernel: tile.28
= control target key start
LH: loop header
LB: loop body
LE: loop exit
PB: predicated region body
PF: predicated region fallthrough
CT: control target
= control target key end

     0   :  { %s22_s0 = inlined_call_operand.vmem [shape: f32[32], index: 0, kind: input, shape index: {}]   ;;  %s23_s1 = inlined_call_operand.vmem [shape: f32[4,32], index: 1, kind: output, shape index: {}]  }
   0x1   :  { %v4_v0 = vld [vmem:[%s22_s0] ss:$0 sm:$0xff] }
   0x2   :  { %5 = vst [vmem:[%s23_s1] sm:$0xf] %v4_v0 }

// kernel: qconv_etal_forward.1
= control target key start
LH: loop header
LB: loop body
LE: loop exit
PB: predicated region body
PF: predicated region fallthrough
CT: control target
= control target key end

     0   :  { %v14876_v43 = vmov 0.0|0.0   ;;  %vm10627_vm0 = vmmov 0   ;;  %vm2739_vm1 = vcmask 1046528   ;;  %vm2219_vm2 = vsmask.f32 7424  ;;  %s14860_s1 = inlined_call_operand.vmem [shape: bf16[128,128], index: 1, kind: input, shape index: {}]   ;;  %s14861_s0 = inlined_call_operand.vmem [shape: bf16[512,128], index: 0, kind: input, shape index: {}]   ;;  %s14862_s3 = inlined_call_operand.vmem [shape: f32[128,128], index: 3, kind: input, shape index: {}]   ;;  %s14863_s2 = inlined_call_operand.vmem [shape: f32[8,128], index: 2, kind: input, shape index: {}]   ;;  %s14864_s4 = inlined_call_operand.vmem [shape: bf16[222,512], index: 4, kind: input, shape index: {}]   ;;  %s14865_s5 = inlined_call_operand.vmem [shape: bf16[9,128,128], index: 5, kind: input, shape index: {}]   ;;  %s14866_s8 = inlined_call_operand.vmem [shape: f32[200,1], index: 8, kind: input, shape index: {}]   ;;  %s14867_s13 = inlined_call_operand.vmem [shape: f32[72,1], index: 13, kind: input, shape index: {}]   ;;  %s14868_s7 = inlined_call_operand.vmem [shape: f32[128,128], index: 7, kind: input, shape index: {}]   ;;  %s14869_s6 = inlined_call_operand.vmem [shape: f32[8,128], index: 6, kind: input, shape index: {}]   ;;  %s14870_s9 = inlined_call_operand.vmem [shape: bf16[86,200], index: 9, kind: input, shape index: {}]   ;;  %s14871_s10 = inlined_call_operand.vmem [shape: bf16[9,128,128], index: 10, kind: input, shape index: {}]   ;;  %s14872_s12 = inlined_call_operand.vmem [shape: f32[128,128], index: 12, kind: input, shape index: {}]   ;;  %s14873_s11 = inlined_call_operand.vmem [shape: f32[8,128], index: 11, kind: input, shape index: {}]   ;;  %s14874_s14 = inlined_call_operand.vmem [shape: bf16[8,72], index: 14, kind: input, shape index: {}]   ;;  %s14875_s15 = inlined_call_operand.vmem [shape: f32[8,128], index: 15, kind: output, shape index: {}]  }
   0x1   :  { %v10263_v0 = vld [vmem:[%s14860_s1] sm:$0xff]   ;;  %v10264_v1 = vld [vmem:[%s14860_s1 + $0x8] sm:$0xff]   ;;  %v10265_v2 = vld [vmem:[%s14860_s1 + $0x10] sm:$0xff]   ;;  %10173 = vmatprep.subr.bf16.mxu1 %v14876_v43  ;;  %vm3723_vm3 = vcmask 1045504   ;;  %vm3363_vm4 = vsmask.f32 6400 }
   0x2   :  { %9038 = vmatprep.subr.bf16.mxu0 %v10263_v0  ;;  %v10266_v3 = vld [vmem:[%s14860_s1 + $0x18] sm:$0xff]   ;;  %v10271_v4 = vld [vmem:[%s14861_s0] sm:$0xff]   ;;  %v10268_v6 = vld [vmem:[%s14860_s1 + $0x28] sm:$0xff]   ;;  %vm4707_vm5 = vcmask 1044480   ;;  %vm4347_vm6 = vsmask.f32 5376 }
   0x3   :  { %9039 = vmatpush3.bf16.msra.mxu0 %v10263_v0  ;;  %9054 = vmatprep.mubr.bf16.mxu0 %v10271_v4  ;;  %v10267_v5 = vld [vmem:[%s14860_s1 + $0x20] sm:$0xff]   ;;  %v10269_v7 = vld [vmem:[%s14860_s1 + $0x30] sm:$0xff]   ;;  %v10270_v8 = vld [vmem:[%s14860_s1 + $0x38] sm:$0xff]   ;;  %vm5578_vm7 = vcmask 588800   ;;  %vm5597_vm8 = vcmask 1043456  }
   0x4   :  { %9040 = vmatprep.subr.bf16.mxu0 %v10264_v1  ;;  %v10272_v9 = vld [vmem:[%s14861_s0 + $0x8] sm:$0xff]   ;;  %v10273_v10 = vld [vmem:[%s14861_s0 + $0x10] sm:$0xff]   ;;  %v10274_v11 = vld [vmem:[%s14861_s0 + $0x18] sm:$0xff]   ;;  %vm6449_vm9 = vsmask.f32 4352 }
   0x5   :  { %v10275_v12 = vld [vmem:[%s14861_s0 + $0x20] sm:$0xff]   ;;  %v10276_v13 = vld [vmem:[%s14861_s0 + $0x28] sm:$0xff]   ;;  %v10277_v14 = vld [vmem:[%s14861_s0 + $0x30] sm:$0xff]  }
   0x6   :  { %v10278_v15 = vld [vmem:[%s14861_s0 + $0x38] sm:$0xff]   ;;  %v10279_v16 = vld [vmem:[%s14861_s0 + $0x40] sm:$0xff]   ;;  %v10280_v17 = vld [vmem:[%s14861_s0 + $0x48] sm:$0xff]  }
   0x7   :  { %9041 = vmatpush3.bf16.msra.mxu0 %v10264_v1  ;;  %v10281_v18 = vld [vmem:[%s14861_s0 + $0x50] sm:$0xff]   ;;  %v10282_v19 = vld [vmem:[%s14861_s0 + $0x58] sm:$0xff]   ;;  %v10283_v20 = vld [vmem:[%s14861_s0 + $0x60] sm:$0xff]  }
   0x8   :  { %9042 = vmatprep.subr.bf16.mxu0 %v10265_v2  ;;  %v10284_v21 = vld [vmem:[%s14861_s0 + $0x68] sm:$0xff]   ;;  %v10285_v22 = vld [vmem:[%s14861_s0 + $0x70] sm:$0xff]   ;;  %v10286_v23 = vld [vmem:[%s14861_s0 + $0x78] sm:$0xff]  }
   0x9   :  { %v10287_v24 = vld [vmem:[%s14861_s0 + $0x80] sm:$0xff]   ;;  %v10288_v25 = vld [vmem:[%s14861_s0 + $0x88] sm:$0xff]   ;;  %v10289_v26 = vld [vmem:[%s14861_s0 + $0x90] sm:$0xff]  }
   0xa   :  { %v10290_v27 = vld [vmem:[%s14861_s0 + $0x98] sm:$0xff]   ;;  %v10291_v28 = vld [vmem:[%s14861_s0 + $0xa0] sm:$0xff]   ;;  %v10292_v29 = vld [vmem:[%s14861_s0 + $0xa8] sm:$0xff]  }
   0xb   :  { %9043 = vmatpush3.bf16.msra.mxu0 %v10265_v2  ;;  %v10293_v30 = vld [vmem:[%s14861_s0 + $0xb0] sm:$0xff]   ;;  %v10294_v31 = vld [vmem:[%s14861_s0 + $0xb8] sm:$0xff]   ;;  %v10295_v32 = vld [vmem:[%s14861_s0 + $0xc0] sm:$0xff]   ;;  %v14878_v2 = vmov 0.0  }
   0xc   :  { %9044 = vmatprep.subr.bf16.mxu0 %v10266_v3  ;;  %v10296_v33 = vld [vmem:[%s14861_s0 + $0xc8] sm:$0xff]   ;;  %v10297_v34 = vld [vmem:[%s14861_s0 + $0xd0] sm:$0xff]   ;;  %v10298_v35 = vld [vmem:[%s14861_s0 + $0xd8] sm:$0xff]   ;;  %9150 = vmatprep.mubr.msk.f32.mxu1 %vm10627_vm0, %v14878_v2 }
   0xd   :  { %v10299_v36 = vld [vmem:[%s14861_s0 + $0xe0] sm:$0xff]   ;;  %v10300_v37 = vld [vmem:[%s14861_s0 + $0xe8] sm:$0xff]   ;;  %v10301_v38 = vld [vmem:[%s14861_s0 + $0xf0] sm:$0xff]  }
   0xe   :  { %v10302_v39 = vld [vmem:[%s14861_s0 + $0xf8] sm:$0xff]   ;;  %v667_v40 = vld [vmem:[%s14862_s3] sm:$0xff]  ;;  %v668_v41 = vld [vmem:[%s14862_s3 + $0x8] sm:$0xff] }
   0xf   :  { %9045 = vmatpush3.bf16.msra.mxu0 %v10266_v3  ;;  %v10174_v42 = vpack.c.bf16 %v668_v41, %v667_v40  ;;  %v669_v44 = vld [vmem:[%s14862_s3 + $0x10] sm:$0xff]  ;;  %v670_v45 = vld [vmem:[%s14862_s3 + $0x18] sm:$0xff]  ;;  %v671_v47 = vld [vmem:[%s14862_s3 + $0x20] sm:$0xff] }
  0x10   :  { %9046 = vmatprep.subr.bf16.mxu0 %v10267_v5  ;;  %v10177_v46 = vpack.c.bf16 %v670_v45, %v669_v44  ;;  %v672_v48 = vld [vmem:[%s14862_s3 + $0x28] sm:$0xff]  ;;  %v673_v50 = vld [vmem:[%s14862_s3 + $0x30] sm:$0xff]  ;;  %v674_v51 = vld [vmem:[%s14862_s3 + $0x38] sm:$0xff] }
  0x11   :  { %10175 = vmatpush3.bf16.msra.mxu1 %v10174_v42  ;;  %v10180_v49 = vpack.c.bf16 %v672_v48, %v671_v47  ;;  %v10183_v52 = vpack.c.bf16 %v674_v51, %v673_v50  ;;  %v675_v53 = vld [vmem:[%s14862_s3 + $0x40] sm:$0xff]  ;;  %v676_v54 = vld [vmem:[%s14862_s3 + $0x48] sm:$0xff]  ;;  %v677_v60 = vld [vmem:[%s14862_s3 + $0x50] sm:$0xff] }
  0x12   :  { %10176 = vmatprep.subr.bf16.mxu1 %v14876_v43  ;;  %v10186_v55 = vpack.c.bf16 %v676_v54, %v675_v53  ;;  %v10868_v57 = vld [vmem:[%s14863_s2] ss:$0 sm:$0xff]  ;;  %v678_v61 = vld [vmem:[%s14862_s3 + $0x58] sm:$0xff]  ;;  %v680_v1 = vld [vmem:[%s14862_s3 + $0x68] sm:$0xff] }
  0x13   :  { %9047 = vmatpush3.bf16.msra.mxu0 %v10267_v5  ;;  %v679_v62 = vld [vmem:[%s14862_s3 + $0x60] sm:$0xff]  ;;  %v10189_v0 = vpack.c.bf16 %v678_v61, %v677_v60 }
  0x14   :  { %9048 = vmatprep.subr.bf16.mxu0 %v10268_v6  ;;  %v10192_v5 = vpack.c.bf16 %v680_v1, %v679_v62 }
  0x15   :  { %10178 = vmatpush3.bf16.msra.mxu1 %v10177_v46 }
  0x16   :  { %10179 = vmatprep.subr.bf16.mxu1 %v14876_v43 }
  0x17   :  { %9049 = vmatpush3.bf16.msra.mxu0 %v10268_v6 }
  0x18   :  { %9050 = vmatprep.subr.bf16.mxu0 %v10269_v7 }
  0x19   :  { %10181 = vmatpush3.bf16.msra.mxu1 %v10180_v49 }
  0x1a   :  { %10182 = vmatprep.subr.bf16.mxu1 %v14876_v43 }
  0x1b   :  { %9051 = vmatpush3.bf16.msra.mxu0 %v10269_v7 }
  0x1c   :  { %9052 = vmatprep.subr.bf16.mxu0 %v10270_v8 }
  0x1d   :  { %10184 = vmatpush3.bf16.msra.mxu1 %v10183_v52 }
  0x1e   :  { %10185 = vmatprep.subr.bf16.mxu1 %v14876_v43 }
  0x1f   :  { %9053 = vmatpush3.bf16.msra.mxu0 %v10270_v8  ;;  %v681_v8 = vld [vmem:[%s14862_s3 + $0x70] sm:$0xff] }
  0x21   :  { %10187 = vmatpush3.bf16.msra.mxu1 %v10186_v55 }
  0x22   :  { %9055 = vmatmul.mubr.bf16.vlgmr.msra.gmra.mrb[0].mxu0 %v10272_v9  ;;  %10188 = vmatprep.subr.bf16.mxu1 %v14876_v43  ;;  %v682_v9 = vld [vmem:[%s14862_s3 + $0x78] sm:$0xff] }
  0x23   :  { %9058 = vmatprep.mubr.bf16.mxu0 %v10273_v10 }
  0x25   :  { %10190 = vmatpush3.bf16.msra.mxu1 %v10189_v0 }
  0x26   :  { %10191 = vmatprep.subr.bf16.mxu1 %v14876_v43 }
  0x29   :  { %10193 = vmatpush3.bf16.msra.mxu1 %v10192_v5 }
  0x2a   :  { %9059 = vmatmul.mubr.bf16.gmra.mrb[4].mxu0 %v10274_v11  ;;  %10194 = vmatprep.subr.bf16.mxu1 %v14876_v43 }
  0x2b   :  { %9062 = vmatprep.mubr.bf16.mxu0 %v10275_v12 }
  0x32   :  { %9063 = vmatmul.mubr.bf16.gmra.mrb[8].mxu0 %v10276_v13 }
  0x33   :  { %9066 = vmatprep.mubr.bf16.mxu0 %v10277_v14  ;;  %v10195_v14 = vpack.c.bf16 %v682_v9, %v681_v8 }
  0x35   :  { %10196 = vmatpush3.bf16.msra.mxu1 %v10195_v14 }
  0x3a   :  { %9067 = vmatmul.mubr.bf16.gmra.mrb[12].mxu0 %v10278_v15 }
  0x3b   :  { %9070 = vmatprep.mubr.bf16.mxu0 %v10279_v16 }
  0x42   :  { %9071 = vmatmul.mubr.bf16.gmra.mrb[16].mxu0 %v10280_v17 }
  0x43   :  { %9074 = vmatprep.mubr.bf16.mxu0 %v10281_v18 }
  0x4a   :  { %9075 = vmatmul.mubr.bf16.gmra.mrb[20].mxu0 %v10282_v19 }
  0x4b   :  { %9078 = vmatprep.mubr.bf16.mxu0 %v10283_v20 }
  0x52   :  { %9079 = vmatmul.mubr.bf16.gmra.mrb[24].mxu0 %v10284_v21 }
  0x53   :  { %9082 = vmatprep.mubr.bf16.mxu0 %v10285_v22 }
  0x5a   :  { %9083 = vmatmul.mubr.bf16.gmra.mrb[28].mxu0 %v10286_v23 }
  0x5b   :  { %9086 = vmatprep.mubr.bf16.mxu0 %v10287_v24 }
  0x62   :  { %9087 = vmatmul.mubr.bf16.gmra.mrb[32].mxu0 %v10288_v25 }
  0x63   :  { %9090 = vmatprep.mubr.bf16.mxu0 %v10289_v26 }
  0x6a   :  { %9091 = vmatmul.mubr.bf16.gmra.mrb[36].mxu0 %v10290_v27 }
  0x6b   :  { %9094 = vmatprep.mubr.bf16.mxu0 %v10291_v28 }
  0x72   :  { %9095 = vmatmul.mubr.bf16.gmra.mrb[40].mxu0 %v10292_v29 }
  0x73   :  { %9098 = vmatprep.mubr.bf16.mxu0 %v10293_v30 }
  0x7a   :  { %9099 = vmatmul.mubr.bf16.gmra.mrb[44].mxu0 %v10294_v31 }
  0x7b   :  { %9102 = vmatprep.mubr.bf16.mxu0 %v10295_v32 }
  0x82   :  { %9103 = vmatmul.mubr.bf16.gmra.mrb[48].mxu0 %v10296_v33 }
  0x83   :  { %9106 = vmatprep.mubr.bf16.mxu0 %v10297_v34 }
  0x8a   :  { %9107 = vmatmul.mubr.bf16.gmra.mrb[52].mxu0 %v10298_v35 }
  0x8b   :  { %9110 = vmatprep.mubr.bf16.mxu0 %v10299_v36 }
  0x92   :  { %9111 = vmatmul.mubr.bf16.gmra.mrb[56].mxu0 %v10300_v37 }
  0x93   :  { %9114 = vmatprep.mubr.bf16.mxu0 %v10301_v38 }
  0x9a   :  { %9115 = vmatmul.mubr.bf16.gmra.mrb[60].mxu0 %v10302_v39 }
  0xf5   :  { %v9056_v56 = vpop.f32.mrb[0].mxu0 }
  0xf6   :  { %v410_v58 = vpop.f32.mrb[1].mxu0  ;;  %v10892_v6 = vadd.f32 %v9056_v56, %v10868_v57 }
  0xf7   :  { %v9057_v59 = vpop.f32.mrb[2].mxu0  ;;  %v10886_v3 = vadd.f32 %v10868_v57, %v410_v58 }
  0xf8   :  { %v413_v63 = vpop.f32.mrb[3].mxu0  ;;  %v10904_v10 = vadd.f32 %v9057_v59, %v10868_v57 }
  0xf9   :  { %v10889_v4 = vadd.f32 %v10868_v57, %v413_v63 }
  0xfb   :  { %v683_v7 = vadd.f32 %v10889_v4, %v10886_v3 }
  0xfd   :  { %v684_v11 = vadd.f32 %v683_v7, %v10892_v6  ;;  %v9060_v12 = vpop.f32.mrb[4].mxu0 }
  0xfe   :  { %v426_v13 = vpop.f32.mrb[5].mxu0  ;;  %v10917_v21 = vadd.f32 %v9060_v12, %v10868_v57 }
  0xff   :  { %v10908_v15 = vadd.f32 %v10868_v57, %v426_v13  ;;  %v685_v16 = vadd.f32 %v684_v11, %v10904_v10  ;;  %v9061_v17 = vpop.f32.mrb[6].mxu0 }
 0x100   :  { %v429_v18 = vpop.f32.mrb[7].mxu0  ;;  %v10921_v23 = vadd.f32 %v9061_v17, %v10868_v57 }
 0x101   :  { %v686_v19 = vadd.f32 %v685_v16, %v10908_v15  ;;  %v10914_v20 = vadd.f32 %v10868_v57, %v429_v18 }
 0x103   :  { %v687_v22 = vadd.f32 %v686_v19, %v10914_v20 }
 0x105   :  { %v688_v24 = vadd.f32 %v687_v22, %v10917_v21  ;;  %v9064_v25 = vpop.f32.mrb[8].mxu0 }
 0x106   :  { %v442_v26 = vpop.f32.mrb[9].mxu0  ;;  %v10933_v33 = vadd.f32 %v9064_v25, %v10868_v57 }
 0x107   :  { %v10925_v27 = vadd.f32 %v10868_v57, %v442_v26  ;;  %v689_v28 = vadd.f32 %v688_v24, %v10921_v23  ;;  %v9065_v29 = vpop.f32.mrb[10].mxu0 }
 0x108   :  { %v445_v30 = vpop.f32.mrb[11].mxu0  ;;  %v10937_v35 = vadd.f32 %v9065_v29, %v10868_v57 }
 0x109   :  { %v690_v31 = vadd.f32 %v689_v28, %v10925_v27  ;;  %v10930_v32 = vadd.f32 %v10868_v57, %v445_v30 }
 0x10b   :  { %v691_v34 = vadd.f32 %v690_v31, %v10930_v32 }
 0x10d   :  { %v692_v36 = vadd.f32 %v691_v34, %v10933_v33  ;;  %v9068_v37 = vpop.f32.mrb[12].mxu0 }
 0x10e   :  { %v458_v38 = vpop.f32.mrb[13].mxu0  ;;  %v10949_v46 = vadd.f32 %v9068_v37, %v10868_v57 }
 0x10f   :  { %v10941_v39 = vadd.f32 %v10868_v57, %v458_v38  ;;  %v693_v40 = vadd.f32 %v692_v36, %v10937_v35  ;;  %v9069_v41 = vpop.f32.mrb[14].mxu0 }
 0x110   :  { %v461_v42 = vpop.f32.mrb[15].mxu0  ;;  %v10953_v48 = vadd.f32 %v9069_v41, %v10868_v57 }
 0x111   :  { %v694_v44 = vadd.f32 %v693_v40, %v10941_v39  ;;  %v10946_v45 = vadd.f32 %v10868_v57, %v461_v42 }
 0x113   :  { %v695_v47 = vadd.f32 %v694_v44, %v10946_v45 }
 0x115   :  { %v696_v49 = vadd.f32 %v695_v47, %v10949_v46  ;;  %v9072_v50 = vpop.f32.mrb[16].mxu0 }
 0x116   :  { %v474_v51 = vpop.f32.mrb[17].mxu0  ;;  %v10965_v59 = vadd.f32 %v9072_v50, %v10868_v57 }
 0x117   :  { %v10957_v52 = vadd.f32 %v10868_v57, %v474_v51  ;;  %v697_v53 = vadd.f32 %v696_v49, %v10953_v48  ;;  %v9073_v54 = vpop.f32.mrb[18].mxu0 }
 0x118   :  { %v477_v55 = vpop.f32.mrb[19].mxu0  ;;  %v10969_v61 = vadd.f32 %v9073_v54, %v10868_v57 }
 0x119   :  { %v698_v56 = vadd.f32 %v697_v53, %v10957_v52  ;;  %v10962_v58 = vadd.f32 %v10868_v57, %v477_v55 }
 0x11b   :  { %v699_v60 = vadd.f32 %v698_v56, %v10962_v58 }
 0x11d   :  { %v700_v62 = vadd.f32 %v699_v60, %v10965_v59  ;;  %v9076_v63 = vpop.f32.mrb[20].mxu0 }
 0x11e   :  { %v490_v0 = vpop.f32.mrb[21].mxu0  ;;  %v10981_v12 = vadd.f32 %v9076_v63, %v10868_v57 }
 0x11f   :  { %v10973_v1 = vadd.f32 %v10868_v57, %v490_v0  ;;  %v701_v5 = vadd.f32 %v700_v62, %v10969_v61  ;;  %v9077_v7 = vpop.f32.mrb[22].mxu0 }
 0x120   :  { %v493_v8 = vpop.f32.mrb[23].mxu0  ;;  %v10985_v14 = vadd.f32 %v9077_v7, %v10868_v57 }
 0x121   :  { %v702_v9 = vadd.f32 %v701_v5, %v10973_v1  ;;  %v10978_v11 = vadd.f32 %v10868_v57, %v493_v8 }
 0x123   :  { %v703_v13 = vadd.f32 %v702_v9, %v10978_v11 }
 0x125   :  { %v704_v16 = vadd.f32 %v703_v13, %v10981_v12  ;;  %v9080_v17 = vpop.f32.mrb[24].mxu0 }
 0x126   :  { %v506_v18 = vpop.f32.mrb[25].mxu0  ;;  %v10997_v29 = vadd.f32 %v9080_v17, %v10868_v57 }
 0x127   :  { %v10989_v19 = vadd.f32 %v10868_v57, %v506_v18  ;;  %v705_v22 = vadd.f32 %v704_v16, %v10985_v14  ;;  %v9081_v24 = vpop.f32.mrb[26].mxu0 }
 0x128   :  { %v509_v25 = vpop.f32.mrb[27].mxu0  ;;  %v11001_v31 = vadd.f32 %v9081_v24, %v10868_v57 }
 0x129   :  { %v706_v26 = vadd.f32 %v705_v22, %v10989_v19  ;;  %v10994_v28 = vadd.f32 %v10868_v57, %v509_v25 }
 0x12b   :  { %v707_v30 = vadd.f32 %v706_v26, %v10994_v28 }
 0x12d   :  { %v708_v34 = vadd.f32 %v707_v30, %v10997_v29  ;;  %v9084_v36 = vpop.f32.mrb[28].mxu0 }
 0x12e   :  { %v522_v37 = vpop.f32.mrb[29].mxu0  ;;  %v11013_v49 = vadd.f32 %v9084_v36, %v10868_v57 }
 0x12f   :  { %v11005_v38 = vadd.f32 %v10868_v57, %v522_v37  ;;  %v709_v40 = vadd.f32 %v708_v34, %v11001_v31  ;;  %v9085_v41 = vpop.f32.mrb[30].mxu0 }
 0x130   :  { %v525_v42 = vpop.f32.mrb[31].mxu0  ;;  %v11017_v51 = vadd.f32 %v9085_v41, %v10868_v57 }
 0x131   :  { %v710_v44 = vadd.f32 %v709_v40, %v11005_v38  ;;  %v11010_v47 = vadd.f32 %v10868_v57, %v525_v42 }
 0x133   :  { %v711_v50 = vadd.f32 %v710_v44, %v11010_v47 }
 0x135   :  { %v712_v53 = vadd.f32 %v711_v50, %v11013_v49  ;;  %v9088_v54 = vpop.f32.mrb[32].mxu0 }
 0x136   :  { %v538_v55 = vpop.f32.mrb[33].mxu0  ;;  %v11029_v7 = vadd.f32 %v9088_v54, %v10868_v57 }
 0x137   :  { %v11021_v56 = vadd.f32 %v10868_v57, %v538_v55  ;;  %v713_v60 = vadd.f32 %v712_v53, %v11017_v51  ;;  %v9089_v62 = vpop.f32.mrb[34].mxu0 }
 0x138   :  { %v541_v63 = vpop.f32.mrb[35].mxu0  ;;  %v11033_v9 = vadd.f32 %v9089_v62, %v10868_v57 }
 0x139   :  { %v714_v0 = vadd.f32 %v713_v60, %v11021_v56  ;;  %v11026_v5 = vadd.f32 %v10868_v57, %v541_v63 }
 0x13b   :  { %v715_v8 = vadd.f32 %v714_v0, %v11026_v5 }
 0x13d   :  { %v716_v13 = vadd.f32 %v715_v8, %v11029_v7  ;;  %v9092_v16 = vpop.f32.mrb[36].mxu0 }
 0x13e   :  { %v554_v17 = vpop.f32.mrb[37].mxu0  ;;  %v11045_v34 = vadd.f32 %v9092_v16, %v10868_v57 }
 0x13f   :  { %v11037_v18 = vadd.f32 %v10868_v57, %v554_v17  ;;  %v717_v22 = vadd.f32 %v716_v13, %v11033_v9  ;;  %v9093_v24 = vpop.f32.mrb[38].mxu0 }
 0x140   :  { %v557_v25 = vpop.f32.mrb[39].mxu0  ;;  %v11049_v37 = vadd.f32 %v9093_v24, %v10868_v57 }
 0x141   :  { %v718_v26 = vadd.f32 %v717_v22, %v11037_v18  ;;  %v11042_v30 = vadd.f32 %v10868_v57, %v557_v25 }
 0x143   :  { %v719_v36 = vadd.f32 %v718_v26, %v11042_v30 }
 0x145   :  { %v720_v40 = vadd.f32 %v719_v36, %v11045_v34  ;;  %v9096_v41 = vpop.f32.mrb[40].mxu0 }
 0x146   :  { %v570_v42 = vpop.f32.mrb[41].mxu0  ;;  %v11061_v62 = vadd.f32 %v9096_v41, %v10868_v57 }
 0x147   :  { %v11053_v44 = vadd.f32 %v10868_v57, %v570_v42  ;;  %v721_v50 = vadd.f32 %v720_v40, %v11049_v37  ;;  %v9097_v53 = vpop.f32.mrb[42].mxu0 }
 0x148   :  { %v573_v54 = vpop.f32.mrb[43].mxu0  ;;  %v11065_v0 = vadd.f32 %v9097_v53, %v10868_v57 }
 0x149   :  { %v722_v55 = vadd.f32 %v721_v50, %v11053_v44  ;;  %v11058_v60 = vadd.f32 %v10868_v57, %v573_v54 }
 0x14b   :  { %v723_v63 = vadd.f32 %v722_v55, %v11058_v60 }
 0x14d   :  { %v724_v8 = vadd.f32 %v723_v63, %v11061_v62  ;;  %v9100_v13 = vpop.f32.mrb[44].mxu0 }
 0x14e   :  { %v586_v16 = vpop.f32.mrb[45].mxu0  ;;  %v11077_v40 = vadd.f32 %v9100_v13, %v10868_v57 }
 0x14f   :  { %v11069_v17 = vadd.f32 %v10868_v57, %v586_v16  ;;  %v725_v22 = vadd.f32 %v724_v8, %v11065_v0  ;;  %v9101_v24 = vpop.f32.mrb[46].mxu0 }
 0x150   :  { %v589_v25 = vpop.f32.mrb[47].mxu0  ;;  %14934 = vst [vmem:[#allocation6_spill] sm:$0xff] %v11077_v40  ;;  %v11081_v42 = vadd.f32 %v9101_v24, %v10868_v57 }
 0x151   :  { %14932 = vst [vmem:[#allocation4_spill] sm:$0xff] %v11069_v17  ;;  %v726_v26 = vadd.f32 %v725_v22, %v11069_v17  ;;  %v11074_v36 = vadd.f32 %v10868_v57, %v589_v25 }
 0x152   :  { %14935 = vst [vmem:[#allocation7_spill] sm:$0xff] %v11081_v42 }
 0x153   :  { %14933 = vst [vmem:[#allocation5_spill] sm:$0xff] %v11074_v36  ;;  %v727_v41 = vadd.f32 %v726_v26, %v11074_v36 }
 0x155   :  { %v728_v50 = vadd.f32 %v727_v41, %v11077_v40  ;;  %v9104_v53 = vpop.f32.mrb[48].mxu0 }
 0x156   :  { %v602_v54 = vpop.f32.mrb[49].mxu0  ;;  %v11093_v25 = vadd.f32 %v9104_v53, %v10868_v57 }
 0x157   :  { %v11085_v55 = vadd.f32 %v10868_v57, %v602_v54  ;;  %v729_v63 = vadd.f32 %v728_v50, %v11081_v42  ;;  %v9105_v8 = vpop.f32.mrb[50].mxu0 }
 0x158   :  { %v605_v16 = vpop.f32.mrb[51].mxu0  ;;  %14938 = vst [vmem:[#allocation10_spill] sm:$0xff] %v11093_v25  ;;  %v11097_v26 = vadd.f32 %v9105_v8, %v10868_v57 }
 0x159   :  { %14936 = vst [vmem:[#allocation8_spill] sm:$0xff] %v11085_v55  ;;  %v730_v22 = vadd.f32 %v729_v63, %v11085_v55  ;;  %v11090_v13 = vadd.f32 %v10868_v57, %v605_v16 }
 0x15a   :  { %14939 = vst [vmem:[#allocation11_spill] sm:$0xff] %v11097_v26 }
 0x15b   :  { %14937 = vst [vmem:[#allocation9_spill] sm:$0xff] %v11090_v13  ;;  %v731_v24 = vadd.f32 %v730_v22, %v11090_v13 }
 0x15d   :  { %v732_v41 = vadd.f32 %v731_v24, %v11093_v25  ;;  %v9108_v54 = vpop.f32.mrb[52].mxu0 }
 0x15e   :  { %v618_v43 = vpop.f32.mrb[53].mxu0  ;;  %v11109_v22 = vadd.f32 %v9108_v54, %v10868_v57 }
 0x15f   :  { %v11101_v50 = vadd.f32 %v10868_v57, %v618_v43  ;;  %v733_v63 = vadd.f32 %v732_v41, %v11097_v26  ;;  %v9109_v2 = vpop.f32.mrb[54].mxu0 }
 0x160   :  { %v621_v16 = vpop.f32.mrb[55].mxu0  ;;  %14942 = vst [vmem:[#allocation14_spill] sm:$0xff] %v11109_v22  ;;  %v11113_v24 = vadd.f32 %v9109_v2, %v10868_v57 }
 0x161   :  { %14940 = vst [vmem:[#allocation12_spill] sm:$0xff] %v11101_v50  ;;  %v734_v55 = vadd.f32 %v733_v63, %v11101_v50  ;;  %v11106_v53 = vadd.f32 %v10868_v57, %v621_v16 }
 0x162   :  { %14943 = vst [vmem:[#allocation15_spill] sm:$0xff] %v11113_v24 }
 0x163   :  { %14941 = vst [vmem:[#allocation13_spill] sm:$0xff] %v11106_v53  ;;  %v735_v8 = vadd.f32 %v734_v55, %v11106_v53 }
 0x165   :  { %v736_v43 = vadd.f32 %v735_v8, %v11109_v22  ;;  %v9112_v25 = vpop.f32.mrb[56].mxu0 }
 0x166   :  { %v634_v13 = vpop.f32.mrb[57].mxu0  ;;  %v11125_v55 = vadd.f32 %v9112_v25, %v10868_v57 }
 0x167   :  { %v11117_v41 = vadd.f32 %v10868_v57, %v634_v13  ;;  %v737_v63 = vadd.f32 %v736_v43, %v11113_v24  ;;  %v9113_v50 = vpop.f32.mrb[58].mxu0 }
 0x168   :  { %v637_v16 = vpop.f32.mrb[59].mxu0  ;;  %14946 = vst [vmem:[#allocation18_spill] sm:$0xff] %v11125_v55  ;;  %v11129_v8 = vadd.f32 %v9113_v50, %v10868_v57 }
 0x169   :  { %14944 = vst [vmem:[#allocation16_spill] sm:$0xff] %v11117_v41  ;;  %v738_v26 = vadd.f32 %v737_v63, %v11117_v41  ;;  %v11122_v54 = vadd.f32 %v10868_v57, %v637_v16 }
 0x16a   :  { %14947 = vst [vmem:[#allocation19_spill] sm:$0xff] %v11129_v8 }
 0x16b   :  { %14945 = vst [vmem:[#allocation17_spill] sm:$0xff] %v11122_v54  ;;  %v739_v2 = vadd.f32 %v738_v26, %v11122_v54 }
 0x16d   :  { %v740_v13 = vadd.f32 %v739_v2, %v11125_v55  ;;  %v9116_v22 = vpop.f32.mrb[60].mxu0 }
 0x16e   :  { %v650_v53 = vpop.f32.mrb[61].mxu0  ;;  %v11141_v26 = vadd.f32 %v9116_v22, %v10868_v57  ;;  %v822_v22 = vlaneseq }
 0x16f   :  { %v11133_v43 = vadd.f32 %v10868_v57, %v650_v53  ;;  %v741_v63 = vadd.f32 %v740_v13, %v11129_v8  ;;  %v9117_v41 = vpop.f32.mrb[62].mxu0 }
 0x170   :  { %v653_v16 = vpop.f32.mrb[63].mxu0  ;;  %v11145_v2 = vadd.f32 %v9117_v41, %v10868_v57  ;;  %v823_v36 = vshrl.u32 %v822_v22, 7 }
 0x171   :  { %14948 = vst [vmem:[#allocation20_spill] sm:$0xff] %v11133_v43  ;;  %v742_v24 = vadd.f32 %v741_v63, %v11133_v43  ;;  %v11138_v25 = vadd.f32 %v10868_v57, %v653_v16 }
 0x172   :  { %v11149_v17 = vsub.s32 0, %v823_v36 }
 0x173   :  { %v743_v50 = vadd.f32 %v742_v24, %v11138_v25 }
 0x174   :  { %14949 = vst [vmem:[#allocation21_spill] sm:$0xff] %v11149_v17 }
 0x175   :  { %v744_v53 = vadd.f32 %v743_v50, %v11141_v26 }
 0x177   :  { %v745_v55 = vadd.f32 %v744_v53, %v11145_v2 }
 0x179   :  { %v746_v13 = vrot.slane %v745_v55, 4 }
 0x17b   :  { %v747_v8 = vadd.f32 %v746_v13, %v745_v55 }
 0x17d   :  { %v748_v54 = vrot.slane %v747_v8, 2 }
 0x17f   :  { %v749_v42 = vadd.f32 %v748_v54, %v747_v8 }
 0x181   :  { %v750_v63 = vrot.slane %v749_v42, 1 }
 0x183   :  { %v751_v43 = vadd.f32 %v750_v63, %v749_v42 }
 0x185   :  { %9151 = vmatmul.mubr.f32.vlgmr.msra.gmra.mrb[0].mxu1 %v751_v43 }
 0x258   :  { %v818_v16 = vpop.f32.mrb[0].mxu1 }
 0x259   :  { %v9152_v40 = vpop.f32.mrb[1].mxu1  ;;  %v11152_v57 = vrot.slane %v818_v16, %v11149_v17 }
 0x25b   :  { %v11156_v24 = vsub.f32 %v10886_v3, %v11152_v57  ;;  %v11160_v41 = vsub.f32 %v10889_v4, %v11152_v57  ;;  %v11164_v42 = vsub.f32 %v10892_v6, %v11152_v57  ;;  %v11172_v54 = vsub.f32 %v10904_v10, %v11152_v57 }
 0x25c   :  { %v11176_v3 = vsub.f32 %v10908_v15, %v11152_v57  ;;  %v11182_v6 = vsub.f32 %v10914_v20, %v11152_v57  ;;  %v11188_v10 = vsub.f32 %v10917_v21, %v11152_v57  ;;  %v11194_v53 = vsub.f32 %v10921_v23, %v11152_v57 }
 0x25d   :  { %v890_v40 = vmul.f32 %v11156_v24, %v11156_v24  ;;  %v891_v36 = vmul.f32 %v11160_v41, %v11160_v41  ;;  %v892_v4 = vmul.f32 %v11164_v42, %v11164_v42  ;;  %v893_v8 = vmul.f32 %v11172_v54, %v11172_v54 }
 0x25e   :  { %v894_v15 = vmul.f32 %v11176_v3, %v11176_v3  ;;  %v895_v20 = vmul.f32 %v11182_v6, %v11182_v6  ;;  %v11200_v63 = vsub.f32 %v10925_v27, %v11152_v57  ;;  %v896_v21 = vmul.f32 %v11188_v10, %v11188_v10 }
 0x25f   :  { %v954_v55 = vadd.f32 %v891_v36, %v890_v40  ;;  %v11206_v22 = vsub.f32 %v10930_v32, %v11152_v57  ;;  %v897_v23 = vmul.f32 %v11194_v53, %v11194_v53  ;;  %v11212_v36 = vsub.f32 %v10933_v33, %v11152_v57 }
 0x260   :  { %v898_v27 = vmul.f32 %v11200_v63, %v11200_v63 }
 0x261   :  { %v955_v43 = vadd.f32 %v954_v55, %v892_v4  ;;  %v11218_v55 = vsub.f32 %v10937_v35, %v11152_v57  ;;  %v899_v32 = vmul.f32 %v11206_v22, %v11206_v22  ;;  %v900_v33 = vmul.f32 %v11212_v36, %v11212_v36 }
 0x263   :  { %v956_v50 = vadd.f32 %v955_v43, %v893_v8  ;;  %v11224_v43 = vsub.f32 %v10941_v39, %v11152_v57  ;;  %v901_v35 = vmul.f32 %v11218_v55, %v11218_v55 }
 0x265   :  { %v957_v13 = vadd.f32 %v956_v50, %v894_v15  ;;  %v11230_v50 = vsub.f32 %v10946_v45, %v11152_v57  ;;  %v902_v39 = vmul.f32 %v11224_v43, %v11224_v43 }
 0x267   :  { %v958_v16 = vadd.f32 %v957_v13, %v895_v20  ;;  %v11236_v13 = vsub.f32 %v10949_v46, %v11152_v57  ;;  %v903_v45 = vmul.f32 %v11230_v50, %v11230_v50 }
 0x269   :  { %v959_v40 = vadd.f32 %v958_v16, %v896_v21  ;;  %v11242_v16 = vsub.f32 %v10953_v48, %v11152_v57  ;;  %v904_v46 = vmul.f32 %v11236_v13, %v11236_v13 }
 0x26b   :  { %v960_v4 = vadd.f32 %v959_v40, %v897_v23  ;;  %v11248_v40 = vsub.f32 %v10957_v52, %v11152_v57  ;;  %v905_v48 = vmul.f32 %v11242_v16, %v11242_v16 }
 0x26d   :  { %v961_v8 = vadd.f32 %v960_v4, %v898_v27  ;;  %v11254_v4 = vsub.f32 %v10962_v58, %v11152_v57  ;;  %v906_v52 = vmul.f32 %v11248_v40, %v11248_v40 }
 0x26f   :  { %v962_v15 = vadd.f32 %v961_v8, %v899_v32  ;;  %v11260_v8 = vsub.f32 %v10965_v59, %v11152_v57  ;;  %v907_v58 = vmul.f32 %v11254_v4, %v11254_v4 }
 0x271   :  { %v963_v20 = vadd.f32 %v962_v15, %v900_v33  ;;  %v11266_v15 = vsub.f32 %v10969_v61, %v11152_v57  ;;  %v908_v59 = vmul.f32 %v11260_v8, %v11260_v8 }
 0x273   :  { %v964_v21 = vadd.f32 %v963_v20, %v901_v35  ;;  %v11272_v20 = vsub.f32 %v10973_v1, %v11152_v57  ;;  %v909_v61 = vmul.f32 %v11266_v15, %v11266_v15 }
 0x275   :  { %v965_v23 = vadd.f32 %v964_v21, %v902_v39  ;;  %v11278_v21 = vsub.f32 %v10978_v11, %v11152_v57  ;;  %v910_v1 = vmul.f32 %v11272_v20, %v11272_v20 }
 0x277   :  { %v966_v27 = vadd.f32 %v965_v23, %v903_v45  ;;  %v11284_v23 = vsub.f32 %v10981_v12, %v11152_v57  ;;  %v911_v11 = vmul.f32 %v11278_v21, %v11278_v21 }
 0x279   :  { %v967_v32 = vadd.f32 %v966_v27, %v904_v46  ;;  %v11290_v27 = vsub.f32 %v10985_v14, %v11152_v57  ;;  %v912_v12 = vmul.f32 %v11284_v23, %v11284_v23 }
 0x27b   :  { %v968_v33 = vadd.f32 %v967_v32, %v905_v48  ;;  %v11296_v32 = vsub.f32 %v10989_v19, %v11152_v57  ;;  %v913_v14 = vmul.f32 %v11290_v27, %v11290_v27 }
 0x27d   :  { %v969_v35 = vadd.f32 %v968_v33, %v906_v52  ;;  %v11302_v33 = vsub.f32 %v10994_v28, %v11152_v57  ;;  %v914_v19 = vmul.f32 %v11296_v32, %v11296_v32 }
 0x27f   :  { %v970_v39 = vadd.f32 %v969_v35, %v907_v58  ;;  %v11308_v35 = vsub.f32 %v10997_v29, %v11152_v57  ;;  %v915_v28 = vmul.f32 %v11302_v33, %v11302_v33 }
 0x281   :  { %v971_v45 = vadd.f32 %v970_v39, %v908_v59  ;;  %v11314_v39 = vsub.f32 %v11001_v31, %v11152_v57  ;;  %v916_v29 = vmul.f32 %v11308_v35, %v11308_v35 }
 0x283   :  { %v972_v46 = vadd.f32 %v971_v45, %v909_v61  ;;  %v11320_v45 = vsub.f32 %v11005_v38, %v11152_v57  ;;  %v917_v31 = vmul.f32 %v11314_v39, %v11314_v39 }
 0x285   :  { %v973_v48 = vadd.f32 %v972_v46, %v910_v1  ;;  %v11326_v46 = vsub.f32 %v11010_v47, %v11152_v57  ;;  %v918_v38 = vmul.f32 %v11320_v45, %v11320_v45 }
 0x287   :  { %v974_v52 = vadd.f32 %v973_v48, %v911_v11  ;;  %v11332_v48 = vsub.f32 %v11013_v49, %v11152_v57  ;;  %v919_v47 = vmul.f32 %v11326_v46, %v11326_v46 }
 0x289   :  { %v975_v58 = vadd.f32 %v974_v52, %v912_v12  ;;  %v11338_v52 = vsub.f32 %v11017_v51, %v11152_v57  ;;  %v920_v49 = vmul.f32 %v11332_v48, %v11332_v48 }
 0x28b   :  { %v976_v59 = vadd.f32 %v975_v58, %v913_v14  ;;  %v11344_v58 = vsub.f32 %v11021_v56, %v11152_v57  ;;  %v921_v51 = vmul.f32 %v11338_v52, %v11338_v52 }
 0x28d   :  { %v977_v61 = vadd.f32 %v976_v59, %v914_v19  ;;  %v11350_v59 = vsub.f32 %v11026_v5, %v11152_v57  ;;  %v922_v56 = vmul.f32 %v11344_v58, %v11344_v58 }
 0x28f   :  { %v978_v1 = vadd.f32 %v977_v61, %v915_v28  ;;  %v11356_v61 = vsub.f32 %v11029_v7, %v11152_v57  ;;  %v923_v5 = vmul.f32 %v11350_v59, %v11350_v59 }
 0x291   :  { %v979_v11 = vadd.f32 %v978_v1, %v916_v29  ;;  %v11362_v1 = vsub.f32 %v11033_v9, %v11152_v57  ;;  %v924_v7 = vmul.f32 %v11356_v61, %v11356_v61 }
 0x293   :  { %v980_v12 = vadd.f32 %v979_v11, %v917_v31  ;;  %v11368_v11 = vsub.f32 %v11037_v18, %v11152_v57  ;;  %v925_v9 = vmul.f32 %v11362_v1, %v11362_v1 }
 0x295   :  { %v981_v14 = vadd.f32 %v980_v12, %v918_v38  ;;  %v11374_v12 = vsub.f32 %v11042_v30, %v11152_v57  ;;  %v926_v18 = vmul.f32 %v11368_v11, %v11368_v11 }
 0x297   :  { %v982_v19 = vadd.f32 %v981_v14, %v919_v47  ;;  %v11380_v14 = vsub.f32 %v11045_v34, %v11152_v57  ;;  %v927_v30 = vmul.f32 %v11374_v12, %v11374_v12 }
 0x299   :  { %v983_v28 = vadd.f32 %v982_v19, %v920_v49  ;;  %v11386_v19 = vsub.f32 %v11049_v37, %v11152_v57  ;;  %v928_v34 = vmul.f32 %v11380_v14, %v11380_v14 }
 0x29b   :  { %v984_v29 = vadd.f32 %v983_v28, %v921_v51  ;;  %v11392_v28 = vsub.f32 %v11053_v44, %v11152_v57  ;;  %v929_v37 = vmul.f32 %v11386_v19, %v11386_v19 }
 0x29d   :  { %v985_v31 = vadd.f32 %v984_v29, %v922_v56  ;;  %v11398_v29 = vsub.f32 %v11058_v60, %v11152_v57  ;;  %v930_v44 = vmul.f32 %v11392_v28, %v11392_v28 }
 0x29f   :  { %v986_v38 = vadd.f32 %v985_v31, %v923_v5  ;;  %v11404_v31 = vsub.f32 %v11061_v62, %v11152_v57  ;;  %v931_v60 = vmul.f32 %v11398_v29, %v11398_v29 }
 0x2a1   :  { %v987_v47 = vadd.f32 %v986_v38, %v924_v7  ;;  %v11410_v38 = vsub.f32 %v11065_v0, %v11152_v57  ;;  %v932_v62 = vmul.f32 %v11404_v31, %v11404_v31 }
 0x2a3   :  { %v988_v49 = vadd.f32 %v987_v47, %v925_v9  ;;  %v14950_v47 = vld [vmem:[#allocation4_spill] sm:$0xff]  ;;  %v933_v0 = vmul.f32 %v11410_v38, %v11410_v38 }
 0x2a5   :  { %v989_v51 = vadd.f32 %v988_v49, %v926_v18  ;;  %v11416_v18 = vsub.f32 %v14950_v47, %v11152_v57 }
 0x2a7   :  { %v990_v56 = vadd.f32 %v989_v51, %v927_v30  ;;  %14951 = vst [vmem:[#allocation4_spill] sm:$0xff] %v11416_v18  ;;  %v14952_v30 = vld [vmem:[#allocation5_spill] sm:$0xff] }
 0x2a8   :  { %v11422_v51 = vsub.f32 %v14952_v30, %v11152_v57  ;;  %v14958_v30 = vld [vmem:[#allocation8_spill] sm:$0xff] }
 0x2a9   :  { %v991_v5 = vadd.f32 %v990_v56, %v928_v34  ;;  %v14954_v56 = vld [vmem:[#allocation6_spill] sm:$0xff]  ;;  %v11440_v17 = vsub.f32 %v14958_v30, %v11152_v57  ;;  %v14964_v30 = vld [vmem:[#allocation11_spill] sm:$0xff] }
 0x2aa   :  { %14953 = vst [vmem:[#allocation5_spill] sm:$0xff] %v11422_v51 }
 0x2ab   :  { %v992_v7 = vadd.f32 %v991_v5, %v929_v37  ;;  %v11428_v37 = vsub.f32 %v14954_v56, %v11152_v57  ;;  %v934_v5 = vmul.f32 %v11416_v18, %v11416_v18  ;;  %14959 = vst [vmem:[#allocation8_spill] sm:$0xff] %v11440_v17  ;;  %v14960_v56 = vld [vmem:[#allocation9_spill] sm:$0xff] }
 0x2ac   :  { %v11446_v18 = vsub.f32 %v14960_v56, %v11152_v57  ;;  %v14966_v56 = vld [vmem:[#allocation12_spill] sm:$0xff] }
 0x2ad   :  { %v993_v9 = vadd.f32 %v992_v7, %v930_v44  ;;  %14955 = vst [vmem:[#allocation6_spill] sm:$0xff] %v11428_v37  ;;  %v14956_v7 = vld [vmem:[#allocation7_spill] sm:$0xff] }
 0x2ae   :  { %v11434_v47 = vsub.f32 %v14956_v7, %v11152_v57  ;;  %14961 = vst [vmem:[#allocation9_spill] sm:$0xff] %v11446_v18  ;;  %v14962_v7 = vld [vmem:[#allocation10_spill] sm:$0xff] }
 0x2af   :  { %v994_v49 = vadd.f32 %v993_v9, %v931_v60  ;;  %v935_v60 = vmul.f32 %v11422_v51, %v11422_v51  ;;  %v11452_v51 = vsub.f32 %v14962_v7, %v11152_v57  ;;  %v14968_v7 = vld [vmem:[#allocation13_spill] sm:$0xff] }
 0x2b0   :  { %14957 = vst [vmem:[#allocation7_spill] sm:$0xff] %v11434_v47 }
 0x2b1   :  { %v995_v34 = vadd.f32 %v994_v49, %v932_v62  ;;  %v936_v62 = vmul.f32 %v11428_v37, %v11428_v37  ;;  %14963 = vst [vmem:[#allocation10_spill] sm:$0xff] %v11452_v51  ;;  %v11458_v37 = vsub.f32 %v14964_v30, %v11152_v57  ;;  %v14970_v30 = vld [vmem:[#allocation14_spill] sm:$0xff] }
 0x2b3   :  { %v996_v44 = vadd.f32 %v995_v34, %v933_v0  ;;  %v937_v0 = vmul.f32 %v11434_v47, %v11434_v47  ;;  %14965 = vst [vmem:[#allocation11_spill] sm:$0xff] %v11458_v37  ;;  %v11464_v47 = vsub.f32 %v14966_v56, %v11152_v57  ;;  %v14972_v56 = vld [vmem:[#allocation15_spill] sm:$0xff] }
 0x2b5   :  { %v997_v9 = vadd.f32 %v996_v44, %v934_v5  ;;  %v938_v5 = vmul.f32 %v11440_v17, %v11440_v17  ;;  %14967 = vst [vmem:[#allocation12_spill] sm:$0xff] %v11464_v47  ;;  %v11470_v17 = vsub.f32 %v14968_v7, %v11152_v57  ;;  %v14974_v7 = vld [vmem:[#allocation16_spill] sm:$0xff] }
 0x2b7   :  { %v998_v49 = vadd.f32 %v997_v9, %v935_v60  ;;  %v939_v60 = vmul.f32 %v11446_v18, %v11446_v18  ;;  %14969 = vst [vmem:[#allocation13_spill] sm:$0xff] %v11470_v17  ;;  %v11476_v18 = vsub.f32 %v14970_v30, %v11152_v57  ;;  %v14975_v30 = vld [vmem:[#allocation17_spill] sm:$0xff] }
 0x2b9   :  { %v999_v34 = vadd.f32 %v998_v49, %v936_v62  ;;  %v940_v62 = vmul.f32 %v11452_v51, %v11452_v51  ;;  %14971 = vst [vmem:[#allocation14_spill] sm:$0xff] %v11476_v18  ;;  %v11482_v51 = vsub.f32 %v14972_v56, %v11152_v57  ;;  %v14977_v56 = vld [vmem:[#allocation18_spill] sm:$0xff] }
 0x2bb   :  { %v1000_v44 = vadd.f32 %v999_v34, %v937_v0  ;;  %v941_v0 = vmul.f32 %v11458_v37, %v11458_v37  ;;  %14973 = vst [vmem:[#allocation15_spill] sm:$0xff] %v11482_v51  ;;  %v11488_v37 = vsub.f32 %v14974_v7, %v11152_v57  ;;  %v14979_v7 = vld [vmem:[#allocation19_spill] sm:$0xff] }
 0x2bd   :  { %v1001_v9 = vadd.f32 %v1000_v44, %v938_v5  ;;  %v942_v5 = vmul.f32 %v11464_v47, %v11464_v47  ;;  %v11494_v47 = vsub.f32 %v14975_v30, %v11152_v57  ;;  %v14981_v30 = vld [vmem:[#allocation20_spill] sm:$0xff] }
 0x2bf   :  { %v1002_v49 = vadd.f32 %v1001_v9, %v939_v60  ;;  %v943_v60 = vmul.f32 %v11470_v17, %v11470_v17  ;;  %14976 = vst [vmem:[#allocation16_spill] sm:$0xff] %v11494_v47  ;;  %v11500_v17 = vsub.f32 %v14977_v56, %v11152_v57  ;;  %v11518_v56 = vsub.f32 %v11138_v25, %v11152_v57 }
 0x2c1   :  { %v1003_v34 = vadd.f32 %v1002_v49, %v940_v62  ;;  %v944_v62 = vmul.f32 %v11476_v18, %v11476_v18  ;;  %14978 = vst [vmem:[#allocation17_spill] sm:$0xff] %v11500_v17  ;;  %v11506_v18 = vsub.f32 %v14979_v7, %v11152_v57  ;;  %v11524_v7 = vsub.f32 %v11141_v26, %v11152_v57 }
 0x2c2   :  { %v951_v25 = vmul.f32 %v11518_v56, %v11518_v56 }
 0x2c3   :  { %v1004_v44 = vadd.f32 %v1003_v34, %v941_v0  ;;  %v945_v0 = vmul.f32 %v11482_v51, %v11482_v51  ;;  %14980 = vst [vmem:[#allocation18_spill] sm:$0xff] %v11506_v18  ;;  %v11512_v51 = vsub.f32 %v14981_v30, %v11152_v57  ;;  %v11530_v30 = vsub.f32 %v11145_v2, %v11152_v57 }
 0x2c5   :  { %v1005_v9 = vadd.f32 %v1004_v44, %v942_v5  ;;  %v946_v5 = vmul.f32 %v11488_v37, %v11488_v37  ;;  %14982 = vst [vmem:[#allocation19_spill] sm:$0xff] %v11512_v51  ;;  %v953_v26 = vmul.f32 %v11530_v30, %v11530_v30 }
 0x2c7   :  { %v1006_v49 = vadd.f32 %v1005_v9, %v943_v60  ;;  %v947_v60 = vmul.f32 %v11494_v47, %v11494_v47 }
 0x2c9   :  { %v1007_v34 = vadd.f32 %v1006_v49, %v944_v62  ;;  %v948_v62 = vmul.f32 %v11500_v17, %v11500_v17 }
 0x2cb   :  { %v1008_v44 = vadd.f32 %v1007_v34, %v945_v0  ;;  %v949_v0 = vmul.f32 %v11506_v18, %v11506_v18 }
 0x2cd   :  { %v1009_v9 = vadd.f32 %v1008_v44, %v946_v5  ;;  %v950_v5 = vmul.f32 %v11512_v51, %v11512_v51 }
 0x2cf   :  { %v1010_v49 = vadd.f32 %v1009_v9, %v947_v60  ;;  %v952_v9 = vmul.f32 %v11524_v7, %v11524_v7 }
 0x2d1   :  { %v1011_v34 = vadd.f32 %v1010_v49, %v948_v62 }
 0x2d3   :  { %v1012_v44 = vadd.f32 %v1011_v34, %v949_v0 }
 0x2d5   :  { %v1013_v60 = vadd.f32 %v1012_v44, %v950_v5 }
 0x2d7   :  { %v1014_v62 = vadd.f32 %v1013_v60, %v951_v25  ;;  %v10305_v25 = vld [vmem:[%s14864_s4 + $0x4] ss:$16 sps:$4 sm:$0xff]  }
 0x2d8   :  { %1696 = vmatprep.mubr.bf16.mxu1 %v10305_v25  ;;  %v14996_v25 = vld [vmem:[#allocation10_spill] sm:$0xff] }
 0x2d9   :  { %v1015_v49 = vadd.f32 %v1014_v62, %v952_v9 }
 0x2db   :  { %v1016_v18 = vadd.f32 %v1015_v49, %v953_v26 }
 0x2dd   :  { %1017 = vadd.xlane.f32.xlu0 %v1016_v18  ;;  %v10308_v18 = vld [vmem:[%s14864_s4 + $0xc] ss:$16 sps:$4 sm:$0xff]  }
 0x2de   :  { %1841 = vmatprep.mubr.bf16.mxu0 %v10308_v18  ;;  %v14997_v18 = vld [vmem:[#allocation11_spill] sm:$0xff] }
 0x36a   :  { %v1018_v51 = vpop.xlane.xlu0 %1017 }
 0x36b   :  { %v1019_v0 = vrot.slane %v1018_v51, 4 }
 0x36d   :  { %v1020_v34 = vadd.f32 %v1019_v0, %v1018_v51  ;;  %v14990_v0 = vld [vmem:[#allocation4_spill] sm:$0xff] }
 0x36f   :  { %v1021_v17 = vrot.slane %v1020_v34, 2 }
 0x371   :  { %v1022_v2 = vadd.f32 %v1021_v17, %v1020_v34  ;;  %v14991_v34 = vld [vmem:[#allocation5_spill] sm:$0xff] }
 0x373   :  { %v1023_v57 = vrot.slane %v1022_v2, 1 }
 0x375   :  { %v1024_v47 = vadd.f32 %v1023_v57, %v1022_v2  ;;  %v14992_v2 = vld [vmem:[#allocation6_spill] sm:$0xff]  ;;  %v14993_v57 = vld [vmem:[#allocation7_spill] sm:$0xff] }
 0x377   :  { %10245 = vpush %v1024_v47 }
 0x3a8   :  { %s10246_s3 = spop %10245 }
 0x3a9   :  { %s1026_s19 = smul.f32 0.00048828125, %s10246_s3 }
 0x3ab   :  { %s1027_s20 = sadd.f32 1e-05, %s1026_s19 }
 0x3ad   :  { %v1028_v5 = vstv %s1027_s20 }
 0x3ae   :  { %10613 = vrsqrt.f32 %v1028_v5  ;;  %v14994_v5 = vld [vmem:[#allocation8_spill] sm:$0xff] }
 0x3b8   :  { %v10614_v44 = vpop.eup %10613 }
 0x3b9   :  { %10247 = vpush %v10614_v44  ;;  %v14995_v44 = vld [vmem:[#allocation9_spill] sm:$0xff] }
 0x3ea   :  { %s10248_s0 = spop %10247 }
 0x3eb   :  { %v11544_v17 = vstv %s10248_s0 }
 0x3ec   :  { %v11548_v51 = vmul.f32 %v11544_v17, %v11156_v24  ;;  %v11552_v47 = vmul.f32 %v11544_v17, %v11160_v41  ;;  %v11556_v60 = vmul.f32 %v11544_v17, %v11164_v42  ;;  %v11560_v9 = vmul.f32 %v11544_v17, %v11172_v54 }
 0x3ed   :  { %v11564_v62 = vmul.f32 %v11544_v17, %v11176_v3  ;;  %v11568_v24 = vmul.f32 %v11544_v17, %v11182_v6  ;;  %v11572_v41 = vmul.f32 %v11544_v17, %v11188_v10  ;;  %v11576_v42 = vmul.f32 %v11544_v17, %v11194_v53 }
 0x3ee   :  { %v11580_v54 = vmul.f32 %v11544_v17, %v11200_v63  ;;  %v11584_v3 = vmul.f32 %v11544_v17, %v11206_v22  ;;  %v11588_v6 = vmul.f32 %v11544_v17, %v11212_v36  ;;  %v11592_v10 = vmul.f32 %v11544_v17, %v11218_v55 }
 0x3ef   :  { %v11596_v53 = vmul.f32 %v11544_v17, %v11224_v43  ;;  %v11600_v63 = vmul.f32 %v11544_v17, %v11230_v50  ;;  %v11604_v22 = vmul.f32 %v11544_v17, %v11236_v13  ;;  %v11608_v36 = vmul.f32 %v11544_v17, %v11242_v16 }
 0x3f0   :  { %v11612_v55 = vmul.f32 %v11544_v17, %v11248_v40  ;;  %v11616_v43 = vmul.f32 %v11544_v17, %v11254_v4  ;;  %v11620_v50 = vmul.f32 %v11544_v17, %v11260_v8  ;;  %v11624_v13 = vmul.f32 %v11544_v17, %v11266_v15 }
 0x3f1   :  { %v11628_v16 = vmul.f32 %v11544_v17, %v11272_v20  ;;  %v11632_v40 = vmul.f32 %v11544_v17, %v11278_v21  ;;  %v11636_v4 = vmul.f32 %v11544_v17, %v11284_v23  ;;  %v11640_v8 = vmul.f32 %v11544_v17, %v11290_v27 }
 0x3f2   :  { %v11644_v15 = vmul.f32 %v11544_v17, %v11296_v32  ;;  %v11648_v20 = vmul.f32 %v11544_v17, %v11302_v33  ;;  %v11652_v21 = vmul.f32 %v11544_v17, %v11308_v35  ;;  %v11656_v23 = vmul.f32 %v11544_v17, %v11314_v39 }
 0x3f3   :  { %v11660_v27 = vmul.f32 %v11544_v17, %v11320_v45  ;;  %v11664_v32 = vmul.f32 %v11544_v17, %v11326_v46  ;;  %v11668_v33 = vmul.f32 %v11544_v17, %v11332_v48  ;;  %v11672_v35 = vmul.f32 %v11544_v17, %v11338_v52 }
 0x3f4   :  { %14983 = vst [vmem:[#allocation20_spill] sm:$0xff] %v11648_v20  ;;  %14984 = vst [vmem:[#allocation22_spill] sm:$0xff] %v11652_v21  ;;  %v1064_v39 = vmul.f32 %v11544_v17, %v11344_v58  ;;  %v1065_v26 = vmul.f32 %v11544_v17, %v11350_v59  ;;  %v1066_v45 = vmul.f32 %v11544_v17, %v11356_v61  ;;  %v15005_v21 = vld [vmem:[#allocation18_spill] sm:$0xff]  ;;  %v15006_v20 = vld [vmem:[#allocation19_spill] sm:$0xff] }
 0x3f5   :  { %14985 = vst [vmem:[#allocation23_spill] sm:$0xff] %v11656_v23  ;;  %14986 = vst [vmem:[#allocation24_spill] sm:$0xff] %v11660_v27  ;;  %v1067_v46 = vmul.f32 %v11544_v17, %v11362_v1  ;;  %v1068_v48 = vmul.f32 %v11544_v17, %v11368_v11  ;;  %v1069_v49 = vmul.f32 %v11544_v17, %v11374_v12  ;;  %v15002_v27 = vld [vmem:[#allocation16_spill] sm:$0xff]  ;;  %v15003_v23 = vld [vmem:[#allocation17_spill] sm:$0xff] }
 0x3f6   :  { %14987 = vst [vmem:[#allocation25_spill] sm:$0xff] %v11664_v32  ;;  %14988 = vst [vmem:[#allocation26_spill] sm:$0xff] %v11668_v33  ;;  %v1070_v52 = vmul.f32 %v11544_v17, %v11380_v14  ;;  %v1071_v58 = vmul.f32 %v11544_v17, %v11386_v19  ;;  %v1072_v59 = vmul.f32 %v11544_v17, %v11392_v28  ;;  %v15001_v33 = vld [vmem:[#allocation15_spill] sm:$0xff] }
 0x3f7   :  { %14989 = vst [vmem:[#allocation27_spill] sm:$0xff] %v11672_v35  ;;  %v1073_v61 = vmul.f32 %v11544_v17, %v11398_v29  ;;  %v1074_v1 = vmul.f32 %v11544_v17, %v11404_v31  ;;  %v1075_v11 = vmul.f32 %v11544_v17, %v11410_v38  ;;  %v1076_v12 = vmul.f32 %v11544_v17, %v14990_v0  ;;  %v15000_v35 = vld [vmem:[#allocation14_spill] sm:$0xff] }
 0x3f8   :  { %v1077_v14 = vmul.f32 %v11544_v17, %v14991_v34  ;;  %v1078_v19 = vmul.f32 %v11544_v17, %v14992_v2  ;;  %v1079_v28 = vmul.f32 %v11544_v17, %v14993_v57  ;;  %v1080_v29 = vmul.f32 %v11544_v17, %v14994_v5  ;;  %v11721_v34 = vld [vmem:[%s14863_s2 + $0x1] ss:$0 sm:$0xff]  ;;  %v14999_v5 = vld [vmem:[#allocation13_spill] sm:$0xff] }
 0x3f9   :  { %v1081_v31 = vmul.f32 %v11544_v17, %v14995_v44  ;;  %v11712_v38 = vmul.f32 %v11544_v17, %v14996_v25  ;;  %v11716_v0 = vmul.f32 %v11544_v17, %v14997_v18  ;;  %v14998_v2 = vld [vmem:[#allocation12_spill] sm:$0xff]  ;;  %v11729_v44 = vmul.f32 %v11544_v17, %v14999_v5 }
 0x3fa   :  { %v11725_v57 = vmul.f32 %v11544_v17, %v14998_v2  ;;  %v11733_v25 = vmul.f32 %v11544_v17, %v15000_v35  ;;  %v11737_v18 = vmul.f32 %v11544_v17, %v15001_v33  ;;  %v11741_v32 = vmul.f32 %v11544_v17, %v11488_v37 }
 0x3fb   :  { %v11745_v2 = vmul.f32 %v11544_v17, %v15002_v27  ;;  %v11749_v5 = vmul.f32 %v11544_v17, %v15003_v23  ;;  %v11753_v35 = vmul.f32 %v11544_v17, %v15005_v21  ;;  %v11757_v33 = vmul.f32 %v11544_v17, %v15006_v20 }
 0x3fc   :  { %v11761_v37 = vmul.f32 %v11544_v17, %v11518_v56  ;;  %v11765_v27 = vmul.f32 %v11544_v17, %v11524_v7  ;;  %v1095_v23 = vmul.f32 %v11544_v17, %v11530_v30  ;;  %v1101_v21 = vmul.f32 %v11721_v34, %v11552_v47 }
 0x3fd   :  { %15004 = vst [vmem:[#allocation4_spill] sm:$0xff] %v11749_v5  ;;  %v1100_v5 = vmul.f32 %v11721_v34, %v11548_v51  ;;  %v11775_v20 = vmul.f32 %v11721_v34, %v11556_v60  ;;  %v11779_v56 = vmul.f32 %v11721_v34, %v11560_v9  ;;  %v11783_v7 = vmul.f32 %v11721_v34, %v11564_v62 }
 0x3fe   :  { %15007 = vst [vmem:[#allocation5_spill] sm:$0xff] %v11765_v27  ;;  %v11787_v30 = vmul.f32 %v11721_v34, %v11568_v24  ;;  %v11791_v17 = vmul.f32 %v11721_v34, %v11572_v41  ;;  %v11795_v51 = vmul.f32 %v11721_v34, %v11576_v42  ;;  %v11799_v47 = vmul.f32 %v11721_v34, %v11580_v54 }
 0x3ff   :  { %v11803_v60 = vmul.f32 %v11721_v34, %v11584_v3  ;;  %v11807_v9 = vmul.f32 %v11721_v34, %v11588_v6  ;;  %v11811_v62 = vmul.f32 %v11721_v34, %v11592_v10  ;;  %v11815_v24 = vmul.f32 %v11721_v34, %v11596_v53 }
 0x400   :  { %v11819_v41 = vmul.f32 %v11721_v34, %v11600_v63  ;;  %v11823_v42 = vmul.f32 %v11721_v34, %v11604_v22  ;;  %v11827_v54 = vmul.f32 %v11721_v34, %v11608_v36  ;;  %v1116_v3 = vmul.f32 %v11721_v34, %v11612_v55  ;;  %v11838_v63 = vld [vmem:[%s14863_s2 + $0x2] ss:$0 sm:$0xff] }
 0x401   :  { %v1117_v6 = vmul.f32 %v11721_v34, %v11616_v43  ;;  %v1132_v10 = vmul.f32 %v11721_v34, %v1064_v39  ;;  %v1133_v53 = vmul.f32 %v11721_v34, %v1065_v26  ;;  %v1134_v22 = vmul.f32 %v11721_v34, %v1066_v45 }
 0x402   :  { %15008 = vst [vmem:[#allocation6_spill] sm:$0xff] %v11823_v42  ;;  %15009 = vst [vmem:[#allocation7_spill] sm:$0xff] %v11827_v54  ;;  %v1135_v36 = vmul.f32 %v11721_v34, %v1067_v46  ;;  %v11843_v54 = vmul.f32 %v11721_v34, %v1068_v48  ;;  %v11846_v55 = vmul.f32 %v11721_v34, %v1069_v49 }
 0x403   :  { %v11849_v43 = vmul.f32 %v11721_v34, %v1070_v52  ;;  %v11852_v39 = vmul.f32 %v11721_v34, %v1071_v58  ;;  %v11855_v26 = vmul.f32 %v11721_v34, %v1072_v59  ;;  %v11858_v42 = vmul.f32 %v11721_v34, %v1073_v61 }
 0x404   :  { %v11861_v45 = vmul.f32 %v11721_v34, %v1074_v1  ;;  %v11864_v46 = vmul.f32 %v11721_v34, %v1075_v11  ;;  %v11867_v48 = vmul.f32 %v11721_v34, %v1076_v12  ;;  %v11870_v49 = vmul.f32 %v11721_v34, %v1077_v14 }
 0x405   :  { %v11873_v52 = vmul.f32 %v11721_v34, %v1078_v19  ;;  %v11876_v58 = vmul.f32 %v11721_v34, %v1079_v28  ;;  %v11879_v59 = vmul.f32 %v11721_v34, %v1095_v23  ;;  %v1184_v61 = vadd.f32 %v11838_v63, %v1116_v3 }
 0x406   :  { %15010 = vst [vmem:[#allocation8_spill] sm:$0xff] %v11867_v48  ;;  %15011 = vst [vmem:[#allocation9_spill] sm:$0xff] %v11870_v49  ;;  %v1185_v1 = vadd.f32 %v11838_v63, %v1117_v6  ;;  %v1148_v11 = vmul.f32 %v11721_v34, %v1080_v29  ;;  %v1149_v12 = vmul.f32 %v11721_v34, %v1081_v31 }
 0x407   :  { %15012 = vst [vmem:[#allocation10_spill] sm:$0xff] %v11873_v52  ;;  %15013 = vst [vmem:[#allocation11_spill] sm:$0xff] %v11876_v58  ;;  %v1168_v14 = vadd.f32 %v11838_v63, %v1100_v5  ;;  %v1248_v27 = vmax.f32 %v1184_v61, 0.0  ;;  %v1169_v19 = vadd.f32 %v11838_v63, %v1101_v21  ;;  %v1200_v52 = vadd.f32 %v11838_v63, %v1132_v10 }
 0x408   :  { %15014 = vst [vmem:[#allocation12_spill] sm:$0xff] %v11879_v59  ;;  %v1201_v28 = vadd.f32 %v11838_v63, %v1133_v53  ;;  %v1249_v58 = vmax.f32 %v1185_v1, 0.0  ;;  %v1216_v23 = vadd.f32 %v11838_v63, %v1148_v11  ;;  %v1217_v3 = vadd.f32 %v11838_v63, %v1149_v12 }
 0x409   :  { %v1232_v59 = vmax.f32 %v1168_v14, 0.0  ;;  %v1233_v6 = vmax.f32 %v1169_v19, 0.0  ;;  %v1264_v49 = vmax.f32 %v1200_v52, 0.0  ;;  %v1118_v31 = vmul.f32 %v11721_v34, %v11620_v50 }
 0x40a   :  { %v1265_v29 = vmax.f32 %v1201_v28, 0.0  ;;  %v1360_v5 = vpack.c.bf16 %v1249_v58, %v1248_v27  ;;  %v1280_v61 = vmax.f32 %v1216_v23, 0.0  ;;  %v1281_v48 = vmax.f32 %v1217_v3, 0.0 }
 0x40b   :  { %v1119_v21 = vmul.f32 %v11721_v34, %v11624_v13  ;;  %v1352_v10 = vpack.c.bf16 %v1233_v6, %v1232_v59  ;;  %v1186_v1 = vadd.f32 %v11838_v63, %v1118_v31  ;;  %v1150_v11 = vmul.f32 %v11721_v34, %v11712_v38 }
 0x40c   :  { %v1368_v53 = vpack.c.bf16 %v1265_v29, %v1264_v49  ;;  %8492 = vmatprep.subr.bf16.mxu1 %v1360_v5  ;;  %v1376_v12 = vpack.c.bf16 %v1281_v48, %v1280_v61  ;;  %v1151_v50 = vmul.f32 %v11721_v34, %v11716_v0  ;;  %v1170_v27 = vadd.f32 %v11838_v63, %v11775_v20 }
 0x40d   :  { %v1187_v52 = vadd.f32 %v11838_v63, %v1119_v21  ;;  %8493 = vmatpush3.bf16.msra.mxu1 %v1352_v10  ;;  %v1250_v58 = vmax.f32 %v1186_v1, 0.0  ;;  %v1218_v13 = vadd.f32 %v11838_v63, %v1150_v11  ;;  %v1171_v49 = vadd.f32 %v11838_v63, %v11779_v56 }
 0x40e   :  { %v1202_v59 = vadd.f32 %v11838_v63, %v1134_v22  ;;  %8592 = vmatprep.subr.bf16.mxu0 %v1376_v12  ;;  %v1219_v48 = vadd.f32 %v11838_v63, %v1151_v50  ;;  %v1234_v14 = vmax.f32 %v1170_v27, 0.0  ;;  %v1203_v19 = vadd.f32 %v11838_v63, %v1135_v36 }
 0x40f   :  { %v1251_v38 = vmax.f32 %v1187_v52, 0.0  ;;  %8593 = vmatpush3.bf16.msra.mxu0 %v1368_v53  ;;  %v1282_v0 = vmax.f32 %v1218_v13, 0.0  ;;  %v1235_v28 = vmax.f32 %v1171_v49, 0.0  ;;  %v1120_v23 = vmul.f32 %v11721_v34, %v11628_v16 }
 0x410   :  { %v1266_v20 = vmax.f32 %v1202_v59, 0.0  ;;  %v1283_v6 = vmax.f32 %v1219_v48, 0.0  ;;  %v1267_v29 = vmax.f32 %v1203_v19, 0.0  ;;  %v1121_v56 = vmul.f32 %v11721_v34, %v11632_v40 }
 0x411   :  { %v1361_v3 = vpack.c.bf16 %v1251_v38, %v1250_v58  ;;  %v1353_v22 = vpack.c.bf16 %v1235_v28, %v1234_v14  ;;  %v1188_v31 = vadd.f32 %v11838_v63, %v1120_v23  ;;  %v1152_v5 = vmul.f32 %v11721_v34, %v11725_v57 }
 0x412   :  { %v1153_v36 = vmul.f32 %v11721_v34, %v11729_v44  ;;  %v1377_v61 = vpack.c.bf16 %v1283_v6, %v1282_v0  ;;  %v1369_v21 = vpack.c.bf16 %v1267_v29, %v1266_v20  ;;  %v1189_v16 = vadd.f32 %v11838_v63, %v1121_v56 }
 0x413   :  { %8494 = vmatprep.subr.bf16.mxu1 %v1361_v3  ;;  %v1172_v10 = vadd.f32 %v11838_v63, %v11783_v7  ;;  %v1252_v53 = vmax.f32 %v1188_v31, 0.0  ;;  %v1220_v40 = vadd.f32 %v11838_v63, %v1152_v5  ;;  %v1173_v57 = vadd.f32 %v11838_v63, %v11787_v30 }
 0x414   :  { %8495 = vmatpush3.bf16.msra.mxu1 %v1353_v22  ;;  %v1221_v1 = vadd.f32 %v11838_v63, %v1153_v36  ;;  %8594 = vmatprep.subr.bf16.mxu0 %v1377_v61  ;;  %v1253_v11 = vmax.f32 %v1189_v16, 0.0  ;;  %v1204_v12 = vadd.f32 %v11838_v63, %v11843_v54  ;;  %v1205_v52 = vadd.f32 %v11838_v63, %v11846_v55  ;;  %v15015_v36 = vld [vmem:[#allocation20_spill] sm:$0xff] }
 0x415   :  { %v1236_v44 = vmax.f32 %v1172_v10, 0.0  ;;  %8595 = vmatpush3.bf16.msra.mxu0 %v1369_v21  ;;  %v1284_v7 = vmax.f32 %v1220_v40, 0.0  ;;  %v1237_v27 = vmax.f32 %v1173_v57, 0.0  ;;  %v1122_v58 = vmul.f32 %v11721_v34, %v11636_v4 }
 0x416   :  { %v1285_v50 = vmax.f32 %v1221_v1, 0.0  ;;  %v1362_v13 = vpack.c.bf16 %v1253_v11, %v1252_v53  ;;  %v1268_v49 = vmax.f32 %v1204_v12, 0.0  ;;  %v1269_v59 = vmax.f32 %v1205_v52, 0.0 }
 0x417   :  { %v1123_v30 = vmul.f32 %v11721_v34, %v11640_v8  ;;  %v1354_v48 = vpack.c.bf16 %v1237_v27, %v1236_v44  ;;  %v1190_v54 = vadd.f32 %v11838_v63, %v1122_v58  ;;  %v1154_v55 = vmul.f32 %v11721_v34, %v11733_v25  ;;  %v15016_v27 = vld [vmem:[#allocation22_spill] sm:$0xff] }
 0x418   :  { %v1378_v38 = vpack.c.bf16 %v1285_v50, %v1284_v7  ;;  %8496 = vmatprep.subr.bf16.mxu1 %v1362_v13  ;;  %v1370_v14 = vpack.c.bf16 %v1269_v59, %v1268_v49  ;;  %v1155_v4 = vmul.f32 %v11721_v34, %v11737_v18  ;;  %v1174_v0 = vadd.f32 %v11838_v63, %v11791_v17 }
 0x419   :  { %v1191_v19 = vadd.f32 %v11838_v63, %v1123_v30  ;;  %8497 = vmatpush3.bf16.msra.mxu1 %v1354_v48  ;;  %v1254_v8 = vmax.f32 %v1190_v54, 0.0  ;;  %v1222_v28 = vadd.f32 %v11838_v63, %v1154_v55  ;;  %v1175_v20 = vadd.f32 %v11838_v63, %v11795_v51  ;;  %v15018_v54 = vld [vmem:[#allocation4_spill] sm:$0xff] }
 0x41a   :  { %8596 = vmatprep.subr.bf16.mxu0 %v1378_v38  ;;  %v1206_v25 = vadd.f32 %v11838_v63, %v11849_v43  ;;  %v1223_v3 = vadd.f32 %v11838_v63, %v1155_v4  ;;  %v1238_v6 = vmax.f32 %v1174_v0, 0.0  ;;  %v1207_v18 = vadd.f32 %v11838_v63, %v11852_v39 }
 0x41b   :  { %8597 = vmatpush3.bf16.msra.mxu0 %v1370_v14  ;;  %v1255_v23 = vmax.f32 %v1191_v19, 0.0  ;;  %v1286_v17 = vmax.f32 %v1222_v28, 0.0  ;;  %v1239_v29 = vmax.f32 %v1175_v20, 0.0  ;;  %v1124_v22 = vmul.f32 %v11721_v34, %v11644_v15 }
 0x41c   :  { %v1270_v56 = vmax.f32 %v1206_v25, 0.0  ;;  %v1287_v5 = vmax.f32 %v1223_v3, 0.0  ;;  %v1271_v51 = vmax.f32 %v1207_v18, 0.0  ;;  %v1125_v43 = vmul.f32 %v11721_v34, %v15015_v36 }
 0x41d   :  { %v1363_v31 = vpack.c.bf16 %v1255_v23, %v1254_v8  ;;  %v1355_v61 = vpack.c.bf16 %v1239_v29, %v1238_v6  ;;  %v1192_v21 = vadd.f32 %v11838_v63, %v1124_v22  ;;  %v1156_v16 = vmul.f32 %v11721_v34, %v11741_v32 }
 0x41e   :  { %v1157_v39 = vmul.f32 %v11721_v34, %v11745_v2  ;;  %v1379_v10 = vpack.c.bf16 %v1287_v5, %v1286_v17  ;;  %v1371_v53 = vpack.c.bf16 %v1271_v51, %v1270_v56  ;;  %v1193_v15 = vadd.f32 %v11838_v63, %v1125_v43  ;;  %v15019_v17 = vld [vmem:[#allocation24_spill] sm:$0xff] }
 0x41f   :  { %8498 = vmatprep.subr.bf16.mxu1 %v1363_v31  ;;  %v1176_v40 = vadd.f32 %v11838_v63, %v11799_v47  ;;  %v1256_v1 = vmax.f32 %v1192_v21, 0.0  ;;  %v1224_v57 = vadd.f32 %v11838_v63, %v1156_v16  ;;  %v1177_v32 = vadd.f32 %v11838_v63, %v11803_v60  ;;  %v15017_v60 = vld [vmem:[#allocation23_spill] sm:$0xff]  ;;  %v15020_v31 = vld [vmem:[#allocation25_spill] sm:$0xff] }
 0x420   :  { %8499 = vmatpush3.bf16.msra.mxu1 %v1355_v61  ;;  %v1225_v11 = vadd.f32 %v11838_v63, %v1157_v39  ;;  %8598 = vmatprep.subr.bf16.mxu0 %v1379_v10  ;;  %v1257_v44 = vmax.f32 %v1193_v15, 0.0  ;;  %v1208_v12 = vadd.f32 %v11838_v63, %v11855_v26  ;;  %v1209_v52 = vadd.f32 %v11838_v63, %v11858_v42 }
 0x421   :  { %v1240_v2 = vmax.f32 %v1176_v40, 0.0  ;;  %8599 = vmatpush3.bf16.msra.mxu0 %v1371_v53  ;;  %v1288_v47 = vmax.f32 %v1224_v57, 0.0  ;;  %v1241_v50 = vmax.f32 %v1177_v32, 0.0  ;;  %v1126_v58 = vmul.f32 %v11721_v34, %v15016_v27  ;;  %v15021_v40 = vld [vmem:[#allocation8_spill] sm:$0xff]  ;;  %v15022_v57 = vld [vmem:[#allocation9_spill] sm:$0xff] }
 0x422   :  { %v1289_v7 = vmax.f32 %v1225_v11, 0.0  ;;  %v1364_v13 = vpack.c.bf16 %v1257_v44, %v1256_v1  ;;  %v1272_v49 = vmax.f32 %v1208_v12, 0.0  ;;  %v1273_v59 = vmax.f32 %v1209_v52, 0.0 }
 0x423   :  { %v1127_v30 = vmul.f32 %v11721_v34, %v15017_v60  ;;  %v1356_v48 = vpack.c.bf16 %v1241_v50, %v1240_v2  ;;  %v1194_v26 = vadd.f32 %v11838_v63, %v1126_v58  ;;  %v1158_v42 = vmul.f32 %v11721_v34, %v15018_v54  ;;  %v15023_v2 = vld [vmem:[#allocation26_spill] sm:$0xff] }
 0x424   :  { %v1380_v38 = vpack.c.bf16 %v1289_v7, %v1288_v47  ;;  %8500 = vmatprep.subr.bf16.mxu1 %v1364_v13  ;;  %v1372_v55 = vpack.c.bf16 %v1273_v59, %v1272_v49  ;;  %v1159_v19 = vmul.f32 %v11721_v34, %v11753_v35  ;;  %v1178_v4 = vadd.f32 %v11838_v63, %v11807_v9  ;;  %v15025_v49 = vld [vmem:[#allocation5_spill] sm:$0xff] }
 0x425   :  { %v1195_v14 = vadd.f32 %v11838_v63, %v1127_v30  ;;  %8501 = vmatpush3.bf16.msra.mxu1 %v1356_v48  ;;  %v1258_v0 = vmax.f32 %v1194_v26, 0.0  ;;  %v1226_v8 = vadd.f32 %v11838_v63, %v1158_v42  ;;  %v1179_v28 = vadd.f32 %v11838_v63, %v11811_v62  ;;  %v15027_v26 = vld [vmem:[#allocation6_spill] sm:$0xff] }
 0x426   :  { %8600 = vmatprep.subr.bf16.mxu0 %v1380_v38  ;;  %v1210_v20 = vadd.f32 %v11838_v63, %v11861_v45  ;;  %v1227_v23 = vadd.f32 %v11838_v63, %v1159_v19  ;;  %v1242_v3 = vmax.f32 %v1178_v4, 0.0  ;;  %v1211_v35 = vadd.f32 %v11838_v63, %v11864_v46  ;;  %v15026_v38 = vld [vmem:[#allocation12_spill] sm:$0xff]  ;;  %v15029_v4 = vld [vmem:[#allocation10_spill] sm:$0xff] }
 0x427   :  { %8601 = vmatpush3.bf16.msra.mxu0 %v1372_v55  ;;  %v1259_v25 = vmax.f32 %v1195_v14, 0.0  ;;  %v1290_v9 = vmax.f32 %v1226_v8, 0.0  ;;  %v1243_v6 = vmax.f32 %v1179_v28, 0.0  ;;  %v1128_v29 = vmul.f32 %v11721_v34, %v15019_v17  ;;  %v15028_v14 = vld [vmem:[#allocation7_spill] sm:$0xff] }
 0x428   :  { %v1274_v18 = vmax.f32 %v1210_v20, 0.0  ;;  %v1291_v22 = vmax.f32 %v1227_v23, 0.0  ;;  %v1275_v62 = vmax.f32 %v1211_v35, 0.0  ;;  %v1129_v45 = vmul.f32 %v11721_v34, %v15020_v31  ;;  %v15030_v20 = vld [vmem:[#allocation11_spill] sm:$0xff]  ;;  %v10387_v31 = vld [vmem:[%s14865_s5] sm:$0xff]  }
 0x429   :  { %v1365_v56 = vpack.c.bf16 %v1259_v25, %v1258_v0  ;;  %v1357_v5 = vpack.c.bf16 %v1243_v6, %v1242_v3  ;;  %v1196_v51 = vadd.f32 %v11838_v63, %v1128_v29  ;;  %v1160_v36 = vmul.f32 %v11721_v34, %v11757_v33 }
 0x42a   :  { %v1161_v46 = vmul.f32 %v11721_v34, %v11761_v37  ;;  %v1381_v43 = vpack.c.bf16 %v1291_v22, %v1290_v9  ;;  %v1373_v61 = vpack.c.bf16 %v1275_v62, %v1274_v18  ;;  %v1197_v21 = vadd.f32 %v11838_v63, %v1129_v45  ;;  %v10303_v18 = vld [vmem:[%s14864_s4] ss:$16 sps:$4 sm:$0xff]   ;;  %v10309_v22 = vld [vmem:[%s14864_s4 + $0x24] ss:$16 sps:$4 sm:$0xff]   ;;  %v10311_v62 = vld [vmem:[%s14864_s4 + $0x2c] ss:$16 sps:$4 sm:$0xff]  }
 0x42b   :  { %8502 = vmatprep.subr.bf16.mxu1 %v1365_v56  ;;  %v1180_v16 = vadd.f32 %v11838_v63, %v11815_v24  ;;  %v1260_v39 = vmax.f32 %v1196_v51, 0.0  ;;  %v1228_v10 = vadd.f32 %v11838_v63, %v1160_v36  ;;  %v1181_v33 = vadd.f32 %v11838_v63, %v11819_v41  ;;  %v15024_v41 = vld [vmem:[#allocation27_spill] sm:$0xff]  ;;  %v10313_v51 = vld [vmem:[%s14864_s4 + $0x20] ss:$16 sps:$4 sm:$0xff]  }
 0x42c   :  { %8503 = vmatpush3.bf16.msra.mxu1 %v1357_v5  ;;  %v1229_v53 = vadd.f32 %v11838_v63, %v1161_v46  ;;  %8602 = vmatprep.subr.bf16.mxu0 %v1381_v43  ;;  %v1261_v15 = vmax.f32 %v1197_v21, 0.0  ;;  %v1212_v1 = vadd.f32 %v11838_v63, %v15021_v40  ;;  %v1213_v11 = vadd.f32 %v11838_v63, %v15022_v57  ;;  %v10306_v56 = vld [vmem:[%s14864_s4 + $0x8] ss:$16 sps:$4 sm:$0xff]   ;;  %v10315_v46 = vld [vmem:[%s14864_s4 + $0x44] ss:$16 sps:$4 sm:$0xff]  }
 0x42d   :  { %v1244_v37 = vmax.f32 %v1180_v16, 0.0  ;;  %8603 = vmatpush3.bf16.msra.mxu0 %v1373_v61  ;;  %v1292_v24 = vmax.f32 %v1228_v10, 0.0  ;;  %v1245_v44 = vmax.f32 %v1181_v33, 0.0  ;;  %v1130_v12 = vmul.f32 %v11721_v34, %v15023_v2  ;;  %v10388_v5 = vld [vmem:[%s14865_s5 + $0x8] sm:$0xff]   ;;  %v10389_v61 = vld [vmem:[%s14865_s5 + $0x10] sm:$0xff]  }
 0x42e   :  { %v1293_v32 = vmax.f32 %v1229_v53, 0.0  ;;  %v1366_v52 = vpack.c.bf16 %v1261_v15, %v1260_v39  ;;  %v1276_v47 = vmax.f32 %v1212_v1, 0.0  ;;  %v1277_v7 = vmax.f32 %v1213_v11, 0.0  ;;  %v10314_v36 = vld [vmem:[%s14864_s4 + $0x28] ss:$16 sps:$4 sm:$0xff]  }
 0x42f   :  { %v1131_v50 = vmul.f32 %v11721_v34, %v15024_v41  ;;  %v1358_v58 = vpack.c.bf16 %v1245_v44, %v1244_v37  ;;  %v1198_v13 = vadd.f32 %v11838_v63, %v1130_v12  ;;  %v1162_v59 = vmul.f32 %v11721_v34, %v15025_v49  ;;  %v10317_v43 = vld [vmem:[%s14864_s4 + $0x4c] ss:$16 sps:$4 sm:$0xff]   ;;  %v10319_v21 = vld [vmem:[%s14864_s4 + $0x40] ss:$16 sps:$4 sm:$0xff]   ;;  %v10320_v16 = vld [vmem:[%s14864_s4 + $0x48] ss:$16 sps:$4 sm:$0xff]  }
 0x430   :  { %v1382_v27 = vpack.c.bf16 %v1293_v32, %v1292_v24  ;;  %8504 = vmatprep.subr.bf16.mxu1 %v1366_v52  ;;  %v1374_v60 = vpack.c.bf16 %v1277_v7, %v1276_v47  ;;  %v1231_v48 = vadd.f32 %v11838_v63, %v15026_v38  ;;  %v1182_v54 = vadd.f32 %v11838_v63, %v15027_v26  ;;  %v10321_v39 = vld [vmem:[%s14864_s4 + $0x64] ss:$16 sps:$4 sm:$0xff]   ;;  %v10323_v10 = vld [vmem:[%s14864_s4 + $0x6c] ss:$16 sps:$4 sm:$0xff]   ;;  %v10325_v53 = vld [vmem:[%s14864_s4 + $0x60] ss:$16 sps:$4 sm:$0xff]  }
 0x431   :  { %v1199_v30 = vadd.f32 %v11838_v63, %v1131_v50  ;;  %8505 = vmatpush3.bf16.msra.mxu1 %v1358_v58  ;;  %v1262_v42 = vmax.f32 %v1198_v13, 0.0  ;;  %v1230_v55 = vadd.f32 %v11838_v63, %v1162_v59  ;;  %v1183_v19 = vadd.f32 %v11838_v63, %v15028_v14  ;;  %v10326_v33 = vld [vmem:[%s14864_s4 + $0x68] ss:$16 sps:$4 sm:$0xff]   ;;  %v10327_v15 = vld [vmem:[%s14864_s4 + $0x84] ss:$16 sps:$4 sm:$0xff]  }
 0x432   :  { %8604 = vmatprep.subr.bf16.mxu0 %v1382_v27  ;;  %v1214_v34 = vadd.f32 %v11838_v63, %v15029_v4  ;;  %v1295_v8 = vmax.f32 %v1231_v48, 0.0  ;;  %v1246_v28 = vmax.f32 %v1182_v54, 0.0  ;;  %v1215_v25 = vadd.f32 %v11838_v63, %v15030_v20  ;;  %v10329_v37 = vld [vmem:[%s14864_s4 + $0x8c] ss:$16 sps:$4 sm:$0xff]   ;;  %v10331_v40 = vld [vmem:[%s14864_s4 + $0x80] ss:$16 sps:$4 sm:$0xff]  }
 0x433   :  { %8605 = vmatpush3.bf16.msra.mxu0 %v1374_v60  ;;  %v1263_v0 = vmax.f32 %v1199_v30, 0.0  ;;  %v1294_v23 = vmax.f32 %v1230_v55, 0.0  ;;  %v1247_v3 = vmax.f32 %v1183_v19, 0.0  ;;  %v15031_v45 = vmov 0.0   ;;  %v10332_v1 = vld [vmem:[%s14864_s4 + $0x88] ss:$16 sps:$4 sm:$0xff]  }
 0x434   :  { %v1278_v35 = vmax.f32 %v1214_v34, 0.0  ;;  %v1279_v6 = vmax.f32 %v1215_v25, 0.0  ;;  %v10333_v57 = vld [vmem:[%s14864_s4 + $0xa4] ss:$16 sps:$4 sm:$0xff]   ;;  %v10335_v11 = vld [vmem:[%s14864_s4 + $0xac] ss:$16 sps:$4 sm:$0xff]  }
 0x435   :  { %v1367_v9 = vpack.c.bf16 %v1263_v0, %v1262_v42  ;;  %v1383_v17 = vpack.c.bf16 %v1295_v8, %v1294_v23  ;;  %v1359_v29 = vpack.c.bf16 %v1247_v3, %v1246_v28  ;;  %v10337_v24 = vld [vmem:[%s14864_s4 + $0xa0] ss:$16 sps:$4 sm:$0xff]   ;;  %v10338_v32 = vld [vmem:[%s14864_s4 + $0xa8] ss:$16 sps:$4 sm:$0xff]   ;;  %v10339_v44 = vld [vmem:[%s14864_s4 + $0xc4] ss:$16 sps:$4 sm:$0xff]  }
 0x436   :  { %v1375_v63 = vpack.c.bf16 %v1279_v6, %v1278_v35  ;;  %v10341_v2 = vld [vmem:[%s14864_s4 + $0xcc] ss:$16 sps:$4 sm:$0xff]   ;;  %v10343_v12 = vld [vmem:[%s14864_s4 + $0xc0] ss:$16 sps:$4 sm:$0xff]   ;;  %v10344_v52 = vld [vmem:[%s14864_s4 + $0xc8] ss:$16 sps:$4 sm:$0xff]  }
 0x437   :  { %8506 = vmatprep.subr.bf16.mxu1 %v1367_v9  ;;  %8606 = vmatprep.subr.bf16.mxu0 %v1383_v17  ;;  %v10345_v47 = vld [vmem:[%s14864_s4 + $0xe4] ss:$16 sps:$4 sm:$0xff]   ;;  %v10347_v7 = vld [vmem:[%s14864_s4 + $0xec] ss:$16 sps:$4 sm:$0xff]   ;;  %v10349_v41 = vld [vmem:[%s14864_s4 + $0xe0] ss:$16 sps:$4 sm:$0xff]  }
 0x438   :  { %8507 = vmatpush3.bf16.msra.mxu1 %v1359_v29  ;;  %8607 = vmatpush3.bf16.msra.mxu0 %v1375_v63  ;;  %v10350_v50 = vld [vmem:[%s14864_s4 + $0xe8] ss:$16 sps:$4 sm:$0xff]   ;;  %v10351_v27 = vld [vmem:[%s14864_s4 + $0x104] ss:$16 sps:$4 sm:$0xff]   ;;  %v10353_v58 = vld [vmem:[%s14864_s4 + $0x10c] ss:$16 sps:$4 sm:$0xff]  }
 0x439   :  { %9153 = vmatprep.subr.bf16.mxu1 %v15031_v45  ;;  %9221 = vmatprep.subr.bf16.mxu0 %v15031_v45  ;;  %v10355_v13 = vld [vmem:[%s14864_s4 + $0x100] ss:$16 sps:$4 sm:$0xff]   ;;  %v10356_v49 = vld [vmem:[%s14864_s4 + $0x108] ss:$16 sps:$4 sm:$0xff]   ;;  %v10357_v59 = vld [vmem:[%s14864_s4 + $0x124] ss:$16 sps:$4 sm:$0xff]  }
 0x43a   :  { %v10359_v60 = vld [vmem:[%s14864_s4 + $0x12c] ss:$16 sps:$4 sm:$0xff]   ;;  %v10361_v30 = vld [vmem:[%s14864_s4 + $0x120] ss:$16 sps:$4 sm:$0xff]   ;;  %v10362_v38 = vld [vmem:[%s14864_s4 + $0x128] ss:$16 sps:$4 sm:$0xff]  }
 0x43b   :  { %1697 = vmatmul.mubr.bf16.vlgmr.msra.gmra.mrb[4].mxu1 %v10303_v18  ;;  %1842 = vmatmul.mubr.bf16.vlgmr.msra.gmra.mrb[64].mxu0 %v10306_v56  ;;  %v10363_v48 = vld [vmem:[%s14864_s4 + $0x144] ss:$16 sps:$4 sm:$0xff]   ;;  %v10365_v26 = vld [vmem:[%s14864_s4 + $0x14c] ss:$16 sps:$4 sm:$0xff]   ;;  %v10367_v54 = vld [vmem:[%s14864_s4 + $0x140] ss:$16 sps:$4 sm:$0xff]  }
 0x43c   :  { %1704 = vmatprep.mubr.bf16.mxu1 %v10309_v22  ;;  %1849 = vmatprep.mubr.bf16.mxu0 %v10311_v62  ;;  %v10368_v42 = vld [vmem:[%s14864_s4 + $0x148] ss:$16 sps:$4 sm:$0xff]   ;;  %v10369_v55 = vld [vmem:[%s14864_s4 + $0x164] ss:$16 sps:$4 sm:$0xff]   ;;  %v10371_v14 = vld [vmem:[%s14864_s4 + $0x16c] ss:$16 sps:$4 sm:$0xff]  }
 0x43d   :  { %9222 = vmatpush3.bf16.msra.mxu0 %v10387_v31  ;;  %v10373_v19 = vld [vmem:[%s14864_s4 + $0x160] ss:$16 sps:$4 sm:$0xff]   ;;  %v10374_v4 = vld [vmem:[%s14864_s4 + $0x168] ss:$16 sps:$4 sm:$0xff]   ;;  %v10375_v34 = vld [vmem:[%s14864_s4 + $0x184] ss:$16 sps:$4 sm:$0xff]  }
 0x43e   :  { %9223 = vmatprep.subr.bf16.mxu0 %v15031_v45  ;;  %v10377_v0 = vld [vmem:[%s14864_s4 + $0x18c] ss:$16 sps:$4 sm:$0xff]   ;;  %v10391_v28 = vld [vmem:[%s14865_s5 + $0x40] sm:$0xff]   ;;  %v10380_v25 = vld [vmem:[%s14864_s4 + $0x188] ss:$16 sps:$4 sm:$0xff]  }
 0x43f   :  { %v10390_v8 = vld [vmem:[%s14865_s5 + $0x18] sm:$0xff]   ;;  %9154 = vmatpush3.bf16.msra.mxu1 %v10391_v28  ;;  %v10379_v20 = vld [vmem:[%s14864_s4 + $0x180] ss:$16 sps:$4 sm:$0xff]   ;;  %v10381_v23 = vld [vmem:[%s14864_s4 + $0x1a4] ss:$16 sps:$4 sm:$0x7f]  }
 0x440   :  { %9155 = vmatprep.subr.bf16.mxu1 %v15031_v45  ;;  %v10383_v3 = vld [vmem:[%s14864_s4 + $0x1ac] ss:$16 sps:$4 sm:$0x7f]   ;;  %v10392_v35 = vld [vmem:[%s14865_s5 + $0x20] sm:$0xff]   ;;  %v10395_v18 = vld [vmem:[%s14865_s5 + $0x50] sm:$0xff]  }
 0x441   :  { %9224 = vmatpush3.bf16.msra.mxu0 %v10388_v5  ;;  %v10393_v9 = vld [vmem:[%s14865_s5 + $0x48] sm:$0xff]   ;;  %v10385_v17 = vld [vmem:[%s14864_s4 + $0x1a0] ss:$16 sps:$4 sm:$0x7f]   ;;  %v10397_v22 = vld [vmem:[%s14865_s5 + $0x58] sm:$0xff]  }
 0x442   :  { %9225 = vmatprep.subr.bf16.mxu0 %v15031_v45  ;;  %v10394_v6 = vld [vmem:[%s14865_s5 + $0x28] sm:$0xff]   ;;  %v10396_v56 = vld [vmem:[%s14865_s5 + $0x30] sm:$0xff]   ;;  %v10398_v63 = vld [vmem:[%s14865_s5 + $0x38] sm:$0xff]  }
 0x443   :  { %1705 = vmatmul.mubr.bf16.gmra.mrb[8].mxu1 %v10313_v51  ;;  %1850 = vmatmul.mubr.bf16.gmra.mrb[68].mxu0 %v10314_v36  ;;  %v10386_v29 = vld [vmem:[%s14864_s4 + $0x1a8] ss:$16 sps:$4 sm:$0x7f]   ;;  %v10399_v62 = vld [vmem:[%s14865_s5 + $0x60] sm:$0xff]   ;;  %v10402_v5 = vld [vmem:[%s14865_s5 + $0x70] sm:$0xff]  }
 0x444   :  { %1712 = vmatprep.mubr.bf16.mxu1 %v10315_v46  ;;  %1857 = vmatprep.mubr.bf16.mxu0 %v10317_v43  ;;  %v10401_v31 = vld [vmem:[%s14865_s5 + $0x68] sm:$0xff]   ;;  %v10404_v51 = vld [vmem:[%s14865_s5 + $0x78] sm:$0xff]  }
 0x445   :  { %9226 = vmatpush3.bf16.msra.mxu0 %v10389_v61  ;;  %9156 = vmatpush3.bf16.msra.mxu1 %v10393_v9 }
 0x446   :  { %9227 = vmatprep.subr.bf16.mxu0 %v15031_v45  ;;  %9157 = vmatprep.subr.bf16.mxu1 %v15031_v45 }
 0x449   :  { %9228 = vmatpush3.bf16.msra.mxu0 %v10390_v8  ;;  %9158 = vmatpush3.bf16.msra.mxu1 %v10395_v18 }
 0x44a   :  { %9229 = vmatprep.subr.bf16.mxu0 %v15031_v45  ;;  %9159 = vmatprep.subr.bf16.mxu1 %v15031_v45 }
 0x44b   :  { %1713 = vmatmul.mubr.bf16.gmra.mrb[12].mxu1 %v10319_v21  ;;  %1858 = vmatmul.mubr.bf16.gmra.mrb[72].mxu0 %v10320_v16 }
 0x44c   :  { %1720 = vmatprep.mubr.bf16.mxu1 %v10321_v39  ;;  %1865 = vmatprep.mubr.bf16.mxu0 %v10323_v10 }
 0x44d   :  { %9230 = vmatpush3.bf16.msra.mxu0 %v10392_v35  ;;  %9160 = vmatpush3.bf16.msra.mxu1 %v10397_v22 }
 0x44e   :  { %9231 = vmatprep.subr.bf16.mxu0 %v15031_v45  ;;  %9161 = vmatprep.subr.bf16.mxu1 %v15031_v45 }
 0x451   :  { %9232 = vmatpush3.bf16.msra.mxu0 %v10394_v6  ;;  %9162 = vmatpush3.bf16.msra.mxu1 %v10399_v62 }
 0x452   :  { %9233 = vmatprep.subr.bf16.mxu0 %v15031_v45  ;;  %9163 = vmatprep.subr.bf16.mxu1 %v15031_v45 }
 0x453   :  { %1721 = vmatmul.mubr.bf16.gmra.mrb[16].mxu1 %v10325_v53  ;;  %1866 = vmatmul.mubr.bf16.gmra.mrb[76].mxu0 %v10326_v33 }
 0x454   :  { %1728 = vmatprep.mubr.bf16.mxu1 %v10327_v15  ;;  %1873 = vmatprep.mubr.bf16.mxu0 %v10329_v37 }
 0x455   :  { %9234 = vmatpush3.bf16.msra.mxu0 %v10396_v56  ;;  %9164 = vmatpush3.bf16.msra.mxu1 %v10401_v31 }
 0x456   :  { %9235 = vmatprep.subr.bf16.mxu0 %v15031_v45  ;;  %9165 = vmatprep.subr.bf16.mxu1 %v15031_v45 }
 0x459   :  { %9236 = vmatpush3.bf16.msra.mxu0 %v10398_v63  ;;  %9166 = vmatpush3.bf16.msra.mxu1 %v10402_v5 }
 0x45a   :  { %9357 = vmatprep.subr.bf16.mxu0 %v15031_v45  ;;  %9167 = vmatprep.subr.bf16.mxu1 %v15031_v45 }
 0x45b   :  { %1729 = vmatmul.mubr.bf16.gmra.mrb[20].mxu1 %v10331_v40  ;;  %1874 = vmatmul.mubr.bf16.gmra.mrb[80].mxu0 %v10332_v1 }
 0x45c   :  { %1736 = vmatprep.mubr.bf16.mxu1 %v10333_v57  ;;  %1881 = vmatprep.mubr.bf16.mxu0 %v10335_v11 }
 0x45d   :  { %9168 = vmatpush3.bf16.msra.mxu1 %v10404_v51 }
 0x45e   :  { %9289 = vmatprep.subr.bf16.mxu1 %v15031_v45 }
 0x463   :  { %1737 = vmatmul.mubr.bf16.gmra.mrb[24].mxu1 %v10337_v24  ;;  %1882 = vmatmul.mubr.bf16.gmra.mrb[84].mxu0 %v10338_v32 }
 0x464   :  { %1744 = vmatprep.mubr.bf16.mxu1 %v10339_v44  ;;  %1889 = vmatprep.mubr.bf16.mxu0 %v10341_v2 }
 0x46b   :  { %1745 = vmatmul.mubr.bf16.gmra.mrb[28].mxu1 %v10343_v12  ;;  %1890 = vmatmul.mubr.bf16.gmra.mrb[88].mxu0 %v10344_v52 }
 0x46c   :  { %1752 = vmatprep.mubr.bf16.mxu1 %v10345_v47  ;;  %1897 = vmatprep.mubr.bf16.mxu0 %v10347_v7 }
 0x473   :  { %1753 = vmatmul.mubr.bf16.gmra.mrb[32].mxu1 %v10349_v41  ;;  %1898 = vmatmul.mubr.bf16.gmra.mrb[92].mxu0 %v10350_v50 }
 0x474   :  { %1760 = vmatprep.mubr.bf16.mxu1 %v10351_v27  ;;  %1905 = vmatprep.mubr.bf16.mxu0 %v10353_v58 }
 0x47b   :  { %1761 = vmatmul.mubr.bf16.gmra.mrb[36].mxu1 %v10355_v13  ;;  %1906 = vmatmul.mubr.bf16.gmra.mrb[96].mxu0 %v10356_v49 }
 0x47c   :  { %1768 = vmatprep.mubr.bf16.mxu1 %v10357_v59  ;;  %1913 = vmatprep.mubr.bf16.mxu0 %v10359_v60 }
 0x483   :  { %1769 = vmatmul.mubr.bf16.gmra.mrb[40].mxu1 %v10361_v30  ;;  %1914 = vmatmul.mubr.bf16.gmra.mrb[100].mxu0 %v10362_v38  ;;  %v10413_v38 = vld [vmem:[%s14865_s5 + $0xc0] sm:$0xff]  }
 0x484   :  { %1776 = vmatprep.mubr.bf16.mxu1 %v10363_v48  ;;  %1921 = vmatprep.mubr.bf16.mxu0 %v10365_v26 }
 0x48b   :  { %1777 = vmatmul.mubr.bf16.gmra.mrb[44].mxu1 %v10367_v54  ;;  %1922 = vmatmul.mubr.bf16.gmra.mrb[104].mxu0 %v10368_v42 }
 0x48c   :  { %1784 = vmatprep.mubr.bf16.mxu1 %v10369_v55  ;;  %1929 = vmatprep.mubr.bf16.mxu0 %v10371_v14 }
 0x493   :  { %1785 = vmatmul.mubr.bf16.gmra.mrb[48].mxu1 %v10373_v19  ;;  %1930 = vmatmul.mubr.bf16.gmra.mrb[108].mxu0 %v10374_v4 }
 0x494   :  { %1792 = vmatprep.mubr.bf16.mxu1 %v10375_v34  ;;  %1937 = vmatprep.mubr.bf16.mxu0 %v10377_v0 }
 0x49b   :  { %1793 = vmatmul.mubr.bf16.gmra.mrb[52].mxu1 %v10379_v20  ;;  %1938 = vmatmul.mubr.bf16.gmra.mrb[112].mxu0 %v10380_v25  ;;  %v10414_v25 = vld [vmem:[%s14865_s5 + $0xc8] sm:$0xff]  }
 0x49c   :  { %1800 = vmatprep.mubr.bf16.mxu1 %v10381_v23  ;;  %1945 = vmatprep.mubr.bf16.mxu0 %v10383_v3 }
 0x4a3   :  { %1801 = vmatmul.mubr.bf16.gmra.mrb[56].mxu1 %v10385_v17  ;;  %1946 = vmatmul.mubr.bf16.gmra.mrb[116].mxu0 %v10386_v29  ;;  %v10416_v29 = vld [vmem:[%s14865_s5 + $0xd0] sm:$0xff]  }
 0x4a4   :  { %9237 = vmatprep.mubr.msk.bf16.mxu0 %vm10627_vm0, %v15031_v45  ;;  %9169 = vmatprep.mubr.msk.bf16.mxu1 %vm10627_vm0, %v15031_v45 }
 0x50e   :  { %v8508_v36 = vpop.f32.mrb[4].mxu1  ;;  %v8608_v46 = vpop.f32.mrb[64].mxu0 }
 0x50f   :  { %v8509_v43 = vpop.f32.mrb[5].mxu1  ;;  %v8609_v21 = vpop.f32.mrb[65].mxu0 }
 0x510   :  { %v8510_v61 = vadd.f32 %v8509_v43, %v8508_v36  ;;  %v8511_v16 = vpop.f32.mrb[6].mxu1  ;;  %v8610_v39 = vadd.f32 %v8609_v21, %v8608_v46  ;;  %v8611_v10 = vpop.f32.mrb[66].mxu0 }
 0x511   :  { %v8512_v53 = vpop.f32.mrb[7].mxu1  ;;  %v8612_v15 = vpop.f32.mrb[67].mxu0 }
 0x512   :  { %v8513_v33 = vadd.f32 %v8512_v53, %v8511_v16  ;;  %v1844_v37 = vadd.f32 %v8610_v39, %v8510_v61  ;;  %v8613_v40 = vadd.f32 %v8612_v15, %v8611_v10 }
 0x514   :  { %v1847_v1 = vadd.f32 %v8613_v40, %v8513_v33 }
 0x516   :  { %v8514_v57 = vpop.f32.mrb[8].mxu1  ;;  %v8332_v11 = vpack.c.bf16 %v1847_v1, %v1844_v37  ;;  %v8614_v24 = vpop.f32.mrb[68].mxu0  ;;  %v10417_v37 = vld [vmem:[%s14865_s5 + $0xd8] sm:$0xff]  }
 0x517   :  { %v8515_v32 = vpop.f32.mrb[9].mxu1  ;;  %v8615_v2 = vpop.f32.mrb[69].mxu0 }
 0x518   :  { %v8516_v44 = vadd.f32 %v8515_v32, %v8514_v57  ;;  %v8517_v12 = vpop.f32.mrb[10].mxu1  ;;  %8333 = vst [vmem:[#allocation2] sm:$0xff] %v8332_v11   ;;  %v8616_v52 = vadd.f32 %v8615_v2, %v8614_v24  ;;  %v8617_v47 = vpop.f32.mrb[70].mxu0  ;;  %v10418_v32 = vld [vmem:[%s14865_s5 + $0x80] sm:$0xff]  }
 0x519   :  { %v8518_v7 = vpop.f32.mrb[11].mxu1  ;;  %v8618_v50 = vpop.f32.mrb[71].mxu0 }
 0x51a   :  { %v8519_v41 = vadd.f32 %v8518_v7, %v8517_v12  ;;  %v1852_v27 = vadd.f32 %v8616_v52, %v8516_v44  ;;  %v8619_v58 = vadd.f32 %v8618_v50, %v8617_v47 }
 0x51c   :  { %v1855_v13 = vadd.f32 %v8619_v58, %v8519_v41  ;;  %v10420_v58 = vld [vmem:[%s14865_s5 + $0xe0] sm:$0xff]  }
 0x51e   :  { %v8520_v49 = vpop.f32.mrb[12].mxu1  ;;  %v8337_v59 = vpack.c.bf16 %v1855_v13, %v1852_v27  ;;  %v8620_v60 = vpop.f32.mrb[72].mxu0  ;;  %v10421_v13 = vld [vmem:[%s14865_s5 + $0x88] sm:$0xff]  }
 0x51f   :  { %v8521_v30 = vpop.f32.mrb[13].mxu1  ;;  %v8621_v26 = vpop.f32.mrb[73].mxu0  ;;  %v2095_v42 = vld [vmem:[#allocation2] sm:$0xf]  ;;  %v2096_v55 = vld [vmem:[#allocation2 + $0x4] sm:$0xf] }
 0x520   :  { %v8522_v48 = vadd.f32 %v8521_v30, %v8520_v49  ;;  %v8523_v54 = vpop.f32.mrb[14].mxu1  ;;  %8419 = vst [vmem:[#allocation2 + $0x8] sm:$0xff] %v8337_v59   ;;  %v8622_v14 = vadd.f32 %v8621_v26, %v8620_v60  ;;  %v8623_v19 = vpop.f32.mrb[74].mxu0  ;;  %v7803_v34 = vcombine.low %v2095_v42, %v2096_v55  ;;  %v2718_v35 = vld [vmem:[#allocation2] sm:$0xe] }
 0x521   :  { %v8524_v4 = vpop.f32.mrb[15].mxu1  ;;  %v8624_v8 = vpop.f32.mrb[75].mxu0  ;;  %v7849_v62 = vcombine.low %v2718_v35, %v2096_v55  ;;  %v2987_v39 = vld [vmem:[#allocation2 + $0x4] sm:$0xe] }
 0x522   :  { %v8525_v0 = vadd.f32 %v8524_v4, %v8523_v54  ;;  %v1860_v28 = vadd.f32 %v8622_v14, %v8522_v48  ;;  %v8625_v20 = vadd.f32 %v8624_v8, %v8623_v19  ;;  %9238 = vmatmul.mubr.bf16.vlgmr.msra.gmra.mrb[120].mxu0 %v7803_v34  ;;  %v2223_v3 = vshll.u32 %v7803_v34, 16  ;;  %v3702_v44 = vld [vmem:[#allocation2 + $0x4] sm:$0xc] }
 0x523   :  { %9241 = vmatprep.mubr.msk.bf16.mxu0 %vm10627_vm0, %v15031_v45  ;;  %9358 = vmatpush3.bf16.msra.mxu0 %v10413_v38  ;;  %v2221_v16 = vshrl.u32 %v7803_v34, 16  ;;  %v2740_v40 = vrot.slane %v7849_v62, 1 }
 0x524   :  { %v1863_v23 = vadd.f32 %v8625_v20, %v8525_v0  ;;  %9359 = vmatprep.subr.bf16.mxu0 %v15031_v45  ;;  %v2225_v46 = vrot.slane %v2223_v3, 1 }
 0x526   :  { %v8526_v9 = vpop.f32.mrb[16].mxu1  ;;  %v8342_v6 = vpack.c.bf16 %v1863_v23, %v1860_v28  ;;  %v8626_v18 = vpop.f32.mrb[76].mxu0  ;;  %v2226_v11 = vor.u32 %v2225_v46, %v2221_v16  ;;  %v10422_v28 = vld [vmem:[%s14865_s5 + $0xe8] sm:$0xff]   ;;  %v10426_v46 = vld [vmem:[%s14865_s5 + $0xf0] sm:$0xff]  }
 0x527   :  { %v8527_v17 = vpop.f32.mrb[17].mxu1  ;;  %v8627_v22 = vpop.f32.mrb[77].mxu0  ;;  %9360 = vmatpush3.bf16.msra.mxu0 %v10414_v25  ;;  %v12272_v36 = vld [vmem:[#allocation2 + $0x8] sm:$0xff]  }
 0x528   :  { %v8528_v56 = vadd.f32 %v8527_v17, %v8526_v9  ;;  %v8529_v63 = vpop.f32.mrb[18].mxu1  ;;  %8420 = vst [vmem:[#allocation2 + $0x10] sm:$0xff] %v8342_v6   ;;  %v8628_v31 = vadd.f32 %v8627_v22, %v8626_v18  ;;  %v8629_v5 = vpop.f32.mrb[78].mxu0  ;;  %9361 = vmatprep.subr.bf16.mxu0 %v15031_v45  ;;  %v2988_v43 = vld [vmem:[#allocation2 + $0x8] sm:$0xf]  ;;  %v2228_v33 = vshll.u32 %v12272_v36, 16 }
 0x529   :  { %v8530_v51 = vpop.f32.mrb[19].mxu1  ;;  %v8630_v21 = vpop.f32.mrb[79].mxu0  ;;  %v12277_v15 = vcombine.low %v2987_v39, %v2988_v43  ;;  %v2741_v1 = vrot.slane %v12272_v36, 1  ;;  %v7936_v52 = vcombine.low %v3702_v44, %v2988_v43  ;;  %v2232_v27 = vshrl.u32 %v12272_v36, 16  ;;  %v10423_v18 = vld [vmem:[%s14865_s5 + $0x90] sm:$0xff]   ;;  %v10427_v43 = vld [vmem:[%s14865_s5 + $0x98] sm:$0xff]  }
 0x52a   :  { %v8531_v61 = vadd.f32 %v8530_v51, %v8529_v63  ;;  %v1868_v10 = vadd.f32 %v8628_v31, %v8528_v56  ;;  %v8631_v53 = vadd.f32 %v8630_v21, %v8629_v5  ;;  %9242 = vmatmul.mubr.bf16.gmra.mrb[124].mxu0 %v12272_v36  ;;  %v2230_v24 = vrot.slane %v2228_v33, 1 }
 0x52b   :  { %9245 = vmatprep.mubr.msk.bf16.mxu0 %vm10627_vm0, %v15031_v45  ;;  %9362 = vmatpush3.bf16.msra.mxu0 %v10416_v29  ;;  %v12290_v12 = vsel %vm2739_vm1, %v2740_v40, %v2741_v1  ;;  %v3365_v49 = vshrl.u32 %v12277_v15, 16  ;;  %v3368_v19 = vshll.u32 %v12277_v15, 16  ;;  %v3724_v8 = vrot.slane %v7936_v52, 2 }
 0x52c   :  { %v1871_v57 = vadd.f32 %v8631_v53, %v8531_v61  ;;  %9363 = vmatprep.subr.bf16.mxu0 %v15031_v45  ;;  %v2231_v50 = vsel %vm2219_vm2, %v2226_v11, %v2230_v24  ;;  %v2234_v9 = vor.u32 %v2232_v27, %v2230_v24 }
 0x52d   :  { %9170 = vmatmul.mubr.bf16.vlgmr.msra.gmra.mrb[60].mxu1 %v2231_v50  ;;  %v3367_v23 = vrot.slane %v3365_v49, 1  ;;  %v3370_v63 = vrot.slane %v3368_v19, 2  ;;  %v10429_v49 = vld [vmem:[%s14865_s5 + $0xa0] sm:$0xff]  }
 0x52e   :  { %v8532_v2 = vpop.f32.mrb[20].mxu1  ;;  %v8347_v47 = vpack.c.bf16 %v1871_v57, %v1868_v10  ;;  %v8632_v7 = vpop.f32.mrb[80].mxu0  ;;  %9173 = vmatprep.mubr.msk.bf16.mxu1 %vm10627_vm0, %v15031_v45  ;;  %9290 = vmatpush3.bf16.msra.mxu1 %v10418_v32 }
 0x52f   :  { %v8533_v41 = vpop.f32.mrb[21].mxu1  ;;  %v8633_v60 = vpop.f32.mrb[81].mxu0  ;;  %9364 = vmatpush3.bf16.msra.mxu0 %v10417_v37  ;;  %v12301_v54 = vld [vmem:[#allocation2 + $0x10] sm:$0xff]   ;;  %9291 = vmatprep.subr.bf16.mxu1 %v15031_v45  ;;  %v3371_v24 = vor.u32 %v3370_v63, %v3367_v23 }
 0x530   :  { %v8534_v59 = vadd.f32 %v8533_v41, %v8532_v2  ;;  %v8535_v30 = vpop.f32.mrb[22].mxu1  ;;  %8421 = vst [vmem:[#allocation2 + $0x18] sm:$0xff] %v8347_v47   ;;  %v8634_v38 = vadd.f32 %v8633_v60, %v8632_v7  ;;  %v8635_v48 = vpop.f32.mrb[82].mxu0  ;;  %v12305_v42 = vld [vmem:[#allocation2 + $0xc] sm:$0xff]   ;;  %9365 = vmatprep.subr.bf16.mxu0 %v15031_v45  ;;  %v2236_v0 = vshll.u32 %v12301_v54, 16  ;;  %v2743_v20 = vrot.slane %v12301_v54, 1 }
 0x531   :  { %v8536_v26 = vpop.f32.mrb[23].mxu1  ;;  %v8636_v14 = vpop.f32.mrb[83].mxu0  ;;  %v3725_v25 = vrot.slane %v12305_v42, 2  ;;  %v3373_v3 = vshrl.u32 %v12305_v42, 16  ;;  %v3376_v17 = vshll.u32 %v12305_v42, 16  ;;  %v2240_v2 = vshrl.u32 %v12301_v54, 16 }
 0x532   :  { %v8537_v55 = vadd.f32 %v8536_v26, %v8535_v30  ;;  %v1876_v4 = vadd.f32 %v8634_v38, %v8534_v59  ;;  %v8637_v34 = vadd.f32 %v8636_v14, %v8635_v48  ;;  %9246 = vmatmul.mubr.bf16.gmra.mrb[128].mxu0 %v12301_v54  ;;  %v2238_v6 = vrot.slane %v2236_v0, 1  ;;  %9292 = vmatpush3.bf16.msra.mxu1 %v10421_v13  ;;  %v10428_v47 = vld [vmem:[%s14865_s5 + $0xf8] sm:$0xff]  }
 0x533   :  { %9249 = vmatprep.mubr.msk.bf16.mxu0 %vm10627_vm0, %v15031_v45  ;;  %9366 = vmatpush3.bf16.msra.mxu0 %v10420_v58  ;;  %v12329_v56 = vsel %vm2739_vm1, %v2741_v1, %v2743_v20  ;;  %v12334_v22 = vsel %vm3723_vm3, %v3724_v8, %v3725_v25  ;;  %v3375_v62 = vrot.slane %v3373_v3, 1  ;;  %v3378_v61 = vrot.slane %v3376_v17, 2 }
 0x534   :  { %v1879_v35 = vadd.f32 %v8637_v34, %v8537_v55  ;;  %9367 = vmatprep.subr.bf16.mxu0 %v15031_v45  ;;  %9293 = vmatprep.subr.bf16.mxu1 %v15031_v45  ;;  %v2239_v36 = vsel %vm2219_vm2, %v2234_v9, %v2238_v6  ;;  %v2242_v58 = vor.u32 %v2240_v2, %v2238_v6 }
 0x535   :  { %9174 = vmatmul.mubr.bf16.gmra.mrb[64].mxu1 %v2239_v36  ;;  %v12349_v1 = vor.u32 %v3378_v61, %v3375_v62 }
 0x536   :  { %v8538_v29 = vpop.f32.mrb[24].mxu1  ;;  %v8352_v31 = vpack.c.bf16 %v1879_v35, %v1876_v4  ;;  %v8638_v5 = vpop.f32.mrb[84].mxu0  ;;  %9177 = vmatprep.mubr.msk.bf16.mxu1 %vm10627_vm0, %v15031_v45  ;;  %9294 = vmatpush3.bf16.msra.mxu1 %v10423_v18  ;;  %v10432_v4 = vld [vmem:[%s14865_s5 + $0xa8] sm:$0xff]  }
 0x537   :  { %v8539_v51 = vpop.f32.mrb[25].mxu1  ;;  %v8639_v16 = vpop.f32.mrb[85].mxu0  ;;  %9368 = vmatpush3.bf16.msra.mxu0 %v10422_v28  ;;  %v12343_v37 = vld [vmem:[#allocation2 + $0x18] sm:$0xff]   ;;  %9295 = vmatprep.subr.bf16.mxu1 %v15031_v45  ;;  %v12365_v50 = vsel %vm3363_vm4, %v3371_v24, %v12349_v1 }
 0x538   :  { %v8540_v21 = vadd.f32 %v8539_v51, %v8538_v29  ;;  %v8541_v39 = vpop.f32.mrb[26].mxu1  ;;  %8422 = vst [vmem:[#allocation2 + $0x20] sm:$0xff] %v8352_v31   ;;  %v8640_v10 = vadd.f32 %v8639_v16, %v8638_v5  ;;  %v8641_v53 = vpop.f32.mrb[86].mxu0  ;;  %v12347_v40 = vld [vmem:[#allocation2 + $0x14] sm:$0xff]   ;;  %9369 = vmatprep.subr.bf16.mxu0 %v15031_v45  ;;  %v2244_v52 = vshll.u32 %v12343_v37, 16  ;;  %v2745_v7 = vrot.slane %v12343_v37, 1 }
 0x539   :  { %v8542_v33 = vpop.f32.mrb[27].mxu1  ;;  %v8642_v11 = vpop.f32.mrb[87].mxu0  ;;  %v3727_v41 = vrot.slane %v12347_v40, 2  ;;  %v3382_v59 = vshrl.u32 %v12347_v40, 16  ;;  %v3385_v48 = vshll.u32 %v12347_v40, 16  ;;  %v2248_v29 = vshrl.u32 %v12343_v37, 16 }
 0x53a   :  { %v8543_v57 = vadd.f32 %v8542_v33, %v8541_v39  ;;  %v1884_v32 = vadd.f32 %v8640_v10, %v8540_v21  ;;  %v8643_v44 = vadd.f32 %v8642_v11, %v8641_v53  ;;  %9250 = vmatmul.mubr.bf16.gmra.mrb[132].mxu0 %v12343_v37  ;;  %v2246_v13 = vrot.slane %v2244_v52, 1  ;;  %9296 = vmatpush3.bf16.msra.mxu1 %v10427_v43  ;;  %v10433_v43 = vld [vmem:[%s14865_s5 + $0xb0] sm:$0xff]   ;;  %v10435_v24 = vld [vmem:[%s14865_s5 + $0xb8] sm:$0xff]  }
 0x53b   :  { %9253 = vmatprep.mubr.msk.bf16.mxu0 %vm10627_vm0, %v15031_v45  ;;  %9370 = vmatpush3.bf16.msra.mxu0 %v10426_v46  ;;  %v12376_v30 = vsel %vm2739_vm1, %v2743_v20, %v2745_v7  ;;  %v12381_v38 = vsel %vm3723_vm3, %v3725_v25, %v3727_v41  ;;  %v3384_v54 = vrot.slane %v3382_v59, 1  ;;  %v3387_v6 = vrot.slane %v3385_v48, 2 }
 0x53c   :  { %v1887_v27 = vadd.f32 %v8643_v44, %v8543_v57  ;;  %9371 = vmatprep.subr.bf16.mxu0 %v15031_v45  ;;  %9297 = vmatprep.subr.bf16.mxu1 %v15031_v45  ;;  %v2247_v19 = vsel %vm2219_vm2, %v2242_v58, %v2246_v13  ;;  %v2250_v36 = vor.u32 %v2248_v29, %v2246_v13 }
 0x53d   :  { %9178 = vmatmul.mubr.bf16.gmra.mrb[68].mxu1 %v2247_v19  ;;  %v3388_v5 = vor.u32 %v3387_v6, %v3384_v54 }
 0x53e   :  { %v8544_v60 = vpop.f32.mrb[28].mxu1  ;;  %v8357_v26 = vpack.c.bf16 %v1887_v27, %v1884_v32  ;;  %v8644_v55 = vpop.f32.mrb[88].mxu0  ;;  %9181 = vmatprep.mubr.msk.bf16.mxu1 %vm10627_vm0, %v15031_v45  ;;  %9298 = vmatpush3.bf16.msra.mxu1 %v10429_v49 }
 0x53f   :  { %v8545_v14 = vpop.f32.mrb[29].mxu1  ;;  %v8645_v0 = vpop.f32.mrb[89].mxu0  ;;  %9372 = vmatpush3.bf16.msra.mxu0 %v10428_v47  ;;  %v12388_v23 = vld [vmem:[#allocation2 + $0x20] sm:$0xff]   ;;  %9299 = vmatprep.subr.bf16.mxu1 %v15031_v45  ;;  %v12416_v10 = vsel %vm3363_vm4, %v12349_v1, %v3388_v5 }
 0x540   :  { %v8546_v34 = vadd.f32 %v8545_v14, %v8544_v60  ;;  %v8547_v8 = vpop.f32.mrb[30].mxu1  ;;  %8423 = vst [vmem:[#allocation2 + $0x28] sm:$0xff] %v8357_v26   ;;  %v8646_v28 = vadd.f32 %v8645_v0, %v8644_v55  ;;  %v8647_v20 = vpop.f32.mrb[90].mxu0  ;;  %v12392_v3 = vld [vmem:[#allocation2 + $0x1c] sm:$0xff]   ;;  %9493 = vmatprep.subr.bf16.mxu0 %v15031_v45  ;;  %v2252_v63 = vshll.u32 %v12388_v23, 16  ;;  %v2747_v62 = vrot.slane %v12388_v23, 1 }
 0x541   :  { %v8548_v25 = vpop.f32.mrb[31].mxu1  ;;  %v8648_v9 = vpop.f32.mrb[91].mxu0  ;;  %v3729_v31 = vrot.slane %v12392_v3, 2  ;;  %v3391_v61 = vshrl.u32 %v12392_v3, 16  ;;  %v3394_v53 = vshll.u32 %v12392_v3, 16  ;;  %v2256_v48 = vshrl.u32 %v12388_v23, 16 }
 0x542   :  { %v8549_v35 = vadd.f32 %v8548_v25, %v8547_v8  ;;  %v1892_v18 = vadd.f32 %v8646_v28, %v8546_v34  ;;  %v8649_v17 = vadd.f32 %v8648_v9, %v8647_v20  ;;  %9254 = vmatmul.mubr.bf16.gmra.mrb[136].mxu0 %v12388_v23  ;;  %v2254_v46 = vrot.slane %v2252_v63, 1  ;;  %9300 = vmatpush3.bf16.msra.mxu1 %v10432_v4 }
 0x543   :  { %9257 = vmatprep.mubr.msk.bf16.mxu0 %vm10627_vm0, %v15031_v45  ;;  %9301 = vmatprep.subr.bf16.mxu1 %v15031_v45  ;;  %v12409_v16 = vsel %vm2739_vm1, %v2745_v7, %v2747_v62  ;;  %v12412_v39 = vsel %vm3723_vm3, %v3727_v41, %v3729_v31  ;;  %v3393_v32 = vrot.slane %v3391_v61, 1  ;;  %v3396_v49 = vrot.slane %v3394_v53, 2 }
 0x544   :  { %v1895_v51 = vadd.f32 %v8649_v17, %v8549_v35  ;;  %v2255_v11 = vsel %vm2219_vm2, %v2250_v36, %v2254_v46  ;;  %v2258_v54 = vor.u32 %v2256_v48, %v2254_v46 }
 0x545   :  { %9182 = vmatmul.mubr.bf16.gmra.mrb[72].mxu1 %v2255_v11  ;;  %v3397_v19 = vor.u32 %v3396_v49, %v3393_v32 }
 0x546   :  { %v8550_v21 = vpop.f32.mrb[32].mxu1  ;;  %v8362_v33 = vpack.c.bf16 %v1895_v51, %v1892_v18  ;;  %v8650_v37 = vpop.f32.mrb[92].mxu0  ;;  %9185 = vmatprep.mubr.msk.bf16.mxu1 %vm10627_vm0, %v15031_v45  ;;  %9302 = vmatpush3.bf16.msra.mxu1 %v10433_v43 }
 0x547   :  { %v8551_v57 = vpop.f32.mrb[33].mxu1  ;;  %v8651_v2 = vpop.f32.mrb[93].mxu0  ;;  %v12423_v41 = vld [vmem:[#allocation2 + $0x28] sm:$0xff]   ;;  %9303 = vmatprep.subr.bf16.mxu1 %v15031_v45  ;;  %v12446_v25 = vsel %vm3363_vm4, %v3388_v5, %v3397_v19 }
 0x548   :  { %v8552_v44 = vadd.f32 %v8551_v57, %v8550_v21  ;;  %v8553_v52 = vpop.f32.mrb[34].mxu1  ;;  %8424 = vst [vmem:[#allocation2 + $0x30] sm:$0xff] %v8362_v33   ;;  %v8652_v47 = vadd.f32 %v8651_v2, %v8650_v37  ;;  %v8653_v1 = vpop.f32.mrb[94].mxu0  ;;  %v12427_v27 = vld [vmem:[#allocation2 + $0x24] sm:$0xff]   ;;  %v2260_v26 = vshll.u32 %v12423_v41, 16  ;;  %v2749_v55 = vrot.slane %v12423_v41, 1 }
 0x549   :  { %v8554_v7 = vpop.f32.mrb[35].mxu1  ;;  %v8654_v13 = vpop.f32.mrb[95].mxu0  ;;  %v3731_v14 = vrot.slane %v12427_v27, 2  ;;  %v3400_v0 = vshrl.u32 %v12427_v27, 16  ;;  %v3403_v23 = vshll.u32 %v12427_v27, 16  ;;  %v2264_v37 = vshrl.u32 %v12423_v41, 16 }
 0x54a   :  { %v8555_v58 = vadd.f32 %v8554_v7, %v8553_v52  ;;  %v1900_v59 = vadd.f32 %v8652_v47, %v8552_v44  ;;  %v8655_v60 = vadd.f32 %v8654_v13, %v8653_v1  ;;  %9258 = vmatmul.mubr.bf16.gmra.mrb[140].mxu0 %v12423_v41  ;;  %v2262_v34 = vrot.slane %v2260_v26, 1  ;;  %9304 = vmatpush3.bf16.msra.mxu1 %v10435_v24 }
 0x54b   :  { %9261 = vmatprep.mubr.msk.bf16.mxu0 %vm10627_vm0, %v15031_v45  ;;  %v12439_v28 = vsel %vm2739_vm1, %v2747_v62, %v2749_v55  ;;  %9425 = vmatprep.subr.bf16.mxu1 %v15031_v45  ;;  %v12443_v20 = vsel %vm3723_vm3, %v3729_v31, %v3731_v14  ;;  %v3402_v17 = vrot.slane %v3400_v0, 1  ;;  %v3405_v21 = vrot.slane %v3403_v23, 2 }
 0x54c   :  { %v1903_v4 = vadd.f32 %v8655_v60, %v8555_v58  ;;  %v2263_v18 = vsel %vm2219_vm2, %v2258_v54, %v2262_v34  ;;  %v2266_v2 = vor.u32 %v2264_v37, %v2262_v34 }
 0x54d   :  { %9186 = vmatmul.mubr.bf16.gmra.mrb[76].mxu1 %v2263_v18  ;;  %v3406_v32 = vor.u32 %v3405_v21, %v3402_v17 }
 0x54e   :  { %v8556_v8 = vpop.f32.mrb[36].mxu1  ;;  %v8367_v35 = vpack.c.bf16 %v1903_v4, %v1900_v59  ;;  %v8656_v9 = vpop.f32.mrb[96].mxu0  ;;  %9189 = vmatprep.mubr.msk.bf16.mxu1 %vm10627_vm0, %v15031_v45 }
 0x54f   :  { %v8557_v6 = vpop.f32.mrb[37].mxu1  ;;  %v8657_v63 = vpop.f32.mrb[97].mxu0  ;;  %v10409_v46 = vld [vmem:[#allocation2 + $0x30] sm:$0xff]   ;;  %v12466_v41 = vsel %vm3363_vm4, %v3397_v19, %v3406_v32 }
 0x550   :  { %v8558_v29 = vadd.f32 %v8557_v6, %v8556_v8  ;;  %v8559_v62 = vpop.f32.mrb[38].mxu1  ;;  %8425 = vst [vmem:[#allocation2 + $0x38] sm:$0xff] %v8367_v35   ;;  %v8658_v51 = vadd.f32 %v8657_v63, %v8656_v9  ;;  %v8659_v36 = vpop.f32.mrb[98].mxu0  ;;  %v12452_v5 = vld [vmem:[#allocation2 + $0x2c] sm:$0xff]   ;;  %v2268_v57 = vshll.u32 %v10409_v46, 16  ;;  %v2751_v11 = vrot.slane %v10409_v46, 1 }
 0x551   :  { %v8560_v31 = vpop.f32.mrb[39].mxu1  ;;  %v8660_v61 = vpop.f32.mrb[99].mxu0  ;;  %v3733_v24 = vrot.slane %v12452_v5, 2  ;;  %v3409_v47 = vshrl.u32 %v12452_v5, 16  ;;  %v3412_v13 = vshll.u32 %v12452_v5, 16  ;;  %v2272_v17 = vshrl.u32 %v10409_v46, 16 }
 0x552   :  { %v8561_v43 = vadd.f32 %v8560_v31, %v8559_v62  ;;  %v1908_v53 = vadd.f32 %v8658_v51, %v8558_v29  ;;  %v8661_v33 = vadd.f32 %v8660_v61, %v8659_v36  ;;  %9262 = vmatmul.mubr.bf16.gmra.mrb[144].mxu0 %v10409_v46  ;;  %v2270_v52 = vrot.slane %v2268_v57, 1 }
 0x553   :  { %9265 = vmatprep.mubr.msk.bf16.mxu0 %vm10627_vm0, %v15031_v45  ;;  %v12460_v7 = vsel %vm2739_vm1, %v2749_v55, %v2751_v11  ;;  %v12463_v58 = vsel %vm3723_vm3, %v3731_v14, %v3733_v24  ;;  %v3411_v26 = vrot.slane %v3409_v47, 1  ;;  %v3414_v9 = vrot.slane %v3412_v13, 2 }
 0x554   :  { %v1911_v44 = vadd.f32 %v8661_v33, %v8561_v43  ;;  %v2271_v48 = vsel %vm2219_vm2, %v2266_v2, %v2270_v52  ;;  %v2274_v31 = vor.u32 %v2272_v17, %v2270_v52 }
 0x555   :  { %9190 = vmatmul.mubr.bf16.gmra.mrb[80].mxu1 %v2271_v48  ;;  %v3415_v51 = vor.u32 %v3414_v9, %v3411_v26 }
 0x556   :  { %v8562_v1 = vpop.f32.mrb[40].mxu1  ;;  %v8372_v49 = vpack.c.bf16 %v1911_v44, %v1908_v53  ;;  %v8662_v59 = vpop.f32.mrb[100].mxu0  ;;  %9193 = vmatprep.mubr.msk.bf16.mxu1 %vm10627_vm0, %v15031_v45 }
 0x557   :  { %v8563_v60 = vpop.f32.mrb[41].mxu1  ;;  %v8663_v54 = vpop.f32.mrb[101].mxu0  ;;  %v10410_v8 = vld [vmem:[#allocation2 + $0x38] sm:$0xff]   ;;  %v12485_v46 = vsel %vm3363_vm4, %v3406_v32, %v3415_v51 }
 0x558   :  { %v8564_v4 = vadd.f32 %v8563_v60, %v8562_v1  ;;  %v8565_v34 = vpop.f32.mrb[42].mxu1  ;;  %8426 = vst [vmem:[#allocation2 + $0x40] sm:$0xff] %v8372_v49   ;;  %v8664_v55 = vadd.f32 %v8663_v54, %v8662_v59  ;;  %v8665_v0 = vpop.f32.mrb[102].mxu0  ;;  %v12472_v19 = vld [vmem:[#allocation2 + $0x34] sm:$0xff]   ;;  %v2276_v29 = vshll.u32 %v10410_v8, 16  ;;  %v2753_v63 = vrot.slane %v10410_v8, 1 }
 0x559   :  { %v8566_v14 = vpop.f32.mrb[43].mxu1  ;;  %v8666_v35 = vpop.f32.mrb[103].mxu0  ;;  %v3735_v62 = vrot.slane %v12472_v19, 2  ;;  %v3418_v61 = vshrl.u32 %v12472_v19, 16  ;;  %v3421_v37 = vshll.u32 %v12472_v19, 16 }
 0x55a   :  { %v8567_v23 = vadd.f32 %v8566_v14, %v8565_v34  ;;  %v1916_v6 = vadd.f32 %v8664_v55, %v8564_v4  ;;  %v8667_v18 = vadd.f32 %v8666_v35, %v8665_v0  ;;  %9266 = vmatmul.mubr.bf16.gmra.mrb[148].mxu0 %v10410_v8  ;;  %v2278_v43 = vrot.slane %v2276_v29, 1 }
 0x55b   :  { %9269 = vmatprep.mubr.msk.bf16.mxu0 %vm10627_vm0, %v15031_v45  ;;  %v12479_v53 = vsel %vm2739_vm1, %v2751_v11, %v2753_v63  ;;  %v12482_v33 = vsel %vm3723_vm3, %v3733_v24, %v3735_v62  ;;  %v3420_v47 = vrot.slane %v3418_v61, 1  ;;  %v3423_v4 = vrot.slane %v3421_v37, 2 }
 0x55c   :  { %v1919_v36 = vadd.f32 %v8667_v18, %v8567_v23  ;;  %v2279_v52 = vsel %vm2219_vm2, %v2274_v31, %v2278_v43  ;;  %v2280_v55 = vshrl.u32 %v10410_v8, 16 }
 0x55d   :  { %9194 = vmatmul.mubr.bf16.gmra.mrb[84].mxu1 %v2279_v52  ;;  %v3424_v35 = vor.u32 %v3423_v4, %v3420_v47 }
 0x55e   :  { %v8568_v21 = vpop.f32.mrb[44].mxu1  ;;  %v8377_v57 = vpack.c.bf16 %v1919_v36, %v1916_v6  ;;  %v8668_v44 = vpop.f32.mrb[104].mxu0  ;;  %9197 = vmatprep.mubr.msk.bf16.mxu1 %vm10627_vm0, %v15031_v45  ;;  %v2282_v6 = vor.u32 %v2280_v55, %v2278_v43 }
 0x55f   :  { %v8569_v2 = vpop.f32.mrb[45].mxu1  ;;  %v8669_v13 = vpop.f32.mrb[105].mxu0  ;;  %v10411_v60 = vld [vmem:[#allocation2 + $0x40] sm:$0xff]   ;;  %v12504_v8 = vsel %vm3363_vm4, %v3415_v51, %v3424_v35 }
 0x560   :  { %v8570_v1 = vadd.f32 %v8569_v2, %v8568_v21  ;;  %v8571_v49 = vpop.f32.mrb[46].mxu1  ;;  %8427 = vst [vmem:[#allocation2 + $0x48] sm:$0xff] %v8377_v57   ;;  %v8670_v11 = vadd.f32 %v8669_v13, %v8668_v44  ;;  %v8671_v59 = vpop.f32.mrb[106].mxu0  ;;  %v12491_v32 = vld [vmem:[#allocation2 + $0x3c] sm:$0xff]   ;;  %v2284_v0 = vshll.u32 %v10411_v60, 16  ;;  %v2755_v14 = vrot.slane %v10411_v60, 1 }
 0x561   :  { %v8572_v24 = vpop.f32.mrb[47].mxu1  ;;  %v8672_v26 = vpop.f32.mrb[107].mxu0  ;;  %v3737_v23 = vrot.slane %v12491_v32, 2  ;;  %v3427_v17 = vshrl.u32 %v12491_v32, 16  ;;  %v3430_v61 = vshll.u32 %v12491_v32, 16 }
 0x562   :  { %v8573_v48 = vadd.f32 %v8572_v24, %v8571_v49  ;;  %v1924_v54 = vadd.f32 %v8670_v11, %v8570_v1  ;;  %v8673_v34 = vadd.f32 %v8672_v26, %v8671_v59  ;;  %9270 = vmatmul.mubr.bf16.gmra.mrb[152].mxu0 %v10411_v60  ;;  %v2286_v18 = vrot.slane %v2284_v0, 1 }
 0x563   :  { %9273 = vmatprep.mubr.msk.bf16.mxu0 %vm10627_vm0, %v15031_v45  ;;  %v12498_v36 = vsel %vm2739_vm1, %v2753_v63, %v2755_v14  ;;  %v12501_v31 = vsel %vm3723_vm3, %v3735_v62, %v3737_v23  ;;  %v3429_v44 = vrot.slane %v3427_v17, 1  ;;  %v3432_v59 = vrot.slane %v3430_v61, 2 }
 0x564   :  { %v1927_v9 = vadd.f32 %v8673_v34, %v8573_v48  ;;  %v2287_v43 = vsel %vm2219_vm2, %v2282_v6, %v2286_v18  ;;  %v2288_v26 = vshrl.u32 %v10411_v60, 16 }
 0x565   :  { %9198 = vmatmul.mubr.bf16.gmra.mrb[88].mxu1 %v2287_v43  ;;  %v3433_v55 = vor.u32 %v3432_v59, %v3429_v44 }
 0x566   :  { %v8574_v29 = vpop.f32.mrb[48].mxu1  ;;  %v8382_v21 = vpack.c.bf16 %v1927_v9, %v1924_v54  ;;  %v8674_v37 = vpop.f32.mrb[108].mxu0  ;;  %9201 = vmatprep.mubr.msk.bf16.mxu1 %vm10627_vm0, %v15031_v45  ;;  %v2290_v9 = vor.u32 %v2288_v26, %v2286_v18 }
 0x567   :  { %v8575_v57 = vpop.f32.mrb[49].mxu1  ;;  %v8675_v52 = vpop.f32.mrb[109].mxu0  ;;  %v10412_v13 = vld [vmem:[#allocation2 + $0x48] sm:$0xff]   ;;  %v12523_v60 = vsel %vm3363_vm4, %v3424_v35, %v3433_v55 }
 0x568   :  { %v8576_v2 = vadd.f32 %v8575_v57, %v8574_v29  ;;  %v8577_v47 = vpop.f32.mrb[50].mxu1  ;;  %8428 = vst [vmem:[#allocation2 + $0x50] sm:$0xff] %v8382_v21   ;;  %v8676_v63 = vadd.f32 %v8675_v52, %v8674_v37  ;;  %v8677_v1 = vpop.f32.mrb[110].mxu0  ;;  %v12510_v51 = vld [vmem:[#allocation2 + $0x44] sm:$0xff]   ;;  %v2292_v4 = vshll.u32 %v10412_v13, 16  ;;  %v2757_v54 = vrot.slane %v10412_v13, 1 }
 0x569   :  { %v8578_v62 = vpop.f32.mrb[51].mxu1  ;;  %v8678_v11 = vpop.f32.mrb[111].mxu0  ;;  %v3739_v34 = vrot.slane %v12510_v51, 2  ;;  %v3436_v17 = vshrl.u32 %v12510_v51, 16  ;;  %v3439_v37 = vshll.u32 %v12510_v51, 16  ;;  %v2296_v26 = vshrl.u32 %v10412_v13, 16 }
 0x56a   :  { %v8579_v49 = vadd.f32 %v8578_v62, %v8577_v47  ;;  %v1932_v24 = vadd.f32 %v8676_v63, %v8576_v2  ;;  %v8679_v48 = vadd.f32 %v8678_v11, %v8677_v1  ;;  %9274 = vmatmul.mubr.bf16.gmra.mrb[156].mxu0 %v10412_v13  ;;  %v2294_v6 = vrot.slane %v2292_v4, 1 }
 0x56b   :  { %9277 = vmatprep.mubr.msk.bf16.mxu0 %vm10627_vm0, %v15031_v45  ;;  %v12517_v61 = vsel %vm2739_vm1, %v2755_v14, %v2757_v54  ;;  %v12520_v21 = vsel %vm3723_vm3, %v3737_v23, %v3739_v34  ;;  %v3438_v2 = vrot.slane %v3436_v17, 1  ;;  %v3441_v59 = vrot.slane %v3439_v37, 2 }
 0x56c   :  { %v1935_v0 = vadd.f32 %v8679_v48, %v8579_v49  ;;  %v2295_v18 = vsel %vm2219_vm2, %v2290_v9, %v2294_v6 }
 0x56d   :  { %9202 = vmatmul.mubr.bf16.gmra.mrb[92].mxu1 %v2295_v18  ;;  %v3442_v17 = vor.u32 %v3441_v59, %v3438_v2 }
 0x56e   :  { %v8580_v29 = vpop.f32.mrb[52].mxu1  ;;  %v8387_v57 = vpack.c.bf16 %v1935_v0, %v1932_v24  ;;  %v8680_v43 = vpop.f32.mrb[112].mxu0  ;;  %9205 = vmatprep.mubr.msk.bf16.mxu1 %vm10627_vm0, %v15031_v45 }
 0x56f   :  { %v8581_v44 = vpop.f32.mrb[53].mxu1  ;;  %v8681_v47 = vpop.f32.mrb[113].mxu0  ;;  %v10415_v62 = vld [vmem:[#allocation2 + $0x50] sm:$0xff]   ;;  %v12541_v13 = vsel %vm3363_vm4, %v3433_v55, %v3442_v17 }
 0x570   :  { %v8582_v52 = vadd.f32 %v8581_v44, %v8580_v29  ;;  %v8583_v63 = vpop.f32.mrb[54].mxu1  ;;  %8429 = vst [vmem:[#allocation2 + $0x58] sm:$0xff] %v8387_v57   ;;  %v8682_v14 = vadd.f32 %v8681_v47, %v8680_v43  ;;  %v8683_v1 = vpop.f32.mrb[114].mxu0  ;;  %v12529_v35 = vld [vmem:[#allocation2 + $0x4c] sm:$0xff]   ;;  %v2300_v4 = vshll.u32 %v10415_v62, 16  ;;  %v2759_v0 = vrot.slane %v10415_v62, 1 }
 0x571   :  { %v8584_v23 = vpop.f32.mrb[55].mxu1  ;;  %v8684_v11 = vpop.f32.mrb[115].mxu0  ;;  %v3741_v9 = vrot.slane %v12529_v35, 2  ;;  %v2298_v57 = vor.u32 %v2296_v26, %v2294_v6  ;;  %v2304_v44 = vshrl.u32 %v10415_v62, 16  ;;  %15033 = vst [vmem:[#allocation14_spill] sm:$0xff] %v12541_v13  ;;  %v3445_v2 = vshrl.u32 %v12529_v35, 16 }
 0x572   :  { %v8585_v49 = vadd.f32 %v8584_v23, %v8583_v63  ;;  %v1940_v24 = vadd.f32 %v8682_v14, %v8582_v52  ;;  %v8685_v48 = vadd.f32 %v8684_v11, %v8683_v1  ;;  %9278 = vmatmul.mubr.bf16.gmra.mrb[160].mxu0 %v10415_v62  ;;  %v2302_v43 = vrot.slane %v2300_v4, 1 }
 0x573   :  { %9281 = vmatprep.mubr.msk.bf16.mxu0 %vm10627_vm0, %v15031_v45  ;;  %v12535_v47 = vsel %vm2739_vm1, %v2757_v54, %v2759_v0  ;;  %v12538_v37 = vsel %vm3723_vm3, %v3739_v34, %v3741_v9  ;;  %v3448_v6 = vshll.u32 %v12529_v35, 16 }
 0x574   :  { %v1943_v29 = vadd.f32 %v8685_v48, %v8585_v49  ;;  %15032 = vst [vmem:[#allocation13_spill] sm:$0xff] %v12538_v37  ;;  %v2303_v63 = vsel %vm2219_vm2, %v2298_v57, %v2302_v43  ;;  %v2306_v59 = vor.u32 %v2304_v44, %v2302_v43 }
 0x575   :  { %9206 = vmatmul.mubr.bf16.gmra.mrb[96].mxu1 %v2303_v63  ;;  %v3447_v63 = vrot.slane %v3445_v2, 1 }
 0x576   :  { %v8586_v18 = vpop.f32.mrb[56].mxu1  ;;  %v8392_v52 = vpack.c.bf16 %v1943_v29, %v1940_v24  ;;  %v8686_v14 = vpop.f32.mrb[116].mxu0  ;;  %9209 = vmatprep.mubr.msk.bf16.mxu1 %vm10627_vm0, %v15031_v45 }
 0x577   :  { %v8587_v1 = vpop.f32.mrb[57].mxu1  ;;  %v10419_v23 = vld [vmem:[#allocation2 + $0x58] sm:$0xff]   ;;  %v8687_v54 = vpop.f32.mrb[117].mxu0 }
 0x578   :  { %v8588_v62 = vadd.f32 %v8587_v1, %v8586_v18  ;;  %8430 = vst [vmem:[#allocation2 + $0x60] sm:$0xff] %v8392_v52   ;;  %v8688_v34 = vadd.f32 %v8687_v54, %v8686_v14  ;;  %v8589_v55 = vpop.f32.mrb[58].mxu1  ;;  %v8689_v49 = vpop.f32.mrb[118].mxu0  ;;  %v12548_v11 = vld [vmem:[#allocation2 + $0x54] sm:$0xff]   ;;  %v2308_v24 = vshll.u32 %v10419_v23, 16  ;;  %v2761_v52 = vrot.slane %v10419_v23, 1 }
 0x579   :  { %v8590_v48 = vpop.f32.mrb[59].mxu1  ;;  %v8690_v26 = vpop.f32.mrb[119].mxu0  ;;  %v3743_v14 = vrot.slane %v12548_v11, 2  ;;  %v3450_v1 = vrot.slane %v3448_v6, 2  ;;  %v3454_v43 = vshrl.u32 %v12548_v11, 16 }
 0x57a   :  { %9282 = vmatmul.mubr.bf16.gmra.mrb[164].mxu0 %v10419_v23  ;;  %v1948_v4 = vadd.f32 %v8688_v34, %v8588_v62  ;;  %v8591_v29 = vadd.f32 %v8590_v48, %v8589_v55  ;;  %v8691_v57 = vadd.f32 %v8690_v26, %v8689_v49  ;;  %v2310_v18 = vrot.slane %v2308_v24, 1 }
 0x57b   :  { %9285 = vmatprep.mubr.msk.bf16.mxu0 %vm10627_vm0, %v15031_v45  ;;  %v12556_v37 = vsel %vm2739_vm1, %v2759_v0, %v2761_v52  ;;  %v12559_v62 = vsel %vm3723_vm3, %v3741_v9, %v3743_v14  ;;  %v3451_v34 = vor.u32 %v3450_v1, %v3447_v63  ;;  %v3456_v55 = vrot.slane %v3454_v43, 1 }
 0x57c   :  { %v8316_v54 = vpack.c.bf16 %v1948_v4, %v1948_v4  ;;  %v1951_v13 = vadd.f32 %v8691_v57, %v8591_v29  ;;  %v2311_v44 = vsel %vm2219_vm2, %v2306_v59, %v2310_v18  ;;  %v3457_v49 = vshll.u32 %v12548_v11, 16 }
 0x57d   :  { %9210 = vmatmul.mubr.bf16.gmra.mrb[100].mxu1 %v2311_v44  ;;  %v12569_v9 = vsel %vm3363_vm4, %v3442_v17, %v3451_v34  ;;  %v2312_v59 = vshrl.u32 %v10419_v23, 16  ;;  %v3096_v44 = vrot.slane %v12305_v42, 1 }
 0x57e   :  { %2092 = vst [vmem:[#allocation2 + $0x68] sm:$0xf] %v8316_v54  ;;  %v8317_v2 = vpack.c.bf16 %v1951_v13, %v1951_v13  ;;  %9213 = vmatprep.mubr.msk.bf16.mxu1 %vm10627_vm0, %v15031_v45  ;;  %v3459_v13 = vrot.slane %v3457_v49, 2 }
 0x57f   :  { %v2119_v6 = vld [vmem:[#allocation2 + $0x60] sm:$0xf]  ;;  %v2136_v24 = vld [vmem:[#allocation2 + $0x64] sm:$0x1]  ;;  %v2314_v43 = vor.u32 %v2312_v59, %v2310_v18 }
 0x580   :  { %v12562_v48 = vcombine.low %v2119_v6, %v2136_v24  ;;  %v7824_v26 = vcombine.low %v2119_v6, %v2119_v6  ;;  %2093 = vst [vmem:[#allocation2 + $0x6c] sm:$0x7] %v8317_v2  ;;  %v12566_v0 = vld [vmem:[#allocation2 + $0x5c] sm:$0xff]   ;;  %v3460_v63 = vor.u32 %v3459_v13, %v3456_v55  ;;  %v12584_v2 = vld [vmem:[#allocation2 + $0x64] sm:$0xf] }
 0x581   :  { %v3745_v57 = vrot.slane %v12566_v0, 2  ;;  %v3463_v1 = vshrl.u32 %v12566_v0, 16  ;;  %v3466_v54 = vshll.u32 %v12566_v0, 16  ;;  %v10445_v13 = vld [vmem:[%s14865_s5 + $0x140] sm:$0xff]  }
 0x582   :  { %9286 = vmatmul.mubr.bf16.gmra.mrb[168].mxu0 %v7824_v26  ;;  %v2316_v4 = vshll.u32 %v12562_v48, 16  ;;  %v14916_v29 = vrot.slane %v12562_v48, 1  ;;  %v12590_v55 = vsel %vm3363_vm4, %v3451_v34, %v3460_v63 }
 0x583   :  { %9373 = vmatprep.mubr.msk.bf16.mxu0 %vm10627_vm0, %v15031_v45  ;;  %v12587_v6 = vsel %vm3723_vm3, %v3743_v14, %v3745_v57  ;;  %v3465_v24 = vrot.slane %v3463_v1, 1  ;;  %v3468_v26 = vrot.slane %v3466_v54, 2 }
 0x584   :  { %v2318_v17 = vrot.slane %v2316_v4, 1  ;;  %v12582_v23 = vsel %vm2739_vm1, %v2761_v52, %v14916_v29  ;;  %v3095_v52 = vrot.slane %v12277_v15, 1 }
 0x585   :  { %v3342_v49 = vld [vmem:[#allocation2 + $0x68] sm:$0x3]  ;;  %v3469_v59 = vor.u32 %v3468_v26, %v3465_v24  ;;  %v2320_v24 = vshrl.u32 %v12562_v48, 16 }
 0x586   :  { %v2319_v18 = vsel %vm2219_vm2, %v2314_v43, %v2318_v17  ;;  %v12594_v42 = vcombine.low %v12584_v2, %v3342_v49  ;;  %v3097_v1 = vsel %vm2739_vm1, %v3095_v52, %v3096_v44  ;;  %v10446_v26 = vld [vmem:[%s14865_s5 + $0x148] sm:$0xff]  }
 0x587   :  { %9214 = vmatmul.mubr.bf16.gmra.mrb[104].mxu1 %v2319_v18  ;;  %v12607_v54 = vsel %vm3363_vm4, %v3460_v63, %v3469_v59  ;;  %v2322_v18 = vor.u32 %v2320_v24, %v2318_v17  ;;  %v10450_v17 = vld [vmem:[%s14865_s5 + $0x100] sm:$0xff]   ;;  %v12670_v24 = vld [vmem:[#allocation2 + $0x30] sm:$0xff]  }
 0x588   :  { %9217 = vmatprep.mubr.msk.bf16.mxu1 %vm10627_vm0, %v15031_v45  ;;  %v14915_v14 = vrot.slane %v12594_v42, 2  ;;  %v3472_v34 = vshrl.u32 %v12594_v42, 16  ;;  %v3475_v4 = vshll.u32 %v12594_v42, 16  ;;  %15036 = vst [vmem:[#allocation17_spill] sm:$0xff] %v12670_v24 }
 0x58a   :  { %9374 = vmatmul.mubr.bf16.vlgmr.msra.gmra.mrb[172].mxu0 %v3097_v1  ;;  %v12612_v15 = vsel %vm3723_vm3, %v3745_v57, %v14915_v14  ;;  %v3474_v43 = vrot.slane %v3472_v34, 1  ;;  %v3477_v49 = vrot.slane %v3475_v4, 2  ;;  %v3098_v57 = vrot.slane %v12347_v40, 1  ;;  %v10449_v40 = vld [vmem:[%s14865_s5 + $0x158] sm:$0xff]   ;;  %v10454_v4 = vld [vmem:[%s14865_s5 + $0x108] sm:$0xff]  }
 0x58b   :  { %9377 = vmatprep.mubr.msk.bf16.mxu0 %vm10627_vm0, %v15031_v45  ;;  %9494 = vmatpush3.bf16.msra.mxu0 %v10445_v13  ;;  %v10448_v13 = vld [vmem:[%s14865_s5 + $0x150] sm:$0xff]  }
 0x58c   :  { %9495 = vmatprep.subr.bf16.mxu0 %v15031_v45  ;;  %v12621_v63 = vor.u32 %v3477_v49, %v3474_v43  ;;  %v3099_v34 = vsel %vm2739_vm1, %v3096_v44, %v3098_v57  ;;  %v10453_v44 = vld [vmem:[%s14865_s5 + $0x160] sm:$0xff]   ;;  %v12664_v43 = vld [vmem:[#allocation2 + $0x28] sm:$0xff]   ;;  %v10456_v49 = vld [vmem:[%s14865_s5 + $0x110] sm:$0xff]  }
 0x58e   :  { %15034 = vst [vmem:[#allocation15_spill] sm:$0xff] %v12621_v63  ;;  %v12626_v52 = vsel %vm3363_vm4, %v3469_v59, %v12621_v63  ;;  %v3100_v59 = vrot.slane %v12392_v3, 1  ;;  %v12662_v3 = vld [vmem:[#allocation2 + $0x20] sm:$0xff]  }
 0x58f   :  { %15035 = vst [vmem:[#allocation16_spill] sm:$0xff] %v12626_v52  ;;  %9218 = vmatmul.mubr.bf16.gmra.mrb[108].mxu1 %v2322_v18  ;;  %9496 = vmatpush3.bf16.msra.mxu0 %v10446_v26  ;;  %v12672_v26 = vld [vmem:[#allocation2 + $0x38] sm:$0xff]   ;;  %v3102_v18 = vrot.slane %v12427_v27, 1  ;;  %v14922_v29 = vrot.slane %v12662_v3, 3 }
 0x590   :  { %9305 = vmatprep.mubr.msk.bf16.mxu1 %vm10627_vm0, %v15031_v45  ;;  %9497 = vmatprep.subr.bf16.mxu0 %v15031_v45  ;;  %v3101_v1 = vsel %vm2739_vm1, %v3098_v57, %v3100_v59  ;;  %v12676_v57 = vld [vmem:[#allocation2 + $0x40] sm:$0xff]   ;;  %v10458_v27 = vld [vmem:[%s14865_s5 + $0x118] sm:$0xff]  }
 0x591   :  { %15037 = vst [vmem:[#allocation18_spill] sm:$0xff] %v12676_v57  ;;  %v3103_v63 = vsel %vm2739_vm1, %v3100_v59, %v3102_v18  ;;  %v4721_v52 = vrot.slane %v12676_v57, 3  ;;  %v10459_v57 = vld [vmem:[%s14865_s5 + $0x178] sm:$0xff]  }
 0x592   :  { %9378 = vmatmul.mubr.bf16.gmra.mrb[176].mxu0 %v3099_v34  ;;  %v4326_v34 = vld [vmem:[#allocation2 + $0x6c] sm:$0x7] }
 0x593   :  { %9381 = vmatprep.mubr.msk.bf16.mxu0 %vm10627_vm0, %v15031_v45  ;;  %9498 = vmatpush3.bf16.msra.mxu0 %v10448_v13  ;;  %v3995_v13 = vld [vmem:[#allocation2 + $0x68] sm:$0xf] }
 0x594   :  { %9499 = vmatprep.subr.bf16.mxu0 %v15031_v45  ;;  %v12689_v14 = vcombine.low %v3995_v13, %v4326_v34 }
 0x597   :  { %9306 = vmatmul.mubr.bf16.vlgmr.msra.gmra.mrb[112].mxu1 %v12290_v12  ;;  %9500 = vmatpush3.bf16.msra.mxu0 %v10449_v40  ;;  %v10455_v12 = vld [vmem:[%s14865_s5 + $0x168] sm:$0xff]  }
 0x598   :  { %9309 = vmatprep.mubr.msk.bf16.mxu1 %vm10627_vm0, %v15031_v45  ;;  %9426 = vmatpush3.bf16.msra.mxu1 %v10450_v17  ;;  %v12678_v40 = vld [vmem:[#allocation2 + $0x48] sm:$0xff]   ;;  %v10490_v17 = vld [vmem:[#allocation2 + $0x50] sm:$0xff]  }
 0x599   :  { %9501 = vmatprep.subr.bf16.mxu0 %v15031_v45  ;;  %9427 = vmatprep.subr.bf16.mxu1 %v15031_v45  ;;  %v4723_v59 = vrot.slane %v12678_v40, 3 }
 0x59a   :  { %9382 = vmatmul.mubr.bf16.gmra.mrb[180].mxu0 %v3101_v1  ;;  %v10492_v1 = vld [vmem:[#allocation2 + $0x60] sm:$0xff]  }
 0x59b   :  { %9385 = vmatprep.mubr.msk.bf16.mxu0 %vm10627_vm0, %v15031_v45  ;;  %9502 = vmatpush3.bf16.msra.mxu0 %v10453_v44  ;;  %v10457_v44 = vld [vmem:[%s14865_s5 + $0x170] sm:$0xff]  }
 0x59c   :  { %9428 = vmatpush3.bf16.msra.mxu1 %v10454_v4  ;;  %9503 = vmatprep.subr.bf16.mxu0 %v15031_v45  ;;  %v10491_v4 = vld [vmem:[#allocation2 + $0x58] sm:$0xff]  }
 0x59d   :  { %9429 = vmatprep.subr.bf16.mxu1 %v15031_v45 }
 0x59f   :  { %9310 = vmatmul.mubr.bf16.gmra.mrb[116].mxu1 %v12329_v56  ;;  %9504 = vmatpush3.bf16.msra.mxu0 %v10455_v12  ;;  %v4715_v56 = vrot.slane %v12664_v43, 3  ;;  %v4717_v12 = vrot.slane %v12670_v24, 3  ;;  %v4725_v24 = vrot.slane %v10490_v17, 3  ;;  %v10460_v17 = vld [vmem:[%s14865_s5 + $0x120] sm:$0xff]  }
 0x5a0   :  { %9313 = vmatprep.mubr.msk.bf16.mxu1 %vm10627_vm0, %v15031_v45  ;;  %9430 = vmatpush3.bf16.msra.mxu1 %v10456_v49  ;;  %v4719_v49 = vrot.slane %v12672_v26, 3 }
 0x5a1   :  { %9505 = vmatprep.subr.bf16.mxu0 %v15031_v45  ;;  %9431 = vmatprep.subr.bf16.mxu1 %v15031_v45  ;;  %v12702_v13 = vsel %vm4707_vm5, %v14922_v29, %v4715_v56  ;;  %v12705_v34 = vsel %vm4707_vm5, %v4715_v56, %v4717_v12  ;;  %v4729_v56 = vrot.slane %v10492_v1, 3 }
 0x5a2   :  { %9386 = vmatmul.mubr.bf16.gmra.mrb[184].mxu0 %v3103_v63  ;;  %15038 = vst [vmem:[#allocation19_spill] sm:$0xff] %v12702_v13  ;;  %15039 = vst [vmem:[#allocation20_spill] sm:$0xff] %v12705_v34  ;;  %v12714_v63 = vsel %vm4707_vm5, %v4717_v12, %v4719_v49  ;;  %v12717_v29 = vsel %vm4707_vm5, %v4719_v49, %v4721_v52  ;;  %v4727_v13 = vrot.slane %v10491_v4, 3  ;;  %v14923_v12 = vrot.slane %v12689_v14, 3 }
 0x5a3   :  { %9389 = vmatprep.mubr.msk.bf16.mxu0 %vm10627_vm0, %v15031_v45  ;;  %9506 = vmatpush3.bf16.msra.mxu0 %v10457_v44  ;;  %v12724_v44 = vsel %vm4707_vm5, %v4721_v52, %v4723_v59  ;;  %v12727_v34 = vsel %vm4707_vm5, %v4723_v59, %v4725_v24  ;;  %v3104_v49 = vrot.slane %v12452_v5, 1  ;;  %v10462_v5 = vld [vmem:[%s14865_s5 + $0x128] sm:$0xff]  }
 0x5a4   :  { %9432 = vmatpush3.bf16.msra.mxu1 %v10458_v27  ;;  %9507 = vmatprep.subr.bf16.mxu0 %v15031_v45  ;;  %v12733_v4 = vsel %vm4707_vm5, %v4725_v24, %v4727_v13  ;;  %v12736_v1 = vsel %vm4707_vm5, %v4727_v13, %v4729_v56  ;;  %v12741_v52 = vsel %vm4707_vm5, %v4729_v56, %v14923_v12  ;;  %v3110_v13 = vrot.slane %v12510_v51, 1  ;;  %v3012_v59 = vld [vmem:[#allocation2 + $0x68] sm:$0x1] }
 0x5a5   :  { %9433 = vmatprep.subr.bf16.mxu1 %v15031_v45  ;;  %15040 = vst [vmem:[#allocation22_spill] sm:$0xff] %v12741_v52  ;;  %v3105_v24 = vsel %vm2739_vm1, %v3102_v18, %v3104_v49  ;;  %v10464_v18 = vld [vmem:[%s14865_s5 + $0x138] sm:$0xff]  }
 0x5a7   :  { %9314 = vmatmul.mubr.bf16.gmra.mrb[120].mxu1 %v12376_v30  ;;  %9508 = vmatpush3.bf16.msra.mxu0 %v10459_v57  ;;  %v10463_v30 = vld [vmem:[%s14865_s5 + $0x130] sm:$0xff]   ;;  %v3106_v57 = vrot.slane %v12472_v19, 1  ;;  %v3108_v19 = vrot.slane %v12491_v32, 1 }
 0x5a8   :  { %9317 = vmatprep.mubr.msk.bf16.mxu1 %vm10627_vm0, %v15031_v45  ;;  %9434 = vmatpush3.bf16.msra.mxu1 %v10460_v17 }
 0x5a9   :  { %9435 = vmatprep.subr.bf16.mxu1 %v15031_v45  ;;  %9629 = vmatprep.subr.bf16.mxu0 %v15031_v45  ;;  %v3107_v27 = vsel %vm2739_vm1, %v3104_v49, %v3106_v57  ;;  %v3111_v32 = vsel %vm2739_vm1, %v3108_v19, %v3110_v13 }
 0x5aa   :  { %9390 = vmatmul.mubr.bf16.gmra.mrb[188].mxu0 %v3105_v24 }
 0x5ab   :  { %9393 = vmatprep.mubr.msk.bf16.mxu0 %vm10627_vm0, %v15031_v45 }
 0x5ac   :  { %9436 = vmatpush3.bf16.msra.mxu1 %v10462_v5  ;;  %v10469_v5 = vld [vmem:[%s14865_s5 + $0x180] sm:$0xff]  }
 0x5ad   :  { %9437 = vmatprep.subr.bf16.mxu1 %v15031_v45 }
 0x5af   :  { %9318 = vmatmul.mubr.bf16.gmra.mrb[124].mxu1 %v12409_v16  ;;  %v3109_v16 = vsel %vm2739_vm1, %v3106_v57, %v3108_v19 }
 0x5b0   :  { %9321 = vmatprep.mubr.msk.bf16.mxu1 %vm10627_vm0, %v15031_v45  ;;  %9438 = vmatpush3.bf16.msra.mxu1 %v10463_v30 }
 0x5b1   :  { %9439 = vmatprep.subr.bf16.mxu1 %v15031_v45 }
 0x5b2   :  { %9394 = vmatmul.mubr.bf16.gmra.mrb[192].mxu0 %v3107_v27  ;;  %v10471_v27 = vld [vmem:[%s14865_s5 + $0x188] sm:$0xff]  }
 0x5b3   :  { %9397 = vmatprep.mubr.msk.bf16.mxu0 %vm10627_vm0, %v15031_v45 }
 0x5b4   :  { %9440 = vmatpush3.bf16.msra.mxu1 %v10464_v18 }
 0x5b5   :  { %9561 = vmatprep.subr.bf16.mxu1 %v15031_v45 }
 0x5b7   :  { %9322 = vmatmul.mubr.bf16.gmra.mrb[128].mxu1 %v12439_v28  ;;  %v3112_v28 = vrot.slane %v12529_v35, 1 }
 0x5b8   :  { %9325 = vmatprep.mubr.msk.bf16.mxu1 %vm10627_vm0, %v15031_v45 }
 0x5b9   :  { %v3113_v51 = vsel %vm2739_vm1, %v3110_v13, %v3112_v28  ;;  %v10472_v13 = vld [vmem:[%s14865_s5 + $0x1e8] sm:$0xff]  }
 0x5ba   :  { %9398 = vmatmul.mubr.bf16.gmra.mrb[196].mxu0 %v3109_v16 }
 0x5bb   :  { %9401 = vmatprep.mubr.msk.bf16.mxu0 %vm10627_vm0, %v15031_v45 }
 0x5bf   :  { %9326 = vmatmul.mubr.bf16.gmra.mrb[132].mxu1 %v12460_v7  ;;  %v3114_v7 = vrot.slane %v12548_v11, 1 }
 0x5c0   :  { %9329 = vmatprep.mubr.msk.bf16.mxu1 %vm10627_vm0, %v15031_v45 }
 0x5c1   :  { %v3115_v35 = vsel %vm2739_vm1, %v3112_v28, %v3114_v7 }
 0x5c2   :  { %9402 = vmatmul.mubr.bf16.gmra.mrb[200].mxu0 %v3111_v32 }
 0x5c3   :  { %9405 = vmatprep.mubr.msk.bf16.mxu0 %vm10627_vm0, %v15031_v45 }
 0x5c7   :  { %9330 = vmatmul.mubr.bf16.gmra.mrb[136].mxu1 %v12479_v53  ;;  %v3116_v53 = vrot.slane %v12566_v0, 1 }
 0x5c8   :  { %9333 = vmatprep.mubr.msk.bf16.mxu1 %vm10627_vm0, %v15031_v45 }
 0x5c9   :  { %v3117_v11 = vsel %vm2739_vm1, %v3114_v7, %v3116_v53 }
 0x5ca   :  { %9406 = vmatmul.mubr.bf16.gmra.mrb[204].mxu0 %v3113_v51 }
 0x5cb   :  { %9409 = vmatprep.mubr.msk.bf16.mxu0 %vm10627_vm0, %v15031_v45 }
 0x5cf   :  { %9334 = vmatmul.mubr.bf16.gmra.mrb[140].mxu1 %v12498_v36  ;;  %v7886_v36 = vcombine.low %v12584_v2, %v3012_v59  ;;  %v15041_v2 = vrot.slane %v12562_v48, 1  ;;  %v10468_v48 = vld [vmem:[%s14865_s5 + $0x1d8] sm:$0xff]   ;;  %v10474_v59 = vld [vmem:[%s14865_s5 + $0x1f0] sm:$0xff]  }
 0x5d0   :  { %9337 = vmatprep.mubr.msk.bf16.mxu1 %vm10627_vm0, %v15031_v45 }
 0x5d1   :  { %v3118_v56 = vrot.slane %v7886_v36, 1  ;;  %v10475_v36 = vld [vmem:[%s14865_s5 + $0x198] sm:$0xff]  }
 0x5d2   :  { %9410 = vmatmul.mubr.bf16.gmra.mrb[208].mxu0 %v3115_v35 }
 0x5d3   :  { %9413 = vmatprep.mubr.msk.bf16.mxu0 %vm10627_vm0, %v15031_v45  ;;  %v3119_v0 = vsel %vm2739_vm1, %v3116_v53, %v3118_v56 }
 0x5d7   :  { %9338 = vmatmul.mubr.bf16.gmra.mrb[144].mxu1 %v12517_v61  ;;  %v10465_v61 = vld [vmem:[%s14865_s5 + $0x1c0] sm:$0xff]  }
 0x5d8   :  { %9341 = vmatprep.mubr.msk.bf16.mxu1 %vm10627_vm0, %v15031_v45 }
 0x5da   :  { %9414 = vmatmul.mubr.bf16.gmra.mrb[212].mxu0 %v3117_v11 }
 0x5db   :  { %9417 = vmatprep.mubr.msk.bf16.mxu0 %vm10627_vm0, %v15031_v45 }
 0x5df   :  { %9342 = vmatmul.mubr.bf16.gmra.mrb[148].mxu1 %v12535_v47  ;;  %v10466_v47 = vld [vmem:[%s14865_s5 + $0x1c8] sm:$0xff]  }
 0x5e0   :  { %9345 = vmatprep.mubr.msk.bf16.mxu1 %vm10627_vm0, %v15031_v45 }
 0x5e2   :  { %9418 = vmatmul.mubr.bf16.gmra.mrb[216].mxu0 %v3119_v0 }
 0x5e3   :  { %9421 = vmatprep.mubr.msk.bf16.mxu0 %vm10627_vm0, %v15031_v45 }
 0x5e7   :  { %9346 = vmatmul.mubr.bf16.gmra.mrb[152].mxu1 %v12556_v37 }
 0x5e8   :  { %9349 = vmatprep.mubr.msk.bf16.mxu1 %vm10627_vm0, %v15031_v45 }
 0x5ea   :  { %9422 = vmatmul.mubr.bf16.gmra.mrb[220].mxu0 %v3118_v56 }
 0x5eb   :  { %9509 = vmatprep.mubr.msk.bf16.mxu0 %vm10627_vm0, %v15031_v45 }
 0x5ef   :  { %9350 = vmatmul.mubr.bf16.gmra.mrb[156].mxu1 %v12582_v23 }
 0x5f0   :  { %9353 = vmatprep.mubr.msk.bf16.mxu1 %vm10627_vm0, %v15031_v45 }
 0x5f2   :  { %9510 = vmatmul.mubr.bf16.vlgmr.msra.gmra.mrb[224].mxu0 %v12334_v22  ;;  %v10467_v22 = vld [vmem:[%s14865_s5 + $0x1d0] sm:$0xff]  }
 0x5f3   :  { %9513 = vmatprep.mubr.msk.bf16.mxu0 %vm10627_vm0, %v15031_v45  ;;  %9630 = vmatpush3.bf16.msra.mxu0 %v10465_v61  ;;  %v10476_v61 = vld [vmem:[%s14865_s5 + $0x1f8] sm:$0xff]  }
 0x5f4   :  { %9631 = vmatprep.subr.bf16.mxu0 %v15031_v45 }
 0x5f5   :  { %v2616_v37 = vpop.f32.mrb[120].mxu0 }
 0x5f6   :  { %v9239_v23 = vpop.f32.mrb[121].mxu0 }
 0x5f7   :  { %9354 = vmatmul.mubr.bf16.gmra.mrb[160].mxu1 %v15041_v2  ;;  %v2619_v17 = vpop.f32.mrb[122].mxu0  ;;  %9632 = vmatpush3.bf16.msra.mxu0 %v10466_v47 }
 0x5f8   :  { %9441 = vmatprep.mubr.msk.bf16.mxu1 %vm10627_vm0, %v15031_v45  ;;  %v9240_v49 = vpop.f32.mrb[123].mxu0  ;;  %9633 = vmatprep.subr.bf16.mxu0 %v15031_v45 }
 0x5fa   :  { %9514 = vmatmul.mubr.bf16.gmra.mrb[228].mxu0 %v12381_v38  ;;  %v10470_v38 = vld [vmem:[%s14865_s5 + $0x1e0] sm:$0xff]  }
 0x5fb   :  { %9517 = vmatprep.mubr.msk.bf16.mxu0 %vm10627_vm0, %v15031_v45  ;;  %9634 = vmatpush3.bf16.msra.mxu0 %v10467_v22 }
 0x5fc   :  { %9635 = vmatprep.subr.bf16.mxu0 %v15031_v45 }
 0x5fd   :  { %v2624_v24 = vpop.f32.mrb[124].mxu0 }
 0x5fe   :  { %v9243_v30 = vpop.f32.mrb[125].mxu0 }
 0x5ff   :  { %9442 = vmatmul.mubr.bf16.vlgmr.msra.gmra.mrb[164].mxu1 %v12365_v50  ;;  %v2627_v57 = vpop.f32.mrb[126].mxu0  ;;  %9636 = vmatpush3.bf16.msra.mxu0 %v10468_v48  ;;  %v10480_v48 = vld [vmem:[%s14865_s5 + $0x1a8] sm:$0xff]  }
 0x600   :  { %9445 = vmatprep.mubr.msk.bf16.mxu1 %vm10627_vm0, %v15031_v45  ;;  %v9244_v18 = vpop.f32.mrb[127].mxu0  ;;  %9562 = vmatpush3.bf16.msra.mxu1 %v10469_v5  ;;  %v2418_v50 = vpop.f32.mrb[60].mxu1  ;;  %v15042_v5 = vmov 0.0|0.0  }
 0x601   :  { %9637 = vmatprep.subr.bf16.mxu0 %v15031_v45  ;;  %9563 = vmatprep.subr.bf16.mxu1 %v15031_v45  ;;  %v12862_v19 = vadd.f32 %v2616_v37, %v2418_v50  ;;  %v9171_v16 = vpop.f32.mrb[61].mxu1 }
 0x602   :  { %9518 = vmatmul.mubr.bf16.gmra.mrb[232].mxu0 %v12412_v39  ;;  %v2421_v32 = vpop.f32.mrb[62].mxu1  ;;  %v10473_v39 = vld [vmem:[%s14865_s5 + $0x190] sm:$0xff]  }
 0x603   :  { %9521 = vmatprep.mubr.msk.bf16.mxu0 %vm10627_vm0, %v15031_v45  ;;  %9638 = vmatpush3.bf16.msra.mxu0 %v10470_v38  ;;  %v12871_v28 = vadd.f32 %v2619_v17, %v2421_v32  ;;  %v9172_v51 = vpop.f32.mrb[63].mxu1  ;;  %v10481_v38 = vld [vmem:[%s14865_s5 + $0x1b0] sm:$0xff]   ;;  %v10483_v32 = vld [vmem:[%s14865_s5 + $0x1b8] sm:$0xff]  }
 0x604   :  { %9564 = vmatpush3.bf16.msra.mxu1 %v10471_v27  ;;  %9639 = vmatprep.subr.bf16.mxu0 %v15031_v45 }
 0x605   :  { %v2632_v7 = vpop.f32.mrb[128].mxu0  ;;  %9565 = vmatprep.subr.bf16.mxu1 %v15031_v45 }
 0x606   :  { %v9247_v35 = vpop.f32.mrb[129].mxu0 }
 0x607   :  { %9446 = vmatmul.mubr.bf16.gmra.mrb[168].mxu1 %v12416_v10  ;;  %v2635_v53 = vpop.f32.mrb[130].mxu0  ;;  %9640 = vmatpush3.bf16.msra.mxu0 %v10472_v13 }
 0x608   :  { %9449 = vmatprep.mubr.msk.bf16.mxu1 %vm10627_vm0, %v15031_v45  ;;  %v9248_v11 = vpop.f32.mrb[131].mxu0  ;;  %9566 = vmatpush3.bf16.msra.mxu1 %v10473_v39  ;;  %v2426_v10 = vpop.f32.mrb[64].mxu1 }
 0x609   :  { %9641 = vmatprep.subr.bf16.mxu0 %v15031_v45  ;;  %9567 = vmatprep.subr.bf16.mxu1 %v15031_v45  ;;  %v12888_v56 = vadd.f32 %v2624_v24, %v2426_v10  ;;  %v9175_v0 = vpop.f32.mrb[65].mxu1 }
 0x60a   :  { %9522 = vmatmul.mubr.bf16.gmra.mrb[236].mxu0 %v12443_v20  ;;  %v2429_v47 = vpop.f32.mrb[66].mxu1  ;;  %v10477_v20 = vld [vmem:[%s14865_s5 + $0x1a0] sm:$0xff]  }
 0x60b   :  { %9525 = vmatprep.mubr.msk.bf16.mxu0 %vm10627_vm0, %v15031_v45  ;;  %9642 = vmatpush3.bf16.msra.mxu0 %v10474_v59  ;;  %v12897_v37 = vadd.f32 %v2627_v57, %v2429_v47  ;;  %v9176_v23 = vpop.f32.mrb[67].mxu1 }
 0x60c   :  { %9568 = vmatpush3.bf16.msra.mxu1 %v10475_v36  ;;  %9643 = vmatprep.subr.bf16.mxu0 %v15031_v45 }
 0x60d   :  { %v2640_v2 = vpop.f32.mrb[132].mxu0  ;;  %9569 = vmatprep.subr.bf16.mxu1 %v15031_v45 }
 0x60e   :  { %v9251_v17 = vpop.f32.mrb[133].mxu0 }
 0x60f   :  { %9450 = vmatmul.mubr.bf16.gmra.mrb[172].mxu1 %v12446_v25  ;;  %v2643_v22 = vpop.f32.mrb[134].mxu0  ;;  %9644 = vmatpush3.bf16.msra.mxu0 %v10476_v61 }
 0x610   :  { %9453 = vmatprep.mubr.msk.bf16.mxu1 %vm10627_vm0, %v15031_v45  ;;  %v9252_v49 = vpop.f32.mrb[135].mxu0  ;;  %9570 = vmatpush3.bf16.msra.mxu1 %v10477_v20  ;;  %v2434_v24 = vpop.f32.mrb[68].mxu1 }
 0x611   :  { %9571 = vmatprep.subr.bf16.mxu1 %v15031_v45  ;;  %10197 = vmatprep.subr.bf16.mxu0 %v15042_v5  ;;  %v12911_v25 = vadd.f32 %v2632_v7, %v2434_v24  ;;  %v9179_v30 = vpop.f32.mrb[69].mxu1 }
 0x612   :  { %9526 = vmatmul.mubr.bf16.gmra.mrb[240].mxu0 %v12463_v58  ;;  %v2437_v57 = vpop.f32.mrb[70].mxu1 }
 0x613   :  { %9529 = vmatprep.mubr.msk.bf16.mxu0 %vm10627_vm0, %v15031_v45  ;;  %v12916_v18 = vadd.f32 %v2635_v53, %v2437_v57  ;;  %v9180_v27 = vpop.f32.mrb[71].mxu1 }
 0x614   :  { %9572 = vmatpush3.bf16.msra.mxu1 %v10480_v48 }
 0x615   :  { %v2648_v50 = vpop.f32.mrb[136].mxu0  ;;  %9573 = vmatprep.subr.bf16.mxu1 %v15031_v45 }
 0x616   :  { %v9255_v58 = vpop.f32.mrb[137].mxu0 }
 0x617   :  { %9454 = vmatmul.mubr.bf16.gmra.mrb[176].mxu1 %v12466_v41  ;;  %v2651_v16 = vpop.f32.mrb[138].mxu0 }
 0x618   :  { %9457 = vmatprep.mubr.msk.bf16.mxu1 %vm10627_vm0, %v15031_v45  ;;  %v9256_v13 = vpop.f32.mrb[139].mxu0  ;;  %9574 = vmatpush3.bf16.msra.mxu1 %v10481_v38  ;;  %v2442_v39 = vpop.f32.mrb[72].mxu1 }
 0x619   :  { %9575 = vmatprep.subr.bf16.mxu1 %v15031_v45  ;;  %v12929_v51 = vadd.f32 %v2640_v2, %v2442_v39  ;;  %v9183_v41 = vpop.f32.mrb[73].mxu1 }
 0x61a   :  { %9530 = vmatmul.mubr.bf16.gmra.mrb[244].mxu0 %v12482_v33  ;;  %v2445_v7 = vpop.f32.mrb[74].mxu1 }
 0x61b   :  { %9533 = vmatprep.mubr.msk.bf16.mxu0 %vm10627_vm0, %v15031_v45  ;;  %v12931_v35 = vadd.f32 %v2643_v22, %v2445_v7  ;;  %v9184_v53 = vpop.f32.mrb[75].mxu1 }
 0x61c   :  { %9576 = vmatpush3.bf16.msra.mxu1 %v10483_v32  ;;  %v15044_v53 = vld [vmem:[#allocation14_spill] sm:$0xff] }
 0x61d   :  { %v2656_v59 = vpop.f32.mrb[140].mxu0  ;;  %9697 = vmatprep.subr.bf16.mxu1 %v15031_v45 }
 0x61e   :  { %v9259_v11 = vpop.f32.mrb[141].mxu0 }
 0x61f   :  { %9458 = vmatmul.mubr.bf16.gmra.mrb[180].mxu1 %v12485_v46  ;;  %v2659_v36 = vpop.f32.mrb[142].mxu0 }
 0x620   :  { %9461 = vmatprep.mubr.msk.bf16.mxu1 %vm10627_vm0, %v15031_v45  ;;  %v9260_v33 = vpop.f32.mrb[143].mxu0  ;;  %v2450_v10 = vpop.f32.mrb[76].mxu1 }
 0x621   :  { %v12940_v0 = vadd.f32 %v2648_v50, %v2450_v10  ;;  %v9187_v61 = vpop.f32.mrb[77].mxu1  ;;  %v15043_v50 = vld [vmem:[#allocation13_spill] sm:$0xff] }
 0x622   :  { %9534 = vmatmul.mubr.bf16.gmra.mrb[248].mxu0 %v12501_v31  ;;  %v2453_v47 = vpop.f32.mrb[78].mxu1 }
 0x623   :  { %9537 = vmatprep.mubr.msk.bf16.mxu0 %vm10627_vm0, %v15031_v45  ;;  %v12942_v20 = vadd.f32 %v2651_v16, %v2453_v47  ;;  %v9188_v2 = vpop.f32.mrb[79].mxu1 }
 0x625   :  { %v2664_v23 = vpop.f32.mrb[144].mxu0 }
 0x626   :  { %v9263_v46 = vpop.f32.mrb[145].mxu0 }
 0x627   :  { %9462 = vmatmul.mubr.bf16.gmra.mrb[184].mxu1 %v12504_v8  ;;  %v2667_v17 = vpop.f32.mrb[146].mxu0 }
 0x628   :  { %9465 = vmatprep.mubr.msk.bf16.mxu1 %vm10627_vm0, %v15031_v45  ;;  %v9264_v31 = vpop.f32.mrb[147].mxu0  ;;  %v2458_v22 = vpop.f32.mrb[80].mxu1 }
 0x629   :  { %v12950_v49 = vadd.f32 %v2656_v59, %v2458_v22  ;;  %v9191_v48 = vpop.f32.mrb[81].mxu1 }
 0x62a   :  { %9538 = vmatmul.mubr.bf16.gmra.mrb[252].mxu0 %v12520_v21  ;;  %v2461_v24 = vpop.f32.mrb[82].mxu1 }
 0x62b   :  { %9541 = vmatprep.mubr.msk.bf16.mxu0 %vm10627_vm0, %v15031_v45  ;;  %v12952_v57 = vadd.f32 %v2659_v36, %v2461_v24  ;;  %v9192_v38 = vpop.f32.mrb[83].mxu1 }
 0x62d   :  { %v2672_v30 = vpop.f32.mrb[148].mxu0 }
 0x62e   :  { %v9267_v8 = vpop.f32.mrb[149].mxu0 }
 0x62f   :  { %9466 = vmatmul.mubr.bf16.gmra.mrb[188].mxu1 %v12523_v60  ;;  %v2675_v27 = vpop.f32.mrb[150].mxu0 }
 0x630   :  { %9469 = vmatprep.mubr.msk.bf16.mxu1 %vm10627_vm0, %v15031_v45  ;;  %v9268_v21 = vpop.f32.mrb[151].mxu0  ;;  %v2466_v58 = vpop.f32.mrb[84].mxu1 }
 0x631   :  { %v12960_v16 = vadd.f32 %v2664_v23, %v2466_v58  ;;  %v9195_v13 = vpop.f32.mrb[85].mxu1  ;;  %v3971_v21 = vld [vmem:[#allocation2 + $0x8] sm:$0xc]  ;;  %v12989_v58 = vld [vmem:[#allocation2 + $0x10] sm:$0xff]  }
 0x632   :  { %9542 = vmatmul.mubr.bf16.gmra.mrb[0].mxu0 %v15043_v50  ;;  %v2469_v32 = vpop.f32.mrb[86].mxu1  ;;  %v12987_v50 = vld [vmem:[#allocation2 + $0xc] sm:$0xf] }
 0x633   :  { %9545 = vmatprep.mubr.msk.bf16.mxu0 %vm10627_vm0, %v15031_v45  ;;  %v12962_v41 = vadd.f32 %v2667_v17, %v2469_v32  ;;  %v9196_v7 = vpop.f32.mrb[87].mxu1 }
 0x635   :  { %v2680_v39 = vpop.f32.mrb[152].mxu0 }
 0x636   :  { %v9271_v60 = vpop.f32.mrb[153].mxu0 }
 0x637   :  { %9470 = vmatmul.mubr.bf16.gmra.mrb[192].mxu1 %v15044_v53  ;;  %v2683_v59 = vpop.f32.mrb[154].mxu0  ;;  %v4357_v53 = vshrl.u32 %v12989_v58, 16 }
 0x638   :  { %9473 = vmatprep.mubr.msk.bf16.mxu1 %vm10627_vm0, %v15031_v45  ;;  %v9272_v11 = vpop.f32.mrb[155].mxu0  ;;  %v2474_v36 = vpop.f32.mrb[88].mxu1 }
 0x639   :  { %v12970_v33 = vadd.f32 %v2672_v30, %v2474_v36  ;;  %v9199_v10 = vpop.f32.mrb[89].mxu1 }
 0x63a   :  { %9546 = vmatmul.mubr.bf16.gmra.mrb[4].mxu0 %v12559_v62  ;;  %v2477_v61 = vpop.f32.mrb[90].mxu1 }
 0x63b   :  { %9549 = vmatprep.mubr.msk.bf16.mxu0 %vm10627_vm0, %v15031_v45  ;;  %v12972_v23 = vadd.f32 %v2675_v27, %v2477_v61  ;;  %v9200_v2 = vpop.f32.mrb[91].mxu1 }
 0x63d   :  { %v2688_v47 = vpop.f32.mrb[156].mxu0 }
 0x63e   :  { %v9275_v46 = vpop.f32.mrb[157].mxu0 }
 0x63f   :  { %9474 = vmatmul.mubr.bf16.gmra.mrb[196].mxu1 %v12569_v9  ;;  %v2691_v17 = vpop.f32.mrb[158].mxu0  ;;  %v4359_v46 = vrot.slane %v4357_v53, 2 }
 0x640   :  { %9477 = vmatprep.mubr.msk.bf16.mxu1 %vm10627_vm0, %v15031_v45  ;;  %v9276_v62 = vpop.f32.mrb[159].mxu0  ;;  %v2482_v31 = vpop.f32.mrb[92].mxu1 }
 0x641   :  { %v12980_v22 = vadd.f32 %v2680_v39, %v2482_v31  ;;  %v9203_v48 = vpop.f32.mrb[93].mxu1  ;;  %v13008_v31 = vld [vmem:[#allocation2 + $0x18] sm:$0xff]  }
 0x642   :  { %9550 = vmatmul.mubr.bf16.gmra.mrb[8].mxu0 %v12587_v6  ;;  %v2485_v24 = vpop.f32.mrb[94].mxu1  ;;  %v4366_v53 = vshrl.u32 %v13008_v31, 16 }
 0x643   :  { %9553 = vmatprep.mubr.msk.bf16.mxu0 %vm10627_vm0, %v15031_v45  ;;  %v12982_v38 = vadd.f32 %v2683_v59, %v2485_v24  ;;  %v9204_v8 = vpop.f32.mrb[95].mxu1  ;;  %v4360_v59 = vshll.u32 %v12989_v58, 16 }
 0x645   :  { %v2696_v30 = vpop.f32.mrb[160].mxu0  ;;  %v4362_v62 = vrot.slane %v4360_v59, 3 }
 0x646   :  { %v9279_v9 = vpop.f32.mrb[161].mxu0 }
 0x647   :  { %9478 = vmatmul.mubr.bf16.gmra.mrb[200].mxu1 %v12590_v55  ;;  %v2699_v27 = vpop.f32.mrb[162].mxu0  ;;  %v12997_v55 = vcombine.low %v3971_v21, %v12987_v50 }
 0x648   :  { %9481 = vmatprep.mubr.msk.bf16.mxu1 %vm10627_vm0, %v15031_v45  ;;  %v9280_v6 = vpop.f32.mrb[163].mxu0  ;;  %v2490_v13 = vpop.f32.mrb[96].mxu1 }
 0x649   :  { %v12994_v32 = vadd.f32 %v2688_v47, %v2490_v13  ;;  %v9207_v39 = vpop.f32.mrb[97].mxu1  ;;  %v4349_v61 = vshrl.u32 %v12997_v55, 16  ;;  %v4352_v47 = vshll.u32 %v12997_v55, 16  ;;  %v4363_v13 = vor.u32 %v4362_v62, %v4359_v46 }
 0x64a   :  { %9554 = vmatmul.mubr.bf16.gmra.mrb[12].mxu0 %v12612_v15  ;;  %v2493_v7 = vpop.f32.mrb[98].mxu1 }
 0x64b   :  { %9557 = vmatprep.mubr.msk.bf16.mxu0 %vm10627_vm0, %v15031_v45  ;;  %v13001_v11 = vadd.f32 %v2691_v17, %v2493_v7  ;;  %v9208_v36 = vpop.f32.mrb[99].mxu1  ;;  %v15045_v17 = vrot.slane %v12594_v42, 2  ;;  %v4354_v24 = vrot.slane %v4352_v47, 3  ;;  %v4369_v42 = vshll.u32 %v13008_v31, 16 }
 0x64c   :  { %v15046_v36 = vld [vmem:[#allocation16_spill] sm:$0xff] }
 0x64d   :  { %v2704_v60 = vpop.f32.mrb[164].mxu0 }
 0x64e   :  { %v9283_v15 = vpop.f32.mrb[165].mxu0 }
 0x64f   :  { %9482 = vmatmul.mubr.bf16.gmra.mrb[204].mxu1 %v12607_v54  ;;  %v2707_v10 = vpop.f32.mrb[166].mxu0  ;;  %v4351_v54 = vrot.slane %v4349_v61, 2 }
 0x650   :  { %9485 = vmatprep.mubr.msk.bf16.mxu1 %vm10627_vm0, %v15031_v45  ;;  %v9284_v2 = vpop.f32.mrb[167].mxu0  ;;  %v2498_v48 = vpop.f32.mrb[100].mxu1 }
 0x651   :  { %v13014_v8 = vadd.f32 %v2696_v30, %v2498_v48  ;;  %v9211_v9 = vpop.f32.mrb[101].mxu1  ;;  %v4355_v15 = vor.u32 %v4354_v24, %v4351_v54  ;;  %v4368_v2 = vrot.slane %v4366_v53, 2 }
 0x652   :  { %9558 = vmatmul.mubr.bf16.gmra.mrb[16].mxu0 %v15045_v17  ;;  %v2501_v6 = vpop.f32.mrb[102].mxu1 }
 0x653   :  { %9645 = vmatprep.mubr.msk.bf16.mxu0 %vm10627_vm0, %v15031_v45  ;;  %v13016_v39 = vadd.f32 %v2699_v27, %v2501_v6  ;;  %v9212_v7 = vpop.f32.mrb[103].mxu1  ;;  %v4364_v30 = vsel %vm4347_vm6, %v4355_v15, %v4363_v13  ;;  %v4371_v27 = vrot.slane %v4369_v42, 3 }
 0x654   :  { %v4375_v7 = vshrl.u32 %v12662_v3, 16 }
 0x655   :  { %v2712_v21 = vpop.f32.mrb[168].mxu0  ;;  %v4372_v54 = vor.u32 %v4371_v27, %v4368_v2 }
 0x656   :  { %v9287_v59 = vpop.f32.mrb[169].mxu0 }
 0x657   :  { %9486 = vmatmul.mubr.bf16.gmra.mrb[208].mxu1 %v15046_v36  ;;  %v2715_v61 = vpop.f32.mrb[170].mxu0  ;;  %v4378_v59 = vshll.u32 %v12662_v3, 16  ;;  %v15047_v36 = vld [vmem:[#allocation15_spill] sm:$0xff] }
 0x658   :  { %v9288_v47 = vpop.f32.mrb[171].mxu0  ;;  %9489 = vmatprep.mubr.msk.bf16.mxu1 %vm10627_vm0, %v15031_v45  ;;  %v4377_v61 = vrot.slane %v4375_v7, 2 }
 0x659   :  { %v4380_v47 = vrot.slane %v4378_v59, 3  ;;  %v4384_v59 = vshrl.u32 %v12664_v43, 16 }
 0x65a   :  { %9646 = vmatmul.mubr.bf16.vlgmr.msra.gmra.mrb[20].mxu0 %v4364_v30  ;;  %v2506_v46 = vpop.f32.mrb[104].mxu1  ;;  %v4080_v30 = vrot.slane %v12989_v58, 2 }
 0x65b   :  { %9649 = vmatprep.mubr.msk.bf16.mxu0 %vm10627_vm0, %v15031_v45  ;;  %v13026_v62 = vadd.f32 %v2704_v60, %v2506_v46  ;;  %v9215_v17 = vpop.f32.mrb[105].mxu1  ;;  %v4373_v60 = vsel %vm4347_vm6, %v4363_v13, %v4372_v54  ;;  %v4079_v46 = vrot.slane %v12997_v55, 2  ;;  %v4381_v7 = vor.u32 %v4380_v47, %v4377_v61  ;;  %v10495_v55 = vld [vmem:[%s14865_s5 + $0x208] sm:$0xff]  }
 0x65c   :  { %v2509_v48 = vpop.f32.mrb[106].mxu1  ;;  %v4386_v47 = vrot.slane %v4384_v59, 2 }
 0x65d   :  { %v3215_v9 = vpop.f32.mrb[172].mxu0  ;;  %v13028_v24 = vadd.f32 %v2707_v10, %v2509_v48  ;;  %v9216_v6 = vpop.f32.mrb[107].mxu1  ;;  %v10493_v48 = vld [vmem:[%s14865_s5 + $0x200] sm:$0xff]   ;;  %v4382_v61 = vsel %vm4347_vm6, %v4372_v54, %v4381_v7  ;;  %v10496_v54 = vld [vmem:[%s14865_s5 + $0x210] sm:$0xff]  }
 0x65e   :  { %v9375_v53 = vpop.f32.mrb[173].mxu0 }
 0x65f   :  { %v3218_v42 = vpop.f32.mrb[174].mxu0  ;;  %9490 = vmatmul.mubr.bf16.gmra.mrb[212].mxu1 %v15047_v36  ;;  %v4081_v36 = vsel %vm3723_vm3, %v4079_v46, %v4080_v30  ;;  %v4082_v46 = vrot.slane %v13008_v31, 2 }
 0x660   :  { %v9376_v15 = vpop.f32.mrb[175].mxu0  ;;  %9577 = vmatprep.mubr.msk.bf16.mxu1 %vm10627_vm0, %v15031_v45 }
 0x661   :  { %v4083_v12 = vsel %vm3723_vm3, %v4080_v30, %v4082_v46 }
 0x662   :  { %9650 = vmatmul.mubr.bf16.gmra.mrb[24].mxu0 %v4373_v60  ;;  %v2514_v10 = vpop.f32.mrb[108].mxu1 }
 0x663   :  { %v13037_v2 = vadd.f32 %v2712_v21, %v2514_v10  ;;  %v9219_v27 = vpop.f32.mrb[109].mxu1  ;;  %9653 = vmatprep.mubr.msk.bf16.mxu0 %vm10627_vm0, %v15031_v45  ;;  %v4387_v21 = vshll.u32 %v12664_v43, 16 }
 0x664   :  { %v2517_v17 = vpop.f32.mrb[110].mxu1 }
 0x665   :  { %v13045_v13 = vpop.f32.mrb[176].mxu0  ;;  %v9220_v6 = vpop.f32.mrb[111].mxu1  ;;  %v4389_v10 = vrot.slane %v4387_v21, 3 }
 0x666   :  { %v9379_v53 = vpop.f32.mrb[177].mxu0 }
 0x667   :  { %v3226_v15 = vpop.f32.mrb[178].mxu0  ;;  %9578 = vmatmul.mubr.bf16.vlgmr.msra.gmra.mrb[216].mxu1 %v4081_v36  ;;  %v15048_v53 = vld [vmem:[#allocation17_spill] sm:$0xff] }
 0x668   :  { %v9380_v60 = vpop.f32.mrb[179].mxu0  ;;  %9581 = vmatprep.mubr.msk.bf16.mxu1 %vm10627_vm0, %v15031_v45  ;;  %9698 = vmatpush3.bf16.msra.mxu1 %v10493_v48  ;;  %v4393_v36 = vshrl.u32 %v15048_v53, 16 }
 0x669   :  { %9699 = vmatprep.subr.bf16.mxu1 %v15031_v45 }
 0x66a   :  { %v2860_v27 = vpop.f32.mrb[112].mxu1  ;;  %9654 = vmatmul.mubr.bf16.gmra.mrb[28].mxu0 %v4382_v61  ;;  %v4390_v61 = vor.u32 %v4389_v10, %v4386_v47 }
 0x66b   :  { %v2962_v17 = vadd.f32 %v2860_v27, %v12862_v19  ;;  %v9307_v6 = vpop.f32.mrb[113].mxu1  ;;  %9657 = vmatprep.mubr.msk.bf16.mxu0 %vm10627_vm0, %v15031_v45  ;;  %v4396_v19 = vshll.u32 %v15048_v53, 16 }
 0x66c   :  { %v2863_v48 = vpop.f32.mrb[114].mxu1  ;;  %9700 = vmatpush3.bf16.msra.mxu1 %v10495_v55  ;;  %v4391_v47 = vsel %vm4347_vm6, %v4381_v7, %v4390_v61  ;;  %v10499_v7 = vld [vmem:[%s14865_s5 + $0x220] sm:$0xff]  }
 0x66d   :  { %v2963_v59 = vadd.f32 %v2863_v48, %v12871_v28  ;;  %v9308_v21 = vpop.f32.mrb[115].mxu1  ;;  %v13066_v60 = vpop.f32.mrb[180].mxu0  ;;  %9701 = vmatprep.subr.bf16.mxu1 %v15031_v45  ;;  %v13070_v27 = vadd.f32 %v3215_v9, %v2962_v17  ;;  %v10497_v28 = vld [vmem:[%s14865_s5 + $0x218] sm:$0xff]   ;;  %v4395_v9 = vrot.slane %v4393_v36, 2  ;;  %v4398_v10 = vrot.slane %v4396_v19, 3 }
 0x66e   :  { %v9383_v6 = vpop.f32.mrb[181].mxu0  ;;  %v4402_v48 = vshrl.u32 %v12672_v26, 16  ;;  %v4405_v19 = vshll.u32 %v12672_v26, 16  ;;  %v10500_v26 = vld [vmem:[%s14865_s5 + $0x228] sm:$0xff]  }
 0x66f   :  { %v3234_v55 = vpop.f32.mrb[182].mxu0  ;;  %9582 = vmatmul.mubr.bf16.gmra.mrb[220].mxu1 %v4083_v12  ;;  %v13073_v5 = vadd.f32 %v3218_v42, %v2963_v59  ;;  %v4084_v12 = vrot.slane %v12662_v3, 2  ;;  %v4399_v21 = vor.u32 %v4398_v10, %v4395_v9 }
 0x670   :  { %v9384_v52 = vpop.f32.mrb[183].mxu0  ;;  %9585 = vmatprep.mubr.msk.bf16.mxu1 %vm10627_vm0, %v15031_v45  ;;  %9702 = vmatpush3.bf16.msra.mxu1 %v10496_v54  ;;  %v4407_v9 = vrot.slane %v4405_v19, 3 }
 0x671   :  { %9703 = vmatprep.subr.bf16.mxu1 %v15031_v45 }
 0x672   :  { %v2868_v30 = vpop.f32.mrb[116].mxu1  ;;  %9658 = vmatmul.mubr.bf16.gmra.mrb[32].mxu0 %v4391_v47  ;;  %v4085_v47 = vsel %vm3723_vm3, %v4082_v46, %v4084_v12 }
 0x673   :  { %v2964_v52 = vadd.f32 %v2868_v30, %v12888_v56  ;;  %v9311_v42 = vpop.f32.mrb[117].mxu1  ;;  %9661 = vmatprep.mubr.msk.bf16.mxu0 %vm10627_vm0, %v15031_v45 }
 0x674   :  { %v2871_v17 = vpop.f32.mrb[118].mxu1  ;;  %9704 = vmatpush3.bf16.msra.mxu1 %v10497_v28 }
 0x675   :  { %v2965_v36 = vadd.f32 %v2871_v17, %v12897_v37  ;;  %v9312_v54 = vpop.f32.mrb[119].mxu1  ;;  %v3239_v59 = vpop.f32.mrb[184].mxu0  ;;  %9705 = vmatprep.subr.bf16.mxu1 %v15031_v45  ;;  %v13094_v56 = vadd.f32 %v13045_v13, %v2964_v52  ;;  %v4400_v37 = vsel %vm4347_vm6, %v4390_v61, %v4399_v21  ;;  %v4404_v13 = vrot.slane %v4402_v48, 2  ;;  %v10501_v61 = vld [vmem:[%s14865_s5 + $0x230] sm:$0xff]  }
 0x676   :  { %v9387_v6 = vpop.f32.mrb[185].mxu0 }
 0x677   :  { %v3242_v28 = vpop.f32.mrb[186].mxu0  ;;  %9586 = vmatmul.mubr.bf16.gmra.mrb[224].mxu1 %v4085_v47  ;;  %v13097_v30 = vadd.f32 %v3226_v15, %v2965_v36  ;;  %v4086_v15 = vrot.slane %v12664_v43, 2  ;;  %v4408_v43 = vor.u32 %v4407_v9, %v4404_v13  ;;  %v10502_v13 = vld [vmem:[%s14865_s5 + $0x238] sm:$0xff]  }
 0x678   :  { %v9388_v42 = vpop.f32.mrb[187].mxu0  ;;  %9589 = vmatprep.mubr.msk.bf16.mxu1 %vm10627_vm0, %v15031_v45  ;;  %9706 = vmatpush3.bf16.msra.mxu1 %v10499_v7  ;;  %v15049_v7 = vld [vmem:[#allocation18_spill] sm:$0xff] }
 0x679   :  { %9707 = vmatprep.subr.bf16.mxu1 %v15031_v45  ;;  %v4411_v36 = vshrl.u32 %v15049_v7, 16  ;;  %v4087_v42 = vsel %vm3723_vm3, %v4084_v12, %v4086_v15 }
 0x67a   :  { %v2876_v46 = vpop.f32.mrb[120].mxu1  ;;  %9662 = vmatmul.mubr.bf16.gmra.mrb[36].mxu0 %v4400_v37 }
 0x67b   :  { %v2966_v10 = vadd.f32 %v2876_v46, %v12911_v25  ;;  %v9315_v52 = vpop.f32.mrb[121].mxu1  ;;  %9665 = vmatprep.mubr.msk.bf16.mxu0 %vm10627_vm0, %v15031_v45  ;;  %v4414_v25 = vshll.u32 %v15049_v7, 16  ;;  %v4413_v9 = vrot.slane %v4411_v36, 2  ;;  %v4420_v7 = vshrl.u32 %v12678_v40, 16 }
 0x67c   :  { %v2879_v17 = vpop.f32.mrb[122].mxu1  ;;  %9708 = vmatpush3.bf16.msra.mxu1 %v10500_v26 }
 0x67d   :  { %v2967_v48 = vadd.f32 %v2879_v17, %v12916_v18  ;;  %v9316_v54 = vpop.f32.mrb[123].mxu1  ;;  %v13115_v19 = vpop.f32.mrb[188].mxu0  ;;  %9709 = vmatprep.subr.bf16.mxu1 %v15031_v45  ;;  %v13120_v6 = vadd.f32 %v13066_v60, %v2966_v10  ;;  %v4409_v60 = vsel %vm4347_vm6, %v4399_v21, %v4408_v43  ;;  %v4416_v46 = vrot.slane %v4414_v25, 3 }
 0x67e   :  { %v9391_v47 = vpop.f32.mrb[189].mxu0  ;;  %v4423_v54 = vshll.u32 %v12678_v40, 16 }
 0x67f   :  { %v13123_v26 = vpop.f32.mrb[190].mxu0  ;;  %9590 = vmatmul.mubr.bf16.gmra.mrb[228].mxu1 %v4087_v42  ;;  %v13125_v37 = vadd.f32 %v3234_v55, %v2967_v48  ;;  %v4088_v55 = vrot.slane %v15048_v53, 2  ;;  %v4417_v48 = vor.u32 %v4416_v46, %v4413_v9  ;;  %v14924_v9 = vmov 0  }
 0x680   :  { %v9392_v18 = vpop.f32.mrb[191].mxu0  ;;  %9593 = vmatprep.mubr.msk.bf16.mxu1 %vm10627_vm0, %v15031_v45  ;;  %9710 = vmatpush3.bf16.msra.mxu1 %v10501_v61 }
 0x681   :  { %9711 = vmatprep.subr.bf16.mxu1 %v15031_v45  ;;  %10262 = vset.pattern.permute.xlu1 %v14924_v9 }
 0x682   :  { %v2884_v12 = vpop.f32.mrb[124].mxu1  ;;  %9666 = vmatmul.mubr.bf16.gmra.mrb[40].mxu0 %v4409_v60  ;;  %v4425_v60 = vrot.slane %v4423_v54, 3  ;;  %10261 = vset.pattern.permute.xlu0 %v14924_v9 }
 0x683   :  { %v2968_v10 = vadd.f32 %v2884_v12, %v12929_v51  ;;  %v9319_v52 = vpop.f32.mrb[125].mxu1  ;;  %9669 = vmatprep.mubr.msk.bf16.mxu0 %vm10627_vm0, %v15031_v45  ;;  %v4089_v51 = vsel %vm3723_vm3, %v4086_v15, %v4088_v55  ;;  %v13159_v12 = vld [vmem:[#allocation2 + $0x50] sm:$0xff]  }
 0x684   :  { %v2887_v17 = vpop.f32.mrb[126].mxu1  ;;  %9712 = vmatpush3.bf16.msra.mxu1 %v10502_v13  ;;  %v4422_v13 = vrot.slane %v4420_v7, 2  ;;  %v5003_v52 = vld [vmem:[%s14866_s8 + $0x8] sm:$0xff] }
 0x685   :  { %v2969_v21 = vadd.f32 %v2887_v17, %v12931_v35  ;;  %v9320_v36 = vpop.f32.mrb[127].mxu1  ;;  %v13140_v61 = vpop.f32.mrb[192].mxu0  ;;  %v13143_v25 = vadd.f32 %v3239_v59, %v2968_v10  ;;  %v4418_v35 = vsel %vm4347_vm6, %v4408_v43, %v4417_v48  ;;  %v10619_v59 = vld [vmem:[#allocation2 + $0x38] sm:$0xff]   ;;  %5601 = vmatprep.subr.bf16.mxu1 %v14924_v9  ;;  %v4429_v10 = vshrl.u32 %v13159_v12, 16  ;;  %5034 = vperm.xlu1 %10262, %v5003_v52  }
 0x686   :  { %v9395_v53 = vpop.f32.mrb[193].mxu0  ;;  %v4090_v15 = vrot.slane %v10619_v59, 2  ;;  %v4426_v36 = vor.u32 %v4425_v60, %v4422_v13 }
 0x687   :  { %v13146_v47 = vpop.f32.mrb[194].mxu0  ;;  %9594 = vmatmul.mubr.bf16.gmra.mrb[232].mxu1 %v4089_v51  ;;  %v13148_v42 = vadd.f32 %v3242_v28, %v2969_v21  ;;  %v4431_v13 = vrot.slane %v4429_v10, 2 }
 0x688   :  { %v9396_v18 = vpop.f32.mrb[195].mxu0  ;;  %9597 = vmatprep.mubr.msk.bf16.mxu1 %vm10627_vm0, %v15031_v45  ;;  %v4091_v51 = vsel %vm3723_vm3, %v4088_v55, %v4090_v15  ;;  %v10621_v55 = vld [vmem:[#allocation2 + $0x40] sm:$0xff]  }
 0x689   :  { %v5004_v18 = vld [vmem:[%s14866_s8 + $0x10] sm:$0xff] }
 0x68a   :  { %v2892_v40 = vpop.f32.mrb[128].mxu1  ;;  %9670 = vmatmul.mubr.bf16.gmra.mrb[44].mxu0 %v4418_v35  ;;  %5039 = vperm.xlu1 %10262, %v5004_v18  }
 0x68b   :  { %v2970_v28 = vadd.f32 %v2892_v40, %v12940_v0  ;;  %v9323_v46 = vpop.f32.mrb[129].mxu1  ;;  %9673 = vmatprep.mubr.msk.bf16.mxu0 %vm10627_vm0, %v15031_v45  ;;  %v4432_v0 = vshll.u32 %v13159_v12, 16 }
 0x68c   :  { %v2895_v43 = vpop.f32.mrb[130].mxu1 }
 0x68d   :  { %v2971_v17 = vadd.f32 %v2895_v43, %v12942_v20  ;;  %v9324_v7 = vpop.f32.mrb[131].mxu1  ;;  %v13166_v21 = vpop.f32.mrb[196].mxu0  ;;  %v13170_v54 = vadd.f32 %v13115_v19, %v2970_v28  ;;  %v4427_v19 = vsel %vm4347_vm6, %v4417_v48, %v4426_v36  ;;  %v4434_v60 = vrot.slane %v4432_v0, 3 }
 0x68e   :  { %v9399_v53 = vpop.f32.mrb[197].mxu0  ;;  %v4092_v28 = vrot.slane %v10621_v55, 2 }
 0x68f   :  { %v3266_v35 = vpop.f32.mrb[198].mxu0  ;;  %9598 = vmatmul.mubr.bf16.gmra.mrb[236].mxu1 %v4091_v51  ;;  %v13177_v20 = vadd.f32 %v13123_v26, %v2971_v17  ;;  %v5005_v26 = vld [vmem:[%s14866_s8 + $0x18] sm:$0xff]  ;;  %v4435_v53 = vor.u32 %v4434_v60, %v4431_v13 }
 0x690   :  { %v9400_v40 = vpop.f32.mrb[199].mxu0  ;;  %9601 = vmatprep.mubr.msk.bf16.mxu1 %vm10627_vm0, %v15031_v45  ;;  %v13188_v17 = vld [vmem:[#allocation2 + $0x58] sm:$0xff]   ;;  %5044 = vperm.xlu1 %10262, %v5005_v26  }
 0x691   :  { %v4438_v48 = vshrl.u32 %v13188_v17, 16  ;;  %v4093_v40 = vsel %vm3723_vm3, %v4090_v15, %v4092_v28  ;;  %v10623_v15 = vld [vmem:[#allocation2 + $0x48] sm:$0xff]  }
 0x692   :  { %v2900_v59 = vpop.f32.mrb[132].mxu1  ;;  %9674 = vmatmul.mubr.bf16.gmra.mrb[48].mxu0 %v4427_v19  ;;  %v5006_v19 = vld [vmem:[%s14866_s8 + $0x20] sm:$0xff] }
 0x693   :  { %v2972_v46 = vadd.f32 %v2900_v59, %v12950_v49  ;;  %v9327_v43 = vpop.f32.mrb[133].mxu1  ;;  %9677 = vmatprep.mubr.msk.bf16.mxu0 %vm10627_vm0, %v15031_v45  ;;  %v4441_v49 = vshll.u32 %v13188_v17, 16  ;;  %v4440_v13 = vrot.slane %v4438_v48, 2 }
 0x694   :  { %v2903_v52 = vpop.f32.mrb[134].mxu1  ;;  %5049 = vperm.xlu1 %10262, %v5006_v19   ;;  %v4094_v43 = vrot.slane %v10623_v15, 2 }
 0x695   :  { %v2973_v10 = vadd.f32 %v2903_v52, %v12952_v57  ;;  %v9328_v7 = vpop.f32.mrb[135].mxu1  ;;  %v3271_v0 = vpop.f32.mrb[200].mxu0  ;;  %v13194_v51 = vadd.f32 %v13140_v61, %v2972_v46  ;;  %v4436_v61 = vsel %vm4347_vm6, %v4426_v36, %v4435_v53  ;;  %v4443_v60 = vrot.slane %v4441_v49, 3 }
 0x696   :  { %v9403_v18 = vpop.f32.mrb[201].mxu0  ;;  %v13212_v7 = vld [vmem:[#allocation2 + $0x60] sm:$0xff]  }
 0x697   :  { %v3274_v59 = vpop.f32.mrb[202].mxu0  ;;  %9602 = vmatmul.mubr.bf16.gmra.mrb[240].mxu1 %v4093_v40  ;;  %v13201_v57 = vadd.f32 %v13146_v47, %v2973_v10  ;;  %v5007_v47 = vld [vmem:[%s14866_s8 + $0x28] sm:$0xff]  ;;  %v4447_v36 = vshrl.u32 %v13212_v7, 16  ;;  %v4444_v40 = vor.u32 %v4443_v60, %v4440_v13 }
 0x698   :  { %v9404_v55 = vpop.f32.mrb[203].mxu0  ;;  %9605 = vmatprep.mubr.msk.bf16.mxu1 %vm10627_vm0, %v15031_v45  ;;  %5054 = vperm.xlu1 %10262, %v5007_v47  }
 0x699   :  { %v4445_v13 = vsel %vm4347_vm6, %v4435_v53, %v4444_v40  ;;  %v4456_v53 = vshrl.u32 %v12689_v14, 16 }
 0x69a   :  { %v2908_v46 = vpop.f32.mrb[136].mxu1  ;;  %9678 = vmatmul.mubr.bf16.gmra.mrb[52].mxu0 %v4436_v61  ;;  %v4095_v61 = vsel %vm3723_vm3, %v4092_v28, %v4094_v43  ;;  %v4096_v28 = vrot.slane %v13159_v12, 2  ;;  %v4459_v12 = vshll.u32 %v12689_v14, 16 }
 0x69b   :  { %v2974_v26 = vadd.f32 %v2908_v46, %v12960_v16  ;;  %v9331_v52 = vpop.f32.mrb[137].mxu1  ;;  %9681 = vmatprep.mubr.msk.bf16.mxu0 %vm10627_vm0, %v15031_v45  ;;  %v4450_v16 = vshll.u32 %v13212_v7, 16  ;;  %v5008_v46 = vld [vmem:[%s14866_s8 + $0x30] sm:$0xff] }
 0x69c   :  { %v2911_v10 = vpop.f32.mrb[138].mxu1  ;;  %5059 = vperm.xlu1 %10262, %v5008_v46   ;;  %v4097_v46 = vsel %vm3723_vm3, %v4094_v43, %v4096_v28  ;;  %v4458_v43 = vrot.slane %v4456_v53, 2 }
 0x69d   :  { %v2975_v48 = vadd.f32 %v2911_v10, %v12962_v41  ;;  %v9332_v49 = vpop.f32.mrb[139].mxu1  ;;  %v3279_v18 = vpop.f32.mrb[204].mxu0  ;;  %v13218_v19 = vadd.f32 %v13166_v21, %v2974_v26  ;;  %v4449_v21 = vrot.slane %v4447_v36, 2  ;;  %v4452_v60 = vrot.slane %v4450_v16, 3 }
 0x69e   :  { %v9407_v55 = vpop.f32.mrb[205].mxu0 }
 0x69f   :  { %v3282_v15 = vpop.f32.mrb[206].mxu0  ;;  %9606 = vmatmul.mubr.bf16.gmra.mrb[244].mxu1 %v4095_v61  ;;  %v13224_v52 = vadd.f32 %v3266_v35, %v2975_v48  ;;  %v5009_v35 = vld [vmem:[%s14866_s8 + $0x38] sm:$0xff]  ;;  %v4453_v55 = vor.u32 %v4452_v60, %v4449_v21  ;;  %v4461_v60 = vrot.slane %v4459_v12, 3 }
 0x6a0   :  { %v9408_v41 = vpop.f32.mrb[207].mxu0  ;;  %9609 = vmatprep.mubr.msk.bf16.mxu1 %vm10627_vm0, %v15031_v45  ;;  %5064 = vperm.xlu1 %10262, %v5009_v35  }
 0x6a1   :  { %v5010_v41 = vld [vmem:[%s14866_s8 + $0x40] sm:$0xff]  ;;  %v4462_v12 = vor.u32 %v4461_v60, %v4458_v43  ;;  %v3996_v60 = vld [vmem:[#allocation2 + $0x6c] sm:$0x3] }
 0x6a2   :  { %v2916_v26 = vpop.f32.mrb[140].mxu1  ;;  %9682 = vmatmul.mubr.bf16.gmra.mrb[56].mxu0 %v4445_v13  ;;  %v5002_v13 = vld [vmem:[%s14866_s8] sm:$0xff] }
 0x6a3   :  { %v2976_v47 = vadd.f32 %v2916_v26, %v12970_v33  ;;  %v9335_v10 = vpop.f32.mrb[141].mxu1  ;;  %9685 = vmatprep.mubr.msk.bf16.mxu0 %vm10627_vm0, %v15031_v45  ;;  %5029 = vperm.xlu0 %10261, %v5002_v13  }
 0x6a4   :  { %v2919_v48 = vpop.f32.mrb[142].mxu1  ;;  %5069 = vperm.xlu1 %10262, %v5010_v41   ;;  %v4098_v10 = vrot.slane %v13188_v17, 2 }
 0x6a5   :  { %v2977_v36 = vadd.f32 %v2919_v48, %v12972_v23  ;;  %v9336_v49 = vpop.f32.mrb[143].mxu1  ;;  %v3287_v16 = vpop.f32.mrb[208].mxu0  ;;  %v13239_v61 = vadd.f32 %v3271_v0, %v2976_v47  ;;  %v4454_v0 = vsel %vm4347_vm6, %v4444_v40, %v4453_v55 }
 0x6a6   :  { %v9411_v33 = vpop.f32.mrb[209].mxu0 }
 0x6a7   :  { %v3290_v23 = vpop.f32.mrb[210].mxu0  ;;  %9610 = vmatmul.mubr.bf16.gmra.mrb[248].mxu1 %v4097_v46  ;;  %v13248_v26 = vadd.f32 %v3274_v59, %v2977_v36  ;;  %v5011_v59 = vld [vmem:[%s14866_s8 + $0x48] sm:$0xff]  ;;  %v5012_v46 = vld [vmem:[%s14866_s8 + $0x50] sm:$0xff] }
 0x6a8   :  { %v9412_v21 = vpop.f32.mrb[211].mxu0  ;;  %9613 = vmatprep.mubr.msk.bf16.mxu1 %vm10627_vm0, %v15031_v45  ;;  %5074 = vperm.xlu1 %10262, %v5011_v59  }
 0x6aa   :  { %v2924_v47 = vpop.f32.mrb[144].mxu1  ;;  %9686 = vmatmul.mubr.bf16.gmra.mrb[60].mxu0 %v4454_v0  ;;  %v4100_v0 = vrot.slane %v13212_v7, 2 }
 0x6ab   :  { %v2978_v35 = vadd.f32 %v2924_v47, %v12980_v22  ;;  %v9339_v48 = vpop.f32.mrb[145].mxu1  ;;  %9689 = vmatprep.mubr.msk.bf16.mxu0 %vm10627_vm0, %v15031_v45  ;;  %v4099_v22 = vsel %vm3723_vm3, %v4096_v28, %v4098_v10 }
 0x6ac   :  { %v2927_v36 = vpop.f32.mrb[146].mxu1  ;;  %5079 = vperm.xlu1 %10262, %v5012_v46  }
 0x6ad   :  { %v2979_v40 = vadd.f32 %v2927_v36, %v12982_v38  ;;  %v9340_v53 = vpop.f32.mrb[147].mxu1  ;;  %v3295_v49 = vpop.f32.mrb[212].mxu0  ;;  %v13261_v33 = vadd.f32 %v3279_v18, %v2978_v35  ;;  %v4463_v38 = vsel %vm4347_vm6, %v4453_v55, %v4462_v12  ;;  %v10625_v36 = vld [vmem:[#allocation2 + $0x68] sm:$0xf] }
 0x6ae   :  { %v9415_v17 = vpop.f32.mrb[213].mxu0  ;;  %v5014_v53 = vld [vmem:[%s14866_s8 + $0x60] sm:$0xff] }
 0x6af   :  { %v3298_v41 = vpop.f32.mrb[214].mxu0  ;;  %9614 = vmatmul.mubr.bf16.gmra.mrb[252].mxu1 %v4099_v22  ;;  %v13267_v13 = vadd.f32 %v3282_v15, %v2979_v40  ;;  %v5013_v15 = vld [vmem:[%s14866_s8 + $0x58] sm:$0xff]  ;;  %v7973_v40 = vcombine.low %v10625_v36, %v3996_v60 }
 0x6b0   :  { %v9416_v21 = vpop.f32.mrb[215].mxu0  ;;  %9617 = vmatprep.mubr.msk.bf16.mxu1 %vm10627_vm0, %v15031_v45  ;;  %5084 = vperm.xlu1 %10262, %v5013_v15  }
 0x6b2   :  { %v2932_v18 = vpop.f32.mrb[148].mxu1  ;;  %9690 = vmatmul.mubr.bf16.gmra.mrb[64].mxu0 %v4463_v38  ;;  %v5016_v38 = vld [vmem:[%s14866_s8 + $0x70] sm:$0xff] }
 0x6b3   :  { %v2980_v28 = vadd.f32 %v2932_v18, %v12994_v32  ;;  %v9343_v43 = vpop.f32.mrb[149].mxu1  ;;  %9693 = vmatprep.mubr.msk.bf16.mxu0 %vm10627_vm0, %v15031_v45  ;;  %v4101_v32 = vsel %vm3723_vm3, %v4098_v10, %v4100_v0 }
 0x6b4   :  { %v2935_v47 = vpop.f32.mrb[150].mxu1  ;;  %5089 = vperm.xlu1 %10262, %v5014_v53  }
 0x6b5   :  { %v2981_v35 = vadd.f32 %v2935_v47, %v13001_v11  ;;  %v9344_v55 = vpop.f32.mrb[151].mxu1  ;;  %v3303_v48 = vpop.f32.mrb[216].mxu0  ;;  %v13280_v59 = vadd.f32 %v3287_v16, %v2980_v28  ;;  %v4102_v16 = vrot.slane %v7973_v40, 2 }
 0x6b6   :  { %v9419_v7 = vpop.f32.mrb[217].mxu0 }
 0x6b7   :  { %v3306_v17 = vpop.f32.mrb[218].mxu0  ;;  %9618 = vmatmul.mubr.bf16.gmra.mrb[0].mxu1 %v4101_v32  ;;  %v13286_v22 = vadd.f32 %v3290_v23, %v2981_v35  ;;  %v4103_v15 = vsel %vm3723_vm3, %v4100_v0, %v4102_v16  ;;  %v5020_v0 = vld [vmem:[%s14866_s8 + $0x90] sm:$0xff] }
 0x6b8   :  { %v9420_v46 = vpop.f32.mrb[219].mxu0  ;;  %9621 = vmatprep.mubr.msk.bf16.mxu1 %vm10627_vm0, %v15031_v45  ;;  %5099 = vperm.xlu1 %10262, %v5016_v38  }
 0x6ba   :  { %v2940_v11 = vpop.f32.mrb[152].mxu1  ;;  %9694 = vmatmul.mubr.bf16.gmra.mrb[68].mxu0 %v4462_v12 }
 0x6bb   :  { %v2982_v10 = vadd.f32 %v2940_v11, %v13014_v8  ;;  %v9347_v21 = vpop.f32.mrb[153].mxu1  ;;  %9797 = vmatprep.mubr.msk.f32.mxu0 %vm10627_vm0, %v15031_v45  ;;  %v5018_v8 = vld [vmem:[%s14866_s8 + $0x80] sm:$0xff] }
 0x6bc   :  { %v2943_v23 = vpop.f32.mrb[154].mxu1  ;;  %5109 = vperm.xlu1 %10262, %v5018_v8  }
 0x6bd   :  { %v2983_v18 = vadd.f32 %v2943_v23, %v13016_v39  ;;  %v9348_v28 = vpop.f32.mrb[155].mxu1  ;;  %v3311_v43 = vpop.f32.mrb[220].mxu0  ;;  %v13297_v60 = vadd.f32 %v3295_v49, %v2982_v10  ;;  %v5022_v10 = vld [vmem:[%s14866_s8 + $0xa0] sm:$0xff] }
 0x6be   :  { %v9423_v12 = vpop.f32.mrb[221].mxu0 }
 0x6bf   :  { %v3314_v47 = vpop.f32.mrb[222].mxu0  ;;  %9622 = vmatmul.mubr.bf16.gmra.mrb[4].mxu1 %v4103_v15  ;;  %v13303_v35 = vadd.f32 %v3298_v41, %v2983_v18  ;;  %v4686_v41 = vld [vmem:[#allocation2 + $0x8] sm:$0x8]  ;;  %v5024_v12 = vld [vmem:[%s14866_s8 + $0xb0] sm:$0xff] }
 0x6c0   :  { %v9424_v55 = vpop.f32.mrb[223].mxu0  ;;  %9625 = vmatprep.mubr.msk.bf16.mxu1 %vm10627_vm0, %v15031_v45  ;;  %5119 = vperm.xlu1 %10262, %v5020_v0  }
 0x6c2   :  { %v2948_v39 = vpop.f32.mrb[156].mxu1 }
 0x6c3   :  { %v2984_v49 = vadd.f32 %v2948_v39, %v13026_v62  ;;  %v9351_v7 = vpop.f32.mrb[157].mxu1 }
 0x6c4   :  { %v2951_v32 = vpop.f32.mrb[158].mxu1  ;;  %5129 = vperm.xlu1 %10262, %v5022_v10   ;;  %v4711_v7 = vrot.slane %v13008_v31, 3  ;;  %v7359_v31 = vld [vmem:[%s14867_s13 + $0x8] sm:$0xff] }
 0x6c5   :  { %v2985_v36 = vadd.f32 %v2951_v32, %v13028_v24  ;;  %v9352_v40 = vpop.f32.mrb[159].mxu1  ;;  %v3844_v53 = vpop.f32.mrb[224].mxu0  ;;  %v13312_v46 = vadd.f32 %v3303_v48, %v2984_v49  ;;  %v8023_v24 = vcombine.low %v4686_v41, %v12987_v50  ;;  %v4709_v48 = vrot.slane %v12989_v58, 3  ;;  %v5026_v58 = vld [vmem:[%s14866_s8 + $0xc0] sm:$0xff] }
 0x6c6   :  { %v9511_v11 = vpop.f32.mrb[225].mxu0 }
 0x6c7   :  { %v3847_v62 = vpop.f32.mrb[226].mxu0  ;;  %9626 = vmatmul.mubr.bf16.gmra.mrb[8].mxu1 %v4102_v16  ;;  %v13317_v21 = vadd.f32 %v3306_v17, %v2985_v36  ;;  %v4708_v17 = vrot.slane %v8023_v24, 3  ;;  %v7358_v36 = vld [vmem:[%s14867_s13] sm:$0xff]  ;;  %v4712_v24 = vsel %vm4707_vm5, %v4709_v48, %v4711_v7 }
 0x6c8   :  { %v9512_v38 = vpop.f32.mrb[227].mxu0  ;;  %9713 = vmatprep.mubr.msk.bf16.mxu1 %vm10627_vm0, %v15031_v45  ;;  %5139 = vperm.xlu1 %10262, %v5024_v12   ;;  %v7360_v12 = vld [vmem:[%s14867_s13 + $0x10] sm:$0xff] }
 0x6c9   :  { %v4710_v50 = vsel %vm4707_vm5, %v4708_v17, %v4709_v48 }
 0x6ca   :  { %v2956_v23 = vpop.f32.mrb[160].mxu1 }
 0x6cb   :  { %v2986_v18 = vadd.f32 %v2956_v23, %v13037_v2  ;;  %v9355_v28 = vpop.f32.mrb[161].mxu1 }
 0x6cc   :  { %v2959_v16 = vpop.f32.mrb[162].mxu1  ;;  %5149 = vperm.xlu1 %10262, %v5026_v58   ;;  %v15050_v58 = vrot.slane %v12662_v3, 3 }
 0x6cd   :  { %v9356_v15 = vpop.f32.mrb[163].mxu1  ;;  %v3852_v8 = vpop.f32.mrb[228].mxu0  ;;  %v13327_v47 = vadd.f32 %v3311_v43, %v2986_v18 }
 0x6ce   :  { %v9515_v55 = vpop.f32.mrb[229].mxu0 }
 0x6cf   :  { %v3855_v2 = vpop.f32.mrb[230].mxu0  ;;  %9714 = vmatmul.mubr.bf16.vlgmr.msra.gmra.mrb[12].mxu1 %v4710_v50 }
 0x6d0   :  { %v9516_v39 = vpop.f32.mrb[231].mxu0  ;;  %9717 = vmatprep.mubr.msk.bf16.mxu1 %vm10627_vm0, %v15031_v45  ;;  %7369 = vperm.xlu1 %10262, %v7358_v36  }
 0x6d1   :  { %v4714_v39 = vsel %vm4707_vm5, %v4711_v7, %v15050_v58 }
 0x6d2   :  { %v3575_v49 = vpop.f32.mrb[164].mxu1 }
 0x6d3   :  { %v3677_v43 = vadd.f32 %v3575_v49, %v13070_v27  ;;  %v9443_v0 = vpop.f32.mrb[165].mxu1 }
 0x6d4   :  { %v3578_v32 = vpop.f32.mrb[166].mxu1  ;;  %7374 = vperm.xlu1 %10262, %v7359_v31   ;;  %v7363_v31 = vld [vmem:[%s14867_s13 + $0x28] sm:$0xff] }
 0x6d5   :  { %v3678_v40 = vadd.f32 %v3578_v32, %v13073_v5  ;;  %v9444_v41 = vpop.f32.mrb[167].mxu1  ;;  %v3860_v11 = vpop.f32.mrb[232].mxu0  ;;  %v13341_v10 = vadd.f32 %v3844_v53, %v3677_v43  ;;  %v5015_v5 = vld [vmem:[%s14866_s8 + $0x68] sm:$0xff]  ;;  %v7362_v32 = vld [vmem:[%s14867_s13 + $0x20] sm:$0xff] }
 0x6d6   :  { %v9519_v38 = vpop.f32.mrb[233].mxu0  ;;  %5094 = vperm.xlu0 %10261, %v5015_v5  }
 0x6d7   :  { %v3863_v27 = vpop.f32.mrb[234].mxu0  ;;  %9718 = vmatmul.mubr.bf16.gmra.mrb[16].mxu1 %v4712_v24  ;;  %v13347_v23 = vadd.f32 %v3847_v62, %v3678_v40 }
 0x6d8   :  { %v9520_v18 = vpop.f32.mrb[235].mxu0  ;;  %9721 = vmatprep.mubr.msk.bf16.mxu1 %vm10627_vm0, %v15031_v45  ;;  %7379 = vperm.xlu1 %10262, %v7360_v12   ;;  %v7364_v12 = vld [vmem:[%s14867_s13 + $0x30] sm:$0xff] }
 0x6da   :  { %v3583_v53 = vpop.f32.mrb[168].mxu1 }
 0x6db   :  { %v3679_v48 = vadd.f32 %v3583_v53, %v13094_v56  ;;  %v9447_v28 = vpop.f32.mrb[169].mxu1  ;;  %v7361_v56 = vld [vmem:[%s14867_s13 + $0x18] sm:$0xff] }
 0x6dc   :  { %v3586_v62 = vpop.f32.mrb[170].mxu1  ;;  %7384 = vperm.xlu1 %10262, %v7361_v56  }
 0x6dd   :  { %v3680_v16 = vadd.f32 %v3586_v62, %v13097_v30  ;;  %v9448_v17 = vpop.f32.mrb[171].mxu1  ;;  %v3868_v15 = vpop.f32.mrb[236].mxu0  ;;  %v13359_v55 = vadd.f32 %v3852_v8, %v3679_v48  ;;  %v5017_v30 = vld [vmem:[%s14866_s8 + $0x78] sm:$0xff] }
 0x6de   :  { %v9523_v50 = vpop.f32.mrb[237].mxu0  ;;  %5104 = vperm.xlu0 %10261, %v5017_v30  }
 0x6df   :  { %v3871_v49 = vpop.f32.mrb[238].mxu0  ;;  %9722 = vmatmul.mubr.bf16.gmra.mrb[20].mxu1 %v4714_v39  ;;  %v13367_v43 = vadd.f32 %v3855_v2, %v3680_v16  ;;  %v7365_v39 = vld [vmem:[%s14867_s13 + $0x38] sm:$0xff] }
 0x6e0   :  { %v9524_v0 = vpop.f32.mrb[239].mxu0  ;;  %9725 = vmatprep.mubr.msk.bf16.mxu1 %vm10627_vm0, %v15031_v45  ;;  %7389 = vperm.xlu1 %10262, %v7362_v32  }
 0x6e2   :  { %v3591_v3 = vpop.f32.mrb[172].mxu1 }
 0x6e3   :  { %v3681_v8 = vadd.f32 %v3591_v3, %v13120_v6  ;;  %v9451_v7 = vpop.f32.mrb[173].mxu1  ;;  %v15051_v6 = vld [vmem:[#allocation19_spill] sm:$0xff] }
 0x6e4   :  { %v3594_v2 = vpop.f32.mrb[174].mxu1  ;;  %7394 = vperm.xlu1 %10262, %v7363_v31  }
 0x6e5   :  { %v3682_v36 = vadd.f32 %v3594_v2, %v13125_v37  ;;  %v9452_v40 = vpop.f32.mrb[175].mxu1  ;;  %v3876_v41 = vpop.f32.mrb[240].mxu0  ;;  %v13379_v38 = vadd.f32 %v3860_v11, %v3681_v8  ;;  %v5019_v37 = vld [vmem:[%s14866_s8 + $0x88] sm:$0xff] }
 0x6e6   :  { %v9527_v24 = vpop.f32.mrb[241].mxu0  ;;  %5114 = vperm.xlu0 %10261, %v5019_v37  }
 0x6e7   :  { %v3879_v18 = vpop.f32.mrb[242].mxu0  ;;  %9726 = vmatmul.mubr.bf16.gmra.mrb[24].mxu1 %v15051_v6  ;;  %v13385_v5 = vadd.f32 %v3863_v27, %v3682_v36 }
 0x6e8   :  { %v9528_v53 = vpop.f32.mrb[243].mxu0  ;;  %9729 = vmatprep.mubr.msk.bf16.mxu1 %vm10627_vm0, %v15031_v45  ;;  %7399 = vperm.xlu1 %10262, %v7364_v12  }
 0x6ea   :  { %v3599_v11 = vpop.f32.mrb[176].mxu1 }
 0x6eb   :  { %v3683_v48 = vadd.f32 %v3599_v11, %v13143_v25  ;;  %v9455_v28 = vpop.f32.mrb[177].mxu1  ;;  %v15052_v25 = vld [vmem:[#allocation20_spill] sm:$0xff] }
 0x6ec   :  { %v3602_v27 = vpop.f32.mrb[178].mxu1  ;;  %7404 = vperm.xlu1 %10262, %v7365_v39  }
 0x6ed   :  { %v3684_v62 = vadd.f32 %v3602_v27, %v13148_v42  ;;  %v9456_v16 = vpop.f32.mrb[179].mxu1  ;;  %v3884_v17 = vpop.f32.mrb[244].mxu0  ;;  %v13397_v50 = vadd.f32 %v3868_v15, %v3683_v48  ;;  %v5021_v42 = vld [vmem:[%s14866_s8 + $0x98] sm:$0xff] }
 0x6ee   :  { %v9531_v58 = vpop.f32.mrb[245].mxu0  ;;  %5124 = vperm.xlu0 %10261, %v5021_v42  }
 0x6ef   :  { %v3887_v56 = vpop.f32.mrb[246].mxu0  ;;  %9730 = vmatmul.mubr.bf16.gmra.mrb[28].mxu1 %v15052_v25  ;;  %v13403_v0 = vadd.f32 %v3871_v49, %v3684_v62 }
 0x6f0   :  { %v9532_v30 = vpop.f32.mrb[247].mxu0  ;;  %9733 = vmatprep.mubr.msk.bf16.mxu1 %vm10627_vm0, %v15031_v45 }
 0x6f2   :  { %v3607_v15 = vpop.f32.mrb[180].mxu1 }
 0x6f3   :  { %v3685_v3 = vadd.f32 %v3607_v15, %v13170_v54  ;;  %v9459_v8 = vpop.f32.mrb[181].mxu1  ;;  %v5023_v54 = vld [vmem:[%s14866_s8 + $0xa8] sm:$0xff] }
 0x6f4   :  { %v3610_v7 = vpop.f32.mrb[182].mxu1  ;;  %5134 = vperm.xlu0 %10261, %v5023_v54  }
 0x6f5   :  { %v3686_v32 = vadd.f32 %v3610_v7, %v13177_v20  ;;  %v9460_v2 = vpop.f32.mrb[183].mxu1  ;;  %v3892_v49 = vpop.f32.mrb[248].mxu0  ;;  %v13412_v36 = vadd.f32 %v3876_v41, %v3685_v3 }
 0x6f6   :  { %v9535_v40 = vpop.f32.mrb[249].mxu0 }
 0x6f7   :  { %v3895_v24 = vpop.f32.mrb[250].mxu0  ;;  %9734 = vmatmul.mubr.bf16.gmra.mrb[32].mxu1 %v12714_v63  ;;  %v13415_v31 = vadd.f32 %v3879_v18, %v3686_v32 }
 0x6f8   :  { %v9536_v6 = vpop.f32.mrb[251].mxu0  ;;  %9737 = vmatprep.mubr.msk.bf16.mxu1 %vm10627_vm0, %v15031_v45 }
 0x6fa   :  { %v3615_v20 = vpop.f32.mrb[184].mxu1 }
 0x6fb   :  { %v3687_v53 = vadd.f32 %v3615_v20, %v13194_v51  ;;  %v9463_v41 = vpop.f32.mrb[185].mxu1  ;;  %v5025_v51 = vld [vmem:[%s14866_s8 + $0xb8] sm:$0xff] }
 0x6fc   :  { %v3618_v37 = vpop.f32.mrb[186].mxu1  ;;  %5144 = vperm.xlu0 %10261, %v5025_v51  }
 0x6fd   :  { %v3688_v11 = vadd.f32 %v3618_v37, %v13201_v57  ;;  %v9464_v48 = vpop.f32.mrb[187].mxu1  ;;  %v3900_v63 = vpop.f32.mrb[252].mxu0  ;;  %v13424_v18 = vadd.f32 %v3884_v17, %v3687_v53 }
 0x6fe   :  { %v9539_v28 = vpop.f32.mrb[253].mxu0 }
 0x6ff   :  { %v3903_v12 = vpop.f32.mrb[254].mxu0  ;;  %9738 = vmatmul.mubr.bf16.gmra.mrb[36].mxu1 %v12717_v29  ;;  %v13427_v27 = vadd.f32 %v3887_v56, %v3688_v11 }
 0x700   :  { %v9540_v62 = vpop.f32.mrb[255].mxu0  ;;  %9741 = vmatprep.mubr.msk.bf16.mxu1 %vm10627_vm0, %v15031_v45 }
 0x702   :  { %v3623_v57 = vpop.f32.mrb[188].mxu1 }
 0x703   :  { %v3689_v16 = vadd.f32 %v3623_v57, %v13218_v19  ;;  %v9467_v17 = vpop.f32.mrb[189].mxu1 }
 0x704   :  { %v3626_v58 = vpop.f32.mrb[190].mxu1 }
 0x705   :  { %v3690_v39 = vadd.f32 %v3626_v58, %v13224_v52  ;;  %v9468_v25 = vpop.f32.mrb[191].mxu1  ;;  %v3908_v29 = vpop.f32.mrb[0].mxu0  ;;  %v13436_v56 = vadd.f32 %v3892_v49, %v3689_v16 }
 0x706   :  { %v9543_v30 = vpop.f32.mrb[1].mxu0 }
 0x707   :  { %v3911_v42 = vpop.f32.mrb[2].mxu0  ;;  %9742 = vmatmul.mubr.bf16.gmra.mrb[40].mxu1 %v12724_v44  ;;  %v13439_v15 = vadd.f32 %v3895_v24, %v3690_v39 }
 0x708   :  { %v9544_v3 = vpop.f32.mrb[3].mxu0  ;;  %9745 = vmatprep.mubr.msk.bf16.mxu1 %vm10627_vm0, %v15031_v45 }
 0x70a   :  { %v3631_v8 = vpop.f32.mrb[192].mxu1 }
 0x70b   :  { %v3691_v19 = vadd.f32 %v3631_v8, %v13239_v61  ;;  %v9471_v7 = vpop.f32.mrb[193].mxu1 }
 0x70c   :  { %v3634_v32 = vpop.f32.mrb[194].mxu1 }
 0x70d   :  { %v3692_v52 = vadd.f32 %v3634_v32, %v13248_v26  ;;  %v9472_v2 = vpop.f32.mrb[195].mxu1  ;;  %v3916_v49 = vpop.f32.mrb[4].mxu0  ;;  %v13445_v40 = vadd.f32 %v3900_v63, %v3691_v19 }
 0x70e   :  { %v9547_v6 = vpop.f32.mrb[5].mxu0 }
 0x70f   :  { %v3919_v54 = vpop.f32.mrb[6].mxu0  ;;  %9746 = vmatmul.mubr.bf16.gmra.mrb[44].mxu1 %v12727_v34  ;;  %v13448_v44 = vadd.f32 %v3903_v12, %v3692_v52 }
 0x710   :  { %v9548_v24 = vpop.f32.mrb[7].mxu0  ;;  %9749 = vmatprep.mubr.msk.bf16.mxu1 %vm10627_vm0, %v15031_v45 }
 0x712   :  { %v3639_v20 = vpop.f32.mrb[196].mxu1 }
 0x713   :  { %v3693_v61 = vadd.f32 %v3639_v20, %v13261_v33  ;;  %v9475_v53 = vpop.f32.mrb[197].mxu1 }
 0x714   :  { %v3642_v41 = vpop.f32.mrb[198].mxu1 }
 0x715   :  { %v3694_v26 = vadd.f32 %v3642_v41, %v13267_v13  ;;  %v9476_v37 = vpop.f32.mrb[199].mxu1  ;;  %v3924_v11 = vpop.f32.mrb[8].mxu0  ;;  %v13454_v48 = vadd.f32 %v3908_v29, %v3693_v61 }
 0x716   :  { %v9551_v63 = vpop.f32.mrb[9].mxu0  ;;  %v15054_v37 = vrot.slane %v12689_v14, 3 }
 0x717   :  { %v3927_v28 = vpop.f32.mrb[10].mxu0  ;;  %9750 = vmatmul.mubr.bf16.gmra.mrb[48].mxu1 %v12733_v4  ;;  %v13457_v34 = vadd.f32 %v3911_v42, %v3694_v26 }
 0x718   :  { %v9552_v12 = vpop.f32.mrb[11].mxu0  ;;  %9753 = vmatprep.mubr.msk.bf16.mxu1 %vm10627_vm0, %v15031_v45 }
 0x71a   :  { %v3647_v62 = vpop.f32.mrb[200].mxu1 }
 0x71b   :  { %v3695_v33 = vadd.f32 %v3647_v62, %v13280_v59  ;;  %v9479_v51 = vpop.f32.mrb[201].mxu1 }
 0x71c   :  { %v3650_v57 = vpop.f32.mrb[202].mxu1 }
 0x71d   :  { %v3696_v13 = vadd.f32 %v3650_v57, %v13286_v22  ;;  %v9480_v16 = vpop.f32.mrb[203].mxu1  ;;  %v3932_v17 = vpop.f32.mrb[12].mxu0  ;;  %v13463_v58 = vadd.f32 %v3916_v49, %v3695_v33 }
 0x71e   :  { %v9555_v39 = vpop.f32.mrb[13].mxu0 }
 0x71f   :  { %v3935_v25 = vpop.f32.mrb[14].mxu0  ;;  %9754 = vmatmul.mubr.bf16.gmra.mrb[52].mxu1 %v12736_v1  ;;  %v13466_v4 = vadd.f32 %v3919_v54, %v3696_v13  ;;  %v15053_v1 = vld [vmem:[#allocation22_spill] sm:$0xff] }
 0x720   :  { %v9556_v29 = vpop.f32.mrb[15].mxu0  ;;  %9757 = vmatprep.mubr.msk.bf16.mxu1 %vm10627_vm0, %v15031_v45 }
 0x722   :  { %v3655_v30 = vpop.f32.mrb[204].mxu1 }
 0x723   :  { %v3697_v59 = vadd.f32 %v3655_v30, %v13297_v60  ;;  %v9483_v42 = vpop.f32.mrb[205].mxu1 }
 0x724   :  { %v3658_v3 = vpop.f32.mrb[206].mxu1 }
 0x725   :  { %v3698_v22 = vadd.f32 %v3658_v3, %v13303_v35  ;;  %v9484_v8 = vpop.f32.mrb[207].mxu1  ;;  %v3940_v19 = vpop.f32.mrb[16].mxu0  ;;  %v13472_v7 = vadd.f32 %v3924_v11, %v3697_v59 }
 0x726   :  { %v9559_v32 = vpop.f32.mrb[17].mxu0 }
 0x727   :  { %v3943_v52 = vpop.f32.mrb[18].mxu0  ;;  %9758 = vmatmul.mubr.bf16.gmra.mrb[56].mxu1 %v15053_v1  ;;  %v13475_v2 = vadd.f32 %v3927_v28, %v3698_v22 }
 0x728   :  { %v9560_v49 = vpop.f32.mrb[19].mxu0  ;;  %9761 = vmatprep.mubr.msk.bf16.mxu1 %vm10627_vm0, %v15031_v45 }
 0x72a   :  { %v3663_v6 = vpop.f32.mrb[208].mxu1 }
 0x72b   :  { %v3699_v60 = vadd.f32 %v3663_v6, %v13312_v46  ;;  %v9487_v54 = vpop.f32.mrb[209].mxu1 }
 0x72c   :  { %v3666_v24 = vpop.f32.mrb[210].mxu1 }
 0x72d   :  { %v3700_v35 = vadd.f32 %v3666_v24, %v13317_v21  ;;  %v9488_v20 = vpop.f32.mrb[211].mxu1  ;;  %v4559_v61 = vpop.f32.mrb[20].mxu0  ;;  %v13481_v53 = vadd.f32 %v3932_v17, %v3699_v60 }
 0x72e   :  { %v9647_v41 = vpop.f32.mrb[21].mxu0 }
 0x72f   :  { %v4562_v26 = vpop.f32.mrb[22].mxu0  ;;  %9762 = vmatmul.mubr.bf16.gmra.mrb[60].mxu1 %v15054_v37  ;;  %v13485_v11 = vadd.f32 %v3935_v25, %v3700_v35 }
 0x730   :  { %v9648_v63 = vpop.f32.mrb[23].mxu0 }
 0x732   :  { %v3671_v28 = vpop.f32.mrb[212].mxu1 }
 0x733   :  { %v3701_v12 = vadd.f32 %v3671_v28, %v13327_v47  ;;  %v9491_v46 = vpop.f32.mrb[213].mxu1 }
 0x734   :  { %v3674_v62 = vpop.f32.mrb[214].mxu1 }
 0x735   :  { %v9492_v33 = vpop.f32.mrb[215].mxu1  ;;  %v4567_v51 = vpop.f32.mrb[24].mxu0  ;;  %v13488_v21 = vadd.f32 %v3940_v19, %v3701_v12 }
 0x736   :  { %v9651_v57 = vpop.f32.mrb[25].mxu0 }
 0x737   :  { %v4570_v13 = vpop.f32.mrb[26].mxu0 }
 0x738   :  { %v9652_v16 = vpop.f32.mrb[27].mxu0 }
 0x73a   :  { %v4199_v17 = vpop.f32.mrb[216].mxu1 }
 0x73b   :  { %v4301_v39 = vadd.f32 %v4199_v17, %v13341_v10  ;;  %v9579_v14 = vpop.f32.mrb[217].mxu1 }
 0x73c   :  { %v4202_v29 = vpop.f32.mrb[218].mxu1 }
 0x73d   :  { %v4302_v25 = vadd.f32 %v4202_v29, %v13347_v23  ;;  %v9580_v30 = vpop.f32.mrb[219].mxu1  ;;  %v4575_v59 = vpop.f32.mrb[28].mxu0  ;;  %v13492_v42 = vadd.f32 %v4559_v61, %v4301_v39 }
 0x73e   :  { %v9655_v47 = vpop.f32.mrb[29].mxu0 }
 0x73f   :  { %v4578_v3 = vpop.f32.mrb[30].mxu0  ;;  %v13494_v22 = vadd.f32 %v4562_v26, %v4302_v25 }
 0x740   :  { %v9656_v8 = vpop.f32.mrb[31].mxu0 }
 0x742   :  { %v4207_v19 = vpop.f32.mrb[220].mxu1 }
 0x743   :  { %v4303_v32 = vadd.f32 %v4207_v19, %v13359_v55  ;;  %v9583_v52 = vpop.f32.mrb[221].mxu1 }
 0x744   :  { %v4210_v1 = vpop.f32.mrb[222].mxu1 }
 0x745   :  { %v4304_v10 = vadd.f32 %v4210_v1, %v13367_v43  ;;  %v9584_v49 = vpop.f32.mrb[223].mxu1  ;;  %v4583_v6 = vpop.f32.mrb[32].mxu0  ;;  %v13498_v60 = vadd.f32 %v4567_v51, %v4303_v32 }
 0x746   :  { %v9659_v23 = vpop.f32.mrb[33].mxu0 }
 0x747   :  { %v4586_v54 = vpop.f32.mrb[34].mxu0  ;;  %v13500_v24 = vadd.f32 %v4570_v13, %v4304_v10 }
 0x748   :  { %v9660_v35 = vpop.f32.mrb[35].mxu0 }
 0x74a   :  { %v4215_v20 = vpop.f32.mrb[224].mxu1 }
 0x74b   :  { %v4305_v61 = vadd.f32 %v4215_v20, %v13379_v38  ;;  %v9587_v41 = vpop.f32.mrb[225].mxu1 }
 0x74c   :  { %v4218_v26 = vpop.f32.mrb[226].mxu1 }
 0x74d   :  { %v4306_v55 = vadd.f32 %v4218_v26, %v13385_v5  ;;  %v9588_v37 = vpop.f32.mrb[227].mxu1  ;;  %v4591_v63 = vpop.f32.mrb[36].mxu0  ;;  %v13504_v28 = vadd.f32 %v4575_v59, %v4305_v61 }
 0x74e   :  { %v9663_v43 = vpop.f32.mrb[37].mxu0 }
 0x74f   :  { %v4594_v12 = vpop.f32.mrb[38].mxu0  ;;  %v13506_v46 = vadd.f32 %v4578_v3, %v4306_v55 }
 0x750   :  { %v9664_v62 = vpop.f32.mrb[39].mxu0 }
 0x752   :  { %v4223_v33 = vpop.f32.mrb[228].mxu1 }
 0x753   :  { %v4307_v51 = vadd.f32 %v4223_v33, %v13397_v50  ;;  %v9591_v57 = vpop.f32.mrb[229].mxu1 }
 0x754   :  { %v4226_v13 = vpop.f32.mrb[230].mxu1 }
 0x755   :  { %v4308_v38 = vadd.f32 %v4226_v13, %v13403_v0  ;;  %v9592_v16 = vpop.f32.mrb[231].mxu1  ;;  %v4599_v17 = vpop.f32.mrb[40].mxu0  ;;  %v13510_v39 = vadd.f32 %v4583_v6, %v4307_v51 }
 0x756   :  { %v9667_v5 = vpop.f32.mrb[41].mxu0 }
 0x757   :  { %v4602_v14 = vpop.f32.mrb[42].mxu0  ;;  %v13512_v29 = vadd.f32 %v4586_v54, %v4308_v38 }
 0x758   :  { %v9668_v25 = vpop.f32.mrb[43].mxu0 }
 0x75a   :  { %v4231_v30 = vpop.f32.mrb[232].mxu1 }
 0x75b   :  { %v4309_v59 = vadd.f32 %v4231_v30, %v13412_v36  ;;  %v9595_v47 = vpop.f32.mrb[233].mxu1 }
 0x75c   :  { %v4234_v3 = vpop.f32.mrb[234].mxu1 }
 0x75d   :  { %v4310_v50 = vadd.f32 %v4234_v3, %v13415_v31  ;;  %v9596_v8 = vpop.f32.mrb[235].mxu1  ;;  %v4607_v19 = vpop.f32.mrb[44].mxu0  ;;  %v13516_v32 = vadd.f32 %v4591_v63, %v4309_v59 }
 0x75e   :  { %v9671_v0 = vpop.f32.mrb[45].mxu0 }
 0x75f   :  { %v4610_v52 = vpop.f32.mrb[46].mxu0  ;;  %v13518_v1 = vadd.f32 %v4594_v12, %v4310_v50 }
 0x760   :  { %v9672_v10 = vpop.f32.mrb[47].mxu0 }
 0x762   :  { %v4239_v49 = vpop.f32.mrb[236].mxu1 }
 0x763   :  { %v4311_v6 = vadd.f32 %v4239_v49, %v13424_v18  ;;  %v9599_v23 = vpop.f32.mrb[237].mxu1 }
 0x764   :  { %v4242_v54 = vpop.f32.mrb[238].mxu1 }
 0x765   :  { %v4312_v36 = vadd.f32 %v4242_v54, %v13427_v27  ;;  %v9600_v35 = vpop.f32.mrb[239].mxu1  ;;  %v4615_v20 = vpop.f32.mrb[48].mxu0  ;;  %v13522_v61 = vadd.f32 %v4599_v17, %v4311_v6 }
 0x766   :  { %v9675_v31 = vpop.f32.mrb[49].mxu0 }
 0x767   :  { %v4618_v41 = vpop.f32.mrb[50].mxu0  ;;  %v13524_v26 = vadd.f32 %v4602_v14, %v4312_v36  ;;  %v4989_v31 = vld [vmem:[%s14868_s7 + $0x18] sm:$0xff] }
 0x768   :  { %v9676_v55 = vpop.f32.mrb[51].mxu0 }
 0x76a   :  { %v4247_v37 = vpop.f32.mrb[240].mxu1 }
 0x76b   :  { %v4313_v63 = vadd.f32 %v4247_v37, %v13436_v56  ;;  %v9603_v43 = vpop.f32.mrb[241].mxu1 }
 0x76c   :  { %v4250_v12 = vpop.f32.mrb[242].mxu1 }
 0x76d   :  { %v4314_v18 = vadd.f32 %v4250_v12, %v13439_v15  ;;  %v9604_v62 = vpop.f32.mrb[243].mxu1  ;;  %v4623_v33 = vpop.f32.mrb[52].mxu0  ;;  %v13528_v51 = vadd.f32 %v4607_v19, %v4313_v63  ;;  %v4990_v12 = vld [vmem:[%s14868_s7 + $0x20] sm:$0xff] }
 0x76e   :  { %v9679_v27 = vpop.f32.mrb[53].mxu0 }
 0x76f   :  { %v4626_v57 = vpop.f32.mrb[54].mxu0  ;;  %v13530_v13 = vadd.f32 %v4610_v52, %v4314_v18  ;;  %v4991_v18 = vld [vmem:[%s14868_s7 + $0x28] sm:$0xff] }
 0x770   :  { %v9680_v38 = vpop.f32.mrb[55].mxu0 }
 0x772   :  { %v4255_v16 = vpop.f32.mrb[244].mxu1 }
 0x773   :  { %v4315_v17 = vadd.f32 %v4255_v16, %v13445_v40  ;;  %v9607_v5 = vpop.f32.mrb[245].mxu1  ;;  %v4986_v40 = vld [vmem:[%s14868_s7] sm:$0xff] }
 0x774   :  { %v4258_v14 = vpop.f32.mrb[246].mxu1 }
 0x775   :  { %v4316_v56 = vadd.f32 %v4258_v14, %v13448_v44  ;;  %v9608_v25 = vpop.f32.mrb[247].mxu1  ;;  %v4631_v30 = vpop.f32.mrb[56].mxu0  ;;  %v13534_v59 = vadd.f32 %v4615_v20, %v4315_v17  ;;  %v4987_v44 = vld [vmem:[%s14868_s7 + $0x8] sm:$0xff]  ;;  %v4988_v20 = vld [vmem:[%s14868_s7 + $0x10] sm:$0xff] }
 0x776   :  { %v9683_v15 = vpop.f32.mrb[57].mxu0  ;;  %v10198_v54 = vpack.c.bf16 %v4987_v44, %v4986_v40  ;;  %v10201_v55 = vpack.c.bf16 %v4989_v31, %v4988_v20 }
 0x777   :  { %v4634_v47 = vpop.f32.mrb[58].mxu0  ;;  %v13536_v3 = vadd.f32 %v4618_v41, %v4316_v56 }
 0x778   :  { %v9684_v50 = vpop.f32.mrb[59].mxu0  ;;  %10199 = vmatpush3.bf16.msra.mxu0 %v10198_v54 }
 0x77a   :  { %v4263_v8 = vpop.f32.mrb[248].mxu1 }
 0x77b   :  { %v4317_v19 = vadd.f32 %v4263_v8, %v13454_v48  ;;  %v9611_v0 = vpop.f32.mrb[249].mxu1 }
 0x77c   :  { %v4266_v52 = vpop.f32.mrb[250].mxu1 }
 0x77d   :  { %v4318_v10 = vadd.f32 %v4266_v52, %v13457_v34  ;;  %v9612_v49 = vpop.f32.mrb[251].mxu1  ;;  %v4639_v6 = vpop.f32.mrb[60].mxu0  ;;  %v13546_v23 = vadd.f32 %v4623_v33, %v4317_v19  ;;  %v15055_v34 = vmov 0.0|0.0   ;;  %v10204_v33 = vpack.c.bf16 %v4991_v18, %v4990_v12 }
 0x77e   :  { %v9687_v36 = vpop.f32.mrb[61].mxu0  ;;  %10200 = vmatprep.subr.bf16.mxu0 %v15055_v34 }
 0x77f   :  { %v4642_v35 = vpop.f32.mrb[62].mxu0  ;;  %v13548_v48 = vadd.f32 %v4626_v57, %v4318_v10  ;;  %10202 = vmatpush3.bf16.msra.mxu0 %v10201_v55  ;;  %v4996_v55 = vld [vmem:[%s14868_s7 + $0x50] sm:$0xff] }
 0x780   :  { %v9688_v41 = vpop.f32.mrb[63].mxu0  ;;  %10203 = vmatprep.subr.bf16.mxu0 %v15055_v34 }
 0x782   :  { %v4271_v37 = vpop.f32.mrb[252].mxu1 }
 0x783   :  { %v4319_v63 = vadd.f32 %v4271_v37, %v13463_v58  ;;  %v9615_v43 = vpop.f32.mrb[253].mxu1  ;;  %10205 = vmatpush3.bf16.msra.mxu0 %v10204_v33  ;;  %v4997_v37 = vld [vmem:[%s14868_s7 + $0x58] sm:$0xff] }
 0x784   :  { %v4274_v62 = vpop.f32.mrb[254].mxu1  ;;  %10206 = vmatprep.subr.bf16.mxu0 %v15055_v34 }
 0x785   :  { %v4320_v27 = vadd.f32 %v4274_v62, %v13466_v4  ;;  %v9616_v57 = vpop.f32.mrb[255].mxu1  ;;  %v4647_v38 = vpop.f32.mrb[64].mxu0  ;;  %v13566_v16 = vadd.f32 %v4631_v30, %v4319_v63  ;;  %v10213_v62 = vpack.c.bf16 %v4997_v37, %v4996_v55 }
 0x786   :  { %v9691_v58 = vpop.f32.mrb[65].mxu0  ;;  %v4998_v57 = vld [vmem:[%s14868_s7 + $0x60] sm:$0xff] }
 0x787   :  { %v4650_v17 = vpop.f32.mrb[66].mxu0  ;;  %v13568_v5 = vadd.f32 %v4634_v47, %v4320_v27  ;;  %v13612_v58 = vpop.permute.xlu1 %5034 }
 0x788   :  { %v9692_v14 = vpop.f32.mrb[67].mxu0 }
 0x789   :  { %v5001_v14 = vld [vmem:[%s14868_s7 + $0x78] sm:$0xff] }
 0x78a   :  { %v4279_v56 = vpop.f32.mrb[0].mxu1 }
 0x78b   :  { %v4321_v25 = vadd.f32 %v4279_v56, %v13472_v7  ;;  %v9619_v15 = vpop.f32.mrb[1].mxu1 }
 0x78c   :  { %v4282_v50 = vpop.f32.mrb[2].mxu1 }
 0x78d   :  { %v4322_v8 = vadd.f32 %v4282_v50, %v13475_v2  ;;  %v9620_v4 = vpop.f32.mrb[3].mxu1  ;;  %v4655_v19 = vpop.f32.mrb[68].mxu0  ;;  %v13573_v0 = vadd.f32 %v4639_v6, %v4321_v25  ;;  %v4992_v2 = vld [vmem:[%s14868_s7 + $0x30] sm:$0xff]  ;;  %v4993_v6 = vld [vmem:[%s14868_s7 + $0x38] sm:$0xff] }
 0x78e   :  { %v9695_v30 = vpop.f32.mrb[69].mxu0  ;;  %v13622_v50 = vpop.permute.xlu1 %5039 }
 0x78f   :  { %v4658_v52 = vpop.f32.mrb[70].mxu0  ;;  %v13575_v40 = vadd.f32 %v4642_v35, %v4322_v8  ;;  %v4994_v35 = vld [vmem:[%s14868_s7 + $0x40] sm:$0xff] }
 0x790   :  { %v9696_v47 = vpop.f32.mrb[71].mxu0 }
 0x792   :  { %v4287_v44 = vpop.f32.mrb[4].mxu1  ;;  %v13627_v52 = vpop.permute.xlu1 %5044 }
 0x793   :  { %v4323_v10 = vadd.f32 %v4287_v44, %v13481_v53  ;;  %v9623_v49 = vpop.f32.mrb[5].mxu1  ;;  %v10207_v53 = vpack.c.bf16 %v4993_v6, %v4992_v2 }
 0x794   :  { %v4290_v54 = vpop.f32.mrb[6].mxu1 }
 0x795   :  { %v4324_v7 = vadd.f32 %v4290_v54, %v13485_v11  ;;  %v9624_v36 = vpop.f32.mrb[7].mxu1  ;;  %v13579_v20 = vadd.f32 %v4647_v38, %v4323_v10  ;;  %v4995_v11 = vld [vmem:[%s14868_s7 + $0x48] sm:$0xff]  ;;  %10208 = vmatpush3.bf16.msra.mxu0 %v10207_v53 }
 0x796   :  { %v10210_v41 = vpack.c.bf16 %v4995_v11, %v4994_v35  ;;  %10209 = vmatprep.subr.bf16.mxu0 %v15055_v34  ;;  %v4999_v38 = vld [vmem:[%s14868_s7 + $0x68] sm:$0xff] }
 0x797   :  { %v13593_v31 = vadd.f32 %v4650_v17, %v4324_v7  ;;  %v5000_v17 = vld [vmem:[%s14868_s7 + $0x70] sm:$0xff]  ;;  %v13631_v7 = vpop.permute.xlu1 %5049 }
 0x798   :  { %v10219_v4 = vpack.c.bf16 %v5001_v14, %v5000_v17 }
 0x799   :  { %10211 = vmatpush3.bf16.msra.mxu0 %v10210_v41 }
 0x79a   :  { %v4295_v63 = vpop.f32.mrb[8].mxu1  ;;  %10212 = vmatprep.subr.bf16.mxu0 %v15055_v34 }
 0x79b   :  { %v4325_v43 = vadd.f32 %v4295_v63, %v13488_v21  ;;  %v9627_v12 = vpop.f32.mrb[9].mxu1  ;;  %v10216_v21 = vpack.c.bf16 %v4999_v38, %v4998_v57  ;;  %v13635_v11 = vpop.permute.xlu1 %5054 }
 0x79c   :  { %v4298_v18 = vpop.f32.mrb[10].mxu1 }
 0x79d   :  { %v9628_v33 = vpop.f32.mrb[11].mxu1  ;;  %v13603_v27 = vadd.f32 %v4655_v19, %v4325_v43  ;;  %10214 = vmatpush3.bf16.msra.mxu0 %v10213_v62  ;;  %v13655_v18 = vpop.permute.xlu0 %5029 }
 0x79e   :  { %10215 = vmatprep.subr.bf16.mxu0 %v15055_v34 }
 0x79f   :  { %v13638_v37 = vpop.permute.xlu1 %5059 }
 0x7a1   :  { %10217 = vmatpush3.bf16.msra.mxu0 %v10216_v21 }
 0x7a2   :  { %v4828_v56 = vpop.f32.mrb[12].mxu1  ;;  %10218 = vmatprep.subr.bf16.mxu0 %v15055_v34 }
 0x7a3   :  { %v4930_v25 = vadd.f32 %v4828_v56, %v13492_v42  ;;  %v9715_v15 = vpop.f32.mrb[13].mxu1  ;;  %v13659_v33 = vpop.permute.xlu1 %5064 }
 0x7a4   :  { %v4831_v8 = vpop.f32.mrb[14].mxu1 }
 0x7a5   :  { %v4931_v19 = vadd.f32 %v4831_v8, %v13494_v22  ;;  %v9716_v30 = vpop.f32.mrb[15].mxu1  ;;  %10220 = vmatpush3.bf16.msra.mxu0 %v10219_v4 }
 0x7a6   :  { %9800 = vmatprep.subr.bf16.mxu0 %v15031_v45 }
 0x7aa   :  { %v4836_v47 = vpop.f32.mrb[16].mxu1 }
 0x7ab   :  { %v4932_v44 = vadd.f32 %v4836_v47, %v13498_v60  ;;  %v9719_v42 = vpop.f32.mrb[17].mxu1  ;;  %v13675_v47 = vpop.permute.xlu1 %5069 }
 0x7ac   :  { %v4839_v10 = vpop.f32.mrb[18].mxu1 }
 0x7ad   :  { %v4933_v49 = vadd.f32 %v4839_v10, %v13500_v24  ;;  %v9720_v54 = vpop.f32.mrb[19].mxu1  ;;  %v13643_v24 = vld [vmem:[%s14869_s6] ss:$0 sm:$0xff] }
 0x7ae   :  { %v13650_v12 = vadd.f32 %v13643_v24, %v4930_v25 }
 0x7af   :  { %v13666_v21 = vadd.f32 %v13643_v24, %v4933_v49 }
 0x7b0   :  { %v5152_v38 = vmul.f32 %v13655_v18, %v13650_v12 }
 0x7b1   :  { %v5155_v30 = vmul.f32 %v13627_v52, %v13666_v21 }
 0x7b2   :  { %v4844_v36 = vpop.f32.mrb[20].mxu1 }
 0x7b3   :  { %v4934_v22 = vadd.f32 %v4844_v36, %v13504_v28  ;;  %v9723_v2 = vpop.f32.mrb[21].mxu1  ;;  %v13646_v28 = vadd.f32 %v13643_v24, %v4931_v19 }
 0x7b4   :  { %v4847_v6 = vpop.f32.mrb[22].mxu1 }
 0x7b5   :  { %v4935_v35 = vadd.f32 %v4847_v6, %v13506_v46  ;;  %v9724_v53 = vpop.f32.mrb[23].mxu1  ;;  %v5153_v62 = vmul.f32 %v13612_v58, %v13646_v28  ;;  %v13670_v15 = vadd.f32 %v13643_v24, %v4934_v22 }
 0x7b7   :  { %v5177_v25 = vadd.f32 %v5153_v62, %v5152_v38 }
 0x7ba   :  { %v4852_v41 = vpop.f32.mrb[24].mxu1 }
 0x7bb   :  { %v4936_v60 = vadd.f32 %v4852_v41, %v13510_v39  ;;  %v9727_v55 = vpop.f32.mrb[25].mxu1  ;;  %v13653_v39 = vadd.f32 %v13643_v24, %v4932_v44  ;;  %v5156_v44 = vmul.f32 %v13631_v7, %v13670_v15  ;;  %v13689_v41 = vpop.permute.xlu1 %5074 }
 0x7bc   :  { %v4855_v63 = vpop.f32.mrb[26].mxu1 }
 0x7bd   :  { %v4937_v46 = vadd.f32 %v4855_v63, %v13512_v29  ;;  %v9728_v43 = vpop.f32.mrb[27].mxu1  ;;  %v5154_v29 = vmul.f32 %v13622_v50, %v13653_v39  ;;  %v13683_v49 = vadd.f32 %v13643_v24, %v4936_v60 }
 0x7bf   :  { %v5178_v19 = vadd.f32 %v5177_v25, %v5154_v29  ;;  %v13694_v55 = vadd.f32 %v13643_v24, %v4937_v46  ;;  %v13702_v38 = vpop.permute.xlu1 %5079 }
 0x7c1   :  { %v5179_v10 = vadd.f32 %v5178_v19, %v5155_v30  ;;  %v5159_v62 = vmul.f32 %v13659_v33, %v13694_v55 }
 0x7c2   :  { %v4860_v57 = vpop.f32.mrb[28].mxu1 }
 0x7c3   :  { %v4938_v17 = vadd.f32 %v4860_v57, %v13516_v32  ;;  %v9731_v14 = vpop.f32.mrb[29].mxu1  ;;  %v13680_v32 = vadd.f32 %v13643_v24, %v4935_v35  ;;  %v5180_v22 = vadd.f32 %v5179_v10, %v5156_v44  ;;  %v5158_v35 = vmul.f32 %v13638_v37, %v13683_v49  ;;  %v13715_v30 = vpop.permute.xlu1 %5084 }
 0x7c4   :  { %v4863_v56 = vpop.f32.mrb[30].mxu1 }
 0x7c5   :  { %v4939_v8 = vadd.f32 %v4863_v56, %v13518_v1  ;;  %v9732_v4 = vpop.f32.mrb[31].mxu1  ;;  %v5157_v2 = vmul.f32 %v13635_v11, %v13680_v32 }
 0x7c7   :  { %v5181_v60 = vadd.f32 %v5180_v22, %v5157_v2  ;;  %v13707_v46 = vadd.f32 %v13643_v24, %v4939_v8 }
 0x7c9   :  { %v5182_v43 = vadd.f32 %v5181_v60, %v5158_v35  ;;  %v13729_v60 = vpop.permute.xlu1 %5089 }
 0x7ca   :  { %v4868_v42 = vpop.f32.mrb[32].mxu1 }
 0x7cb   :  { %v4940_v1 = vadd.f32 %v4868_v42, %v13522_v61  ;;  %v9735_v54 = vpop.f32.mrb[33].mxu1  ;;  %v13697_v61 = vadd.f32 %v13643_v24, %v4938_v17  ;;  %v5183_v25 = vadd.f32 %v5182_v43, %v5159_v62 }
 0x7cc   :  { %v4871_v36 = vpop.f32.mrb[34].mxu1 }
 0x7cd   :  { %v4941_v6 = vadd.f32 %v4871_v36, %v13524_v26  ;;  %v9736_v53 = vpop.f32.mrb[35].mxu1  ;;  %v5160_v14 = vmul.f32 %v13675_v47, %v13697_v61  ;;  %v13711_v4 = vadd.f32 %v13643_v24, %v4940_v1 }
 0x7cf   :  { %v5184_v19 = vadd.f32 %v5183_v25, %v5160_v14  ;;  %v5162_v42 = vmul.f32 %v13702_v38, %v13711_v4  ;;  %v13720_v8 = vadd.f32 %v13643_v24, %v4941_v6 }
 0x7d1   :  { %v5163_v35 = vmul.f32 %v13715_v30, %v13720_v8 }
 0x7d2   :  { %v4876_v63 = vpop.f32.mrb[36].mxu1 }
 0x7d3   :  { %v4942_v26 = vadd.f32 %v4876_v63, %v13528_v51  ;;  %v9739_v57 = vpop.f32.mrb[37].mxu1  ;;  %v5161_v51 = vmul.f32 %v13689_v41, %v13707_v46 }
 0x7d4   :  { %v4879_v29 = vpop.f32.mrb[38].mxu1  ;;  %v13740_v57 = vpop.permute.xlu0 %5094 }
 0x7d5   :  { %v4943_v17 = vadd.f32 %v4879_v29, %v13530_v13  ;;  %v9740_v56 = vpop.f32.mrb[39].mxu1  ;;  %v5185_v36 = vadd.f32 %v5184_v19, %v5161_v51  ;;  %v13724_v1 = vadd.f32 %v13643_v24, %v4942_v26 }
 0x7d7   :  { %v5186_v53 = vadd.f32 %v5185_v36, %v5162_v42  ;;  %v5164_v6 = vmul.f32 %v13729_v60, %v13724_v1 }
 0x7d9   :  { %v5187_v43 = vadd.f32 %v5186_v53, %v5163_v35 }
 0x7da   :  { %v4884_v44 = vpop.f32.mrb[40].mxu1 }
 0x7db   :  { %v4944_v13 = vadd.f32 %v4884_v44, %v13534_v59  ;;  %v9743_v10 = vpop.f32.mrb[41].mxu1  ;;  %v13734_v59 = vadd.f32 %v13643_v24, %v4943_v17  ;;  %v5188_v56 = vadd.f32 %v5187_v43, %v5164_v6  ;;  %v13745_v17 = vpop.permute.xlu1 %5099 }
 0x7dc   :  { %v4887_v54 = vpop.f32.mrb[42].mxu1 }
 0x7dd   :  { %v4945_v22 = vadd.f32 %v4887_v54, %v13536_v3  ;;  %v9744_v2 = vpop.f32.mrb[43].mxu1  ;;  %v13737_v62 = vadd.f32 %v13643_v24, %v4944_v13  ;;  %v5165_v14 = vmul.f32 %v13740_v57, %v13734_v59  ;;  %v13755_v13 = vpop.permute.xlu0 %5104 }
 0x7df   :  { %v5166_v51 = vmul.f32 %v13745_v17, %v13737_v62  ;;  %v13750_v44 = vadd.f32 %v13643_v24, %v4945_v22  ;;  %v13760_v53 = vpop.permute.xlu1 %5109 }
 0x7e1   :  { %v5167_v54 = vmul.f32 %v13755_v13, %v13750_v44 }
 0x7e2   :  { %v4892_v63 = vpop.f32.mrb[44].mxu1 }
 0x7e3   :  { %v4946_v3 = vadd.f32 %v4892_v63, %v13546_v23  ;;  %v9747_v26 = vpop.f32.mrb[45].mxu1  ;;  %v5189_v23 = vadd.f32 %v5188_v56, %v5165_v14  ;;  %v13775_v56 = vpop.permute.xlu1 %5119 }
 0x7e4   :  { %v4895_v29 = vpop.f32.mrb[46].mxu1 }
 0x7e5   :  { %v4947_v25 = vadd.f32 %v4895_v29, %v13548_v48  ;;  %v9748_v19 = vpop.f32.mrb[47].mxu1  ;;  %v13753_v42 = vadd.f32 %v13643_v24, %v4946_v3  ;;  %v5190_v48 = vadd.f32 %v5189_v23, %v5166_v51  ;;  %v13771_v29 = vpop.permute.xlu0 %5114 }
 0x7e7   :  { %v5168_v22 = vmul.f32 %v13760_v53, %v13753_v42  ;;  %v13765_v6 = vadd.f32 %v13643_v24, %v4947_v25  ;;  %v5191_v3 = vadd.f32 %v5190_v48, %v5167_v54 }
 0x7e9   :  { %v5192_v14 = vadd.f32 %v5191_v3, %v5168_v22  ;;  %v13791_v3 = vpop.permute.xlu1 %5129 }
 0x7ea   :  { %v4900_v10 = vpop.f32.mrb[48].mxu1  ;;  %15057 = vst [vmem:[#allocation4_spill] sm:$0xff] %v13791_v3 }
 0x7eb   :  { %v4948_v36 = vadd.f32 %v4900_v10, %v13566_v16  ;;  %v9751_v2 = vpop.f32.mrb[49].mxu1  ;;  %v5169_v16 = vmul.f32 %v13771_v29, %v13765_v6 }
 0x7ec   :  { %v4903_v35 = vpop.f32.mrb[50].mxu1 }
 0x7ed   :  { %v4949_v63 = vadd.f32 %v4903_v35, %v13568_v5  ;;  %v9752_v43 = vpop.f32.mrb[51].mxu1  ;;  %v13769_v26 = vadd.f32 %v13643_v24, %v4948_v36  ;;  %v5193_v54 = vadd.f32 %v5192_v14, %v5169_v16  ;;  %v13787_v35 = vpop.permute.xlu0 %5124 }
 0x7ee   :  { %15056 = vst [vmem:[#allocation23_spill] sm:$0xff] %v13787_v35 }
 0x7ef   :  { %v5170_v25 = vmul.f32 %v13775_v56, %v13769_v26  ;;  %v13780_v51 = vadd.f32 %v13643_v24, %v4949_v63 }
 0x7f1   :  { %v5171_v22 = vmul.f32 %v13787_v35, %v13780_v51  ;;  %v5194_v43 = vadd.f32 %v5193_v54, %v5170_v25 }
 0x7f2   :  { %v4908_v19 = vpop.f32.mrb[52].mxu1 }
 0x7f3   :  { %v4950_v5 = vadd.f32 %v4908_v19, %v13573_v0  ;;  %v9755_v23 = vpop.f32.mrb[53].mxu1  ;;  %v5195_v14 = vadd.f32 %v5194_v43, %v5171_v22 }
 0x7f4   :  { %v4911_v10 = vpop.f32.mrb[54].mxu1 }
 0x7f5   :  { %v13784_v48 = vadd.f32 %v13643_v24, %v4950_v5  ;;  %v4951_v36 = vadd.f32 %v4911_v10, %v13575_v40  ;;  %v9756_v2 = vpop.f32.mrb[55].mxu1  ;;  %v13799_v5 = vpop.permute.xlu0 %5134 }
 0x7f6   :  { %15058 = vst [vmem:[#allocation24_spill] sm:$0xff] %v13799_v5 }
 0x7f7   :  { %v5172_v0 = vmul.f32 %v13791_v3, %v13784_v48  ;;  %v13796_v63 = vadd.f32 %v13643_v24, %v4951_v36  ;;  %v13807_v36 = vpop.permute.xlu1 %5139 }
 0x7f8   :  { %15059 = vst [vmem:[#allocation25_spill] sm:$0xff] %v13807_v36 }
 0x7f9   :  { %v5173_v10 = vmul.f32 %v13799_v5, %v13796_v63  ;;  %v5196_v25 = vadd.f32 %v5195_v14, %v5172_v0 }
 0x7fa   :  { %v4916_v16 = vpop.f32.mrb[56].mxu1 }
 0x7fb   :  { %v4952_v19 = vadd.f32 %v4916_v16, %v13579_v20  ;;  %v9759_v40 = vpop.f32.mrb[57].mxu1  ;;  %v5197_v43 = vadd.f32 %v5196_v25, %v5173_v10  ;;  %v13814_v16 = vpop.permute.xlu0 %5144 }
 0x7fc   :  { %v4919_v23 = vpop.f32.mrb[58].mxu1  ;;  %15060 = vst [vmem:[#allocation8_spill] sm:$0xff] %v13814_v16 }
 0x7fd   :  { %v13804_v54 = vadd.f32 %v13643_v24, %v4952_v19  ;;  %v4953_v2 = vadd.f32 %v4919_v23, %v13593_v31  ;;  %v9760_v9 = vpop.f32.mrb[59].mxu1 }
 0x7ff   :  { %v5174_v22 = vmul.f32 %v13807_v36, %v13804_v54  ;;  %v13812_v20 = vadd.f32 %v13643_v24, %v4953_v2  ;;  %v13822_v36 = vpop.permute.xlu1 %5149 }
 0x801   :  { %v5175_v0 = vmul.f32 %v13814_v16, %v13812_v20  ;;  %v5198_v14 = vadd.f32 %v5197_v43, %v5174_v22 }
 0x802   :  { %v4924_v40 = vpop.f32.mrb[60].mxu1 }
 0x803   :  { %v4954_v19 = vadd.f32 %v4924_v40, %v13603_v27  ;;  %v9763_v31 = vpop.f32.mrb[61].mxu1  ;;  %v5199_v2 = vadd.f32 %v5198_v14, %v5175_v0 }
 0x804   :  { %v4927_v9 = vpop.f32.mrb[62].mxu1 }
 0x805   :  { %v13820_v23 = vadd.f32 %v13643_v24, %v4954_v19  ;;  %v9764_v34 = vpop.f32.mrb[63].mxu1 }
 0x806   :  { %v15061_v34 = vld [vmem:[#allocation21_spill] sm:$0xff] }
 0x807   :  { %v5176_v10 = vmul.f32 %v13822_v36, %v13820_v23 }
 0x809   :  { %v5200_v25 = vadd.f32 %v5199_v2, %v5176_v10 }
 0x80b   :  { %v5201_v5 = vrot.slane %v5200_v25, 4 }
 0x80d   :  { %v5202_v3 = vadd.f32 %v5201_v5, %v5200_v25 }
 0x80f   :  { %v5203_v35 = vrot.slane %v5202_v3, 2 }
 0x811   :  { %v5204_v16 = vadd.f32 %v5203_v35, %v5202_v3 }
 0x813   :  { %v5205_v22 = vrot.slane %v5204_v16, 1 }
 0x815   :  { %v5206_v43 = vadd.f32 %v5205_v22, %v5204_v16 }
 0x817   :  { %9798 = vmatmul.mubr.f32.vlgmr.msra.gmra.mrb[72].mxu0 %v5206_v43 }
 0x818   :  { %9816 = vmatprep.mubr.msk.bf16.mxu0 %vm10627_vm0, %v15031_v45 }
 0x8ea   :  { %v5273_v27 = vpop.f32.mrb[72].mxu0 }
 0x8eb   :  { %v9799_v24 = vpop.f32.mrb[73].mxu0  ;;  %v13829_v40 = vrot.slane %v5273_v27, %v15061_v34 }
 0x8ed   :  { %v13833_v0 = vsub.f32 %v13650_v12, %v13829_v40  ;;  %v13837_v5 = vsub.f32 %v13646_v28, %v13829_v40  ;;  %v13841_v35 = vsub.f32 %v13653_v39, %v13829_v40  ;;  %v13849_v14 = vsub.f32 %v13666_v21, %v13829_v40 }
 0x8ee   :  { %v13853_v12 = vsub.f32 %v13670_v15, %v13829_v40  ;;  %v13861_v31 = vsub.f32 %v13680_v32, %v13829_v40  ;;  %v13867_v21 = vsub.f32 %v13683_v49, %v13829_v40  ;;  %v13881_v49 = vsub.f32 %v13697_v61, %v13829_v40 }
 0x8ef   :  { %v5306_v3 = vmul.f32 %v13833_v0, %v13833_v0  ;;  %v5307_v16 = vmul.f32 %v13837_v5, %v13837_v5  ;;  %v5308_v28 = vmul.f32 %v13841_v35, %v13841_v35  ;;  %v5309_v9 = vmul.f32 %v13849_v14, %v13849_v14 }
 0x8f0   :  { %v5310_v15 = vmul.f32 %v13853_v12, %v13853_v12  ;;  %v5312_v22 = vmul.f32 %v13867_v21, %v13867_v21  ;;  %v13895_v61 = vsub.f32 %v13711_v4, %v13829_v40  ;;  %v13909_v4 = vsub.f32 %v13724_v1, %v13829_v40 }
 0x8f1   :  { %v5331_v39 = vmul.f32 %v5306_v3, %v13655_v18  ;;  %v5332_v19 = vmul.f32 %v5307_v16, %v13612_v58  ;;  %v5333_v2 = vmul.f32 %v5308_v28, %v13622_v50  ;;  %v13874_v58 = vsub.f32 %v13694_v55, %v13829_v40 }
 0x8f2   :  { %v5311_v18 = vmul.f32 %v13861_v31, %v13861_v31  ;;  %v5334_v32 = vmul.f32 %v5309_v9, %v13627_v52  ;;  %v5335_v50 = vmul.f32 %v5310_v15, %v13631_v7  ;;  %v13888_v55 = vsub.f32 %v13707_v46, %v13829_v40 }
 0x8f3   :  { %v5356_v10 = vadd.f32 %v5332_v19, %v5331_v39  ;;  %v5313_v27 = vmul.f32 %v13874_v58, %v13874_v58  ;;  %v5314_v3 = vmul.f32 %v13881_v49, %v13881_v49  ;;  %v5337_v7 = vmul.f32 %v5312_v22, %v13638_v37 }
 0x8f4   :  { %v5336_v52 = vmul.f32 %v5311_v18, %v13635_v11  ;;  %v13902_v46 = vsub.f32 %v13720_v8, %v13829_v40  ;;  %v5315_v28 = vmul.f32 %v13888_v55, %v13888_v55  ;;  %v5316_v19 = vmul.f32 %v13895_v61, %v13895_v61 }
 0x8f5   :  { %v5357_v25 = vadd.f32 %v5356_v10, %v5333_v2  ;;  %v5338_v11 = vmul.f32 %v5313_v27, %v13659_v33  ;;  %v5339_v37 = vmul.f32 %v5314_v3, %v13675_v47  ;;  %v13916_v8 = vsub.f32 %v13734_v59, %v13829_v40 }
 0x8f6   :  { %v5317_v15 = vmul.f32 %v13902_v46, %v13902_v46  ;;  %v5340_v33 = vmul.f32 %v5315_v28, %v13689_v41  ;;  %v13923_v1 = vsub.f32 %v13737_v62, %v13829_v40  ;;  %v5318_v10 = vmul.f32 %v13909_v4, %v13909_v4 }
 0x8f7   :  { %v5358_v43 = vadd.f32 %v5357_v25, %v5334_v32  ;;  %v5341_v47 = vmul.f32 %v5316_v19, %v13702_v38  ;;  %v13930_v59 = vsub.f32 %v13750_v44, %v13829_v40  ;;  %v5319_v32 = vmul.f32 %v13916_v8, %v13916_v8 }
 0x8f8   :  { %v5342_v41 = vmul.f32 %v5317_v15, %v13715_v30  ;;  %v13937_v62 = vsub.f32 %v13753_v42, %v13829_v40  ;;  %v5320_v22 = vmul.f32 %v13923_v1, %v13923_v1  ;;  %v5343_v38 = vmul.f32 %v5318_v10, %v13729_v60  ;;  %v15062_v15 = vld [vmem:[#allocation23_spill] sm:$0xff]  ;;  %v15063_v10 = vld [vmem:[#allocation4_spill] sm:$0xff] }
 0x8f9   :  { %v5359_v24 = vadd.f32 %v5358_v43, %v5335_v50  ;;  %v13944_v44 = vsub.f32 %v13765_v6, %v13829_v40  ;;  %v5321_v43 = vmul.f32 %v13930_v59, %v13930_v59  ;;  %v5344_v30 = vmul.f32 %v5319_v32, %v13740_v57 }
 0x8fa   :  { %v13951_v42 = vsub.f32 %v13769_v26, %v13829_v40  ;;  %v5345_v60 = vmul.f32 %v5320_v22, %v13745_v17  ;;  %v13958_v6 = vsub.f32 %v13780_v51, %v13829_v40  ;;  %v13965_v26 = vsub.f32 %v13784_v48, %v13829_v40  ;;  %v15065_v22 = vld [vmem:[#allocation25_spill] sm:$0xff] }
 0x8fb   :  { %v5360_v16 = vadd.f32 %v5359_v24, %v5336_v52  ;;  %v5322_v52 = vmul.f32 %v13937_v62, %v13937_v62  ;;  %v5323_v3 = vmul.f32 %v13944_v44, %v13944_v44  ;;  %v5346_v57 = vmul.f32 %v5321_v43, %v13755_v13 }
 0x8fc   :  { %v13972_v51 = vsub.f32 %v13796_v63, %v13829_v40  ;;  %v13979_v48 = vsub.f32 %v13804_v54, %v13829_v40  ;;  %v5326_v19 = vmul.f32 %v13965_v26, %v13965_v26  ;;  %v13986_v63 = vsub.f32 %v13812_v20, %v13829_v40 }
 0x8fd   :  { %v5361_v39 = vadd.f32 %v5360_v16, %v5337_v7  ;;  %v5324_v16 = vmul.f32 %v13951_v42, %v13951_v42  ;;  %v5347_v17 = vmul.f32 %v5322_v52, %v13760_v53  ;;  %v5348_v13 = vmul.f32 %v5323_v3, %v13771_v29 }
 0x8fe   :  { %v13993_v54 = vsub.f32 %v13820_v23, %v13829_v40  ;;  %v5329_v20 = vmul.f32 %v13986_v63, %v13986_v63  ;;  %v15066_v23 = vld [vmem:[#allocation8_spill] sm:$0xff] }
 0x8ff   :  { %v5362_v9 = vadd.f32 %v5361_v39, %v5338_v11  ;;  %v5325_v11 = vmul.f32 %v13958_v6, %v13958_v6  ;;  %v5349_v53 = vmul.f32 %v5324_v16, %v13775_v56  ;;  %v5351_v56 = vmul.f32 %v5326_v19, %v15063_v10  ;;  %v14020_v19 = vld [vmem:[%s14869_s6 + $0x1] ss:$0 sm:$0xff] }
 0x900   :  { %v5354_v40 = vmul.f32 %v5329_v20, %v15066_v23 }
 0x901   :  { %v5363_v2 = vadd.f32 %v5362_v9, %v5339_v37  ;;  %v5327_v9 = vmul.f32 %v13972_v51, %v13972_v51  ;;  %v5350_v29 = vmul.f32 %v5325_v11, %v15062_v15 }
 0x903   :  { %v5364_v18 = vadd.f32 %v5363_v2, %v5340_v33  ;;  %v5328_v2 = vmul.f32 %v13979_v48, %v13979_v48 }
 0x905   :  { %v5365_v25 = vadd.f32 %v5364_v18, %v5341_v47  ;;  %v15064_v18 = vld [vmem:[#allocation24_spill] sm:$0xff] }
 0x906   :  { %v5352_v32 = vmul.f32 %v5327_v9, %v15064_v18 }
 0x907   :  { %v5366_v50 = vadd.f32 %v5365_v25, %v5342_v41  ;;  %v5330_v25 = vmul.f32 %v13993_v54, %v13993_v54 }
 0x909   :  { %v5367_v27 = vadd.f32 %v5366_v50, %v5343_v38  ;;  %v5353_v38 = vmul.f32 %v5328_v2, %v15065_v22 }
 0x90b   :  { %v5368_v24 = vadd.f32 %v5367_v27, %v5344_v30  ;;  %v5355_v30 = vmul.f32 %v5330_v25, %v13822_v36  ;;  %v10506_v36 = vld [vmem:[%s14870_s9 + $0x4] ss:$8 sps:$4 sm:$0xff]  }
 0x90c   :  { %8047 = vmatprep.mubr.msk.bf16.mxu1 %vm5578_vm7, %v10506_v36 }
 0x90d   :  { %v5369_v7 = vadd.f32 %v5368_v24, %v5345_v60  ;;  %v7366_v60 = vld [vmem:[%s14867_s13 + $0x40] sm:$0xff] }
 0x90f   :  { %v5370_v28 = vadd.f32 %v5369_v7, %v5346_v57 }
 0x911   :  { %v5371_v39 = vadd.f32 %v5370_v28, %v5347_v17 }
 0x913   :  { %v5372_v37 = vadd.f32 %v5371_v39, %v5348_v13  ;;  %v10525_v39 = vld [vmem:[%s14871_s10 + $0x40] sm:$0xff]  }
 0x914   :  { %9801 = vmatpush3.bf16.msra.mxu0 %v10525_v39 }
 0x915   :  { %v5373_v33 = vadd.f32 %v5372_v37, %v5349_v53  ;;  %9802 = vmatprep.subr.bf16.mxu0 %v15031_v45  ;;  %v14025_v53 = vld [vmem:[%s14869_s6 + $0x2] ss:$0 sm:$0xff] }
 0x917   :  { %v5374_v47 = vadd.f32 %v5373_v33, %v5350_v29 }
 0x919   :  { %v5375_v41 = vadd.f32 %v5374_v47, %v5351_v56 }
 0x91b   :  { %v5376_v50 = vadd.f32 %v5375_v41, %v5352_v32 }
 0x91d   :  { %v5377_v43 = vadd.f32 %v5376_v50, %v5353_v38 }
 0x91f   :  { %v5378_v27 = vadd.f32 %v5377_v43, %v5354_v40 }
 0x921   :  { %v5379_v52 = vadd.f32 %v5378_v27, %v5355_v30 }
 0x923   :  { %5380 = vadd.xlane.f32.xlu0 %v5379_v52 }
 0x939   :  { %7409 = vperm.xlu0 %10261, %v7366_v60  }
 0x9b0   :  { %v5381_v24 = vpop.xlane.xlu0 %5380 }
 0x9b1   :  { %v5382_v3 = vrot.slane %v5381_v24, 4 }
 0x9b3   :  { %v5383_v57 = vadd.f32 %v5382_v3, %v5381_v24 }
 0x9b5   :  { %v5384_v7 = vrot.slane %v5383_v57, 2 }
 0x9b7   :  { %v5385_v16 = vadd.f32 %v5384_v7, %v5383_v57  ;;  %v15067_v57 = vmov 0  }
 0x9b9   :  { %v5386_v17 = vrot.slane %v5385_v16, 1 }
 0x9bb   :  { %v5387_v28 = vadd.f32 %v5386_v17, %v5385_v16 }
 0x9bd   :  { %10249 = vpush %v5387_v28 }
 0x9ee   :  { %s10250_s23 = spop %10249 }
 0x9ef   :  { %s5389_s25 = smul.f32 0.00048828125, %s10250_s23 }
 0x9f1   :  { %s5390_s26 = sadd.f32 1e-05, %s5389_s25 }
 0x9f3   :  { %v5391_v11 = vstv %s5390_s26 }
 0x9f4   :  { %10615 = vrsqrt.f32 %v5391_v11 }
 0x9fe   :  { %v10616_v13 = vpop.eup %10615 }
 0x9ff   :  { %10251 = vpush %v10616_v13 }
 0xa30   :  { %s10252_s28 = spop %10251 }
 0xa31   :  { %v14027_v37 = vstv %s10252_s28 }
 0xa32   :  { %v5395_v9 = vmul.f32 %v14027_v37, %v13833_v0  ;;  %v5396_v15 = vmul.f32 %v14027_v37, %v13837_v5  ;;  %v5397_v29 = vmul.f32 %v14027_v37, %v13841_v35  ;;  %v5398_v33 = vmul.f32 %v14027_v37, %v13849_v14 }
 0xa33   :  { %v5399_v2 = vmul.f32 %v14027_v37, %v13853_v12  ;;  %v5400_v10 = vmul.f32 %v14027_v37, %v13861_v31  ;;  %v5401_v56 = vmul.f32 %v14027_v37, %v13867_v21  ;;  %v5402_v12 = vmul.f32 %v14027_v37, %v13874_v58 }
 0xa34   :  { %v5424_v0 = vmul.f32 %v14020_v19, %v5395_v9  ;;  %v5425_v47 = vmul.f32 %v14020_v19, %v5396_v15  ;;  %v5426_v5 = vmul.f32 %v14020_v19, %v5397_v29  ;;  %v5427_v35 = vmul.f32 %v14020_v19, %v5398_v33 }
 0xa35   :  { %v5428_v20 = vmul.f32 %v14020_v19, %v5399_v2  ;;  %v5429_v14 = vmul.f32 %v14020_v19, %v5400_v10  ;;  %v5430_v50 = vmul.f32 %v14020_v19, %v5401_v56  ;;  %v5431_v27 = vmul.f32 %v14020_v19, %v5402_v12 }
 0xa36   :  { %v5453_v31 = vadd.f32 %v14025_v53, %v5424_v0  ;;  %v5454_v18 = vadd.f32 %v14025_v53, %v5425_v47  ;;  %v5455_v21 = vadd.f32 %v14025_v53, %v5426_v5  ;;  %v5456_v32 = vadd.f32 %v14025_v53, %v5427_v35 }
 0xa37   :  { %v5457_v41 = vadd.f32 %v14025_v53, %v5428_v20  ;;  %v5458_v25 = vadd.f32 %v14025_v53, %v5429_v14  ;;  %v5403_v52 = vmul.f32 %v14027_v37, %v13881_v49  ;;  %v5404_v60 = vmul.f32 %v14027_v37, %v13888_v55 }
 0xa38   :  { %v5478_v22 = vmax.f32 %v5453_v31, 0.0  ;;  %v5479_v38 = vmax.f32 %v5454_v18, 0.0  ;;  %v5480_v23 = vmax.f32 %v5455_v21, 0.0  ;;  %v5481_v40 = vmax.f32 %v5456_v32, 0.0 }
 0xa39   :  { %v5482_v43 = vmax.f32 %v5457_v41, 0.0  ;;  %v5483_v58 = vmax.f32 %v5458_v25, 0.0  ;;  %v5432_v24 = vmul.f32 %v14020_v19, %v5403_v52  ;;  %v5433_v3 = vmul.f32 %v14020_v19, %v5404_v60 }
 0xa3a   :  { %v5514_v30 = vpack.c.bf16 %v5479_v38, %v5478_v22  ;;  %v5405_v7 = vmul.f32 %v14027_v37, %v13895_v61  ;;  %v5406_v16 = vmul.f32 %v14027_v37, %v13902_v46  ;;  %v5515_v17 = vpack.c.bf16 %v5481_v40, %v5480_v23 }
 0xa3b   :  { %v5459_v28 = vadd.f32 %v14025_v53, %v5430_v50  ;;  %v5460_v49 = vadd.f32 %v14025_v53, %v5431_v27  ;;  %v5461_v55 = vadd.f32 %v14025_v53, %v5432_v24  ;;  %v5462_v36 = vadd.f32 %v14025_v53, %v5433_v3 }
 0xa3c   :  { %5602 = vmatpush1.bf16.msra.mxu1 %v5514_v30  ;;  %v5434_v11 = vmul.f32 %v14020_v19, %v5405_v7  ;;  %v5435_v13 = vmul.f32 %v14020_v19, %v5406_v16  ;;  %v5407_v61 = vmul.f32 %v14027_v37, %v13909_v4  ;;  %v5408_v46 = vmul.f32 %v14027_v37, %v13916_v8 }
 0xa3d   :  { %5603 = vmatprep.subr.bf16.mxu1 %v15067_v57  ;;  %v5516_v39 = vpack.c.bf16 %v5483_v58, %v5482_v43  ;;  %v5484_v9 = vmax.f32 %v5459_v28, 0.0  ;;  %v5485_v15 = vmax.f32 %v5460_v49, 0.0  ;;  %v5486_v29 = vmax.f32 %v5461_v55, 0.0 }
 0xa3e   :  { %v5487_v33 = vmax.f32 %v5462_v36, 0.0  ;;  %v5409_v2 = vmul.f32 %v14027_v37, %v13923_v1  ;;  %v5410_v10 = vmul.f32 %v14027_v37, %v13930_v59  ;;  %v5463_v56 = vadd.f32 %v14025_v53, %v5434_v11 }
 0xa3f   :  { %v5464_v4 = vadd.f32 %v14025_v53, %v5435_v13  ;;  %v5436_v8 = vmul.f32 %v14020_v19, %v5407_v61  ;;  %v5437_v0 = vmul.f32 %v14020_v19, %v5408_v46  ;;  %v5517_v47 = vpack.c.bf16 %v5485_v15, %v5484_v9 }
 0xa40   :  { %5604 = vmatpush1.bf16.msra.mxu1 %v5515_v17  ;;  %v5438_v5 = vmul.f32 %v14020_v19, %v5409_v2  ;;  %v5439_v35 = vmul.f32 %v14020_v19, %v5410_v10  ;;  %v5488_v1 = vmax.f32 %v5463_v56, 0.0  ;;  %v5518_v12 = vpack.c.bf16 %v5487_v33, %v5486_v29 }
 0xa41   :  { %5605 = vmatprep.subr.bf16.mxu1 %v15067_v57  ;;  %v5489_v59 = vmax.f32 %v5464_v4, 0.0  ;;  %v5465_v20 = vadd.f32 %v14025_v53, %v5436_v8  ;;  %v5466_v14 = vadd.f32 %v14025_v53, %v5437_v0  ;;  %v5411_v31 = vmul.f32 %v14027_v37, %v13937_v62  ;;  %v10509_v0 = vld [vmem:[%s14870_s9 + $0x14] ss:$8 sps:$4 sm:$0xff]  }
 0xa42   :  { %v5412_v18 = vmul.f32 %v14027_v37, %v13944_v44  ;;  %v5467_v21 = vadd.f32 %v14025_v53, %v5438_v5  ;;  %v5468_v32 = vadd.f32 %v14025_v53, %v5439_v35  ;;  %v5413_v62 = vmul.f32 %v14027_v37, %v13951_v42  ;;  %v10507_v5 = vld [vmem:[%s14870_s9 + $0x10] ss:$8 sps:$4 sm:$0xff]   ;;  %v10512_v35 = vld [vmem:[%s14870_s9 + $0x24] ss:$8 sps:$4 sm:$0xff]  }
 0xa43   :  { %v5519_v41 = vpack.c.bf16 %v5489_v59, %v5488_v1  ;;  %v5490_v25 = vmax.f32 %v5465_v20, 0.0  ;;  %v5491_v22 = vmax.f32 %v5466_v14, 0.0  ;;  %v5440_v38 = vmul.f32 %v14020_v19, %v5411_v31  ;;  %v10523_v1 = vld [vmem:[%s14871_s10 + $0x10] sm:$0xff]   ;;  %v10524_v59 = vld [vmem:[%s14871_s10 + $0x18] sm:$0xff]   ;;  %v10510_v20 = vld [vmem:[%s14870_s9 + $0x20] ss:$8 sps:$4 sm:$0xff]  }
 0xa44   :  { %5606 = vmatpush1.bf16.msra.mxu1 %v5516_v39  ;;  %v5441_v50 = vmul.f32 %v14020_v19, %v5412_v18  ;;  %v5414_v44 = vmul.f32 %v14027_v37, %v13958_v6  ;;  %v5492_v23 = vmax.f32 %v5467_v21, 0.0  ;;  %v5493_v40 = vmax.f32 %v5468_v32, 0.0  ;;  %v10515_v14 = vld [vmem:[%s14870_s9 + $0x34] ss:$8 sps:$4 sm:$0xff]   ;;  %v10518_v31 = vld [vmem:[%s14870_s9 + $0x44] ss:$8 sps:$4 sm:$0xff]  }
 0xa45   :  { %5607 = vmatprep.subr.bf16.mxu1 %v15067_v57  ;;  %v5520_v43 = vpack.c.bf16 %v5491_v22, %v5490_v25  ;;  %v5415_v58 = vmul.f32 %v14027_v37, %v13965_v26  ;;  %v5416_v30 = vmul.f32 %v14027_v37, %v13972_v51  ;;  %v5469_v27 = vadd.f32 %v14025_v53, %v5440_v38  ;;  %v5513_v18 = vld [vmem:[%s14870_s9 + $0x50] sm:$0x77]  ;;  %v10516_v21 = vld [vmem:[%s14870_s9 + $0x40] ss:$8 sps:$4 sm:$0xff]  }
 0xa46   :  { %v5470_v52 = vadd.f32 %v14025_v53, %v5441_v50  ;;  %v5442_v42 = vmul.f32 %v14020_v19, %v5413_v62  ;;  %v5443_v6 = vmul.f32 %v14020_v19, %v5414_v44  ;;  %v5521_v60 = vpack.c.bf16 %v5493_v40, %v5492_v23  ;;  %v10526_v25 = vld [vmem:[%s14871_s10 + $0x20] sm:$0xff]   ;;  %v10527_v22 = vld [vmem:[%s14871_s10 + $0x48] sm:$0xff]   ;;  %v10530_v50 = vld [vmem:[%s14871_s10 + $0x50] sm:$0xff]  }
 0xa47   :  { %v5444_v24 = vmul.f32 %v14020_v19, %v5415_v58  ;;  %v5445_v3 = vmul.f32 %v14020_v19, %v5416_v30  ;;  %v5417_v26 = vmul.f32 %v14027_v37, %v13979_v48  ;;  %v5418_v51 = vmul.f32 %v14027_v37, %v13986_v63  ;;  %9803 = vmatpush3.bf16.msra.mxu0 %v10527_v22  ;;  %v10529_v38 = vld [vmem:[%s14871_s10 + $0x28] sm:$0xff]   ;;  %v10531_v62 = vld [vmem:[%s14871_s10 + $0x30] sm:$0xff]   ;;  %v10532_v44 = vld [vmem:[%s14871_s10 + $0x58] sm:$0xff]  }
 0xa48   :  { %5608 = vmatpush1.bf16.msra.mxu1 %v5517_v47  ;;  %v5494_v7 = vmax.f32 %v5469_v27, 0.0  ;;  %v5495_v16 = vmax.f32 %v5470_v52, 0.0  ;;  %v5471_v17 = vadd.f32 %v14025_v53, %v5442_v42  ;;  %v5472_v28 = vadd.f32 %v14025_v53, %v5443_v6  ;;  %v10521_v47 = vld [vmem:[%s14871_s10] sm:$0xff]   ;;  %9804 = vmatprep.subr.bf16.mxu0 %v15031_v45  ;;  %v10533_v23 = vld [vmem:[%s14871_s10 + $0x38] sm:$0xff]   ;;  %v10536_v58 = vld [vmem:[%s14871_s10 + $0x70] sm:$0xff]  }
 0xa49   :  { %5609 = vmatprep.subr.bf16.mxu1 %v15067_v57  ;;  %v5419_v49 = vmul.f32 %v14027_v37, %v13993_v54  ;;  %v5473_v55 = vadd.f32 %v14025_v53, %v5444_v24  ;;  %v5474_v36 = vadd.f32 %v14025_v53, %v5445_v3  ;;  %v5446_v48 = vmul.f32 %v14020_v19, %v5417_v26  ;;  %v10534_v40 = vld [vmem:[%s14871_s10 + $0x60] sm:$0xff]   ;;  %v10539_v30 = vld [vmem:[%s14871_s10 + $0x78] sm:$0xff]   ;;  %v10548_v22 = vld [vmem:[%s14871_s10 + $0xe8] sm:$0xff]  }
 0xa4a   :  { %v5522_v11 = vpack.c.bf16 %v5495_v16, %v5494_v7  ;;  %v5496_v63 = vmax.f32 %v5471_v17, 0.0  ;;  %v5497_v13 = vmax.f32 %v5472_v28, 0.0  ;;  %v5447_v61 = vmul.f32 %v14020_v19, %v5418_v51  ;;  %v10538_v28 = vld [vmem:[%s14871_s10 + $0xc0] sm:$0xff]  }
 0xa4b   :  { %v5448_v46 = vmul.f32 %v14020_v19, %v5419_v49  ;;  %v5475_v54 = vadd.f32 %v14025_v53, %v5446_v48  ;;  %v5498_v39 = vmax.f32 %v5473_v55, 0.0  ;;  %v5499_v9 = vmax.f32 %v5474_v36, 0.0  ;;  %9805 = vmatpush3.bf16.msra.mxu0 %v10530_v50  ;;  %v10540_v36 = vld [vmem:[%s14871_s10 + $0xc8] sm:$0xff]  }
 0xa4c   :  { %5610 = vmatpush1.bf16.msra.mxu1 %v5518_v12  ;;  %v5523_v37 = vpack.c.bf16 %v5497_v13, %v5496_v63  ;;  %v5476_v15 = vadd.f32 %v14025_v53, %v5447_v61  ;;  %v10513_v12 = vld [vmem:[%s14870_s9 + $0x30] ss:$8 sps:$4 sm:$0xff]   ;;  %v8046_v32 = vcombine.high %v5513_v18, %v5513_v18  ;;  %9806 = vmatprep.subr.bf16.mxu0 %v15031_v45 }
 0xa4d   :  { %5611 = vmatprep.subr.bf16.mxu1 %v15067_v57  ;;  %v5477_v29 = vadd.f32 %v14025_v53, %v5448_v46  ;;  %v5524_v33 = vpack.c.bf16 %v5499_v9, %v5498_v39  ;;  %v5500_v2 = vmax.f32 %v5475_v54, 0.0  ;;  %v10504_v53 = vld [vmem:[%s14870_s9] ss:$8 sps:$4 sm:$0xff]  }
 0xa4e   :  { %v5501_v10 = vmax.f32 %v5476_v15, 0.0 }
 0xa4f   :  { %v5502_v56 = vmax.f32 %v5477_v29, 0.0  ;;  %9807 = vmatpush3.bf16.msra.mxu0 %v10532_v44  ;;  %v10549_v44 = vld [vmem:[%s14871_s10 + $0x90] sm:$0xff]  }
 0xa50   :  { %5612 = vmatpush1.bf16.msra.mxu1 %v5519_v41  ;;  %v5525_v19 = vpack.c.bf16 %v5501_v10, %v5500_v2  ;;  %v8045_v41 = vcombine.low %v5513_v18, %v5513_v18  ;;  %9808 = vmatprep.subr.bf16.mxu0 %v15031_v45  ;;  %v10547_v18 = vld [vmem:[%s14871_s10 + $0x88] sm:$0xff]  }
 0xa51   :  { %5613 = vmatprep.subr.bf16.mxu1 %v15067_v57  ;;  %v5526_v4 = vpack.c.bf16 %v5502_v56, %v5502_v56  ;;  %v10543_v56 = vld [vmem:[%s14871_s10 + $0xd8] sm:$0xff]  }
 0xa53   :  { %v5599_v8 = vsel %vm5597_vm8, %v5526_v4, 0  ;;  %9809 = vmatpush3.bf16.msra.mxu0 %v10534_v40 }
 0xa54   :  { %5614 = vmatpush1.bf16.msra.mxu1 %v5520_v43  ;;  %v10535_v43 = vld [vmem:[%s14871_s10 + $0x68] sm:$0xff]   ;;  %9810 = vmatprep.subr.bf16.mxu0 %v15031_v45 }
 0xa55   :  { %5615 = vmatprep.subr.bf16.mxu1 %v15067_v57 }
 0xa57   :  { %9811 = vmatpush3.bf16.msra.mxu0 %v10535_v43 }
 0xa58   :  { %5616 = vmatpush1.bf16.msra.mxu1 %v5521_v60  ;;  %9812 = vmatprep.subr.bf16.mxu0 %v15031_v45 }
 0xa59   :  { %5617 = vmatprep.subr.bf16.mxu1 %v15067_v57 }
 0xa5b   :  { %9813 = vmatpush3.bf16.msra.mxu0 %v10536_v58 }
 0xa5c   :  { %5618 = vmatpush1.bf16.msra.mxu1 %v5522_v11  ;;  %9814 = vmatprep.subr.bf16.mxu0 %v15031_v45 }
 0xa5d   :  { %5619 = vmatprep.subr.bf16.mxu1 %v15067_v57 }
 0xa5f   :  { %9815 = vmatpush3.bf16.msra.mxu0 %v10539_v30 }
 0xa60   :  { %5620 = vmatpush1.bf16.msra.mxu1 %v5523_v37  ;;  %9872 = vmatprep.subr.bf16.mxu0 %v15031_v45  ;;  %v10542_v37 = vld [vmem:[%s14871_s10 + $0xd0] sm:$0xff]  }
 0xa61   :  { %5621 = vmatprep.subr.bf16.mxu1 %v15067_v57 }
 0xa64   :  { %5622 = vmatpush1.bf16.msra.mxu1 %v5524_v33 }
 0xa65   :  { %5623 = vmatprep.subr.bf16.mxu1 %v15067_v57 }
 0xa68   :  { %5624 = vmatpush1.bf16.msra.mxu1 %v5525_v19 }
 0xa69   :  { %5625 = vmatprep.subr.bf16.mxu1 %v15067_v57  ;;  %v10522_v57 = vld [vmem:[%s14871_s10 + $0x8] sm:$0xff]  }
 0xa6c   :  { %5626 = vmatpush1.bf16.msra.mxu1 %v5599_v8 }
 0xa6d   :  { %9836 = vmatprep.subr.bf16.mxu1 %v15031_v45 }
 0xa6f   :  { %5634 = vmatmul.mubr.bf16.vlgmr.msra.gmra.mrb[64].mxu1 %v10504_v53 }
 0xa70   :  { %8048 = vmatprep.mubr.msk.bf16.mxu1 %vm5578_vm7, %v10509_v0  ;;  %9837 = vmatpush3.bf16.msra.mxu1 %v10521_v47  ;;  %v10544_v47 = vld [vmem:[%s14871_s10 + $0x80] sm:$0xff]  }
 0xa71   :  { %9838 = vmatprep.subr.bf16.mxu1 %v15031_v45 }
 0xa74   :  { %9839 = vmatpush3.bf16.msra.mxu1 %v10522_v57 }
 0xa75   :  { %9840 = vmatprep.subr.bf16.mxu1 %v15031_v45 }
 0xa77   :  { %5642 = vmatmul.mubr.bf16.gmra.mrb[68].mxu1 %v10507_v5 }
 0xa78   :  { %8049 = vmatprep.mubr.msk.bf16.mxu1 %vm5578_vm7, %v10512_v35  ;;  %9841 = vmatpush3.bf16.msra.mxu1 %v10523_v1 }
 0xa79   :  { %9842 = vmatprep.subr.bf16.mxu1 %v15031_v45 }
 0xa7c   :  { %9843 = vmatpush3.bf16.msra.mxu1 %v10524_v59 }
 0xa7d   :  { %9844 = vmatprep.subr.bf16.mxu1 %v15031_v45 }
 0xa7f   :  { %5650 = vmatmul.mubr.bf16.gmra.mrb[72].mxu1 %v10510_v20 }
 0xa80   :  { %8050 = vmatprep.mubr.msk.bf16.mxu1 %vm5578_vm7, %v10515_v14  ;;  %9845 = vmatpush3.bf16.msra.mxu1 %v10526_v25 }
 0xa81   :  { %9846 = vmatprep.subr.bf16.mxu1 %v15031_v45 }
 0xa84   :  { %9847 = vmatpush3.bf16.msra.mxu1 %v10529_v38 }
 0xa85   :  { %9848 = vmatprep.subr.bf16.mxu1 %v15031_v45 }
 0xa87   :  { %5658 = vmatmul.mubr.bf16.gmra.mrb[76].mxu1 %v10513_v12  ;;  %v10546_v12 = vld [vmem:[%s14871_s10 + $0xe0] sm:$0xff]  }
 0xa88   :  { %8051 = vmatprep.mubr.msk.bf16.mxu1 %vm5578_vm7, %v10518_v31  ;;  %9849 = vmatpush3.bf16.msra.mxu1 %v10531_v62 }
 0xa89   :  { %9850 = vmatprep.subr.bf16.mxu1 %v15031_v45 }
 0xa8c   :  { %9851 = vmatpush3.bf16.msra.mxu1 %v10533_v23 }
 0xa8d   :  { %9908 = vmatprep.subr.bf16.mxu1 %v15031_v45 }
 0xa8f   :  { %5666 = vmatmul.mubr.bf16.gmra.mrb[80].mxu1 %v10516_v21 }
 0xa90   :  { %8052 = vmatprep.mubr.msk.bf16.mxu1 %vm5578_vm7, %v8046_v32 }
 0xa97   :  { %5674 = vmatmul.mubr.bf16.gmra.mrb[84].mxu1 %v8045_v41 }
 0xa98   :  { %9852 = vmatprep.mubr.msk.bf16.mxu1 %vm10627_vm0, %v15031_v45 }
 0xb42   :  { %v5635_v27 = vpop.f32.mrb[64].mxu1 }
 0xb43   :  { %v5637_v52 = vpop.f32.mrb[65].mxu1 }
 0xb44   :  { %v5638_v42 = vpop.f32.mrb[66].mxu1 }
 0xb45   :  { %v8397_v6 = vpack.c.bf16 %v5638_v42, %v5635_v27  ;;  %v5640_v60 = vpop.f32.mrb[67].mxu1  ;;  %v10551_v27 = vld [vmem:[%s14871_s10 + $0xf0] sm:$0xff]  }
 0xb47   :  { %8398 = vst [vmem:[#allocation3] sm:$0xff] %v8397_v6  }
 0xb4a   :  { %v5643_v24 = vpop.f32.mrb[68].mxu1 }
 0xb4b   :  { %v5645_v3 = vpop.f32.mrb[69].mxu1 }
 0xb4c   :  { %v5646_v26 = vpop.f32.mrb[70].mxu1  ;;  %v10552_v3 = vld [vmem:[%s14871_s10 + $0x98] sm:$0xff]  }
 0xb4d   :  { %v8402_v51 = vpack.c.bf16 %v5646_v26, %v5643_v24  ;;  %v5648_v7 = vpop.f32.mrb[71].mxu1 }
 0xb4e   :  { %v5738_v16 = vld [vmem:[#allocation3] sm:$0xf]  ;;  %v14240_v17 = vld [vmem:[#allocation3 + $0x4] sm:$0xf] }
 0xb4f   :  { %v8080_v49 = vcombine.low %v5738_v16, %v14240_v17  ;;  %8431 = vst [vmem:[#allocation3 + $0x8] sm:$0xff] %v8402_v51  }
 0xb51   :  { %9853 = vmatmul.mubr.bf16.vlgmr.msra.gmra.mrb[88].mxu1 %v8080_v49  ;;  %v5809_v11 = vshll.u32 %v8080_v49, 16  ;;  %v5807_v29 = vshrl.u32 %v8080_v49, 16 }
 0xb52   :  { %v5651_v55 = vpop.f32.mrb[72].mxu1  ;;  %9856 = vmatprep.mubr.msk.bf16.mxu1 %vm10627_vm0, %v15031_v45  ;;  %9909 = vmatpush3.bf16.msra.mxu1 %v10538_v28  ;;  %v10554_v28 = vld [vmem:[%s14871_s10 + $0xf8] sm:$0xff]  }
 0xb53   :  { %v5653_v48 = vpop.f32.mrb[73].mxu1  ;;  %9910 = vmatprep.subr.bf16.mxu1 %v15031_v45  ;;  %v5811_v15 = vrot.slane %v5809_v11, 1 }
 0xb54   :  { %v5654_v63 = vpop.f32.mrb[74].mxu1  ;;  %v10555_v48 = vld [vmem:[%s14871_s10 + $0xa0] sm:$0xff]  }
 0xb55   :  { %v8407_v13 = vpack.c.bf16 %v5654_v63, %v5651_v55  ;;  %v5656_v61 = vpop.f32.mrb[75].mxu1  ;;  %v5812_v4 = vor.u32 %v5811_v15, %v5807_v29 }
 0xb56   :  { %v14252_v46 = vld [vmem:[#allocation3 + $0x8] sm:$0xf]  ;;  %v14254_v54 = vld [vmem:[#allocation3 + $0xc] sm:$0xf]  ;;  %9911 = vmatpush3.bf16.msra.mxu1 %v10540_v36 }
 0xb57   :  { %8432 = vst [vmem:[#allocation3 + $0x10] sm:$0xff] %v8407_v13   ;;  %v14261_v39 = vcombine.low %v14252_v46, %v14254_v54  ;;  %v8194_v9 = vcombine.low %v14240_v17, %v14252_v46  ;;  %9912 = vmatprep.subr.bf16.mxu1 %v15031_v45 }
 0xb59   :  { %9857 = vmatmul.mubr.bf16.gmra.mrb[92].mxu1 %v14261_v39  ;;  %v5814_v33 = vshll.u32 %v14261_v39, 16  ;;  %v5818_v2 = vshrl.u32 %v14261_v39, 16 }
 0xb5a   :  { %v5659_v10 = vpop.f32.mrb[76].mxu1  ;;  %9860 = vmatprep.mubr.msk.bf16.mxu1 %vm10627_vm0, %v15031_v45  ;;  %9913 = vmatpush3.bf16.msra.mxu1 %v10542_v37 }
 0xb5b   :  { %v5661_v19 = vpop.f32.mrb[77].mxu1  ;;  %v5816_v8 = vrot.slane %v5814_v33, 1  ;;  %v6459_v53 = vrot.slane %v5814_v33, 4  ;;  %9914 = vmatprep.subr.bf16.mxu1 %v15031_v45  ;;  %v6458_v0 = vrot.slane %v5818_v2, 3 }
 0xb5c   :  { %v5662_v57 = vpop.f32.mrb[78].mxu1 }
 0xb5d   :  { %v8412_v5 = vpack.c.bf16 %v5662_v57, %v5659_v10  ;;  %v5817_v35 = vsel %vm2219_vm2, %v5812_v4, %v5816_v8  ;;  %v5664_v1 = vpop.f32.mrb[79].mxu1  ;;  %v14279_v59 = vor.u32 %v6459_v53, %v6458_v0  ;;  %v5820_v50 = vor.u32 %v5818_v2, %v5816_v8  ;;  %v10557_v10 = vld [vmem:[%s14871_s10 + $0xa8] sm:$0xff]   ;;  %v6260_v8 = vld [vmem:[#allocation3] sm:$0x8] }
 0xb5e   :  { %9817 = vmatmul.mubr.bf16.vlgmr.msra.gmra.mrb[76].mxu0 %v5817_v35  ;;  %v14281_v20 = vld [vmem:[#allocation3 + $0x10] sm:$0xf]  ;;  %v14283_v14 = vld [vmem:[#allocation3 + $0x14] sm:$0xf]  ;;  %9915 = vmatpush3.bf16.msra.mxu1 %v10543_v56 }
 0xb5f   :  { %8433 = vst [vmem:[#allocation3 + $0x18] sm:$0xff] %v8412_v5   ;;  %v14290_v31 = vcombine.low %v14281_v20, %v14283_v14  ;;  %9820 = vmatprep.mubr.msk.bf16.mxu0 %vm10627_vm0, %v15031_v45  ;;  %9873 = vmatpush3.bf16.msra.mxu0 %v10544_v47  ;;  %v8195_v21 = vcombine.low %v14254_v54, %v14281_v20  ;;  %v10586_v54 = vld [vmem:[%s14871_s10 + $0x1e0] sm:$0xff]   ;;  %v10587_v20 = vld [vmem:[%s14871_s10 + $0x188] sm:$0xff]  }
 0xb60   :  { %9916 = vmatprep.subr.bf16.mxu1 %v15031_v45  ;;  %9874 = vmatprep.subr.bf16.mxu0 %v15031_v45  ;;  %v14378_v5 = vcombine.low %v6260_v8, %v14240_v17  ;;  %v10572_v8 = vld [vmem:[%s14871_s10 + $0x118] sm:$0xff]  }
 0xb61   :  { %9861 = vmatmul.mubr.bf16.gmra.mrb[96].mxu1 %v14290_v31  ;;  %v5822_v32 = vshll.u32 %v14290_v31, 16  ;;  %v5826_v41 = vshrl.u32 %v14290_v31, 16 }
 0xb62   :  { %v5667_v25 = vpop.f32.mrb[80].mxu1  ;;  %9864 = vmatprep.mubr.msk.bf16.mxu1 %vm10627_vm0, %v15031_v45  ;;  %9917 = vmatpush3.bf16.msra.mxu1 %v10546_v12 }
 0xb63   :  { %v5669_v38 = vpop.f32.mrb[81].mxu1  ;;  %v5824_v62 = vrot.slane %v5822_v32, 1  ;;  %9875 = vmatpush3.bf16.msra.mxu0 %v10547_v18  ;;  %9918 = vmatprep.subr.bf16.mxu1 %v15031_v45  ;;  %v6462_v23 = vrot.slane %v5826_v41, 3  ;;  %v6463_v43 = vrot.slane %v5822_v32, 4  ;;  %v10558_v18 = vld [vmem:[%s14871_s10 + $0xb0] sm:$0xff]   ;;  %v6286_v32 = vrot.slane %v14261_v39, 3 }
 0xb64   :  { %v5670_v40 = vpop.f32.mrb[82].mxu1  ;;  %9876 = vmatprep.subr.bf16.mxu0 %v15031_v45  ;;  %v6285_v38 = vrot.slane %v14378_v5, 3 }
 0xb65   :  { %v8417_v58 = vpack.c.bf16 %v5670_v40, %v5667_v25  ;;  %v5825_v30 = vsel %vm2219_vm2, %v5820_v50, %v5824_v62  ;;  %v5672_v52 = vpop.f32.mrb[83].mxu1  ;;  %v6464_v60 = vor.u32 %v6463_v43, %v6462_v23  ;;  %v5828_v55 = vor.u32 %v5826_v41, %v5824_v62  ;;  %v10559_v50 = vld [vmem:[%s14871_s10 + $0x140] sm:$0xff]   ;;  %v10560_v23 = vld [vmem:[%s14871_s10 + $0xb8] sm:$0xff]  }
 0xb66   :  { %9821 = vmatmul.mubr.bf16.gmra.mrb[80].mxu0 %v5825_v30  ;;  %v14318_v42 = vld [vmem:[#allocation3 + $0x18] sm:$0xf]  ;;  %v14320_v6 = vld [vmem:[#allocation3 + $0x1c] sm:$0xf]  ;;  %9919 = vmatpush3.bf16.msra.mxu1 %v10548_v22  ;;  %v6287_v40 = vsel %vm4707_vm5, %v6285_v38, %v6286_v32 }
 0xb67   :  { %8434 = vst [vmem:[#allocation3 + $0x20] sm:$0xff] %v8417_v58   ;;  %v14324_v24 = vcombine.low %v14318_v42, %v14320_v6  ;;  %9824 = vmatprep.mubr.msk.bf16.mxu0 %vm10627_vm0, %v15031_v45  ;;  %9877 = vmatpush3.bf16.msra.mxu0 %v10549_v44  ;;  %v8196_v26 = vcombine.low %v14283_v14, %v14318_v42  ;;  %v10562_v30 = vld [vmem:[%s14871_s10 + $0x148] sm:$0xff]   ;;  %v10591_v14 = vld [vmem:[%s14871_s10 + $0x1f0] sm:$0xff]   ;;  %v6771_v42 = vld [vmem:[#allocation3 + $0xc] sm:$0xf] }
 0xb68   :  { %9920 = vmatprep.subr.bf16.mxu1 %v15031_v45  ;;  %9878 = vmatprep.subr.bf16.mxu0 %v15031_v45  ;;  %v14337_v51 = vsel %vm6449_vm9, %v14279_v59, %v6464_v60  ;;  %v10580_v38 = vld [vmem:[%s14871_s10 + $0x1c8] sm:$0xff]  }
 0xb69   :  { %9865 = vmatmul.mubr.bf16.gmra.mrb[100].mxu1 %v14324_v24  ;;  %v5830_v7 = vshll.u32 %v14324_v24, 16  ;;  %v5834_v16 = vshrl.u32 %v14324_v24, 16 }
 0xb6a   :  { %9868 = vmatprep.mubr.msk.bf16.mxu1 %vm10627_vm0, %v15031_v45  ;;  %9921 = vmatpush3.bf16.msra.mxu1 %v10551_v27  ;;  %v5675_v49 = vpop.f32.mrb[84].mxu1 }
 0xb6b   :  { %v5832_v36 = vrot.slane %v5830_v7, 1  ;;  %9879 = vmatpush3.bf16.msra.mxu0 %v10552_v3  ;;  %9922 = vmatprep.subr.bf16.mxu1 %v15031_v45  ;;  %v8328_v11 = vpack.c.bf16 %v5675_v49, %v5675_v49  ;;  %v5677_v63 = vpop.f32.mrb[85].mxu1  ;;  %v6466_v13 = vrot.slane %v5834_v16, 3  ;;  %v6467_v61 = vrot.slane %v5830_v7, 4  ;;  %v6096_v3 = vld [vmem:[#allocation3] sm:$0xe] }
 0xb6c   :  { %9880 = vmatprep.subr.bf16.mxu0 %v15031_v45  ;;  %v5678_v37 = vpop.f32.mrb[86].mxu1  ;;  %v10563_v7 = vld [vmem:[%s14871_s10 + $0x150] sm:$0xff]   ;;  %v6118_v49 = vrot.slane %v14261_v39, 1 }
 0xb6d   :  { %v5833_v15 = vsel %vm2219_vm2, %v5828_v55, %v5832_v36  ;;  %5736 = vst [vmem:[#allocation3 + $0x28] sm:$0x7] %v8328_v11  ;;  %v5679_v29 = vpop.f32.mrb[87].mxu1  ;;  %v6468_v56 = vor.u32 %v6467_v61, %v6466_v13  ;;  %v5836_v1 = vor.u32 %v5834_v16, %v5832_v36  ;;  %v8118_v16 = vcombine.low %v6096_v3, %v14240_v17  ;;  %v10564_v55 = vld [vmem:[%s14871_s10 + $0x158] sm:$0xff]   ;;  %v10567_v13 = vld [vmem:[%s14871_s10 + $0x160] sm:$0xff]   ;;  %v10568_v61 = vld [vmem:[%s14871_s10 + $0x108] sm:$0xff]  }
 0xb6e   :  { %9825 = vmatmul.mubr.bf16.gmra.mrb[84].mxu0 %v5833_v15  ;;  %v14353_v33 = vld [vmem:[#allocation3 + $0x20] sm:$0xf]  ;;  %v5763_v2 = vld [vmem:[#allocation3 + $0x24] sm:$0x1]  ;;  %9923 = vmatpush3.bf16.msra.mxu1 %v10554_v28  ;;  %v6290_v11 = vrot.slane %v14324_v24, 3  ;;  %v6120_v29 = vrot.slane %v14290_v31, 1 }
 0xb6f   :  { %v8093_v19 = vcombine.low %v14353_v33, %v14353_v33  ;;  %9828 = vmatprep.mubr.msk.bf16.mxu0 %vm10627_vm0, %v15031_v45  ;;  %v14363_v4 = vcombine.low %v14353_v33, %v5763_v2  ;;  %9881 = vmatpush3.bf16.msra.mxu0 %v10555_v48  ;;  %v14365_v53 = vld [vmem:[#allocation3 + $0x24] sm:$0xf]  ;;  %v8197_v0 = vcombine.low %v14320_v6, %v14353_v33  ;;  %v6117_v36 = vrot.slane %v8118_v16, 1  ;;  %v10565_v48 = vld [vmem:[%s14871_s10 + $0x100] sm:$0xff]   ;;  %v10569_v2 = vld [vmem:[%s14871_s10 + $0x168] sm:$0xff]  }
 0xb70   :  { %9882 = vmatprep.subr.bf16.mxu0 %v15031_v45  ;;  %9980 = vmatprep.subr.bf16.mxu1 %v15031_v45  ;;  %v14372_v47 = vsel %vm6449_vm9, %v6464_v60, %v6468_v56  ;;  %v8169_v35 = vcombine.low %v14353_v33, %v14365_v53  ;;  %v6288_v60 = vrot.slane %v14290_v31, 3  ;;  %v6261_v39 = vld [vmem:[#allocation3 + $0x24] sm:$0x7]  ;;  %v6121_v31 = vsel %vm2739_vm1, %v6118_v49, %v6120_v29  ;;  %v10595_v6 = vld [vmem:[%s14871_s10 + $0x1a0] sm:$0xff]  }
 0xb71   :  { %9869 = vmatmul.mubr.bf16.gmra.mrb[104].mxu1 %v8093_v19  ;;  %v5838_v57 = vshll.u32 %v14363_v4, 16  ;;  %v5842_v58 = vshrl.u32 %v14363_v4, 16  ;;  %v6119_v63 = vsel %vm2739_vm1, %v6117_v36, %v6118_v49  ;;  %v8144_v15 = vcombine.low %v14353_v33, %v6261_v39  ;;  %v10571_v19 = vld [vmem:[%s14871_s10 + $0x170] sm:$0xff]   ;;  %v10597_v49 = vld [vmem:[%s14871_s10 + $0x1a8] sm:$0xff]  }
 0xb72   :  { %9924 = vmatprep.mubr.msk.bf16.mxu1 %vm10627_vm0, %v15031_v45  ;;  %v6471_v41 = vshrl.u32 %v8169_v35, 16  ;;  %v6474_v25 = vshll.u32 %v8169_v35, 16  ;;  %v6289_v28 = vsel %vm4707_vm5, %v6286_v32, %v6288_v60  ;;  %v6291_v37 = vsel %vm4707_vm5, %v6288_v60, %v6290_v11  ;;  %v10582_v17 = vld [vmem:[%s14871_s10 + $0x1d0] sm:$0xff]   ;;  %v10594_v60 = vld [vmem:[%s14871_s10 + $0x1f8] sm:$0xff]  }
 0xb73   :  { %v5840_v12 = vrot.slane %v5838_v57, 1  ;;  %9883 = vmatpush3.bf16.msra.mxu0 %v10557_v10  ;;  %v10570_v10 = vld [vmem:[%s14871_s10 + $0x110] sm:$0xff]   ;;  %v6122_v35 = vrot.slane %v14324_v24, 1  ;;  %v10575_v24 = vld [vmem:[%s14871_s10 + $0x128] sm:$0xff]   ;;  %v6124_v32 = vrot.slane %v14363_v4, 1  ;;  %v10579_v4 = vld [vmem:[%s14871_s10 + $0x138] sm:$0xff]  }
 0xb74   :  { %9884 = vmatprep.subr.bf16.mxu0 %v15031_v45  ;;  %v6473_v62 = vrot.slane %v6471_v41, 3  ;;  %v6476_v44 = vrot.slane %v6474_v25, 4  ;;  %v10576_v41 = vld [vmem:[%s14871_s10 + $0x130] sm:$0xff]  }
 0xb75   :  { %v5841_v22 = vsel %vm2219_vm2, %v5836_v1, %v5840_v12  ;;  %v5844_v52 = vor.u32 %v5842_v58, %v5840_v12  ;;  %v10573_v1 = vld [vmem:[%s14871_s10 + $0x178] sm:$0xff]   ;;  %v10574_v12 = vld [vmem:[%s14871_s10 + $0x120] sm:$0xff]   ;;  %v6125_v25 = vsel %vm2739_vm1, %v6122_v35, %v6124_v32 }
 0xb76   :  { %9829 = vmatmul.mubr.bf16.gmra.mrb[88].mxu0 %v5841_v22  ;;  %v14399_v43 = vor.u32 %v6476_v44, %v6473_v62  ;;  %v10578_v22 = vld [vmem:[%s14871_s10 + $0x1c0] sm:$0xff]   ;;  %v6454_v62 = vshll.u32 %v14378_v5, 16 }
 0xb77   :  { %9832 = vmatprep.mubr.msk.bf16.mxu0 %vm10627_vm0, %v15031_v45  ;;  %9885 = vmatpush3.bf16.msra.mxu0 %v10558_v18  ;;  %v6123_v18 = vsel %vm2739_vm1, %v6120_v29, %v6122_v35  ;;  %v6772_v58 = vld [vmem:[#allocation3 + $0x10] sm:$0xf] }
 0xb78   :  { %9886 = vmatprep.subr.bf16.mxu0 %v15031_v45  ;;  %v14409_v27 = vsel %vm6449_vm9, %v6468_v56, %v14399_v43  ;;  %v6292_v56 = vrot.slane %v8144_v15, 3  ;;  %v10600_v15 = vld [vmem:[%s14871_s10 + $0x1b8] sm:$0xff]  }
 0xb79   :  { %9925 = vmatmul.mubr.bf16.vlgmr.msra.gmra.mrb[108].mxu1 %v6287_v40 }
 0xb7a   :  { %9928 = vmatprep.mubr.msk.bf16.mxu1 %vm10627_vm0, %v15031_v45  ;;  %9981 = vmatpush3.bf16.msra.mxu1 %v10559_v50  ;;  %v6293_v57 = vsel %vm4707_vm5, %v6290_v11, %v6292_v56  ;;  %v6451_v50 = vshrl.u32 %v14378_v5, 16  ;;  %v10583_v5 = vld [vmem:[%s14871_s10 + $0x1d8] sm:$0xff]  }
 0xb7b   :  { %9887 = vmatpush3.bf16.msra.mxu0 %v10560_v23  ;;  %9982 = vmatprep.subr.bf16.mxu1 %v15031_v45  ;;  %v10584_v23 = vld [vmem:[%s14871_s10 + $0x180] sm:$0xff]  }
 0xb7c   :  { %9944 = vmatprep.subr.bf16.mxu0 %v15031_v45  ;;  %v6453_v46 = vrot.slane %v6451_v50, 3 }
 0xb7e   :  { %9833 = vmatmul.mubr.bf16.gmra.mrb[92].mxu0 %v5844_v52  ;;  %9983 = vmatpush3.bf16.msra.mxu1 %v10562_v30  ;;  %v14569_v30 = vld [vmem:[#allocation3 + $0x8] sm:$0xf]  ;;  %v14571_v52 = vcombine.low %v6771_v42, %v6772_v58 }
 0xb7f   :  { %9888 = vmatprep.mubr.msk.bf16.mxu0 %vm10627_vm0, %v15031_v45  ;;  %9984 = vmatprep.subr.bf16.mxu1 %v15031_v45 }
 0xb80   :  { %v6994_v33 = vshrl.u32 %v14571_v52, 16 }
 0xb81   :  { %9929 = vmatmul.mubr.bf16.gmra.mrb[112].mxu1 %v6289_v28  ;;  %v8198_v28 = vcombine.low %v14365_v53, %v14365_v53 }
 0xb82   :  { %9932 = vmatprep.mubr.msk.bf16.mxu1 %vm10627_vm0, %v15031_v45  ;;  %9985 = vmatpush3.bf16.msra.mxu1 %v10563_v7 }
 0xb83   :  { %9986 = vmatprep.subr.bf16.mxu1 %v15031_v45 }
 0xb86   :  { %9889 = vmatmul.mubr.bf16.vlgmr.msra.gmra.mrb[96].mxu0 %v6119_v63  ;;  %9987 = vmatpush3.bf16.msra.mxu1 %v10564_v55  ;;  %v6996_v55 = vrot.slane %v6994_v33, 2  ;;  %v10598_v63 = vld [vmem:[%s14871_s10 + $0x1b0] sm:$0xff]   ;;  %v7185_v33 = vrot.slane %v14571_v52, 3 }
 0xb87   :  { %9892 = vmatprep.mubr.msk.bf16.mxu0 %vm10627_vm0, %v15031_v45  ;;  %9945 = vmatpush3.bf16.msra.mxu0 %v10565_v48  ;;  %v15068_v48 = vmov 0.0|0.0  }
 0xb88   :  { %9988 = vmatprep.subr.bf16.mxu1 %v15031_v45  ;;  %9946 = vmatprep.subr.bf16.mxu0 %v15031_v45 }
 0xb89   :  { %9933 = vmatmul.mubr.bf16.gmra.mrb[116].mxu1 %v6291_v37 }
 0xb8a   :  { %9936 = vmatprep.mubr.msk.bf16.mxu1 %vm10627_vm0, %v15031_v45  ;;  %9989 = vmatpush3.bf16.msra.mxu1 %v10567_v13 }
 0xb8b   :  { %9947 = vmatpush3.bf16.msra.mxu0 %v10568_v61  ;;  %9990 = vmatprep.subr.bf16.mxu1 %v15031_v45 }
 0xb8c   :  { %9948 = vmatprep.subr.bf16.mxu0 %v15031_v45 }
 0xb8e   :  { %9893 = vmatmul.mubr.bf16.gmra.mrb[100].mxu0 %v6121_v31  ;;  %9991 = vmatpush3.bf16.msra.mxu1 %v10569_v2 }
 0xb8f   :  { %9896 = vmatprep.mubr.msk.bf16.mxu0 %vm10627_vm0, %v15031_v45  ;;  %9949 = vmatpush3.bf16.msra.mxu0 %v10570_v10 }
 0xb90   :  { %9992 = vmatprep.subr.bf16.mxu1 %v15031_v45  ;;  %9950 = vmatprep.subr.bf16.mxu0 %v15031_v45 }
 0xb91   :  { %9937 = vmatmul.mubr.bf16.gmra.mrb[120].mxu1 %v6293_v57  ;;  %v6777_v57 = vld [vmem:[#allocation3 + $0x24] sm:$0xf] }
 0xb92   :  { %9940 = vmatprep.mubr.msk.bf16.mxu1 %vm10627_vm0, %v15031_v45  ;;  %9993 = vmatpush3.bf16.msra.mxu1 %v10571_v19 }
 0xb93   :  { %9951 = vmatpush3.bf16.msra.mxu0 %v10572_v8  ;;  %9994 = vmatprep.subr.bf16.mxu1 %v15031_v45  ;;  %v6964_v8 = vld [vmem:[#allocation3 + $0x28] sm:$0x7] }
 0xb94   :  { %9952 = vmatprep.subr.bf16.mxu0 %v15031_v45 }
 0xb96   :  { %9897 = vmatmul.mubr.bf16.gmra.mrb[104].mxu0 %v6123_v18  ;;  %9995 = vmatpush3.bf16.msra.mxu1 %v10573_v1  ;;  %v14634_v18 = vcombine.low %v6777_v57, %v6964_v8 }
 0xb97   :  { %9900 = vmatprep.mubr.msk.bf16.mxu0 %vm10627_vm0, %v15031_v45  ;;  %9953 = vmatpush3.bf16.msra.mxu0 %v10574_v12 }
 0xb98   :  { %9954 = vmatprep.subr.bf16.mxu0 %v15031_v45  ;;  %10052 = vmatprep.subr.bf16.mxu1 %v15031_v45 }
 0xb99   :  { %9941 = vmatmul.mubr.bf16.gmra.mrb[124].mxu1 %v6292_v56  ;;  %v14623_v56 = vld [vmem:[#allocation3 + $0x1c] sm:$0xff]  }
 0xb9a   :  { %9996 = vmatprep.mubr.msk.bf16.mxu1 %vm10627_vm0, %v15031_v45  ;;  %v7012_v31 = vshrl.u32 %v14623_v56, 16  ;;  %v7015_v19 = vshll.u32 %v14623_v56, 16 }
 0xb9b   :  { %9955 = vmatpush3.bf16.msra.mxu0 %v10575_v24  ;;  %v6822_v24 = vrot.slane %v14571_v52, 2 }
 0xb9c   :  { %9956 = vmatprep.subr.bf16.mxu0 %v15031_v45  ;;  %v7014_v1 = vrot.slane %v7012_v31, 2  ;;  %v7017_v12 = vrot.slane %v7015_v19, 3 }
 0xb9e   :  { %9901 = vmatmul.mubr.bf16.gmra.mrb[108].mxu0 %v6125_v25  ;;  %v7021_v25 = vshrl.u32 %v14634_v18, 16 }
 0xb9f   :  { %9904 = vmatprep.mubr.msk.bf16.mxu0 %vm10627_vm0, %v15031_v45  ;;  %9957 = vmatpush3.bf16.msra.mxu0 %v10576_v41  ;;  %v7018_v41 = vor.u32 %v7017_v12, %v7014_v1 }
 0xba0   :  { %9958 = vmatprep.subr.bf16.mxu0 %v15031_v45 }
 0xba1   :  { %9997 = vmatmul.mubr.bf16.vlgmr.msra.gmra.mrb[128].mxu1 %v8194_v9  ;;  %v6456_v9 = vrot.slane %v6454_v62, 4  ;;  %v7023_v62 = vrot.slane %v7021_v25, 2 }
 0xba2   :  { %10000 = vmatprep.mubr.msk.bf16.mxu1 %vm10627_vm0, %v15031_v45  ;;  %10053 = vmatpush3.bf16.msra.mxu1 %v10578_v22  ;;  %v7024_v22 = vshll.u32 %v14634_v18, 16 }
 0xba3   :  { %9959 = vmatpush3.bf16.msra.mxu0 %v10579_v4  ;;  %10054 = vmatprep.subr.bf16.mxu1 %v15031_v45  ;;  %v6457_v44 = vor.u32 %v6456_v9, %v6453_v46  ;;  %v10605_v9 = vld [vmem:[%s14871_s10 + $0x210] sm:$0xff]  }
 0xba4   :  { %10016 = vmatprep.subr.bf16.mxu0 %v15031_v45 }
 0xba5   :  { %v6461_v40 = vsel %vm6449_vm9, %v6457_v44, %v14279_v59  ;;  %v10588_v59 = vld [vmem:[%s14871_s10 + $0x1e8] sm:$0xff]  }
 0xba6   :  { %9905 = vmatmul.mubr.bf16.gmra.mrb[112].mxu0 %v6124_v32  ;;  %10055 = vmatpush3.bf16.msra.mxu1 %v10580_v38  ;;  %v10604_v38 = vld [vmem:[%s14871_s10 + $0x208] sm:$0xff]  }
 0xba7   :  { %9960 = vmatprep.mubr.msk.bf16.mxu0 %vm10627_vm0, %v15031_v45  ;;  %10056 = vmatprep.subr.bf16.mxu1 %v15031_v45 }
 0xba9   :  { %10001 = vmatmul.mubr.bf16.gmra.mrb[132].mxu1 %v8195_v21  ;;  %v10589_v21 = vld [vmem:[%s14871_s10 + $0x190] sm:$0xff]  }
 0xbaa   :  { %10004 = vmatprep.mubr.msk.bf16.mxu1 %vm10627_vm0, %v15031_v45  ;;  %10057 = vmatpush3.bf16.msra.mxu1 %v10582_v17  ;;  %v7026_v17 = vrot.slane %v7024_v22, 3 }
 0xbab   :  { %10058 = vmatprep.subr.bf16.mxu1 %v15031_v45 }
 0xbae   :  { %9961 = vmatmul.mubr.bf16.vlgmr.msra.gmra.mrb[116].mxu0 %v6461_v40  ;;  %10059 = vmatpush3.bf16.msra.mxu1 %v10583_v5  ;;  %v7027_v5 = vor.u32 %v7026_v17, %v7023_v62 }
 0xbaf   :  { %9964 = vmatprep.mubr.msk.bf16.mxu0 %vm10627_vm0, %v15031_v45  ;;  %10017 = vmatpush3.bf16.msra.mxu0 %v10584_v23  ;;  %v10606_v23 = vld [vmem:[%s14871_s10 + $0x218] sm:$0xff]  }
 0xbb0   :  { %10060 = vmatprep.subr.bf16.mxu1 %v15031_v45  ;;  %10018 = vmatprep.subr.bf16.mxu0 %v15031_v45  ;;  %v7028_v40 = vsel %vm4347_vm6, %v7018_v41, %v7027_v5 }
 0xbb1   :  { %10005 = vmatmul.mubr.bf16.gmra.mrb[136].mxu1 %v8196_v26  ;;  %v10592_v26 = vld [vmem:[%s14871_s10 + $0x198] sm:$0xff]  }
 0xbb2   :  { %10008 = vmatprep.mubr.msk.bf16.mxu1 %vm10627_vm0, %v15031_v45  ;;  %10061 = vmatpush3.bf16.msra.mxu1 %v10586_v54  ;;  %v6826_v54 = vrot.slane %v14623_v56, 2 }
 0xbb3   :  { %10019 = vmatpush3.bf16.msra.mxu0 %v10587_v20  ;;  %10062 = vmatprep.subr.bf16.mxu1 %v15031_v45  ;;  %v6778_v20 = vld [vmem:[#allocation3 + $0x28] sm:$0x3] }
 0xbb4   :  { %10020 = vmatprep.subr.bf16.mxu0 %v15031_v45  ;;  %v8227_v58 = vcombine.low %v6777_v57, %v6778_v20 }
 0xbb6   :  { %9965 = vmatmul.mubr.bf16.gmra.mrb[120].mxu0 %v14337_v51  ;;  %10063 = vmatpush3.bf16.msra.mxu1 %v10588_v59  ;;  %v6769_v51 = vld [vmem:[#allocation3 + $0x4] sm:$0xc]  ;;  %v10608_v59 = vld [vmem:[%s14871_s10 + $0x220] sm:$0xff]   ;;  %v6828_v42 = vrot.slane %v8227_v58, 2 }
 0xbb7   :  { %9968 = vmatprep.mubr.msk.bf16.mxu0 %vm10627_vm0, %v15031_v45  ;;  %10021 = vmatpush3.bf16.msra.mxu0 %v10589_v21  ;;  %v14584_v3 = vcombine.low %v6769_v51, %v14569_v30 }
 0xbb8   :  { %10064 = vmatprep.subr.bf16.mxu1 %v15031_v45  ;;  %10022 = vmatprep.subr.bf16.mxu0 %v15031_v45  ;;  %v6829_v51 = vsel %vm3723_vm3, %v6826_v54, %v6828_v42 }
 0xbb9   :  { %10009 = vmatmul.mubr.bf16.gmra.mrb[140].mxu1 %v8197_v0  ;;  %v6997_v0 = vshll.u32 %v14571_v52, 16  ;;  %v6986_v7 = vshrl.u32 %v14584_v3, 16  ;;  %v6989_v16 = vshll.u32 %v14584_v3, 16  ;;  %v6821_v32 = vrot.slane %v14584_v3, 2  ;;  %v7163_v3 = vld [vmem:[#allocation3 + $0x4] sm:$0x8] }
 0xbba   :  { %10012 = vmatprep.mubr.msk.bf16.mxu1 %vm10627_vm0, %v15031_v45  ;;  %10065 = vmatpush3.bf16.msra.mxu1 %v10591_v14  ;;  %v10609_v14 = vld [vmem:[%s14871_s10 + $0x228] sm:$0xff]   ;;  %v7191_v52 = vrot.slane %v14634_v18, 3 }
 0xbbb   :  { %10023 = vmatpush3.bf16.msra.mxu0 %v10592_v26  ;;  %10066 = vmatprep.subr.bf16.mxu1 %v15031_v45  ;;  %v6999_v36 = vrot.slane %v6997_v0, 3  ;;  %v6988_v53 = vrot.slane %v6986_v7, 2  ;;  %v6991_v11 = vrot.slane %v6989_v16, 3  ;;  %v6823_v4 = vsel %vm3723_vm3, %v6821_v32, %v6822_v24  ;;  %v10610_v26 = vld [vmem:[%s14871_s10 + $0x230] sm:$0xff]  }
 0xbbc   :  { %10024 = vmatprep.subr.bf16.mxu0 %v15031_v45 }
 0xbbd   :  { %v7000_v39 = vor.u32 %v6999_v36, %v6996_v55  ;;  %v6992_v37 = vor.u32 %v6991_v11, %v6988_v53 }
 0xbbe   :  { %9969 = vmatmul.mubr.bf16.gmra.mrb[124].mxu0 %v14372_v47  ;;  %10067 = vmatpush3.bf16.msra.mxu1 %v10594_v60  ;;  %v14604_v47 = vld [vmem:[#allocation3 + $0x14] sm:$0xff]   ;;  %v10611_v60 = vld [vmem:[%s14871_s10 + $0x238] sm:$0xff]  }
 0xbbf   :  { %9972 = vmatprep.mubr.msk.bf16.mxu0 %vm10627_vm0, %v15031_v45  ;;  %10025 = vmatpush3.bf16.msra.mxu0 %v10595_v6  ;;  %v7003_v13 = vshrl.u32 %v14604_v47, 16  ;;  %v7006_v61 = vshll.u32 %v14604_v47, 16  ;;  %v7001_v29 = vsel %vm4347_vm6, %v6992_v37, %v7000_v39  ;;  %v6824_v46 = vrot.slane %v14604_v47, 2 }
 0xbc0   :  { %10026 = vmatprep.subr.bf16.mxu0 %v15031_v45  ;;  %10221 = vmatprep.subr.bf16.mxu1 %v15068_v48  ;;  %v8277_v6 = vcombine.low %v7163_v3, %v14569_v30  ;;  %v7187_v16 = vrot.slane %v14604_v47, 3 }
 0xbc1   :  { %10013 = vmatmul.mubr.bf16.gmra.mrb[144].mxu1 %v8198_v28  ;;  %v7005_v2 = vrot.slane %v7003_v13, 2  ;;  %v7008_v10 = vrot.slane %v7006_v61, 3  ;;  %v6825_v44 = vsel %vm3723_vm3, %v6822_v24, %v6824_v46  ;;  %v6827_v21 = vsel %vm3723_vm3, %v6824_v46, %v6826_v54 }
 0xbc2   :  { %10068 = vmatprep.mubr.msk.bf16.mxu1 %vm10627_vm0, %v15031_v45  ;;  %v7184_v0 = vrot.slane %v8277_v6, 3  ;;  %v7188_v28 = vsel %vm4707_vm5, %v7185_v33, %v7187_v16 }
 0xbc3   :  { %10027 = vmatpush3.bf16.msra.mxu0 %v10597_v49  ;;  %v7189_v49 = vrot.slane %v14623_v56, 3 }
 0xbc4   :  { %10028 = vmatprep.subr.bf16.mxu0 %v15031_v45  ;;  %v7186_v7 = vsel %vm4707_vm5, %v7184_v0, %v7185_v33 }
 0xbc5   :  { %v7190_v30 = vsel %vm4707_vm5, %v7187_v16, %v7189_v49  ;;  %v7192_v55 = vsel %vm4707_vm5, %v7189_v49, %v7191_v52 }
 0xbc6   :  { %9973 = vmatmul.mubr.bf16.gmra.mrb[128].mxu0 %v14409_v27  ;;  %v7009_v27 = vor.u32 %v7008_v10, %v7005_v2 }
 0xbc7   :  { %9976 = vmatprep.mubr.msk.bf16.mxu0 %vm10627_vm0, %v15031_v45  ;;  %10029 = vmatpush3.bf16.msra.mxu0 %v10598_v63 }
 0xbc8   :  { %10030 = vmatprep.subr.bf16.mxu0 %v15031_v45  ;;  %v7010_v35 = vsel %vm4347_vm6, %v7000_v39, %v7009_v27  ;;  %v7019_v50 = vsel %vm4347_vm6, %v7009_v27, %v7018_v41 }
 0xbc9   :  { %10069 = vmatmul.mubr.bf16.vlgmr.msra.gmra.mrb[148].mxu1 %v7001_v29 }
 0xbca   :  { %10072 = vmatprep.mubr.msk.bf16.mxu1 %vm10627_vm0, %v15031_v45 }
 0xbcb   :  { %10031 = vmatpush3.bf16.msra.mxu0 %v10600_v15 }
 0xbcc   :  { %10088 = vmatprep.subr.bf16.mxu0 %v15031_v45 }
 0xbce   :  { %9977 = vmatmul.mubr.bf16.gmra.mrb[132].mxu0 %v14399_v43  ;;  %v10602_v43 = vld [vmem:[%s14871_s10 + $0x200] sm:$0xff]  }
 0xbcf   :  { %10032 = vmatprep.mubr.msk.bf16.mxu0 %vm10627_vm0, %v15031_v45 }
 0xbd1   :  { %10073 = vmatmul.mubr.bf16.gmra.mrb[152].mxu1 %v7010_v35 }
 0xbd2   :  { %10076 = vmatprep.mubr.msk.bf16.mxu1 %vm10627_vm0, %v15031_v45 }
 0xbd6   :  { %10033 = vmatmul.mubr.bf16.vlgmr.msra.gmra.mrb[136].mxu0 %v6823_v4 }
 0xbd7   :  { %10036 = vmatprep.mubr.msk.bf16.mxu0 %vm10627_vm0, %v15031_v45  ;;  %10089 = vmatpush3.bf16.msra.mxu0 %v10602_v43 }
 0xbd8   :  { %10090 = vmatprep.subr.bf16.mxu0 %v15031_v45 }
 0xbd9   :  { %10077 = vmatmul.mubr.bf16.gmra.mrb[156].mxu1 %v7019_v50 }
 0xbda   :  { %10080 = vmatprep.mubr.msk.bf16.mxu1 %vm10627_vm0, %v15031_v45 }
 0xbdb   :  { %10091 = vmatpush3.bf16.msra.mxu0 %v10604_v38 }
 0xbdc   :  { %10092 = vmatprep.subr.bf16.mxu0 %v15031_v45 }
 0xbde   :  { %10037 = vmatmul.mubr.bf16.gmra.mrb[140].mxu0 %v6825_v44 }
 0xbdf   :  { %10040 = vmatprep.mubr.msk.bf16.mxu0 %vm10627_vm0, %v15031_v45  ;;  %10093 = vmatpush3.bf16.msra.mxu0 %v10605_v9 }
 0xbe0   :  { %10094 = vmatprep.subr.bf16.mxu0 %v15031_v45 }
 0xbe1   :  { %10081 = vmatmul.mubr.bf16.gmra.mrb[160].mxu1 %v7028_v40 }
 0xbe2   :  { %10084 = vmatprep.mubr.msk.bf16.mxu1 %vm10627_vm0, %v15031_v45 }
 0xbe3   :  { %10095 = vmatpush3.bf16.msra.mxu0 %v10606_v23 }
 0xbe4   :  { %10096 = vmatprep.subr.bf16.mxu0 %v15031_v45 }
 0xbe6   :  { %10041 = vmatmul.mubr.bf16.gmra.mrb[144].mxu0 %v6827_v21 }
 0xbe7   :  { %10044 = vmatprep.mubr.msk.bf16.mxu0 %vm10627_vm0, %v15031_v45  ;;  %10097 = vmatpush3.bf16.msra.mxu0 %v10608_v59 }
 0xbe8   :  { %10098 = vmatprep.subr.bf16.mxu0 %v15031_v45 }
 0xbe9   :  { %10085 = vmatmul.mubr.bf16.gmra.mrb[164].mxu1 %v7027_v5 }
 0xbea   :  { %10156 = vmatprep.mubr.msk.f32.mxu1 %vm10627_vm0, %v15031_v45 }
 0xbeb   :  { %10099 = vmatpush3.bf16.msra.mxu0 %v10609_v14 }
 0xbec   :  { %10100 = vmatprep.subr.bf16.mxu0 %v15031_v45 }
 0xbee   :  { %10045 = vmatmul.mubr.bf16.gmra.mrb[148].mxu0 %v6829_v51 }
 0xbef   :  { %10048 = vmatprep.mubr.msk.bf16.mxu0 %vm10627_vm0, %v15031_v45  ;;  %10101 = vmatpush3.bf16.msra.mxu0 %v10610_v26 }
 0xbf0   :  { %10102 = vmatprep.subr.bf16.mxu0 %v15031_v45 }
 0xbf3   :  { %10103 = vmatpush3.bf16.msra.mxu0 %v10611_v60 }
 0xbf4   :  { %10159 = vmatprep.subr.bf16.mxu0 %v15031_v45 }
 0xbf6   :  { %10049 = vmatmul.mubr.bf16.gmra.mrb[152].mxu0 %v6828_v42 }
 0xbf7   :  { %10104 = vmatprep.mubr.msk.bf16.mxu0 %vm10627_vm0, %v15031_v45 }
 0xbfe   :  { %10105 = vmatmul.mubr.bf16.vlgmr.msra.gmra.mrb[156].mxu0 %v7186_v7 }
 0xbff   :  { %10108 = vmatprep.mubr.msk.bf16.mxu0 %vm10627_vm0, %v15031_v45 }
 0xc06   :  { %10109 = vmatmul.mubr.bf16.gmra.mrb[160].mxu0 %v7188_v28 }
 0xc07   :  { %10112 = vmatprep.mubr.msk.bf16.mxu0 %vm10627_vm0, %v15031_v45 }
 0xc0e   :  { %10113 = vmatmul.mubr.bf16.gmra.mrb[164].mxu0 %v7190_v30 }
 0xc0f   :  { %10116 = vmatprep.mubr.msk.bf16.mxu0 %vm10627_vm0, %v15031_v45 }
 0xc16   :  { %10117 = vmatmul.mubr.bf16.gmra.mrb[168].mxu0 %v7192_v55 }
 0xc17   :  { %10120 = vmatprep.mubr.msk.bf16.mxu0 %vm10627_vm0, %v15031_v45 }
 0xc1e   :  { %10121 = vmatmul.mubr.bf16.gmra.mrb[172].mxu0 %v7191_v52 }
 0xc1f   :  { %10169 = vmatprep.mubr.msk.bf16.mxu0 %vm10627_vm0, %v15031_v45 }
 0xc24   :  { %v6058_v36 = vpop.f32.mrb[88].mxu1 }
 0xc25   :  { %v9854_v47 = vpop.f32.mrb[89].mxu1 }
 0xc26   :  { %v6061_v53 = vpop.f32.mrb[90].mxu1 }
 0xc27   :  { %v9855_v11 = vpop.f32.mrb[91].mxu1 }
 0xc2c   :  { %v6066_v63 = vpop.f32.mrb[92].mxu1 }
 0xc2d   :  { %v9858_v39 = vpop.f32.mrb[93].mxu1 }
 0xc2e   :  { %v6069_v13 = vpop.f32.mrb[94].mxu1 }
 0xc2f   :  { %v9859_v61 = vpop.f32.mrb[95].mxu1 }
 0xc31   :  { %v5932_v37 = vpop.f32.mrb[76].mxu0 }
 0xc32   :  { %v6059_v15 = vadd.f32 %v6058_v36, %v5932_v37  ;;  %v9818_v29 = vpop.f32.mrb[77].mxu0 }
 0xc33   :  { %v5935_v2 = vpop.f32.mrb[78].mxu0 }
 0xc34   :  { %v6074_v10 = vpop.f32.mrb[96].mxu1  ;;  %v6062_v56 = vadd.f32 %v6061_v53, %v5935_v2  ;;  %v9819_v27 = vpop.f32.mrb[79].mxu0 }
 0xc35   :  { %v9862_v31 = vpop.f32.mrb[97].mxu1 }
 0xc36   :  { %v6077_v19 = vpop.f32.mrb[98].mxu1 }
 0xc37   :  { %v9863_v8 = vpop.f32.mrb[99].mxu1 }
 0xc39   :  { %v5940_v57 = vpop.f32.mrb[80].mxu0 }
 0xc3a   :  { %v6067_v35 = vadd.f32 %v6066_v63, %v5940_v57  ;;  %v9822_v1 = vpop.f32.mrb[81].mxu0 }
 0xc3b   :  { %v5943_v12 = vpop.f32.mrb[82].mxu0 }
 0xc3c   :  { %v6082_v18 = vpop.f32.mrb[100].mxu1  ;;  %v6070_v24 = vadd.f32 %v6069_v13, %v5943_v12  ;;  %v9823_v32 = vpop.f32.mrb[83].mxu0 }
 0xc3d   :  { %v9866_v43 = vpop.f32.mrb[101].mxu1 }
 0xc3e   :  { %v6085_v41 = vpop.f32.mrb[102].mxu1 }
 0xc3f   :  { %v9867_v25 = vpop.f32.mrb[103].mxu1 }
 0xc41   :  { %v5948_v22 = vpop.f32.mrb[84].mxu0 }
 0xc42   :  { %v6075_v4 = vadd.f32 %v6074_v10, %v5948_v22  ;;  %v9826_v38 = vpop.f32.mrb[85].mxu0 }
 0xc43   :  { %v5951_v50 = vpop.f32.mrb[86].mxu0 }
 0xc44   :  { %v6090_v62 = vpop.f32.mrb[104].mxu1  ;;  %v6078_v17 = vadd.f32 %v6077_v19, %v5951_v50  ;;  %v9827_v46 = vpop.f32.mrb[87].mxu0 }
 0xc45   :  { %v9870_v9 = vpop.f32.mrb[105].mxu1 }
 0xc46   :  { %v6093_v5 = vpop.f32.mrb[106].mxu1 }
 0xc47   :  { %v9871_v44 = vpop.f32.mrb[107].mxu1 }
 0xc49   :  { %v5956_v23 = vpop.f32.mrb[88].mxu0 }
 0xc4a   :  { %v6083_v40 = vadd.f32 %v6082_v18, %v5956_v23  ;;  %v9830_v54 = vpop.f32.mrb[89].mxu0 }
 0xc4b   :  { %v5959_v20 = vpop.f32.mrb[90].mxu0  ;;  %v7344_v54 = vld [vmem:[%s14872_s12 + $0x10] sm:$0xff] }
 0xc4c   :  { %v6381_v59 = vpop.f32.mrb[108].mxu1  ;;  %v14717_v21 = vadd.f32 %v6085_v41, %v5959_v20  ;;  %v9831_v58 = vpop.f32.mrb[91].mxu0  ;;  %v7346_v20 = vld [vmem:[%s14872_s12 + $0x20] sm:$0xff] }
 0xc4d   :  { %v9926_v14 = vpop.f32.mrb[109].mxu1 }
 0xc4e   :  { %v6384_v42 = vpop.f32.mrb[110].mxu1  ;;  %v7347_v14 = vld [vmem:[%s14872_s12 + $0x28] sm:$0xff] }
 0xc4f   :  { %v9927_v26 = vpop.f32.mrb[111].mxu1 }
 0xc51   :  { %v5964_v51 = vpop.f32.mrb[92].mxu0 }
 0xc52   :  { %v14719_v60 = vadd.f32 %v6090_v62, %v5964_v51  ;;  %v9834_v3 = vpop.f32.mrb[93].mxu0 }
 0xc53   :  { %v5967_v6 = vpop.f32.mrb[94].mxu0 }
 0xc54   :  { %v6389_v33 = vpop.f32.mrb[112].mxu1  ;;  %v9835_v0 = vpop.f32.mrb[95].mxu0  ;;  %v10228_v6 = vpack.c.bf16 %v7347_v14, %v7346_v20  ;;  %v7356_v20 = vld [vmem:[%s14872_s12 + $0x70] sm:$0xff] }
 0xc55   :  { %v9930_v7 = vpop.f32.mrb[113].mxu1 }
 0xc56   :  { %v6392_v16 = vpop.f32.mrb[114].mxu1 }
 0xc57   :  { %v9931_v28 = vpop.f32.mrb[115].mxu1 }
 0xc59   :  { %v6213_v49 = vpop.f32.mrb[96].mxu0 }
 0xc5a   :  { %v6251_v30 = vadd.f32 %v6213_v49, %v6059_v15  ;;  %v9890_v52 = vpop.f32.mrb[97].mxu0 }
 0xc5b   :  { %v6216_v55 = vpop.f32.mrb[98].mxu0 }
 0xc5c   :  { %v6397_v36 = vpop.f32.mrb[116].mxu1  ;;  %v6252_v47 = vadd.f32 %v6216_v55, %v6062_v56  ;;  %v9891_v53 = vpop.f32.mrb[99].mxu0  ;;  %v14721_v11 = vadd.f32 %v6381_v59, %v6251_v30 }
 0xc5d   :  { %v9934_v63 = vpop.f32.mrb[117].mxu1 }
 0xc5e   :  { %v6400_v39 = vpop.f32.mrb[118].mxu1  ;;  %v14723_v13 = vadd.f32 %v6384_v42, %v6252_v47 }
 0xc5f   :  { %v9935_v61 = vpop.f32.mrb[119].mxu1 }
 0xc61   :  { %v6221_v37 = vpop.f32.mrb[100].mxu0 }
 0xc62   :  { %v6253_v29 = vadd.f32 %v6221_v37, %v6067_v35  ;;  %v9894_v2 = vpop.f32.mrb[101].mxu0  ;;  %v7342_v35 = vld [vmem:[%s14872_s12] sm:$0xff] }
 0xc63   :  { %v6224_v10 = vpop.f32.mrb[102].mxu0 }
 0xc64   :  { %v6405_v27 = vpop.f32.mrb[120].mxu1  ;;  %v6254_v31 = vadd.f32 %v6224_v10, %v6070_v24  ;;  %v9895_v19 = vpop.f32.mrb[103].mxu0  ;;  %v14725_v15 = vadd.f32 %v6389_v33, %v6253_v29  ;;  %v7343_v24 = vld [vmem:[%s14872_s12 + $0x8] sm:$0xff] }
 0xc65   :  { %v9938_v8 = vpop.f32.mrb[121].mxu1  ;;  %v10222_v50 = vpack.c.bf16 %v7343_v24, %v7342_v35 }
 0xc66   :  { %v6408_v57 = vpop.f32.mrb[122].mxu1  ;;  %v14727_v56 = vadd.f32 %v6392_v16, %v6254_v31  ;;  %v7349_v31 = vld [vmem:[%s14872_s12 + $0x38] sm:$0xff] }
 0xc67   :  { %v9939_v1 = vpop.f32.mrb[123].mxu1  ;;  %10223 = vmatpush3.bf16.msra.mxu1 %v10222_v50 }
 0xc68   :  { %10224 = vmatprep.subr.bf16.mxu1 %v15068_v48 }
 0xc69   :  { %v6229_v12 = vpop.f32.mrb[104].mxu0 }
 0xc6a   :  { %v6255_v18 = vadd.f32 %v6229_v12, %v6075_v4  ;;  %v9898_v32 = vpop.f32.mrb[105].mxu0 }
 0xc6b   :  { %v6232_v43 = vpop.f32.mrb[106].mxu0  ;;  %v7352_v32 = vld [vmem:[%s14872_s12 + $0x50] sm:$0xff] }
 0xc6c   :  { %v6413_v41 = vpop.f32.mrb[124].mxu1  ;;  %v6256_v25 = vadd.f32 %v6232_v43, %v6078_v17  ;;  %v9899_v22 = vpop.f32.mrb[107].mxu0  ;;  %v14735_v38 = vadd.f32 %v6397_v36, %v6255_v18  ;;  %v7345_v17 = vld [vmem:[%s14872_s12 + $0x18] sm:$0xff] }
 0xc6d   :  { %v9942_v62 = vpop.f32.mrb[125].mxu1  ;;  %v10225_v58 = vpack.c.bf16 %v7345_v17, %v7344_v54  ;;  %v7353_v43 = vld [vmem:[%s14872_s12 + $0x58] sm:$0xff] }
 0xc6e   :  { %v6416_v46 = vpop.f32.mrb[126].mxu1  ;;  %v14737_v9 = vadd.f32 %v6400_v39, %v6256_v25  ;;  %v10237_v22 = vpack.c.bf16 %v7353_v43, %v7352_v32 }
 0xc6f   :  { %v9943_v4 = vpop.f32.mrb[127].mxu1  ;;  %10226 = vmatpush3.bf16.msra.mxu1 %v10225_v58 }
 0xc70   :  { %10227 = vmatprep.subr.bf16.mxu1 %v15068_v48 }
 0xc71   :  { %v6237_v5 = vpop.f32.mrb[108].mxu0 }
 0xc72   :  { %v6257_v44 = vadd.f32 %v6237_v5, %v6083_v40  ;;  %v9902_v23 = vpop.f32.mrb[109].mxu0  ;;  %v7354_v5 = vld [vmem:[%s14872_s12 + $0x60] sm:$0xff] }
 0xc73   :  { %v6240_v59 = vpop.f32.mrb[110].mxu0  ;;  %10229 = vmatpush3.bf16.msra.mxu1 %v10228_v6 }
 0xc74   :  { %v6722_v40 = vpop.f32.mrb[128].mxu1  ;;  %v6258_v42 = vadd.f32 %v6240_v59, %v14717_v21  ;;  %v9903_v26 = vpop.f32.mrb[111].mxu0  ;;  %v14753_v51 = vadd.f32 %v6405_v27, %v6257_v44  ;;  %10230 = vmatprep.subr.bf16.mxu1 %v15068_v48  ;;  %v7348_v27 = vld [vmem:[%s14872_s12 + $0x30] sm:$0xff]  ;;  %v7357_v59 = vld [vmem:[%s14872_s12 + $0x78] sm:$0xff] }
 0xc75   :  { %v9998_v3 = vpop.f32.mrb[129].mxu1  ;;  %v10231_v8 = vpack.c.bf16 %v7349_v31, %v7348_v27  ;;  %v10243_v26 = vpack.c.bf16 %v7357_v59, %v7356_v20 }
 0xc76   :  { %v6725_v33 = vpop.f32.mrb[130].mxu1  ;;  %v14755_v0 = vadd.f32 %v6408_v57, %v6258_v42 }
 0xc77   :  { %v9999_v7 = vpop.f32.mrb[131].mxu1  ;;  %10232 = vmatpush3.bf16.msra.mxu1 %v10231_v8 }
 0xc78   :  { %10233 = vmatprep.subr.bf16.mxu1 %v15068_v48 }
 0xc79   :  { %v6245_v16 = vpop.f32.mrb[112].mxu0 }
 0xc7a   :  { %v6259_v28 = vadd.f32 %v6245_v16, %v14719_v60  ;;  %v9906_v49 = vpop.f32.mrb[113].mxu0 }
 0xc7b   :  { %v6248_v21 = vpop.f32.mrb[114].mxu0 }
 0xc7c   :  { %v6730_v30 = vpop.f32.mrb[132].mxu1  ;;  %v9907_v52 = vpop.f32.mrb[115].mxu0  ;;  %v14760_v55 = vadd.f32 %v6413_v41, %v6259_v28 }
 0xc7d   :  { %v10002_v36 = vpop.f32.mrb[133].mxu1 }
 0xc7e   :  { %v6733_v47 = vpop.f32.mrb[134].mxu1 }
 0xc7f   :  { %v10003_v53 = vpop.f32.mrb[135].mxu1 }
 0xc81   :  { %v6566_v63 = vpop.f32.mrb[116].mxu0 }
 0xc82   :  { %v6604_v39 = vadd.f32 %v6566_v63, %v14721_v11  ;;  %v9962_v61 = vpop.f32.mrb[117].mxu0  ;;  %v7350_v11 = vld [vmem:[%s14872_s12 + $0x40] sm:$0xff] }
 0xc83   :  { %v6569_v37 = vpop.f32.mrb[118].mxu0 }
 0xc84   :  { %v6605_v29 = vadd.f32 %v6569_v37, %v14723_v13  ;;  %v9963_v2 = vpop.f32.mrb[119].mxu0  ;;  %v6738_v60 = vpop.f32.mrb[136].mxu1  ;;  %v14764_v10 = vadd.f32 %v6722_v40, %v6604_v39  ;;  %v7351_v13 = vld [vmem:[%s14872_s12 + $0x48] sm:$0xff] }
 0xc85   :  { %v10006_v19 = vpop.f32.mrb[137].mxu1  ;;  %v10234_v18 = vpack.c.bf16 %v7351_v13, %v7350_v11 }
 0xc86   :  { %v6741_v57 = vpop.f32.mrb[138].mxu1  ;;  %v14778_v1 = vadd.f32 %v6725_v33, %v6605_v29 }
 0xc87   :  { %v10007_v12 = vpop.f32.mrb[139].mxu1  ;;  %10235 = vmatpush3.bf16.msra.mxu1 %v10234_v18 }
 0xc88   :  { %10236 = vmatprep.subr.bf16.mxu1 %v15068_v48 }
 0xc89   :  { %v6574_v35 = vpop.f32.mrb[120].mxu0 }
 0xc8a   :  { %v6606_v24 = vadd.f32 %v6574_v35, %v14725_v15  ;;  %v9966_v41 = vpop.f32.mrb[121].mxu0  ;;  %v7355_v15 = vld [vmem:[%s14872_s12 + $0x68] sm:$0xff] }
 0xc8b   :  { %v6577_v25 = vpop.f32.mrb[122].mxu0  ;;  %10238 = vmatpush3.bf16.msra.mxu1 %v10237_v22 }
 0xc8c   :  { %v6607_v50 = vadd.f32 %v6577_v25, %v14727_v56  ;;  %v9967_v62 = vpop.f32.mrb[123].mxu0  ;;  %v6746_v46 = vpop.f32.mrb[140].mxu1  ;;  %v14789_v4 = vadd.f32 %v6730_v30, %v6606_v24  ;;  %v10240_v56 = vpack.c.bf16 %v7355_v15, %v7354_v5  ;;  %10239 = vmatprep.subr.bf16.mxu1 %v15068_v48 }
 0xc8d   :  { %v10010_v44 = vpop.f32.mrb[141].mxu1 }
 0xc8e   :  { %v6749_v23 = vpop.f32.mrb[142].mxu1  ;;  %v6763_v54 = vadd.f32 %v6733_v47, %v6607_v50 }
 0xc8f   :  { %v10011_v17 = vpop.f32.mrb[143].mxu1  ;;  %10241 = vmatpush3.bf16.msra.mxu1 %v10240_v56 }
 0xc90   :  { %10242 = vmatprep.subr.bf16.mxu1 %v15068_v48 }
 0xc91   :  { %v6582_v58 = vpop.f32.mrb[124].mxu0 }
 0xc92   :  { %v6608_v14 = vadd.f32 %v6582_v58, %v14735_v38  ;;  %v9970_v40 = vpop.f32.mrb[125].mxu0 }
 0xc93   :  { %v6585_v42 = vpop.f32.mrb[126].mxu0  ;;  %10244 = vmatpush3.bf16.msra.mxu1 %v10243_v26 }
 0xc94   :  { %v6609_v3 = vadd.f32 %v6585_v42, %v14737_v9  ;;  %v9971_v6 = vpop.f32.mrb[127].mxu0  ;;  %v6754_v33 = vpop.f32.mrb[144].mxu1  ;;  %v6764_v7 = vadd.f32 %v6738_v60, %v6608_v14 }
 0xc95   :  { %v10014_v16 = vpop.f32.mrb[145].mxu1 }
 0xc96   :  { %v6757_v28 = vpop.f32.mrb[146].mxu1  ;;  %v6765_v49 = vadd.f32 %v6741_v57, %v6609_v3 }
 0xc97   :  { %v10015_v21 = vpop.f32.mrb[147].mxu1 }
 0xc99   :  { %v6590_v30 = vpop.f32.mrb[128].mxu0 }
 0xc9a   :  { %v6610_v52 = vadd.f32 %v6590_v30, %v14753_v51  ;;  %v9974_v38 = vpop.f32.mrb[129].mxu0 }
 0xc9b   :  { %v6593_v36 = vpop.f32.mrb[130].mxu0 }
 0xc9c   :  { %v6611_v47 = vadd.f32 %v6593_v36, %v14755_v0  ;;  %v9975_v53 = vpop.f32.mrb[131].mxu0  ;;  %v7116_v63 = vpop.f32.mrb[148].mxu1  ;;  %v6766_v9 = vadd.f32 %v6746_v46, %v6610_v52 }
 0xc9d   :  { %v10070_v39 = vpop.f32.mrb[149].mxu1 }
 0xc9e   :  { %v7119_v61 = vpop.f32.mrb[150].mxu1  ;;  %v6767_v37 = vadd.f32 %v6749_v23, %v6611_v47 }
 0xc9f   :  { %v10071_v29 = vpop.f32.mrb[151].mxu1 }
 0xca1   :  { %v6598_v48 = vpop.f32.mrb[132].mxu0 }
 0xca2   :  { %v6612_v2 = vadd.f32 %v6598_v48, %v14760_v55  ;;  %v9978_v60 = vpop.f32.mrb[133].mxu0 }
 0xca3   :  { %v6601_v27 = vpop.f32.mrb[134].mxu0 }
 0xca4   :  { %v9979_v31 = vpop.f32.mrb[135].mxu0  ;;  %v7124_v11 = vpop.f32.mrb[152].mxu1  ;;  %v6768_v19 = vadd.f32 %v6754_v33, %v6612_v2 }
 0xca5   :  { %v10074_v51 = vpop.f32.mrb[153].mxu1 }
 0xca6   :  { %v7127_v8 = vpop.f32.mrb[154].mxu1 }
 0xca7   :  { %v10075_v13 = vpop.f32.mrb[155].mxu1 }
 0xca9   :  { %v6917_v57 = vpop.f32.mrb[136].mxu0 }
 0xcaa   :  { %v6955_v0 = vadd.f32 %v6917_v57, %v14764_v10  ;;  %v10034_v12 = vpop.f32.mrb[137].mxu0 }
 0xcab   :  { %v6920_v18 = vpop.f32.mrb[138].mxu0 }
 0xcac   :  { %v6956_v32 = vadd.f32 %v6920_v18, %v14778_v1  ;;  %v10035_v43 = vpop.f32.mrb[139].mxu0  ;;  %v7132_v35 = vpop.f32.mrb[156].mxu1  ;;  %v7154_v24 = vadd.f32 %v7116_v63, %v6955_v0 }
 0xcad   :  { %v10078_v41 = vpop.f32.mrb[157].mxu1  ;;  %v14814_v63 = vpop.permute.xlu1 %7369 }
 0xcae   :  { %v7135_v55 = vpop.f32.mrb[158].mxu1  ;;  %v7155_v25 = vadd.f32 %v7119_v61, %v6956_v32 }
 0xcaf   :  { %v10079_v22 = vpop.f32.mrb[159].mxu1 }
 0xcb1   :  { %v6925_v50 = vpop.f32.mrb[140].mxu0  ;;  %v14816_v2 = vpop.permute.xlu1 %7374 }
 0xcb2   :  { %v6957_v62 = vadd.f32 %v6925_v50, %v14789_v4  ;;  %v10038_v46 = vpop.f32.mrb[141].mxu0 }
 0xcb3   :  { %v6928_v5 = vpop.f32.mrb[142].mxu0 }
 0xcb4   :  { %v6958_v15 = vadd.f32 %v6928_v5, %v6763_v54  ;;  %v10039_v44 = vpop.f32.mrb[143].mxu0  ;;  %v7140_v23 = vpop.f32.mrb[160].mxu1  ;;  %v7156_v10 = vadd.f32 %v7124_v11, %v6957_v62 }
 0xcb5   :  { %v10082_v17 = vpop.f32.mrb[161].mxu1 }
 0xcb6   :  { %v7143_v56 = vpop.f32.mrb[162].mxu1  ;;  %v7157_v20 = vadd.f32 %v7127_v8, %v6958_v15 }
 0xcb7   :  { %v10083_v1 = vpop.f32.mrb[163].mxu1 }
 0xcb9   :  { %v6933_v59 = vpop.f32.mrb[144].mxu0 }
 0xcba   :  { %v6959_v58 = vadd.f32 %v6933_v59, %v6764_v7  ;;  %v10042_v14 = vpop.f32.mrb[145].mxu0 }
 0xcbb   :  { %v6936_v40 = vpop.f32.mrb[146].mxu0 }
 0xcbc   :  { %v6960_v42 = vadd.f32 %v6936_v40, %v6765_v49  ;;  %v10043_v26 = vpop.f32.mrb[147].mxu0  ;;  %v7148_v3 = vpop.f32.mrb[164].mxu1  ;;  %v7158_v6 = vadd.f32 %v7132_v35, %v6959_v58 }
 0xcbd   :  { %v10086_v33 = vpop.f32.mrb[165].mxu1 }
 0xcbe   :  { %v7151_v4 = vpop.f32.mrb[166].mxu1  ;;  %v7159_v16 = vadd.f32 %v7135_v55, %v6960_v42 }
 0xcbf   :  { %v10087_v28 = vpop.f32.mrb[167].mxu1 }
 0xcc1   :  { %v6941_v54 = vpop.f32.mrb[148].mxu0 }
 0xcc2   :  { %v6961_v21 = vadd.f32 %v6941_v54, %v6766_v9  ;;  %v10046_v30 = vpop.f32.mrb[149].mxu0  ;;  %v14818_v9 = vpop.permute.xlu1 %7379 }
 0xcc3   :  { %v6944_v52 = vpop.f32.mrb[150].mxu0 }
 0xcc4   :  { %v6962_v38 = vadd.f32 %v6944_v52, %v6767_v37  ;;  %v10047_v36 = vpop.f32.mrb[151].mxu0  ;;  %v7160_v47 = vadd.f32 %v7140_v23, %v6961_v21 }
 0xcc6   :  { %v7161_v53 = vadd.f32 %v7143_v56, %v6962_v38  ;;  %v14820_v8 = vpop.permute.xlu1 %7384 }
 0xcc9   :  { %v6949_v7 = vpop.f32.mrb[152].mxu0 }
 0xcca   :  { %v6963_v39 = vadd.f32 %v6949_v7, %v6768_v19  ;;  %v10050_v49 = vpop.f32.mrb[153].mxu0  ;;  %v8286_v19 = vld [vmem:[%s14873_s11] ss:$0 sm:$0xff]  ;;  %v14825_v41 = vpop.permute.xlu1 %7389 }
 0xccb   :  { %v6952_v61 = vpop.f32.mrb[154].mxu0 }
 0xccc   :  { %v10051_v29 = vpop.f32.mrb[155].mxu0  ;;  %v7162_v48 = vadd.f32 %v7148_v3, %v6963_v39 }
 0xcce   :  { %v14830_v56 = vpop.permute.xlu1 %7394 }
 0xcd1   :  { %v7280_v60 = vpop.f32.mrb[156].mxu0 }
 0xcd2   :  { %v7318_v27 = vadd.f32 %v7280_v60, %v7154_v24  ;;  %v10106_v31 = vpop.f32.mrb[157].mxu0  ;;  %v7400_v3 = vpop.permute.xlu1 %7399 }
 0xcd3   :  { %v7283_v11 = vpop.f32.mrb[158].mxu0 }
 0xcd4   :  { %v7319_v37 = vadd.f32 %v7283_v11, %v7155_v25  ;;  %v10107_v51 = vpop.f32.mrb[159].mxu0  ;;  %v7331_v35 = vadd.f32 %v8286_v19, %v7318_v27  ;;  %v7410_v27 = vpop.permute.xlu0 %7409 }
 0xcd6   :  { %v7332_v18 = vadd.f32 %v8286_v19, %v7319_v37  ;;  %v7412_v22 = vmul.f32 %v14814_v63, %v7331_v35  ;;  %v7405_v38 = vpop.permute.xlu1 %7404 }
 0xcd8   :  { %v7413_v55 = vmul.f32 %v14816_v2, %v7332_v18 }
 0xcd9   :  { %v7288_v13 = vpop.f32.mrb[160].mxu0 }
 0xcda   :  { %v7320_v57 = vadd.f32 %v7288_v13, %v7156_v10  ;;  %v10110_v0 = vpop.f32.mrb[161].mxu0  ;;  %v7421_v44 = vadd.f32 %v7413_v55, %v7412_v22 }
 0xcdb   :  { %v7291_v12 = vpop.f32.mrb[162].mxu0 }
 0xcdc   :  { %v7321_v32 = vadd.f32 %v7291_v12, %v7157_v20  ;;  %v10111_v43 = vpop.f32.mrb[163].mxu0  ;;  %v7333_v24 = vadd.f32 %v8286_v19, %v7320_v57 }
 0xcde   :  { %v7414_v50 = vmul.f32 %v14818_v9, %v7333_v24  ;;  %v7334_v62 = vadd.f32 %v8286_v19, %v7321_v32 }
 0xce0   :  { %v7422_v20 = vadd.f32 %v7421_v44, %v7414_v50  ;;  %v7415_v1 = vmul.f32 %v14820_v8, %v7334_v62 }
 0xce1   :  { %v7296_v25 = vpop.f32.mrb[164].mxu0 }
 0xce2   :  { %v7322_v46 = vadd.f32 %v7296_v25, %v7158_v6  ;;  %v10114_v5 = vpop.f32.mrb[165].mxu0  ;;  %v7423_v40 = vadd.f32 %v7422_v20, %v7415_v1 }
 0xce3   :  { %v7299_v15 = vpop.f32.mrb[166].mxu0 }
 0xce4   :  { %v7335_v23 = vadd.f32 %v8286_v19, %v7322_v46  ;;  %v7323_v10 = vadd.f32 %v7299_v15, %v7159_v16  ;;  %v10115_v17 = vpop.f32.mrb[167].mxu0 }
 0xce6   :  { %v7416_v59 = vmul.f32 %v14825_v41, %v7335_v23  ;;  %v7336_v58 = vadd.f32 %v8286_v19, %v7323_v10 }
 0xce8   :  { %v7424_v33 = vadd.f32 %v7423_v40, %v7416_v59  ;;  %v7417_v4 = vmul.f32 %v14830_v56, %v7336_v58 }
 0xce9   :  { %v7304_v14 = vpop.f32.mrb[168].mxu0 }
 0xcea   :  { %v7324_v42 = vadd.f32 %v7304_v14, %v7160_v47  ;;  %v10118_v26 = vpop.f32.mrb[169].mxu0  ;;  %v7425_v52 = vadd.f32 %v7424_v33, %v7417_v4 }
 0xceb   :  { %v7307_v6 = vpop.f32.mrb[170].mxu0 }
 0xcec   :  { %v7337_v28 = vadd.f32 %v8286_v19, %v7324_v42  ;;  %v7325_v16 = vadd.f32 %v7307_v6, %v7161_v53  ;;  %v10119_v54 = vpop.f32.mrb[171].mxu0 }
 0xcee   :  { %v7418_v21 = vmul.f32 %v7400_v3, %v7337_v28  ;;  %v7338_v30 = vadd.f32 %v8286_v19, %v7325_v16 }
 0xcf0   :  { %v7426_v7 = vadd.f32 %v7425_v52, %v7418_v21  ;;  %v7419_v39 = vmul.f32 %v7405_v38, %v7338_v30 }
 0xcf1   :  { %v7312_v36 = vpop.f32.mrb[172].mxu0 }
 0xcf2   :  { %v7326_v49 = vadd.f32 %v7312_v36, %v7162_v48  ;;  %v10122_v61 = vpop.f32.mrb[173].mxu0  ;;  %v7427_v31 = vadd.f32 %v7426_v7, %v7419_v39 }
 0xcf3   :  { %v7315_v29 = vpop.f32.mrb[174].mxu0 }
 0xcf4   :  { %v7339_v47 = vadd.f32 %v8286_v19, %v7326_v49  ;;  %v10123_v60 = vpop.f32.mrb[175].mxu0 }
 0xcf6   :  { %v7420_v11 = vmul.f32 %v7410_v27, %v7339_v47 }
 0xcf8   :  { %v7428_v37 = vadd.f32 %v7427_v31, %v7420_v11 }
 0xcfa   :  { %v7429_v51 = vrot.slane %v7428_v37, 4 }
 0xcfc   :  { %v7430_v13 = vadd.f32 %v7429_v51, %v7428_v37 }
 0xcfe   :  { %v7431_v53 = vrot.slane %v7430_v13, 2 }
 0xd00   :  { %v7432_v57 = vadd.f32 %v7431_v53, %v7430_v13 }
 0xd02   :  { %v7433_v0 = vrot.slane %v7432_v57, 1 }
 0xd04   :  { %v7434_v12 = vadd.f32 %v7433_v0, %v7432_v57 }
 0xd06   :  { %10157 = vmatmul.mubr.f32.vlgmr.msra.gmra.mrb[168].mxu1 %v7434_v12 }
 0xdd9   :  { %v7501_v32 = vpop.f32.mrb[168].mxu1 }
 0xdda   :  { %v7508_v43 = vrot.slane %v7501_v32, %v15061_v34  ;;  %v10158_v55 = vpop.f32.mrb[169].mxu1 }
 0xddc   :  { %v7509_v48 = vsub.f32 %v7331_v35, %v7508_v43  ;;  %v7510_v25 = vsub.f32 %v7332_v18, %v7508_v43  ;;  %v7511_v22 = vsub.f32 %v7333_v24, %v7508_v43  ;;  %v7512_v19 = vsub.f32 %v7334_v62, %v7508_v43 }
 0xddd   :  { %v7513_v50 = vsub.f32 %v7335_v23, %v7508_v43  ;;  %v7514_v44 = vsub.f32 %v7336_v58, %v7508_v43  ;;  %v7515_v1 = vsub.f32 %v7337_v28, %v7508_v43  ;;  %v7516_v40 = vsub.f32 %v7338_v30, %v7508_v43 }
 0xdde   :  { %v7518_v46 = vmul.f32 %v7509_v48, %v7509_v48  ;;  %v7519_v5 = vmul.f32 %v7510_v25, %v7510_v25  ;;  %v7520_v15 = vmul.f32 %v7511_v22, %v7511_v22  ;;  %v7521_v10 = vmul.f32 %v7512_v19, %v7512_v19 }
 0xddf   :  { %v7522_v59 = vmul.f32 %v7513_v50, %v7513_v50  ;;  %v7523_v35 = vmul.f32 %v7514_v44, %v7514_v44  ;;  %v7517_v62 = vsub.f32 %v7339_v47, %v7508_v43  ;;  %v7524_v23 = vmul.f32 %v7515_v1, %v7515_v1 }
 0xde0   :  { %v7527_v17 = vmul.f32 %v7518_v46, %v14814_v63  ;;  %v7528_v20 = vmul.f32 %v7519_v5, %v14816_v2  ;;  %v7529_v14 = vmul.f32 %v7520_v15, %v14818_v9  ;;  %v7530_v18 = vmul.f32 %v7521_v10, %v14820_v8 }
 0xde1   :  { %v7531_v42 = vmul.f32 %v7522_v59, %v14825_v41  ;;  %v7525_v26 = vmul.f32 %v7516_v40, %v7516_v40  ;;  %v7532_v63 = vmul.f32 %v7523_v35, %v14830_v56  ;;  %v7526_v2 = vmul.f32 %v7517_v62, %v7517_v62 }
 0xde2   :  { %v7536_v34 = vadd.f32 %v7528_v20, %v7527_v17  ;;  %v7533_v33 = vmul.f32 %v7524_v23, %v7400_v3 }
 0xde3   :  { %v7534_v28 = vmul.f32 %v7525_v26, %v7405_v38  ;;  %v7535_v16 = vmul.f32 %v7526_v2, %v7410_v27  ;;  %v8287_v38 = vld [vmem:[%s14873_s11 + $0x1] ss:$0 sm:$0xff]  ;;  %v8288_v27 = vld [vmem:[%s14873_s11 + $0x2] ss:$0 sm:$0xff] }
 0xde4   :  { %v7537_v24 = vadd.f32 %v7536_v34, %v7529_v14 }
 0xde6   :  { %v7538_v58 = vadd.f32 %v7537_v24, %v7530_v18 }
 0xde8   :  { %v7539_v6 = vadd.f32 %v7538_v58, %v7531_v42 }
 0xdea   :  { %v7540_v4 = vadd.f32 %v7539_v6, %v7532_v63  ;;  %v7603_v6 = vld [vmem:[%s14874_s14] sm:$0xf] }
 0xdec   :  { %v7541_v9 = vadd.f32 %v7540_v4, %v7533_v33 }
 0xdee   :  { %v7542_v54 = vadd.f32 %v7541_v9, %v7534_v28 }
 0xdf0   :  { %v7543_v21 = vadd.f32 %v7542_v54, %v7535_v16 }
 0xdf2   :  { %7544 = vadd.xlane.f32.xlu1 %v7543_v21 }
 0xe7f   :  { %v7545_v8 = vpop.xlane.xlu1 %7544 }
 0xe80   :  { %v7546_v30 = vrot.slane %v7545_v8, 4 }
 0xe82   :  { %v7547_v52 = vadd.f32 %v7546_v30, %v7545_v8 }
 0xe84   :  { %v7548_v36 = vrot.slane %v7547_v52, 2 }
 0xe86   :  { %v7549_v7 = vadd.f32 %v7548_v36, %v7547_v52 }
 0xe88   :  { %v7550_v41 = vrot.slane %v7549_v7, 1 }
 0xe8a   :  { %v7551_v39 = vadd.f32 %v7550_v41, %v7549_v7 }
 0xe8c   :  { %10253 = vpush %v7551_v39 }
 0xebd   :  { %s10254_s21 = spop %10253 }
 0xebe   :  { %s7553_s22 = smul.f32 0.0009765625, %s10254_s21 }
 0xec0   :  { %s7554_s23 = sadd.f32 1e-05, %s7553_s22 }
 0xec2   :  { %v7555_v56 = vstv %s7554_s23 }
 0xec3   :  { %10617 = vrsqrt.f32 %v7555_v56 }
 0xecd   :  { %v10618_v3 = vpop.eup %10617 }
 0xece   :  { %10255 = vpush %v10618_v3 }
 0xeff   :  { %s10256_s24 = spop %10255 }
 0xf00   :  { %v7558_v49 = vstv %s10256_s24 }
 0xf01   :  { %v7559_v61 = vmul.f32 %v7558_v49, %v7509_v48  ;;  %v7560_v29 = vmul.f32 %v7558_v49, %v7510_v25  ;;  %v7561_v47 = vmul.f32 %v7558_v49, %v7511_v22  ;;  %v7562_v60 = vmul.f32 %v7558_v49, %v7512_v19 }
 0xf02   :  { %v7563_v31 = vmul.f32 %v7558_v49, %v7513_v50  ;;  %v7564_v11 = vmul.f32 %v7558_v49, %v7514_v44  ;;  %v7565_v12 = vmul.f32 %v7558_v49, %v7515_v1  ;;  %v7566_v32 = vmul.f32 %v7558_v49, %v7516_v40 }
 0xf03   :  { %v7572_v37 = vmul.f32 %v8287_v38, %v7559_v61  ;;  %v7573_v51 = vmul.f32 %v8287_v38, %v7560_v29  ;;  %v7574_v13 = vmul.f32 %v8287_v38, %v7561_v47  ;;  %v7575_v53 = vmul.f32 %v8287_v38, %v7562_v60 }
 0xf04   :  { %v7576_v57 = vmul.f32 %v8287_v38, %v7563_v31  ;;  %v7577_v0 = vmul.f32 %v8287_v38, %v7564_v11  ;;  %v7578_v15 = vmul.f32 %v8287_v38, %v7565_v12  ;;  %v7579_v10 = vmul.f32 %v8287_v38, %v7566_v32 }
 0xf05   :  { %v7585_v43 = vadd.f32 %v8288_v27, %v7572_v37  ;;  %v7586_v55 = vadd.f32 %v8288_v27, %v7573_v51  ;;  %v7587_v48 = vadd.f32 %v8288_v27, %v7574_v13  ;;  %v7588_v25 = vadd.f32 %v8288_v27, %v7575_v53 }
 0xf06   :  { %v7589_v46 = vadd.f32 %v8288_v27, %v7576_v57  ;;  %v7590_v5 = vadd.f32 %v8288_v27, %v7577_v0  ;;  %v7567_v20 = vmul.f32 %v7558_v49, %v7517_v62  ;;  %v7591_v1 = vadd.f32 %v8288_v27, %v7578_v15 }
 0xf07   :  { %v7594_v22 = vmax.f32 %v7585_v43, 0.0  ;;  %v7595_v19 = vmax.f32 %v7586_v55, 0.0  ;;  %v7596_v44 = vmax.f32 %v7587_v48, 0.0  ;;  %v7597_v17 = vmax.f32 %v7588_v25, 0.0 }
 0xf08   :  { %v7580_v59 = vmul.f32 %v8287_v38, %v7567_v20  ;;  %v7598_v34 = vmax.f32 %v7589_v46, 0.0  ;;  %v7599_v40 = vmax.f32 %v7590_v5, 0.0  ;;  %v7592_v35 = vadd.f32 %v8288_v27, %v7579_v10 }
 0xf09   :  { %v7604_v50 = vpack.c.bf16 %v7595_v19, %v7594_v22  ;;  %v7605_v14 = vpack.c.bf16 %v7597_v17, %v7596_v44  ;;  %v7600_v23 = vmax.f32 %v7591_v1, 0.0 }
 0xf0a   :  { %v7593_v18 = vadd.f32 %v8288_v27, %v7580_v59  ;;  %v7606_v24 = vpack.c.bf16 %v7599_v40, %v7598_v34  ;;  %v7601_v42 = vmax.f32 %v7592_v35, 0.0 }
 0xf0b   :  { %10160 = vmatpush3.bf16.msra.mxu0 %v7604_v50 }
 0xf0c   :  { %10161 = vmatprep.subr.bf16.mxu0 %v15031_v45  ;;  %v7602_v58 = vmax.f32 %v7593_v18, 0.0  ;;  %v7607_v62 = vpack.c.bf16 %v7601_v42, %v7600_v23 }
 0xf0e   :  { %v7608_v26 = vpack.c.bf16 %v7602_v58, %v7602_v58 }
 0xf0f   :  { %10162 = vmatpush3.bf16.msra.mxu0 %v7605_v14 }
 0xf10   :  { %10163 = vmatprep.subr.bf16.mxu0 %v15031_v45  ;;  %v7613_v63 = vsel %vm5597_vm8, %v7608_v26, 0 }
 0xf13   :  { %10164 = vmatpush3.bf16.msra.mxu0 %v7606_v24 }
 0xf14   :  { %10165 = vmatprep.subr.bf16.mxu0 %v15031_v45 }
 0xf17   :  { %10166 = vmatpush3.bf16.msra.mxu0 %v7607_v62 }
 0xf18   :  { %10167 = vmatprep.subr.bf16.mxu0 %v15031_v45 }
 0xf1b   :  { %10168 = vmatpush3.bf16.msra.mxu0 %v7613_v63 }
 0xf1e   :  { %10170 = vmatmul.mubr.msk.bf16.vlgmr.msra.gmra.mrb[176].mxu0 %vm5578_vm7, %v7603_v6 }
 0xff1   :  { %v7649_v2 = vpop.f32.mrb[176].mxu0 }
 0xff2   :  { %7655 = vst [vmem:[%s14875_s15] sm:$0xff] %v7649_v2  ;;  %v10171_v33 = vpop.f32.mrb[177].mxu0 }
 0xff3   :  { %v7652_v4 = vpop.f32.mrb[178].mxu0 }
 0xff4   :  { %v10172_v28 = vpop.f32.mrb[179].mxu0 }

</bundles_post_ra>
